<compile_context>
chip_gen: v6e
topology: v6e:2x2x1
jax: 0.10.0
libtpu: 0.0.40
codegen_flags: <defaults>
</compile_context>

<pallas_src>
import functools

import jax
import jax.numpy as jnp
from jax.experimental import pallas as pl
from jax.experimental.pallas import tpu as pltpu

PRIMITIVES = (
    "none",
    "max_pool_3x3",
    "avg_pool_3x3",
    "skip_connect",
    "sep_conv_3x3",
    "sep_conv_5x5",
    "dil_conv_3x3",
    "dil_conv_5x5",
)

BN_EPS = 1e-5


def _mixed_op_kernel(N, H, W, C,
                     alphas_ref,            # SMEM (8,)    architecture weights
                     x_ref,                 # VMEM (N, C, H*W)  lane-dense input
                     hcoord_ref,            # VMEM (1, 1, H*W)  row index of each lane
                     wcoord_ref,            # VMEM (1, 1, H*W)  col index of each lane
                     s3_dw1, s3_pw1, s3_dw2, s3_pw2,
                     s5_dw1, s5_pw1, s5_dw2, s5_pw2,
                     d3_dw, d3_pw,
                     d5_dw, d5_pw,
                     out_ref):
    """All primitives (convs, pools, BN, relu, weighted sum) run in this kernel."""
    HW = H * W
    x = x_ref[...]                           # (N, C, HW)
    hc = hcoord_ref[...]                     # (1, 1, HW) float h-coordinate per lane
    wc = wcoord_ref[...]                     # (1, 1, HW) float w-coordinate per lane
    inv_elems = 1.0 / float(N * HW)

    # ---- lazy per-offset / per-tap boundary masks (tiny (1,1,HW) arrays) ---------
    _axm = {}

    def axis_mask(which, coord, d, size):
        if d == 0:
            return None                      # all-ones: skip the multiply entirely
        key = (which, d)
        if key not in _axm:
            ok = jnp.logical_and(coord >= float(-d), coord <= float(size - 1 - d))
            _axm[key] = jnp.where(ok, 1.0, 0.0).astype(jnp.float32)
        return _axm[key]

    _tapm = {}

    def tap_mask(dh, dw):
        key = (dh, dw)
        if key not in _tapm:
            mh = axis_mask("h", hc, dh, H)
            mw = axis_mask("w", wc, dw, W)
            _tapm[key] = mh if mw is None else (mw if mh is None else mh * mw)
        return _tapm[key]

    def shifted(t, dh, dw):
        """t[..., idx + dh*W + dw] via a lane roll (XLU); wrapped lanes get masked."""
        s = dh * W + dw
        if s == 0:
            return t
        return pltpu.roll(t, (-s) % HW, axis=2)

    # ReLU(x), computed once, shared by all four conv primitives.
    r = jnp.maximum(x, 0.0)

    # Shifted+masked views of r, deduplicated across sep3/sep5/dil3/dil5 first stages.
    _rsh = {}

    def shifted_masked_r(dh, dw):
        key = (dh, dw)
        if key not in _rsh:
            v = shifted(r, dh, dw)
            m = tap_mask(dh, dw)
            _rsh[key] = v if m is None else v * m
        return _rsh[key]

    def dwconv(t, wref, K, dil, p, from_r=False):
        """Depthwise KxK conv, stride 1, dilation `dil`, zero padding `p`."""
        wmat = wref[...]                                   # (C, K*K)
        acc = None
        for kh in range(K):
            dh = kh * dil - p
            for kw in range(K):
                dw_ = kw * dil - p
                if from_r:
                    v = shifted_masked_r(dh, dw_)
                else:
                    v = shifted(t, dh, dw_)
                    m = tap_mask(dh, dw_)
                    if m is not None:
                        v = v * m
                tap = kh * K + kw
                term = v * wmat[:, tap:tap + 1]            # (N,C,HW) * (C,1)
                acc = term if acc is None else acc + term
        return acc

    def pwconv(t, wref):
        """1x1 conv as C broadcast multiply-adds on the VPU (C is far below MXU size).
        TODO(synk): switch to an MXU matmul (channels on lanes) when C >= 128."""
        wmat = wref[...]                                   # (C_out, C_in)
        acc = None
        for ci in range(C):
            term = t[:, ci:ci + 1, :] * wmat[:, ci:ci + 1]  # (N,1,HW)*(C,1)->(N,C,HW)
            acc = term if acc is None else acc + term
        return acc

    def bn(t, scale):
        """BatchNorm2d(affine=False), training mode, biased batch stats, two-pass
        (mean-subtracted) variance; `scale` (architecture weight) folded into the
        normalization scale."""
        m = jnp.sum(jnp.sum(t, axis=2, keepdims=True),
                    axis=0, keepdims=True) * inv_elems      # (1, C, 1)
        d = t - m
        var = jnp.sum(jnp.sum(d * d, axis=2, keepdims=True),
                      axis=0, keepdims=True) * inv_elems    # (1, C, 1)
        return d * (scale * jax.lax.rsqrt(var + BN_EPS))

    def sep_conv(dw1, pw1, dw2, pw2, K, p, alpha):
        # relu -> dw(K,pad=p) -> 1x1 -> BN -> relu -> dw(K,pad=p) -> 1x1 -> BN*alpha
        t = bn(pwconv(dwconv(None, dw1, K, 1, p, from_r=True), pw1), 1.0)
        t = jnp.maximum(t, 0.0)
        return bn(pwconv(dwconv(t, dw2, K, 1, p), pw2), alpha)

    def dil_conv(dwr, pwr, K, p, dil, alpha):
        # relu -> dilated dw(K,pad=p,dil) -> 1x1 -> BN*alpha
        return bn(pwconv(dwconv(None, dwr, K, dil, p, from_r=True), pwr), alpha)

    # ---- fused 3x3 max / avg pooling (stride 1, pad 1, shared shifted taps) ------
    mx = None
    sm = None
    cnt = None
    for dh in (-1, 0, 1):
        for dw_ in (-1, 0, 1):
            v = shifted(x, dh, dw_)
            m = tap_mask(dh, dw_)
            if m is None:
                vmax, vsum, c = v, v, jnp.ones_like(hc)
            else:
                vmax = jnp.where(m > 0.5, v, -jnp.inf)     # max pool pads with -inf
                vsum, c = v * m, m
            mx = vmax if mx is None else jnp.maximum(mx, vmax)
            sm = vsum if sm is None else sm + vsum
            cnt = c if cnt is None else cnt + c
    avg = sm * (1.0 / cnt)                                 # count_include_pad=False

    # ---- alpha-weighted sum: local accumulator, one lane-dense output store ------
    # ('none' contributes alphas[0] * 0 == 0 and is omitted.)
    acc = alphas_ref[3] * x                                # skip_connect (identity)
    acc = acc + bn(mx, alphas_ref[1])                      # max_pool_3x3 + BN
    acc = acc + bn(avg, alphas_ref[2])                     # avg_pool_3x3 + BN
    acc = acc + sep_conv(s3_dw1, s3_pw1, s3_dw2, s3_pw2, 3, 1, alphas_ref[4])
    acc = acc + sep_conv(s5_dw1, s5_pw1, s5_dw2, s5_pw2, 5, 2, alphas_ref[5])
    acc = acc + dil_conv(d3_dw, d3_pw, 3, 2, 2, alphas_ref[6])
    acc = acc + dil_conv(d5_dw, d5_pw, 5, 4, 2, alphas_ref[7])
    out_ref[...] = acc


def init_params(key, C):
    """Deterministic synthetic weights (shapes match the PyTorch module; stored
    channels-on-sublanes: depthwise (C, K*K), pointwise (C_out, C_in))."""
    ks = jax.random.split(key, 12)

    def dw(k, K):   # depthwise Conv2d weight (C,1,K,K) stored as (C, K*K)
        return jax.random.normal(k, (C, K * K), jnp.float32) * (1.0 / (K * K))

    def pwm(k):     # 1x1 Conv2d weight (C_out,C_in,1,1) stored as (C_out, C_in)
        return jax.random.normal(k, (C, C), jnp.float32) * (1.0 / C)

    return {
        "s3_dw1": dw(ks[0], 3), "s3_pw1": pwm(ks[1]),
        "s3_dw2": dw(ks[2], 3), "s3_pw2": pwm(ks[3]),
        "s5_dw1": dw(ks[4], 5), "s5_pw1": pwm(ks[5]),
        "s5_dw2": dw(ks[6], 5), "s5_pw2": pwm(ks[7]),
        "d3_dw": dw(ks[8], 3), "d3_pw": pwm(ks[9]),
        "d5_dw": dw(ks[10], 5), "d5_pw": pwm(ks[11]),
    }


def _vmem_limit_bytes(resident_bytes):
    """Scoped-VMEM request: scale with the honest footprint, stay below the
    physical per-core capacity of the current chip generation."""
    cap = 64 * 1024 * 1024                 # conservative fallback (v7x per-core VMEM)
    try:
        cap = int(getattr(pltpu.get_tpu_info(), "vmem_capacity_bytes", cap))
    except Exception:
        pass
    ceiling = (cap * 7) // 8               # leave headroom below physical capacity
    want = max(4 * int(resident_bytes), 32 * 1024 * 1024)
    return int(max(min(want, ceiling), 16 * 1024 * 1024))


def mixed_op_forward(feature_nchw, weights, params):
    """MixedOp.forward(feature, weights).  feature: NCHW float, weights: (8,)."""
    N, C, H, W = feature_nchw.shape
    HW = H * W

    # Lane-dense layout: (N, C, H*W) is a *pure reshape* of NCHW (no transpose, no
    # zero-pad pass); H*W goes on the 128-wide lane axis, C on sublanes.
    x = feature_nchw.reshape(N, C, HW).astype(jnp.float32)

    # Tiny per-lane (h, w) coordinates; the kernel derives every window-boundary
    # mask from these (replaces the old padded input / -inf ring / 1-over-count DMAs).
    hcoord = jnp.repeat(jnp.arange(H, dtype=jnp.float32), W).reshape(1, 1, HW)
    wcoord = jnp.tile(jnp.arange(W, dtype=jnp.float32), H).reshape(1, 1, HW)

    order = ["s3_dw1", "s3_pw1", "s3_dw2", "s3_pw2",
             "s5_dw1", "s5_pw1", "s5_dw2", "s5_pw2",
             "d3_dw", "d3_pw", "d5_dw", "d5_pw"]
    weight_args = [params[k] for k in order]

    kern = functools.partial(_mixed_op_kernel, N, H, W, C)
    vmem = pl.BlockSpec(memory_space=pltpu.MemorySpace.VMEM)
    smem = pl.BlockSpec(memory_space=pltpu.MemorySpace.SMEM)

    # Honest resident estimate: in/out + coords + weights + ~48 live full-size
    # temporaries (shift cache + per-primitive intermediates); x4 compiler headroom.
    full = N * C * HW
    resident = 4 * (2 * full + 2 * HW + sum(int(w.size) for w in weight_args)
                    + 48 * full)

    # TODO(synk): for large N*H*W, split into a gridded two-pass kernel (per-tile BN
    # partial stats, then normalize) so spatial tiles fit v7x's 64 MiB VMEM and shard
    # across its two TensorCores; every BatchNorm couples all of (N, H, W), so a
    # single-pass spatial grid cannot be numerically exact.
    out = pl.pallas_call(
        kern,
        out_shape=jax.ShapeDtypeStruct((N, C, HW), jnp.float32),
        in_specs=[smem, vmem, vmem, vmem] + [vmem] * len(order),
        out_specs=vmem,
        compiler_params=pltpu.CompilerParams(
            vmem_limit_bytes=_vmem_limit_bytes(resident)),
    )(weights.astype(jnp.float32), x, hcoord, wcoord, *weight_args)

    return out.reshape(N, C, H, W)          # pure reshape back to NCHW (no transpose)


if __name__ == "__main__":
    key = jax.random.PRNGKey(0)
    k_x, k_a, k_p = jax.random.split(key, 3)

    N, C, H, W = 2, 4, 16, 16
    feature = jax.random.normal(k_x, (N, C, H, W), jnp.float32)
    # architecture weights (as in DARTS: softmax over alphas), length = #primitives
    arch_weights = jax.nn.softmax(
        jax.random.normal(k_a, (len(PRIMITIVES),), jnp.float32))
    params = init_params(k_p, C)

    out = mixed_op_forward(feature, arch_weights, params)
    out = jax.block_until_ready(out)
    assert out.shape == (N, C, H, W)
    assert bool(jnp.all(jnp.isfinite(out)))
    # TODO(synk): BatchNorm running-stat updates (training-time side effect) are not
    # reproduced; they do not affect the forward output in training mode.
    print("KERNEL_OK")
</pallas_src>

<mosaic_0001>
module attributes {stable_mosaic.version = 11 : i64} {
  func.func @_mixed_op_kernel(%arg0: memref<8xf32, #tpu.memory_space<smem>>, %arg1: memref<2x4x256xf32, #tpu.memory_space<vmem>>, %arg2: memref<1x1x256xf32, #tpu.memory_space<vmem>>, %arg3: memref<1x1x256xf32, #tpu.memory_space<vmem>>, %arg4: memref<4x9xf32, #tpu.memory_space<vmem>>, %arg5: memref<4x4xf32, #tpu.memory_space<vmem>>, %arg6: memref<4x9xf32, #tpu.memory_space<vmem>>, %arg7: memref<4x4xf32, #tpu.memory_space<vmem>>, %arg8: memref<4x25xf32, #tpu.memory_space<vmem>>, %arg9: memref<4x4xf32, #tpu.memory_space<vmem>>, %arg10: memref<4x25xf32, #tpu.memory_space<vmem>>, %arg11: memref<4x4xf32, #tpu.memory_space<vmem>>, %arg12: memref<4x9xf32, #tpu.memory_space<vmem>>, %arg13: memref<4x4xf32, #tpu.memory_space<vmem>>, %arg14: memref<4x25xf32, #tpu.memory_space<vmem>>, %arg15: memref<4x4xf32, #tpu.memory_space<vmem>>, %arg16: memref<2x4x256xf32, #tpu.memory_space<vmem>>) attributes {dimension_semantics = [], scalar_prefetch = 0 : i64, scratch_operands = 0 : i64, tpu.core_type = #tpu.core_type<tc>} {
    %c0 = arith.constant 0 : index
    %c0_0 = arith.constant 0 : index
    %c0_1 = arith.constant 0 : index
    %0 = vector.load %arg1[%c0, %c0_0, %c0_1] : memref<2x4x256xf32, #tpu.memory_space<vmem>>, vector<2x4x256xf32>
    %c0_2 = arith.constant 0 : index
    %c0_3 = arith.constant 0 : index
    %c0_4 = arith.constant 0 : index
    %1 = vector.load %arg2[%c0_2, %c0_3, %c0_4] : memref<1x1x256xf32, #tpu.memory_space<vmem>>, vector<1x1x256xf32>
    %c0_5 = arith.constant 0 : index
    %c0_6 = arith.constant 0 : index
    %c0_7 = arith.constant 0 : index
    %2 = vector.load %arg3[%c0_5, %c0_6, %c0_7] : memref<1x1x256xf32, #tpu.memory_space<vmem>>, vector<1x1x256xf32>
    %cst = arith.constant 0.000000e+00 : f32
    %3 = vector.broadcast %cst : f32 to vector<2x4x256xf32>
    %4 = arith.maximumf %0, %3 : vector<2x4x256xf32>
    %c17_i32 = arith.constant 17 : i32
    %5 = tpu.dynamic_rotate %0 by %c17_i32 dim 2 : vector<2x4x256xf32>, i32 -> vector<2x4x256xf32>
    %cst_8 = arith.constant 1.000000e+00 : f32
    %6 = vector.broadcast %cst_8 : f32 to vector<1x1x256xf32>
    %7 = arith.cmpf oge, %1, %6 : vector<1x1x256xf32>
    %cst_9 = arith.constant 1.600000e+01 : f32
    %8 = vector.broadcast %cst_9 : f32 to vector<1x1x256xf32>
    %9 = arith.cmpf ole, %1, %8 : vector<1x1x256xf32>
    %10 = arith.andi %7, %9 : vector<1x1x256xi1>
    %cst_10 = arith.constant 1.000000e+00 : f32
    %cst_11 = arith.constant 0.000000e+00 : f32
    %11 = vector.broadcast %cst_10 : f32 to vector<1x1x256xf32>
    %12 = vector.broadcast %cst_11 : f32 to vector<1x1x256xf32>
    %13 = arith.select %10, %11, %12 : vector<1x1x256xi1>, vector<1x1x256xf32>
    %cst_12 = arith.constant 1.000000e+00 : f32
    %14 = vector.broadcast %cst_12 : f32 to vector<1x1x256xf32>
    %15 = arith.cmpf oge, %2, %14 : vector<1x1x256xf32>
    %cst_13 = arith.constant 1.600000e+01 : f32
    %16 = vector.broadcast %cst_13 : f32 to vector<1x1x256xf32>
    %17 = arith.cmpf ole, %2, %16 : vector<1x1x256xf32>
    %18 = arith.andi %15, %17 : vector<1x1x256xi1>
    %cst_14 = arith.constant 1.000000e+00 : f32
    %cst_15 = arith.constant 0.000000e+00 : f32
    %19 = vector.broadcast %cst_14 : f32 to vector<1x1x256xf32>
    %20 = vector.broadcast %cst_15 : f32 to vector<1x1x256xf32>
    %21 = arith.select %18, %19, %20 : vector<1x1x256xi1>, vector<1x1x256xf32>
    %22 = arith.mulf %13, %21 : vector<1x1x256xf32>
    %cst_16 = arith.constant 5.000000e-01 : f32
    %23 = vector.broadcast %cst_16 : f32 to vector<1x1x256xf32>
    %24 = arith.cmpf ogt, %22, %23 : vector<1x1x256xf32>
    %cst_17 = arith.constant 0xFF800000 : f32
    %25 = vector.shape_cast %24 : vector<1x1x256xi1> to vector<1x1x256xi1>
    %26 = vector.broadcast %25 : vector<1x1x256xi1> to vector<2x4x256xi1>
    %27 = vector.broadcast %cst_17 : f32 to vector<2x4x256xf32>
    %28 = arith.select %26, %5, %27 : vector<2x4x256xi1>, vector<2x4x256xf32>
    %29 = vector.broadcast %22 : vector<1x1x256xf32> to vector<2x4x256xf32>
    %30 = arith.mulf %5, %29 : vector<2x4x256xf32>
    %c16_i32 = arith.constant 16 : i32
    %31 = tpu.dynamic_rotate %0 by %c16_i32 dim 2 : vector<2x4x256xf32>, i32 -> vector<2x4x256xf32>
    %cst_18 = arith.constant 5.000000e-01 : f32
    %32 = vector.broadcast %cst_18 : f32 to vector<1x1x256xf32>
    %33 = arith.cmpf ogt, %13, %32 : vector<1x1x256xf32>
    %cst_19 = arith.constant 0xFF800000 : f32
    %34 = vector.shape_cast %33 : vector<1x1x256xi1> to vector<1x1x256xi1>
    %35 = vector.broadcast %34 : vector<1x1x256xi1> to vector<2x4x256xi1>
    %36 = vector.broadcast %cst_19 : f32 to vector<2x4x256xf32>
    %37 = arith.select %35, %31, %36 : vector<2x4x256xi1>, vector<2x4x256xf32>
    %38 = vector.broadcast %13 : vector<1x1x256xf32> to vector<2x4x256xf32>
    %39 = arith.mulf %31, %38 : vector<2x4x256xf32>
    %40 = arith.maximumf %28, %37 : vector<2x4x256xf32>
    %41 = arith.addf %30, %39 : vector<2x4x256xf32>
    %42 = arith.addf %22, %13 : vector<1x1x256xf32>
    %c15_i32 = arith.constant 15 : i32
    %43 = tpu.dynamic_rotate %0 by %c15_i32 dim 2 : vector<2x4x256xf32>, i32 -> vector<2x4x256xf32>
    %cst_20 = arith.constant -1.000000e+00 : f32
    %44 = vector.broadcast %cst_20 : f32 to vector<1x1x256xf32>
    %45 = arith.cmpf oge, %2, %44 : vector<1x1x256xf32>
    %cst_21 = arith.constant 1.400000e+01 : f32
    %46 = vector.broadcast %cst_21 : f32 to vector<1x1x256xf32>
    %47 = arith.cmpf ole, %2, %46 : vector<1x1x256xf32>
    %48 = arith.andi %45, %47 : vector<1x1x256xi1>
    %cst_22 = arith.constant 1.000000e+00 : f32
    %cst_23 = arith.constant 0.000000e+00 : f32
    %49 = vector.broadcast %cst_22 : f32 to vector<1x1x256xf32>
    %50 = vector.broadcast %cst_23 : f32 to vector<1x1x256xf32>
    %51 = arith.select %48, %49, %50 : vector<1x1x256xi1>, vector<1x1x256xf32>
    %52 = arith.mulf %13, %51 : vector<1x1x256xf32>
    %cst_24 = arith.constant 5.000000e-01 : f32
    %53 = vector.broadcast %cst_24 : f32 to vector<1x1x256xf32>
    %54 = arith.cmpf ogt, %52, %53 : vector<1x1x256xf32>
    %cst_25 = arith.constant 0xFF800000 : f32
    %55 = vector.shape_cast %54 : vector<1x1x256xi1> to vector<1x1x256xi1>
    %56 = vector.broadcast %55 : vector<1x1x256xi1> to vector<2x4x256xi1>
    %57 = vector.broadcast %cst_25 : f32 to vector<2x4x256xf32>
    %58 = arith.select %56, %43, %57 : vector<2x4x256xi1>, vector<2x4x256xf32>
    %59 = vector.broadcast %52 : vector<1x1x256xf32> to vector<2x4x256xf32>
    %60 = arith.mulf %43, %59 : vector<2x4x256xf32>
    %61 = arith.maximumf %40, %58 : vector<2x4x256xf32>
    %62 = arith.addf %41, %60 : vector<2x4x256xf32>
    %63 = arith.addf %42, %52 : vector<1x1x256xf32>
    %c1_i32 = arith.constant 1 : i32
    %64 = tpu.dynamic_rotate %0 by %c1_i32 dim 2 : vector<2x4x256xf32>, i32 -> vector<2x4x256xf32>
    %cst_26 = arith.constant 5.000000e-01 : f32
    %65 = vector.broadcast %cst_26 : f32 to vector<1x1x256xf32>
    %66 = arith.cmpf ogt, %21, %65 : vector<1x1x256xf32>
    %cst_27 = arith.constant 0xFF800000 : f32
    %67 = vector.shape_cast %66 : vector<1x1x256xi1> to vector<1x1x256xi1>
    %68 = vector.broadcast %67 : vector<1x1x256xi1> to vector<2x4x256xi1>
    %69 = vector.broadcast %cst_27 : f32 to vector<2x4x256xf32>
    %70 = arith.select %68, %64, %69 : vector<2x4x256xi1>, vector<2x4x256xf32>
    %71 = vector.broadcast %21 : vector<1x1x256xf32> to vector<2x4x256xf32>
    %72 = arith.mulf %64, %71 : vector<2x4x256xf32>
    %73 = arith.maximumf %61, %70 : vector<2x4x256xf32>
    %74 = arith.addf %62, %72 : vector<2x4x256xf32>
    %75 = arith.addf %63, %21 : vector<1x1x256xf32>
    %cst_28 = arith.constant 1.000000e+00 : f32
    %76 = vector.broadcast %cst_28 : f32 to vector<1x1x256xf32>
    %77 = arith.maximumf %73, %0 : vector<2x4x256xf32>
    %78 = arith.addf %74, %0 : vector<2x4x256xf32>
    %79 = arith.addf %75, %76 : vector<1x1x256xf32>
    %c255_i32 = arith.constant 255 : i32
    %80 = tpu.dynamic_rotate %0 by %c255_i32 dim 2 : vector<2x4x256xf32>, i32 -> vector<2x4x256xf32>
    %cst_29 = arith.constant 5.000000e-01 : f32
    %81 = vector.broadcast %cst_29 : f32 to vector<1x1x256xf32>
    %82 = arith.cmpf ogt, %51, %81 : vector<1x1x256xf32>
    %cst_30 = arith.constant 0xFF800000 : f32
    %83 = vector.shape_cast %82 : vector<1x1x256xi1> to vector<1x1x256xi1>
    %84 = vector.broadcast %83 : vector<1x1x256xi1> to vector<2x4x256xi1>
    %85 = vector.broadcast %cst_30 : f32 to vector<2x4x256xf32>
    %86 = arith.select %84, %80, %85 : vector<2x4x256xi1>, vector<2x4x256xf32>
    %87 = vector.broadcast %51 : vector<1x1x256xf32> to vector<2x4x256xf32>
    %88 = arith.mulf %80, %87 : vector<2x4x256xf32>
    %89 = arith.maximumf %77, %86 : vector<2x4x256xf32>
    %90 = arith.addf %78, %88 : vector<2x4x256xf32>
    %91 = arith.addf %79, %51 : vector<1x1x256xf32>
    %c241_i32 = arith.constant 241 : i32
    %92 = tpu.dynamic_rotate %0 by %c241_i32 dim 2 : vector<2x4x256xf32>, i32 -> vector<2x4x256xf32>
    %cst_31 = arith.constant -1.000000e+00 : f32
    %93 = vector.broadcast %cst_31 : f32 to vector<1x1x256xf32>
    %94 = arith.cmpf oge, %1, %93 : vector<1x1x256xf32>
    %cst_32 = arith.constant 1.400000e+01 : f32
    %95 = vector.broadcast %cst_32 : f32 to vector<1x1x256xf32>
    %96 = arith.cmpf ole, %1, %95 : vector<1x1x256xf32>
    %97 = arith.andi %94, %96 : vector<1x1x256xi1>
    %cst_33 = arith.constant 1.000000e+00 : f32
    %cst_34 = arith.constant 0.000000e+00 : f32
    %98 = vector.broadcast %cst_33 : f32 to vector<1x1x256xf32>
    %99 = vector.broadcast %cst_34 : f32 to vector<1x1x256xf32>
    %100 = arith.select %97, %98, %99 : vector<1x1x256xi1>, vector<1x1x256xf32>
    %101 = arith.mulf %100, %21 : vector<1x1x256xf32>
    %cst_35 = arith.constant 5.000000e-01 : f32
    %102 = vector.broadcast %cst_35 : f32 to vector<1x1x256xf32>
    %103 = arith.cmpf ogt, %101, %102 : vector<1x1x256xf32>
    %cst_36 = arith.constant 0xFF800000 : f32
    %104 = vector.shape_cast %103 : vector<1x1x256xi1> to vector<1x1x256xi1>
    %105 = vector.broadcast %104 : vector<1x1x256xi1> to vector<2x4x256xi1>
    %106 = vector.broadcast %cst_36 : f32 to vector<2x4x256xf32>
    %107 = arith.select %105, %92, %106 : vector<2x4x256xi1>, vector<2x4x256xf32>
    %108 = vector.broadcast %101 : vector<1x1x256xf32> to vector<2x4x256xf32>
    %109 = arith.mulf %92, %108 : vector<2x4x256xf32>
    %110 = arith.maximumf %89, %107 : vector<2x4x256xf32>
    %111 = arith.addf %90, %109 : vector<2x4x256xf32>
    %112 = arith.addf %91, %101 : vector<1x1x256xf32>
    %c240_i32 = arith.constant 240 : i32
    %113 = tpu.dynamic_rotate %0 by %c240_i32 dim 2 : vector<2x4x256xf32>, i32 -> vector<2x4x256xf32>
    %cst_37 = arith.constant 5.000000e-01 : f32
    %114 = vector.broadcast %cst_37 : f32 to vector<1x1x256xf32>
    %115 = arith.cmpf ogt, %100, %114 : vector<1x1x256xf32>
    %cst_38 = arith.constant 0xFF800000 : f32
    %116 = vector.shape_cast %115 : vector<1x1x256xi1> to vector<1x1x256xi1>
    %117 = vector.broadcast %116 : vector<1x1x256xi1> to vector<2x4x256xi1>
    %118 = vector.broadcast %cst_38 : f32 to vector<2x4x256xf32>
    %119 = arith.select %117, %113, %118 : vector<2x4x256xi1>, vector<2x4x256xf32>
    %120 = vector.broadcast %100 : vector<1x1x256xf32> to vector<2x4x256xf32>
    %121 = arith.mulf %113, %120 : vector<2x4x256xf32>
    %122 = arith.maximumf %110, %119 : vector<2x4x256xf32>
    %123 = arith.addf %111, %121 : vector<2x4x256xf32>
    %124 = arith.addf %112, %100 : vector<1x1x256xf32>
    %c239_i32 = arith.constant 239 : i32
    %125 = tpu.dynamic_rotate %0 by %c239_i32 dim 2 : vector<2x4x256xf32>, i32 -> vector<2x4x256xf32>
    %126 = arith.mulf %100, %51 : vector<1x1x256xf32>
    %cst_39 = arith.constant 5.000000e-01 : f32
    %127 = vector.broadcast %cst_39 : f32 to vector<1x1x256xf32>
    %128 = arith.cmpf ogt, %126, %127 : vector<1x1x256xf32>
    %cst_40 = arith.constant 0xFF800000 : f32
    %129 = vector.shape_cast %128 : vector<1x1x256xi1> to vector<1x1x256xi1>
    %130 = vector.broadcast %129 : vector<1x1x256xi1> to vector<2x4x256xi1>
    %131 = vector.broadcast %cst_40 : f32 to vector<2x4x256xf32>
    %132 = arith.select %130, %125, %131 : vector<2x4x256xi1>, vector<2x4x256xf32>
    %133 = vector.broadcast %126 : vector<1x1x256xf32> to vector<2x4x256xf32>
    %134 = arith.mulf %125, %133 : vector<2x4x256xf32>
    %135 = arith.maximumf %122, %132 : vector<2x4x256xf32>
    %136 = arith.addf %123, %134 : vector<2x4x256xf32>
    %137 = arith.addf %124, %126 : vector<1x1x256xf32>
    %cst_41 = arith.constant 1.000000e+00 : f32
    %138 = vector.broadcast %cst_41 : f32 to vector<1x1x256xf32>
    %139 = arith.divf %138, %137 : vector<1x1x256xf32>
    %140 = vector.broadcast %139 : vector<1x1x256xf32> to vector<2x4x256xf32>
    %141 = arith.mulf %136, %140 : vector<2x4x256xf32>
    %c3 = arith.constant 3 : index
    %142 = memref.load %arg0[%c3] : memref<8xf32, #tpu.memory_space<smem>>
    %143 = vector.broadcast %142 : f32 to vector<2x4x256xf32>
    %144 = arith.mulf %143, %0 : vector<2x4x256xf32>
    %c1 = arith.constant 1 : index
    %145 = memref.load %arg0[%c1] : memref<8xf32, #tpu.memory_space<smem>>
    %cst_42 = arith.constant dense<0.000000e+00> : vector<2x4xf32>
    %146 = vector.multi_reduction <add>, %135, %cst_42 [2] : vector<2x4x256xf32> to vector<2x4xf32>
    %147 = vector.shape_cast %146 : vector<2x4xf32> to vector<2x4x1xf32>
    %cst_43 = arith.constant dense<0.000000e+00> : vector<4x1xf32>
    %148 = vector.multi_reduction <add>, %147, %cst_43 [0] : vector<2x4x1xf32> to vector<4x1xf32>
    %149 = vector.shape_cast %148 : vector<4x1xf32> to vector<1x4x1xf32>
    %cst_44 = arith.constant 0.001953125 : f32
    %150 = vector.broadcast %cst_44 : f32 to vector<1x4x1xf32>
    %151 = arith.mulf %149, %150 : vector<1x4x1xf32>
    %152 = vector.broadcast %151 : vector<1x4x1xf32> to vector<2x4x256xf32>
    %153 = arith.subf %135, %152 : vector<2x4x256xf32>
    %154 = arith.mulf %153, %153 : vector<2x4x256xf32>
    %cst_45 = arith.constant dense<0.000000e+00> : vector<2x4xf32>
    %155 = vector.multi_reduction <add>, %154, %cst_45 [2] : vector<2x4x256xf32> to vector<2x4xf32>
    %156 = vector.shape_cast %155 : vector<2x4xf32> to vector<2x4x1xf32>
    %cst_46 = arith.constant dense<0.000000e+00> : vector<4x1xf32>
    %157 = vector.multi_reduction <add>, %156, %cst_46 [0] : vector<2x4x1xf32> to vector<4x1xf32>
    %158 = vector.shape_cast %157 : vector<4x1xf32> to vector<1x4x1xf32>
    %cst_47 = arith.constant 0.001953125 : f32
    %159 = vector.broadcast %cst_47 : f32 to vector<1x4x1xf32>
    %160 = arith.mulf %158, %159 : vector<1x4x1xf32>
    %cst_48 = arith.constant 9.99999974E-6 : f32
    %161 = vector.broadcast %cst_48 : f32 to vector<1x4x1xf32>
    %162 = arith.addf %160, %161 : vector<1x4x1xf32>
    %163 = math.rsqrt %162 : vector<1x4x1xf32>
    %164 = vector.broadcast %145 : f32 to vector<1x4x1xf32>
    %165 = arith.mulf %164, %163 : vector<1x4x1xf32>
    %166 = vector.broadcast %165 : vector<1x4x1xf32> to vector<2x4x256xf32>
    %167 = arith.mulf %153, %166 : vector<2x4x256xf32>
    %168 = arith.addf %144, %167 : vector<2x4x256xf32>
    %c2 = arith.constant 2 : index
    %169 = memref.load %arg0[%c2] : memref<8xf32, #tpu.memory_space<smem>>
    %cst_49 = arith.constant dense<0.000000e+00> : vector<2x4xf32>
    %170 = vector.multi_reduction <add>, %141, %cst_49 [2] : vector<2x4x256xf32> to vector<2x4xf32>
    %171 = vector.shape_cast %170 : vector<2x4xf32> to vector<2x4x1xf32>
    %cst_50 = arith.constant dense<0.000000e+00> : vector<4x1xf32>
    %172 = vector.multi_reduction <add>, %171, %cst_50 [0] : vector<2x4x1xf32> to vector<4x1xf32>
    %173 = vector.shape_cast %172 : vector<4x1xf32> to vector<1x4x1xf32>
    %cst_51 = arith.constant 0.001953125 : f32
    %174 = vector.broadcast %cst_51 : f32 to vector<1x4x1xf32>
    %175 = arith.mulf %173, %174 : vector<1x4x1xf32>
    %176 = vector.broadcast %175 : vector<1x4x1xf32> to vector<2x4x256xf32>
    %177 = arith.subf %141, %176 : vector<2x4x256xf32>
    %178 = arith.mulf %177, %177 : vector<2x4x256xf32>
    %cst_52 = arith.constant dense<0.000000e+00> : vector<2x4xf32>
    %179 = vector.multi_reduction <add>, %178, %cst_52 [2] : vector<2x4x256xf32> to vector<2x4xf32>
    %180 = vector.shape_cast %179 : vector<2x4xf32> to vector<2x4x1xf32>
    %cst_53 = arith.constant dense<0.000000e+00> : vector<4x1xf32>
    %181 = vector.multi_reduction <add>, %180, %cst_53 [0] : vector<2x4x1xf32> to vector<4x1xf32>
    %182 = vector.shape_cast %181 : vector<4x1xf32> to vector<1x4x1xf32>
    %cst_54 = arith.constant 0.001953125 : f32
    %183 = vector.broadcast %cst_54 : f32 to vector<1x4x1xf32>
    %184 = arith.mulf %182, %183 : vector<1x4x1xf32>
    %cst_55 = arith.constant 9.99999974E-6 : f32
    %185 = vector.broadcast %cst_55 : f32 to vector<1x4x1xf32>
    %186 = arith.addf %184, %185 : vector<1x4x1xf32>
    %187 = math.rsqrt %186 : vector<1x4x1xf32>
    %188 = vector.broadcast %169 : f32 to vector<1x4x1xf32>
    %189 = arith.mulf %188, %187 : vector<1x4x1xf32>
    %190 = vector.broadcast %189 : vector<1x4x1xf32> to vector<2x4x256xf32>
    %191 = arith.mulf %177, %190 : vector<2x4x256xf32>
    %192 = arith.addf %168, %191 : vector<2x4x256xf32>
    %c4 = arith.constant 4 : index
    %193 = memref.load %arg0[%c4] : memref<8xf32, #tpu.memory_space<smem>>
    %c0_56 = arith.constant 0 : index
    %c0_57 = arith.constant 0 : index
    %194 = vector.load %arg4[%c0_56, %c0_57] : memref<4x9xf32, #tpu.memory_space<vmem>>, vector<4x9xf32>
    %c17_i32_58 = arith.constant 17 : i32
    %195 = tpu.dynamic_rotate %4 by %c17_i32_58 dim 2 : vector<2x4x256xf32>, i32 -> vector<2x4x256xf32>
    %196 = vector.broadcast %22 : vector<1x1x256xf32> to vector<2x4x256xf32>
    %197 = arith.mulf %195, %196 : vector<2x4x256xf32>
    %198 = vector.extract_strided_slice %194 {offsets = [0, 0], sizes = [4, 1], strides = [1, 1]} : vector<4x9xf32> to vector<4x1xf32>
    %199 = vector.shape_cast %198 : vector<4x1xf32> to vector<1x4x1xf32>
    %200 = vector.broadcast %199 : vector<1x4x1xf32> to vector<2x4x256xf32>
    %201 = arith.mulf %197, %200 : vector<2x4x256xf32>
    %c16_i32_59 = arith.constant 16 : i32
    %202 = tpu.dynamic_rotate %4 by %c16_i32_59 dim 2 : vector<2x4x256xf32>, i32 -> vector<2x4x256xf32>
    %203 = vector.broadcast %13 : vector<1x1x256xf32> to vector<2x4x256xf32>
    %204 = arith.mulf %202, %203 : vector<2x4x256xf32>
    %205 = vector.extract_strided_slice %194 {offsets = [0, 1], sizes = [4, 1], strides = [1, 1]} : vector<4x9xf32> to vector<4x1xf32>
    %206 = vector.shape_cast %205 : vector<4x1xf32> to vector<1x4x1xf32>
    %207 = vector.broadcast %206 : vector<1x4x1xf32> to vector<2x4x256xf32>
    %208 = arith.mulf %204, %207 : vector<2x4x256xf32>
    %209 = arith.addf %201, %208 : vector<2x4x256xf32>
    %c15_i32_60 = arith.constant 15 : i32
    %210 = tpu.dynamic_rotate %4 by %c15_i32_60 dim 2 : vector<2x4x256xf32>, i32 -> vector<2x4x256xf32>
    %211 = vector.broadcast %52 : vector<1x1x256xf32> to vector<2x4x256xf32>
    %212 = arith.mulf %210, %211 : vector<2x4x256xf32>
    %213 = vector.extract_strided_slice %194 {offsets = [0, 2], sizes = [4, 1], strides = [1, 1]} : vector<4x9xf32> to vector<4x1xf32>
    %214 = vector.shape_cast %213 : vector<4x1xf32> to vector<1x4x1xf32>
    %215 = vector.broadcast %214 : vector<1x4x1xf32> to vector<2x4x256xf32>
    %216 = arith.mulf %212, %215 : vector<2x4x256xf32>
    %217 = arith.addf %209, %216 : vector<2x4x256xf32>
    %c1_i32_61 = arith.constant 1 : i32
    %218 = tpu.dynamic_rotate %4 by %c1_i32_61 dim 2 : vector<2x4x256xf32>, i32 -> vector<2x4x256xf32>
    %219 = vector.broadcast %21 : vector<1x1x256xf32> to vector<2x4x256xf32>
    %220 = arith.mulf %218, %219 : vector<2x4x256xf32>
    %221 = vector.extract_strided_slice %194 {offsets = [0, 3], sizes = [4, 1], strides = [1, 1]} : vector<4x9xf32> to vector<4x1xf32>
    %222 = vector.shape_cast %221 : vector<4x1xf32> to vector<1x4x1xf32>
    %223 = vector.broadcast %222 : vector<1x4x1xf32> to vector<2x4x256xf32>
    %224 = arith.mulf %220, %223 : vector<2x4x256xf32>
    %225 = arith.addf %217, %224 : vector<2x4x256xf32>
    %226 = vector.extract_strided_slice %194 {offsets = [0, 4], sizes = [4, 1], strides = [1, 1]} : vector<4x9xf32> to vector<4x1xf32>
    %227 = vector.shape_cast %226 : vector<4x1xf32> to vector<1x4x1xf32>
    %228 = vector.broadcast %227 : vector<1x4x1xf32> to vector<2x4x256xf32>
    %229 = arith.mulf %4, %228 : vector<2x4x256xf32>
    %230 = arith.addf %225, %229 : vector<2x4x256xf32>
    %c255_i32_62 = arith.constant 255 : i32
    %231 = tpu.dynamic_rotate %4 by %c255_i32_62 dim 2 : vector<2x4x256xf32>, i32 -> vector<2x4x256xf32>
    %232 = vector.broadcast %51 : vector<1x1x256xf32> to vector<2x4x256xf32>
    %233 = arith.mulf %231, %232 : vector<2x4x256xf32>
    %234 = vector.extract_strided_slice %194 {offsets = [0, 5], sizes = [4, 1], strides = [1, 1]} : vector<4x9xf32> to vector<4x1xf32>
    %235 = vector.shape_cast %234 : vector<4x1xf32> to vector<1x4x1xf32>
    %236 = vector.broadcast %235 : vector<1x4x1xf32> to vector<2x4x256xf32>
    %237 = arith.mulf %233, %236 : vector<2x4x256xf32>
    %238 = arith.addf %230, %237 : vector<2x4x256xf32>
    %c241_i32_63 = arith.constant 241 : i32
    %239 = tpu.dynamic_rotate %4 by %c241_i32_63 dim 2 : vector<2x4x256xf32>, i32 -> vector<2x4x256xf32>
    %240 = vector.broadcast %101 : vector<1x1x256xf32> to vector<2x4x256xf32>
    %241 = arith.mulf %239, %240 : vector<2x4x256xf32>
    %242 = vector.extract_strided_slice %194 {offsets = [0, 6], sizes = [4, 1], strides = [1, 1]} : vector<4x9xf32> to vector<4x1xf32>
    %243 = vector.shape_cast %242 : vector<4x1xf32> to vector<1x4x1xf32>
    %244 = vector.broadcast %243 : vector<1x4x1xf32> to vector<2x4x256xf32>
    %245 = arith.mulf %241, %244 : vector<2x4x256xf32>
    %246 = arith.addf %238, %245 : vector<2x4x256xf32>
    %c240_i32_64 = arith.constant 240 : i32
    %247 = tpu.dynamic_rotate %4 by %c240_i32_64 dim 2 : vector<2x4x256xf32>, i32 -> vector<2x4x256xf32>
    %248 = vector.broadcast %100 : vector<1x1x256xf32> to vector<2x4x256xf32>
    %249 = arith.mulf %247, %248 : vector<2x4x256xf32>
    %250 = vector.extract_strided_slice %194 {offsets = [0, 7], sizes = [4, 1], strides = [1, 1]} : vector<4x9xf32> to vector<4x1xf32>
    %251 = vector.shape_cast %250 : vector<4x1xf32> to vector<1x4x1xf32>
    %252 = vector.broadcast %251 : vector<1x4x1xf32> to vector<2x4x256xf32>
    %253 = arith.mulf %249, %252 : vector<2x4x256xf32>
    %254 = arith.addf %246, %253 : vector<2x4x256xf32>
    %c239_i32_65 = arith.constant 239 : i32
    %255 = tpu.dynamic_rotate %4 by %c239_i32_65 dim 2 : vector<2x4x256xf32>, i32 -> vector<2x4x256xf32>
    %256 = vector.broadcast %126 : vector<1x1x256xf32> to vector<2x4x256xf32>
    %257 = arith.mulf %255, %256 : vector<2x4x256xf32>
    %258 = vector.extract_strided_slice %194 {offsets = [0, 8], sizes = [4, 1], strides = [1, 1]} : vector<4x9xf32> to vector<4x1xf32>
    %259 = vector.shape_cast %258 : vector<4x1xf32> to vector<1x4x1xf32>
    %260 = vector.broadcast %259 : vector<1x4x1xf32> to vector<2x4x256xf32>
    %261 = arith.mulf %257, %260 : vector<2x4x256xf32>
    %262 = arith.addf %254, %261 : vector<2x4x256xf32>
    %c0_66 = arith.constant 0 : index
    %c0_67 = arith.constant 0 : index
    %263 = vector.load %arg5[%c0_66, %c0_67] : memref<4x4xf32, #tpu.memory_space<vmem>>, vector<4x4xf32>
    %264 = vector.extract_strided_slice %262 {offsets = [0, 0, 0], sizes = [2, 1, 256], strides = [1, 1, 1]} : vector<2x4x256xf32> to vector<2x1x256xf32>
    %265 = vector.extract_strided_slice %263 {offsets = [0, 0], sizes = [4, 1], strides = [1, 1]} : vector<4x4xf32> to vector<4x1xf32>
    %266 = vector.shape_cast %265 : vector<4x1xf32> to vector<1x4x1xf32>
    %267 = vector.broadcast %264 : vector<2x1x256xf32> to vector<2x4x256xf32>
    %268 = vector.broadcast %266 : vector<1x4x1xf32> to vector<2x4x256xf32>
    %269 = arith.mulf %267, %268 : vector<2x4x256xf32>
    %270 = vector.extract_strided_slice %262 {offsets = [0, 1, 0], sizes = [2, 1, 256], strides = [1, 1, 1]} : vector<2x4x256xf32> to vector<2x1x256xf32>
    %271 = vector.extract_strided_slice %263 {offsets = [0, 1], sizes = [4, 1], strides = [1, 1]} : vector<4x4xf32> to vector<4x1xf32>
    %272 = vector.shape_cast %271 : vector<4x1xf32> to vector<1x4x1xf32>
    %273 = vector.broadcast %270 : vector<2x1x256xf32> to vector<2x4x256xf32>
    %274 = vector.broadcast %272 : vector<1x4x1xf32> to vector<2x4x256xf32>
    %275 = arith.mulf %273, %274 : vector<2x4x256xf32>
    %276 = arith.addf %269, %275 : vector<2x4x256xf32>
    %277 = vector.extract_strided_slice %262 {offsets = [0, 2, 0], sizes = [2, 1, 256], strides = [1, 1, 1]} : vector<2x4x256xf32> to vector<2x1x256xf32>
    %278 = vector.extract_strided_slice %263 {offsets = [0, 2], sizes = [4, 1], strides = [1, 1]} : vector<4x4xf32> to vector<4x1xf32>
    %279 = vector.shape_cast %278 : vector<4x1xf32> to vector<1x4x1xf32>
    %280 = vector.broadcast %277 : vector<2x1x256xf32> to vector<2x4x256xf32>
    %281 = vector.broadcast %279 : vector<1x4x1xf32> to vector<2x4x256xf32>
    %282 = arith.mulf %280, %281 : vector<2x4x256xf32>
    %283 = arith.addf %276, %282 : vector<2x4x256xf32>
    %284 = vector.extract_strided_slice %262 {offsets = [0, 3, 0], sizes = [2, 1, 256], strides = [1, 1, 1]} : vector<2x4x256xf32> to vector<2x1x256xf32>
    %285 = vector.extract_strided_slice %263 {offsets = [0, 3], sizes = [4, 1], strides = [1, 1]} : vector<4x4xf32> to vector<4x1xf32>
    %286 = vector.shape_cast %285 : vector<4x1xf32> to vector<1x4x1xf32>
    %287 = vector.broadcast %284 : vector<2x1x256xf32> to vector<2x4x256xf32>
    %288 = vector.broadcast %286 : vector<1x4x1xf32> to vector<2x4x256xf32>
    %289 = arith.mulf %287, %288 : vector<2x4x256xf32>
    %290 = arith.addf %283, %289 : vector<2x4x256xf32>
    %cst_68 = arith.constant dense<0.000000e+00> : vector<2x4xf32>
    %291 = vector.multi_reduction <add>, %290, %cst_68 [2] : vector<2x4x256xf32> to vector<2x4xf32>
    %292 = vector.shape_cast %291 : vector<2x4xf32> to vector<2x4x1xf32>
    %cst_69 = arith.constant dense<0.000000e+00> : vector<4x1xf32>
    %293 = vector.multi_reduction <add>, %292, %cst_69 [0] : vector<2x4x1xf32> to vector<4x1xf32>
    %294 = vector.shape_cast %293 : vector<4x1xf32> to vector<1x4x1xf32>
    %cst_70 = arith.constant 0.001953125 : f32
    %295 = vector.broadcast %cst_70 : f32 to vector<1x4x1xf32>
    %296 = arith.mulf %294, %295 : vector<1x4x1xf32>
    %297 = vector.broadcast %296 : vector<1x4x1xf32> to vector<2x4x256xf32>
    %298 = arith.subf %290, %297 : vector<2x4x256xf32>
    %299 = arith.mulf %298, %298 : vector<2x4x256xf32>
    %cst_71 = arith.constant dense<0.000000e+00> : vector<2x4xf32>
    %300 = vector.multi_reduction <add>, %299, %cst_71 [2] : vector<2x4x256xf32> to vector<2x4xf32>
    %301 = vector.shape_cast %300 : vector<2x4xf32> to vector<2x4x1xf32>
    %cst_72 = arith.constant dense<0.000000e+00> : vector<4x1xf32>
    %302 = vector.multi_reduction <add>, %301, %cst_72 [0] : vector<2x4x1xf32> to vector<4x1xf32>
    %303 = vector.shape_cast %302 : vector<4x1xf32> to vector<1x4x1xf32>
    %cst_73 = arith.constant 0.001953125 : f32
    %304 = vector.broadcast %cst_73 : f32 to vector<1x4x1xf32>
    %305 = arith.mulf %303, %304 : vector<1x4x1xf32>
    %cst_74 = arith.constant 9.99999974E-6 : f32
    %306 = vector.broadcast %cst_74 : f32 to vector<1x4x1xf32>
    %307 = arith.addf %305, %306 : vector<1x4x1xf32>
    %308 = math.rsqrt %307 : vector<1x4x1xf32>
    %cst_75 = arith.constant 1.000000e+00 : f32
    %309 = vector.broadcast %cst_75 : f32 to vector<1x4x1xf32>
    %310 = arith.mulf %309, %308 : vector<1x4x1xf32>
    %311 = vector.broadcast %310 : vector<1x4x1xf32> to vector<2x4x256xf32>
    %312 = arith.mulf %298, %311 : vector<2x4x256xf32>
    %cst_76 = arith.constant 0.000000e+00 : f32
    %313 = vector.broadcast %cst_76 : f32 to vector<2x4x256xf32>
    %314 = arith.maximumf %312, %313 : vector<2x4x256xf32>
    %c0_77 = arith.constant 0 : index
    %c0_78 = arith.constant 0 : index
    %315 = vector.load %arg6[%c0_77, %c0_78] : memref<4x9xf32, #tpu.memory_space<vmem>>, vector<4x9xf32>
    %c17_i32_79 = arith.constant 17 : i32
    %316 = tpu.dynamic_rotate %314 by %c17_i32_79 dim 2 : vector<2x4x256xf32>, i32 -> vector<2x4x256xf32>
    %317 = vector.broadcast %22 : vector<1x1x256xf32> to vector<2x4x256xf32>
    %318 = arith.mulf %316, %317 : vector<2x4x256xf32>
    %319 = vector.extract_strided_slice %315 {offsets = [0, 0], sizes = [4, 1], strides = [1, 1]} : vector<4x9xf32> to vector<4x1xf32>
    %320 = vector.shape_cast %319 : vector<4x1xf32> to vector<1x4x1xf32>
    %321 = vector.broadcast %320 : vector<1x4x1xf32> to vector<2x4x256xf32>
    %322 = arith.mulf %318, %321 : vector<2x4x256xf32>
    %c16_i32_80 = arith.constant 16 : i32
    %323 = tpu.dynamic_rotate %314 by %c16_i32_80 dim 2 : vector<2x4x256xf32>, i32 -> vector<2x4x256xf32>
    %324 = vector.broadcast %13 : vector<1x1x256xf32> to vector<2x4x256xf32>
    %325 = arith.mulf %323, %324 : vector<2x4x256xf32>
    %326 = vector.extract_strided_slice %315 {offsets = [0, 1], sizes = [4, 1], strides = [1, 1]} : vector<4x9xf32> to vector<4x1xf32>
    %327 = vector.shape_cast %326 : vector<4x1xf32> to vector<1x4x1xf32>
    %328 = vector.broadcast %327 : vector<1x4x1xf32> to vector<2x4x256xf32>
    %329 = arith.mulf %325, %328 : vector<2x4x256xf32>
    %330 = arith.addf %322, %329 : vector<2x4x256xf32>
    %c15_i32_81 = arith.constant 15 : i32
    %331 = tpu.dynamic_rotate %314 by %c15_i32_81 dim 2 : vector<2x4x256xf32>, i32 -> vector<2x4x256xf32>
    %332 = vector.broadcast %52 : vector<1x1x256xf32> to vector<2x4x256xf32>
    %333 = arith.mulf %331, %332 : vector<2x4x256xf32>
    %334 = vector.extract_strided_slice %315 {offsets = [0, 2], sizes = [4, 1], strides = [1, 1]} : vector<4x9xf32> to vector<4x1xf32>
    %335 = vector.shape_cast %334 : vector<4x1xf32> to vector<1x4x1xf32>
    %336 = vector.broadcast %335 : vector<1x4x1xf32> to vector<2x4x256xf32>
    %337 = arith.mulf %333, %336 : vector<2x4x256xf32>
    %338 = arith.addf %330, %337 : vector<2x4x256xf32>
    %c1_i32_82 = arith.constant 1 : i32
    %339 = tpu.dynamic_rotate %314 by %c1_i32_82 dim 2 : vector<2x4x256xf32>, i32 -> vector<2x4x256xf32>
    %340 = vector.broadcast %21 : vector<1x1x256xf32> to vector<2x4x256xf32>
    %341 = arith.mulf %339, %340 : vector<2x4x256xf32>
    %342 = vector.extract_strided_slice %315 {offsets = [0, 3], sizes = [4, 1], strides = [1, 1]} : vector<4x9xf32> to vector<4x1xf32>
    %343 = vector.shape_cast %342 : vector<4x1xf32> to vector<1x4x1xf32>
    %344 = vector.broadcast %343 : vector<1x4x1xf32> to vector<2x4x256xf32>
    %345 = arith.mulf %341, %344 : vector<2x4x256xf32>
    %346 = arith.addf %338, %345 : vector<2x4x256xf32>
    %347 = vector.extract_strided_slice %315 {offsets = [0, 4], sizes = [4, 1], strides = [1, 1]} : vector<4x9xf32> to vector<4x1xf32>
    %348 = vector.shape_cast %347 : vector<4x1xf32> to vector<1x4x1xf32>
    %349 = vector.broadcast %348 : vector<1x4x1xf32> to vector<2x4x256xf32>
    %350 = arith.mulf %314, %349 : vector<2x4x256xf32>
    %351 = arith.addf %346, %350 : vector<2x4x256xf32>
    %c255_i32_83 = arith.constant 255 : i32
    %352 = tpu.dynamic_rotate %314 by %c255_i32_83 dim 2 : vector<2x4x256xf32>, i32 -> vector<2x4x256xf32>
    %353 = vector.broadcast %51 : vector<1x1x256xf32> to vector<2x4x256xf32>
    %354 = arith.mulf %352, %353 : vector<2x4x256xf32>
    %355 = vector.extract_strided_slice %315 {offsets = [0, 5], sizes = [4, 1], strides = [1, 1]} : vector<4x9xf32> to vector<4x1xf32>
    %356 = vector.shape_cast %355 : vector<4x1xf32> to vector<1x4x1xf32>
    %357 = vector.broadcast %356 : vector<1x4x1xf32> to vector<2x4x256xf32>
    %358 = arith.mulf %354, %357 : vector<2x4x256xf32>
    %359 = arith.addf %351, %358 : vector<2x4x256xf32>
    %c241_i32_84 = arith.constant 241 : i32
    %360 = tpu.dynamic_rotate %314 by %c241_i32_84 dim 2 : vector<2x4x256xf32>, i32 -> vector<2x4x256xf32>
    %361 = vector.broadcast %101 : vector<1x1x256xf32> to vector<2x4x256xf32>
    %362 = arith.mulf %360, %361 : vector<2x4x256xf32>
    %363 = vector.extract_strided_slice %315 {offsets = [0, 6], sizes = [4, 1], strides = [1, 1]} : vector<4x9xf32> to vector<4x1xf32>
    %364 = vector.shape_cast %363 : vector<4x1xf32> to vector<1x4x1xf32>
    %365 = vector.broadcast %364 : vector<1x4x1xf32> to vector<2x4x256xf32>
    %366 = arith.mulf %362, %365 : vector<2x4x256xf32>
    %367 = arith.addf %359, %366 : vector<2x4x256xf32>
    %c240_i32_85 = arith.constant 240 : i32
    %368 = tpu.dynamic_rotate %314 by %c240_i32_85 dim 2 : vector<2x4x256xf32>, i32 -> vector<2x4x256xf32>
    %369 = vector.broadcast %100 : vector<1x1x256xf32> to vector<2x4x256xf32>
    %370 = arith.mulf %368, %369 : vector<2x4x256xf32>
    %371 = vector.extract_strided_slice %315 {offsets = [0, 7], sizes = [4, 1], strides = [1, 1]} : vector<4x9xf32> to vector<4x1xf32>
    %372 = vector.shape_cast %371 : vector<4x1xf32> to vector<1x4x1xf32>
    %373 = vector.broadcast %372 : vector<1x4x1xf32> to vector<2x4x256xf32>
    %374 = arith.mulf %370, %373 : vector<2x4x256xf32>
    %375 = arith.addf %367, %374 : vector<2x4x256xf32>
    %c239_i32_86 = arith.constant 239 : i32
    %376 = tpu.dynamic_rotate %314 by %c239_i32_86 dim 2 : vector<2x4x256xf32>, i32 -> vector<2x4x256xf32>
    %377 = vector.broadcast %126 : vector<1x1x256xf32> to vector<2x4x256xf32>
    %378 = arith.mulf %376, %377 : vector<2x4x256xf32>
    %379 = vector.extract_strided_slice %315 {offsets = [0, 8], sizes = [4, 1], strides = [1, 1]} : vector<4x9xf32> to vector<4x1xf32>
    %380 = vector.shape_cast %379 : vector<4x1xf32> to vector<1x4x1xf32>
    %381 = vector.broadcast %380 : vector<1x4x1xf32> to vector<2x4x256xf32>
    %382 = arith.mulf %378, %381 : vector<2x4x256xf32>
    %383 = arith.addf %375, %382 : vector<2x4x256xf32>
    %c0_87 = arith.constant 0 : index
    %c0_88 = arith.constant 0 : index
    %384 = vector.load %arg7[%c0_87, %c0_88] : memref<4x4xf32, #tpu.memory_space<vmem>>, vector<4x4xf32>
    %385 = vector.extract_strided_slice %383 {offsets = [0, 0, 0], sizes = [2, 1, 256], strides = [1, 1, 1]} : vector<2x4x256xf32> to vector<2x1x256xf32>
    %386 = vector.extract_strided_slice %384 {offsets = [0, 0], sizes = [4, 1], strides = [1, 1]} : vector<4x4xf32> to vector<4x1xf32>
    %387 = vector.shape_cast %386 : vector<4x1xf32> to vector<1x4x1xf32>
    %388 = vector.broadcast %385 : vector<2x1x256xf32> to vector<2x4x256xf32>
    %389 = vector.broadcast %387 : vector<1x4x1xf32> to vector<2x4x256xf32>
    %390 = arith.mulf %388, %389 : vector<2x4x256xf32>
    %391 = vector.extract_strided_slice %383 {offsets = [0, 1, 0], sizes = [2, 1, 256], strides = [1, 1, 1]} : vector<2x4x256xf32> to vector<2x1x256xf32>
    %392 = vector.extract_strided_slice %384 {offsets = [0, 1], sizes = [4, 1], strides = [1, 1]} : vector<4x4xf32> to vector<4x1xf32>
    %393 = vector.shape_cast %392 : vector<4x1xf32> to vector<1x4x1xf32>
    %394 = vector.broadcast %391 : vector<2x1x256xf32> to vector<2x4x256xf32>
    %395 = vector.broadcast %393 : vector<1x4x1xf32> to vector<2x4x256xf32>
    %396 = arith.mulf %394, %395 : vector<2x4x256xf32>
    %397 = arith.addf %390, %396 : vector<2x4x256xf32>
    %398 = vector.extract_strided_slice %383 {offsets = [0, 2, 0], sizes = [2, 1, 256], strides = [1, 1, 1]} : vector<2x4x256xf32> to vector<2x1x256xf32>
    %399 = vector.extract_strided_slice %384 {offsets = [0, 2], sizes = [4, 1], strides = [1, 1]} : vector<4x4xf32> to vector<4x1xf32>
    %400 = vector.shape_cast %399 : vector<4x1xf32> to vector<1x4x1xf32>
    %401 = vector.broadcast %398 : vector<2x1x256xf32> to vector<2x4x256xf32>
    %402 = vector.broadcast %400 : vector<1x4x1xf32> to vector<2x4x256xf32>
    %403 = arith.mulf %401, %402 : vector<2x4x256xf32>
    %404 = arith.addf %397, %403 : vector<2x4x256xf32>
    %405 = vector.extract_strided_slice %383 {offsets = [0, 3, 0], sizes = [2, 1, 256], strides = [1, 1, 1]} : vector<2x4x256xf32> to vector<2x1x256xf32>
    %406 = vector.extract_strided_slice %384 {offsets = [0, 3], sizes = [4, 1], strides = [1, 1]} : vector<4x4xf32> to vector<4x1xf32>
    %407 = vector.shape_cast %406 : vector<4x1xf32> to vector<1x4x1xf32>
    %408 = vector.broadcast %405 : vector<2x1x256xf32> to vector<2x4x256xf32>
    %409 = vector.broadcast %407 : vector<1x4x1xf32> to vector<2x4x256xf32>
    %410 = arith.mulf %408, %409 : vector<2x4x256xf32>
    %411 = arith.addf %404, %410 : vector<2x4x256xf32>
    %cst_89 = arith.constant dense<0.000000e+00> : vector<2x4xf32>
    %412 = vector.multi_reduction <add>, %411, %cst_89 [2] : vector<2x4x256xf32> to vector<2x4xf32>
    %413 = vector.shape_cast %412 : vector<2x4xf32> to vector<2x4x1xf32>
    %cst_90 = arith.constant dense<0.000000e+00> : vector<4x1xf32>
    %414 = vector.multi_reduction <add>, %413, %cst_90 [0] : vector<2x4x1xf32> to vector<4x1xf32>
    %415 = vector.shape_cast %414 : vector<4x1xf32> to vector<1x4x1xf32>
    %cst_91 = arith.constant 0.001953125 : f32
    %416 = vector.broadcast %cst_91 : f32 to vector<1x4x1xf32>
    %417 = arith.mulf %415, %416 : vector<1x4x1xf32>
    %418 = vector.broadcast %417 : vector<1x4x1xf32> to vector<2x4x256xf32>
    %419 = arith.subf %411, %418 : vector<2x4x256xf32>
    %420 = arith.mulf %419, %419 : vector<2x4x256xf32>
    %cst_92 = arith.constant dense<0.000000e+00> : vector<2x4xf32>
    %421 = vector.multi_reduction <add>, %420, %cst_92 [2] : vector<2x4x256xf32> to vector<2x4xf32>
    %422 = vector.shape_cast %421 : vector<2x4xf32> to vector<2x4x1xf32>
    %cst_93 = arith.constant dense<0.000000e+00> : vector<4x1xf32>
    %423 = vector.multi_reduction <add>, %422, %cst_93 [0] : vector<2x4x1xf32> to vector<4x1xf32>
    %424 = vector.shape_cast %423 : vector<4x1xf32> to vector<1x4x1xf32>
    %cst_94 = arith.constant 0.001953125 : f32
    %425 = vector.broadcast %cst_94 : f32 to vector<1x4x1xf32>
    %426 = arith.mulf %424, %425 : vector<1x4x1xf32>
    %cst_95 = arith.constant 9.99999974E-6 : f32
    %427 = vector.broadcast %cst_95 : f32 to vector<1x4x1xf32>
    %428 = arith.addf %426, %427 : vector<1x4x1xf32>
    %429 = math.rsqrt %428 : vector<1x4x1xf32>
    %430 = vector.broadcast %193 : f32 to vector<1x4x1xf32>
    %431 = arith.mulf %430, %429 : vector<1x4x1xf32>
    %432 = vector.broadcast %431 : vector<1x4x1xf32> to vector<2x4x256xf32>
    %433 = arith.mulf %419, %432 : vector<2x4x256xf32>
    %434 = arith.addf %192, %433 : vector<2x4x256xf32>
    %c5 = arith.constant 5 : index
    %435 = memref.load %arg0[%c5] : memref<8xf32, #tpu.memory_space<smem>>
    %c0_96 = arith.constant 0 : index
    %c0_97 = arith.constant 0 : index
    %436 = vector.load %arg8[%c0_96, %c0_97] : memref<4x25xf32, #tpu.memory_space<vmem>>, vector<4x25xf32>
    %c34_i32 = arith.constant 34 : i32
    %437 = tpu.dynamic_rotate %4 by %c34_i32 dim 2 : vector<2x4x256xf32>, i32 -> vector<2x4x256xf32>
    %cst_98 = arith.constant 2.000000e+00 : f32
    %438 = vector.broadcast %cst_98 : f32 to vector<1x1x256xf32>
    %439 = arith.cmpf oge, %1, %438 : vector<1x1x256xf32>
    %cst_99 = arith.constant 1.700000e+01 : f32
    %440 = vector.broadcast %cst_99 : f32 to vector<1x1x256xf32>
    %441 = arith.cmpf ole, %1, %440 : vector<1x1x256xf32>
    %442 = arith.andi %439, %441 : vector<1x1x256xi1>
    %cst_100 = arith.constant 1.000000e+00 : f32
    %cst_101 = arith.constant 0.000000e+00 : f32
    %443 = vector.broadcast %cst_100 : f32 to vector<1x1x256xf32>
    %444 = vector.broadcast %cst_101 : f32 to vector<1x1x256xf32>
    %445 = arith.select %442, %443, %444 : vector<1x1x256xi1>, vector<1x1x256xf32>
    %cst_102 = arith.constant 2.000000e+00 : f32
    %446 = vector.broadcast %cst_102 : f32 to vector<1x1x256xf32>
    %447 = arith.cmpf oge, %2, %446 : vector<1x1x256xf32>
    %cst_103 = arith.constant 1.700000e+01 : f32
    %448 = vector.broadcast %cst_103 : f32 to vector<1x1x256xf32>
    %449 = arith.cmpf ole, %2, %448 : vector<1x1x256xf32>
    %450 = arith.andi %447, %449 : vector<1x1x256xi1>
    %cst_104 = arith.constant 1.000000e+00 : f32
    %cst_105 = arith.constant 0.000000e+00 : f32
    %451 = vector.broadcast %cst_104 : f32 to vector<1x1x256xf32>
    %452 = vector.broadcast %cst_105 : f32 to vector<1x1x256xf32>
    %453 = arith.select %450, %451, %452 : vector<1x1x256xi1>, vector<1x1x256xf32>
    %454 = arith.mulf %445, %453 : vector<1x1x256xf32>
    %455 = vector.broadcast %454 : vector<1x1x256xf32> to vector<2x4x256xf32>
    %456 = arith.mulf %437, %455 : vector<2x4x256xf32>
    %457 = vector.extract_strided_slice %436 {offsets = [0, 0], sizes = [4, 1], strides = [1, 1]} : vector<4x25xf32> to vector<4x1xf32>
    %458 = vector.shape_cast %457 : vector<4x1xf32> to vector<1x4x1xf32>
    %459 = vector.broadcast %458 : vector<1x4x1xf32> to vector<2x4x256xf32>
    %460 = arith.mulf %456, %459 : vector<2x4x256xf32>
    %c33_i32 = arith.constant 33 : i32
    %461 = tpu.dynamic_rotate %4 by %c33_i32 dim 2 : vector<2x4x256xf32>, i32 -> vector<2x4x256xf32>
    %462 = arith.mulf %445, %21 : vector<1x1x256xf32>
    %463 = vector.broadcast %462 : vector<1x1x256xf32> to vector<2x4x256xf32>
    %464 = arith.mulf %461, %463 : vector<2x4x256xf32>
    %465 = vector.extract_strided_slice %436 {offsets = [0, 1], sizes = [4, 1], strides = [1, 1]} : vector<4x25xf32> to vector<4x1xf32>
    %466 = vector.shape_cast %465 : vector<4x1xf32> to vector<1x4x1xf32>
    %467 = vector.broadcast %466 : vector<1x4x1xf32> to vector<2x4x256xf32>
    %468 = arith.mulf %464, %467 : vector<2x4x256xf32>
    %469 = arith.addf %460, %468 : vector<2x4x256xf32>
    %c32_i32 = arith.constant 32 : i32
    %470 = tpu.dynamic_rotate %4 by %c32_i32 dim 2 : vector<2x4x256xf32>, i32 -> vector<2x4x256xf32>
    %471 = vector.broadcast %445 : vector<1x1x256xf32> to vector<2x4x256xf32>
    %472 = arith.mulf %470, %471 : vector<2x4x256xf32>
    %473 = vector.extract_strided_slice %436 {offsets = [0, 2], sizes = [4, 1], strides = [1, 1]} : vector<4x25xf32> to vector<4x1xf32>
    %474 = vector.shape_cast %473 : vector<4x1xf32> to vector<1x4x1xf32>
    %475 = vector.broadcast %474 : vector<1x4x1xf32> to vector<2x4x256xf32>
    %476 = arith.mulf %472, %475 : vector<2x4x256xf32>
    %477 = arith.addf %469, %476 : vector<2x4x256xf32>
    %c31_i32 = arith.constant 31 : i32
    %478 = tpu.dynamic_rotate %4 by %c31_i32 dim 2 : vector<2x4x256xf32>, i32 -> vector<2x4x256xf32>
    %479 = arith.mulf %445, %51 : vector<1x1x256xf32>
    %480 = vector.broadcast %479 : vector<1x1x256xf32> to vector<2x4x256xf32>
    %481 = arith.mulf %478, %480 : vector<2x4x256xf32>
    %482 = vector.extract_strided_slice %436 {offsets = [0, 3], sizes = [4, 1], strides = [1, 1]} : vector<4x25xf32> to vector<4x1xf32>
    %483 = vector.shape_cast %482 : vector<4x1xf32> to vector<1x4x1xf32>
    %484 = vector.broadcast %483 : vector<1x4x1xf32> to vector<2x4x256xf32>
    %485 = arith.mulf %481, %484 : vector<2x4x256xf32>
    %486 = arith.addf %477, %485 : vector<2x4x256xf32>
    %c30_i32 = arith.constant 30 : i32
    %487 = tpu.dynamic_rotate %4 by %c30_i32 dim 2 : vector<2x4x256xf32>, i32 -> vector<2x4x256xf32>
    %cst_106 = arith.constant -2.000000e+00 : f32
    %488 = vector.broadcast %cst_106 : f32 to vector<1x1x256xf32>
    %489 = arith.cmpf oge, %2, %488 : vector<1x1x256xf32>
    %cst_107 = arith.constant 1.300000e+01 : f32
    %490 = vector.broadcast %cst_107 : f32 to vector<1x1x256xf32>
    %491 = arith.cmpf ole, %2, %490 : vector<1x1x256xf32>
    %492 = arith.andi %489, %491 : vector<1x1x256xi1>
    %cst_108 = arith.constant 1.000000e+00 : f32
    %cst_109 = arith.constant 0.000000e+00 : f32
    %493 = vector.broadcast %cst_108 : f32 to vector<1x1x256xf32>
    %494 = vector.broadcast %cst_109 : f32 to vector<1x1x256xf32>
    %495 = arith.select %492, %493, %494 : vector<1x1x256xi1>, vector<1x1x256xf32>
    %496 = arith.mulf %445, %495 : vector<1x1x256xf32>
    %497 = vector.broadcast %496 : vector<1x1x256xf32> to vector<2x4x256xf32>
    %498 = arith.mulf %487, %497 : vector<2x4x256xf32>
    %499 = vector.extract_strided_slice %436 {offsets = [0, 4], sizes = [4, 1], strides = [1, 1]} : vector<4x25xf32> to vector<4x1xf32>
    %500 = vector.shape_cast %499 : vector<4x1xf32> to vector<1x4x1xf32>
    %501 = vector.broadcast %500 : vector<1x4x1xf32> to vector<2x4x256xf32>
    %502 = arith.mulf %498, %501 : vector<2x4x256xf32>
    %503 = arith.addf %486, %502 : vector<2x4x256xf32>
    %c18_i32 = arith.constant 18 : i32
    %504 = tpu.dynamic_rotate %4 by %c18_i32 dim 2 : vector<2x4x256xf32>, i32 -> vector<2x4x256xf32>
    %505 = arith.mulf %13, %453 : vector<1x1x256xf32>
    %506 = vector.broadcast %505 : vector<1x1x256xf32> to vector<2x4x256xf32>
    %507 = arith.mulf %504, %506 : vector<2x4x256xf32>
    %508 = vector.extract_strided_slice %436 {offsets = [0, 5], sizes = [4, 1], strides = [1, 1]} : vector<4x25xf32> to vector<4x1xf32>
    %509 = vector.shape_cast %508 : vector<4x1xf32> to vector<1x4x1xf32>
    %510 = vector.broadcast %509 : vector<1x4x1xf32> to vector<2x4x256xf32>
    %511 = arith.mulf %507, %510 : vector<2x4x256xf32>
    %512 = arith.addf %503, %511 : vector<2x4x256xf32>
    %513 = vector.extract_strided_slice %436 {offsets = [0, 6], sizes = [4, 1], strides = [1, 1]} : vector<4x25xf32> to vector<4x1xf32>
    %514 = vector.shape_cast %513 : vector<4x1xf32> to vector<1x4x1xf32>
    %515 = vector.broadcast %514 : vector<1x4x1xf32> to vector<2x4x256xf32>
    %516 = arith.mulf %197, %515 : vector<2x4x256xf32>
    %517 = arith.addf %512, %516 : vector<2x4x256xf32>
    %518 = vector.extract_strided_slice %436 {offsets = [0, 7], sizes = [4, 1], strides = [1, 1]} : vector<4x25xf32> to vector<4x1xf32>
    %519 = vector.shape_cast %518 : vector<4x1xf32> to vector<1x4x1xf32>
    %520 = vector.broadcast %519 : vector<1x4x1xf32> to vector<2x4x256xf32>
    %521 = arith.mulf %204, %520 : vector<2x4x256xf32>
    %522 = arith.addf %517, %521 : vector<2x4x256xf32>
    %523 = vector.extract_strided_slice %436 {offsets = [0, 8], sizes = [4, 1], strides = [1, 1]} : vector<4x25xf32> to vector<4x1xf32>
    %524 = vector.shape_cast %523 : vector<4x1xf32> to vector<1x4x1xf32>
    %525 = vector.broadcast %524 : vector<1x4x1xf32> to vector<2x4x256xf32>
    %526 = arith.mulf %212, %525 : vector<2x4x256xf32>
    %527 = arith.addf %522, %526 : vector<2x4x256xf32>
    %c14_i32 = arith.constant 14 : i32
    %528 = tpu.dynamic_rotate %4 by %c14_i32 dim 2 : vector<2x4x256xf32>, i32 -> vector<2x4x256xf32>
    %529 = arith.mulf %13, %495 : vector<1x1x256xf32>
    %530 = vector.broadcast %529 : vector<1x1x256xf32> to vector<2x4x256xf32>
    %531 = arith.mulf %528, %530 : vector<2x4x256xf32>
    %532 = vector.extract_strided_slice %436 {offsets = [0, 9], sizes = [4, 1], strides = [1, 1]} : vector<4x25xf32> to vector<4x1xf32>
    %533 = vector.shape_cast %532 : vector<4x1xf32> to vector<1x4x1xf32>
    %534 = vector.broadcast %533 : vector<1x4x1xf32> to vector<2x4x256xf32>
    %535 = arith.mulf %531, %534 : vector<2x4x256xf32>
    %536 = arith.addf %527, %535 : vector<2x4x256xf32>
    %c2_i32 = arith.constant 2 : i32
    %537 = tpu.dynamic_rotate %4 by %c2_i32 dim 2 : vector<2x4x256xf32>, i32 -> vector<2x4x256xf32>
    %538 = vector.broadcast %453 : vector<1x1x256xf32> to vector<2x4x256xf32>
    %539 = arith.mulf %537, %538 : vector<2x4x256xf32>
    %540 = vector.extract_strided_slice %436 {offsets = [0, 10], sizes = [4, 1], strides = [1, 1]} : vector<4x25xf32> to vector<4x1xf32>
    %541 = vector.shape_cast %540 : vector<4x1xf32> to vector<1x4x1xf32>
    %542 = vector.broadcast %541 : vector<1x4x1xf32> to vector<2x4x256xf32>
    %543 = arith.mulf %539, %542 : vector<2x4x256xf32>
    %544 = arith.addf %536, %543 : vector<2x4x256xf32>
    %545 = vector.extract_strided_slice %436 {offsets = [0, 11], sizes = [4, 1], strides = [1, 1]} : vector<4x25xf32> to vector<4x1xf32>
    %546 = vector.shape_cast %545 : vector<4x1xf32> to vector<1x4x1xf32>
    %547 = vector.broadcast %546 : vector<1x4x1xf32> to vector<2x4x256xf32>
    %548 = arith.mulf %220, %547 : vector<2x4x256xf32>
    %549 = arith.addf %544, %548 : vector<2x4x256xf32>
    %550 = vector.extract_strided_slice %436 {offsets = [0, 12], sizes = [4, 1], strides = [1, 1]} : vector<4x25xf32> to vector<4x1xf32>
    %551 = vector.shape_cast %550 : vector<4x1xf32> to vector<1x4x1xf32>
    %552 = vector.broadcast %551 : vector<1x4x1xf32> to vector<2x4x256xf32>
    %553 = arith.mulf %4, %552 : vector<2x4x256xf32>
    %554 = arith.addf %549, %553 : vector<2x4x256xf32>
    %555 = vector.extract_strided_slice %436 {offsets = [0, 13], sizes = [4, 1], strides = [1, 1]} : vector<4x25xf32> to vector<4x1xf32>
    %556 = vector.shape_cast %555 : vector<4x1xf32> to vector<1x4x1xf32>
    %557 = vector.broadcast %556 : vector<1x4x1xf32> to vector<2x4x256xf32>
    %558 = arith.mulf %233, %557 : vector<2x4x256xf32>
    %559 = arith.addf %554, %558 : vector<2x4x256xf32>
    %c254_i32 = arith.constant 254 : i32
    %560 = tpu.dynamic_rotate %4 by %c254_i32 dim 2 : vector<2x4x256xf32>, i32 -> vector<2x4x256xf32>
    %561 = vector.broadcast %495 : vector<1x1x256xf32> to vector<2x4x256xf32>
    %562 = arith.mulf %560, %561 : vector<2x4x256xf32>
    %563 = vector.extract_strided_slice %436 {offsets = [0, 14], sizes = [4, 1], strides = [1, 1]} : vector<4x25xf32> to vector<4x1xf32>
    %564 = vector.shape_cast %563 : vector<4x1xf32> to vector<1x4x1xf32>
    %565 = vector.broadcast %564 : vector<1x4x1xf32> to vector<2x4x256xf32>
    %566 = arith.mulf %562, %565 : vector<2x4x256xf32>
    %567 = arith.addf %559, %566 : vector<2x4x256xf32>
    %c242_i32 = arith.constant 242 : i32
    %568 = tpu.dynamic_rotate %4 by %c242_i32 dim 2 : vector<2x4x256xf32>, i32 -> vector<2x4x256xf32>
    %569 = arith.mulf %100, %453 : vector<1x1x256xf32>
    %570 = vector.broadcast %569 : vector<1x1x256xf32> to vector<2x4x256xf32>
    %571 = arith.mulf %568, %570 : vector<2x4x256xf32>
    %572 = vector.extract_strided_slice %436 {offsets = [0, 15], sizes = [4, 1], strides = [1, 1]} : vector<4x25xf32> to vector<4x1xf32>
    %573 = vector.shape_cast %572 : vector<4x1xf32> to vector<1x4x1xf32>
    %574 = vector.broadcast %573 : vector<1x4x1xf32> to vector<2x4x256xf32>
    %575 = arith.mulf %571, %574 : vector<2x4x256xf32>
    %576 = arith.addf %567, %575 : vector<2x4x256xf32>
    %577 = vector.extract_strided_slice %436 {offsets = [0, 16], sizes = [4, 1], strides = [1, 1]} : vector<4x25xf32> to vector<4x1xf32>
    %578 = vector.shape_cast %577 : vector<4x1xf32> to vector<1x4x1xf32>
    %579 = vector.broadcast %578 : vector<1x4x1xf32> to vector<2x4x256xf32>
    %580 = arith.mulf %241, %579 : vector<2x4x256xf32>
    %581 = arith.addf %576, %580 : vector<2x4x256xf32>
    %582 = vector.extract_strided_slice %436 {offsets = [0, 17], sizes = [4, 1], strides = [1, 1]} : vector<4x25xf32> to vector<4x1xf32>
    %583 = vector.shape_cast %582 : vector<4x1xf32> to vector<1x4x1xf32>
    %584 = vector.broadcast %583 : vector<1x4x1xf32> to vector<2x4x256xf32>
    %585 = arith.mulf %249, %584 : vector<2x4x256xf32>
    %586 = arith.addf %581, %585 : vector<2x4x256xf32>
    %587 = vector.extract_strided_slice %436 {offsets = [0, 18], sizes = [4, 1], strides = [1, 1]} : vector<4x25xf32> to vector<4x1xf32>
    %588 = vector.shape_cast %587 : vector<4x1xf32> to vector<1x4x1xf32>
    %589 = vector.broadcast %588 : vector<1x4x1xf32> to vector<2x4x256xf32>
    %590 = arith.mulf %257, %589 : vector<2x4x256xf32>
    %591 = arith.addf %586, %590 : vector<2x4x256xf32>
    %c238_i32 = arith.constant 238 : i32
    %592 = tpu.dynamic_rotate %4 by %c238_i32 dim 2 : vector<2x4x256xf32>, i32 -> vector<2x4x256xf32>
    %593 = arith.mulf %100, %495 : vector<1x1x256xf32>
    %594 = vector.broadcast %593 : vector<1x1x256xf32> to vector<2x4x256xf32>
    %595 = arith.mulf %592, %594 : vector<2x4x256xf32>
    %596 = vector.extract_strided_slice %436 {offsets = [0, 19], sizes = [4, 1], strides = [1, 1]} : vector<4x25xf32> to vector<4x1xf32>
    %597 = vector.shape_cast %596 : vector<4x1xf32> to vector<1x4x1xf32>
    %598 = vector.broadcast %597 : vector<1x4x1xf32> to vector<2x4x256xf32>
    %599 = arith.mulf %595, %598 : vector<2x4x256xf32>
    %600 = arith.addf %591, %599 : vector<2x4x256xf32>
    %c226_i32 = arith.constant 226 : i32
    %601 = tpu.dynamic_rotate %4 by %c226_i32 dim 2 : vector<2x4x256xf32>, i32 -> vector<2x4x256xf32>
    %cst_110 = arith.constant -2.000000e+00 : f32
    %602 = vector.broadcast %cst_110 : f32 to vector<1x1x256xf32>
    %603 = arith.cmpf oge, %1, %602 : vector<1x1x256xf32>
    %cst_111 = arith.constant 1.300000e+01 : f32
    %604 = vector.broadcast %cst_111 : f32 to vector<1x1x256xf32>
    %605 = arith.cmpf ole, %1, %604 : vector<1x1x256xf32>
    %606 = arith.andi %603, %605 : vector<1x1x256xi1>
    %cst_112 = arith.constant 1.000000e+00 : f32
    %cst_113 = arith.constant 0.000000e+00 : f32
    %607 = vector.broadcast %cst_112 : f32 to vector<1x1x256xf32>
    %608 = vector.broadcast %cst_113 : f32 to vector<1x1x256xf32>
    %609 = arith.select %606, %607, %608 : vector<1x1x256xi1>, vector<1x1x256xf32>
    %610 = arith.mulf %609, %453 : vector<1x1x256xf32>
    %611 = vector.broadcast %610 : vector<1x1x256xf32> to vector<2x4x256xf32>
    %612 = arith.mulf %601, %611 : vector<2x4x256xf32>
    %613 = vector.extract_strided_slice %436 {offsets = [0, 20], sizes = [4, 1], strides = [1, 1]} : vector<4x25xf32> to vector<4x1xf32>
    %614 = vector.shape_cast %613 : vector<4x1xf32> to vector<1x4x1xf32>
    %615 = vector.broadcast %614 : vector<1x4x1xf32> to vector<2x4x256xf32>
    %616 = arith.mulf %612, %615 : vector<2x4x256xf32>
    %617 = arith.addf %600, %616 : vector<2x4x256xf32>
    %c225_i32 = arith.constant 225 : i32
    %618 = tpu.dynamic_rotate %4 by %c225_i32 dim 2 : vector<2x4x256xf32>, i32 -> vector<2x4x256xf32>
    %619 = arith.mulf %609, %21 : vector<1x1x256xf32>
    %620 = vector.broadcast %619 : vector<1x1x256xf32> to vector<2x4x256xf32>
    %621 = arith.mulf %618, %620 : vector<2x4x256xf32>
    %622 = vector.extract_strided_slice %436 {offsets = [0, 21], sizes = [4, 1], strides = [1, 1]} : vector<4x25xf32> to vector<4x1xf32>
    %623 = vector.shape_cast %622 : vector<4x1xf32> to vector<1x4x1xf32>
    %624 = vector.broadcast %623 : vector<1x4x1xf32> to vector<2x4x256xf32>
    %625 = arith.mulf %621, %624 : vector<2x4x256xf32>
    %626 = arith.addf %617, %625 : vector<2x4x256xf32>
    %c224_i32 = arith.constant 224 : i32
    %627 = tpu.dynamic_rotate %4 by %c224_i32 dim 2 : vector<2x4x256xf32>, i32 -> vector<2x4x256xf32>
    %628 = vector.broadcast %609 : vector<1x1x256xf32> to vector<2x4x256xf32>
    %629 = arith.mulf %627, %628 : vector<2x4x256xf32>
    %630 = vector.extract_strided_slice %436 {offsets = [0, 22], sizes = [4, 1], strides = [1, 1]} : vector<4x25xf32> to vector<4x1xf32>
    %631 = vector.shape_cast %630 : vector<4x1xf32> to vector<1x4x1xf32>
    %632 = vector.broadcast %631 : vector<1x4x1xf32> to vector<2x4x256xf32>
    %633 = arith.mulf %629, %632 : vector<2x4x256xf32>
    %634 = arith.addf %626, %633 : vector<2x4x256xf32>
    %c223_i32 = arith.constant 223 : i32
    %635 = tpu.dynamic_rotate %4 by %c223_i32 dim 2 : vector<2x4x256xf32>, i32 -> vector<2x4x256xf32>
    %636 = arith.mulf %609, %51 : vector<1x1x256xf32>
    %637 = vector.broadcast %636 : vector<1x1x256xf32> to vector<2x4x256xf32>
    %638 = arith.mulf %635, %637 : vector<2x4x256xf32>
    %639 = vector.extract_strided_slice %436 {offsets = [0, 23], sizes = [4, 1], strides = [1, 1]} : vector<4x25xf32> to vector<4x1xf32>
    %640 = vector.shape_cast %639 : vector<4x1xf32> to vector<1x4x1xf32>
    %641 = vector.broadcast %640 : vector<1x4x1xf32> to vector<2x4x256xf32>
    %642 = arith.mulf %638, %641 : vector<2x4x256xf32>
    %643 = arith.addf %634, %642 : vector<2x4x256xf32>
    %c222_i32 = arith.constant 222 : i32
    %644 = tpu.dynamic_rotate %4 by %c222_i32 dim 2 : vector<2x4x256xf32>, i32 -> vector<2x4x256xf32>
    %645 = arith.mulf %609, %495 : vector<1x1x256xf32>
    %646 = vector.broadcast %645 : vector<1x1x256xf32> to vector<2x4x256xf32>
    %647 = arith.mulf %644, %646 : vector<2x4x256xf32>
    %648 = vector.extract_strided_slice %436 {offsets = [0, 24], sizes = [4, 1], strides = [1, 1]} : vector<4x25xf32> to vector<4x1xf32>
    %649 = vector.shape_cast %648 : vector<4x1xf32> to vector<1x4x1xf32>
    %650 = vector.broadcast %649 : vector<1x4x1xf32> to vector<2x4x256xf32>
    %651 = arith.mulf %647, %650 : vector<2x4x256xf32>
    %652 = arith.addf %643, %651 : vector<2x4x256xf32>
    %c0_114 = arith.constant 0 : index
    %c0_115 = arith.constant 0 : index
    %653 = vector.load %arg9[%c0_114, %c0_115] : memref<4x4xf32, #tpu.memory_space<vmem>>, vector<4x4xf32>
    %654 = vector.extract_strided_slice %652 {offsets = [0, 0, 0], sizes = [2, 1, 256], strides = [1, 1, 1]} : vector<2x4x256xf32> to vector<2x1x256xf32>
    %655 = vector.extract_strided_slice %653 {offsets = [0, 0], sizes = [4, 1], strides = [1, 1]} : vector<4x4xf32> to vector<4x1xf32>
    %656 = vector.shape_cast %655 : vector<4x1xf32> to vector<1x4x1xf32>
    %657 = vector.broadcast %654 : vector<2x1x256xf32> to vector<2x4x256xf32>
    %658 = vector.broadcast %656 : vector<1x4x1xf32> to vector<2x4x256xf32>
    %659 = arith.mulf %657, %658 : vector<2x4x256xf32>
    %660 = vector.extract_strided_slice %652 {offsets = [0, 1, 0], sizes = [2, 1, 256], strides = [1, 1, 1]} : vector<2x4x256xf32> to vector<2x1x256xf32>
    %661 = vector.extract_strided_slice %653 {offsets = [0, 1], sizes = [4, 1], strides = [1, 1]} : vector<4x4xf32> to vector<4x1xf32>
    %662 = vector.shape_cast %661 : vector<4x1xf32> to vector<1x4x1xf32>
    %663 = vector.broadcast %660 : vector<2x1x256xf32> to vector<2x4x256xf32>
    %664 = vector.broadcast %662 : vector<1x4x1xf32> to vector<2x4x256xf32>
    %665 = arith.mulf %663, %664 : vector<2x4x256xf32>
    %666 = arith.addf %659, %665 : vector<2x4x256xf32>
    %667 = vector.extract_strided_slice %652 {offsets = [0, 2, 0], sizes = [2, 1, 256], strides = [1, 1, 1]} : vector<2x4x256xf32> to vector<2x1x256xf32>
    %668 = vector.extract_strided_slice %653 {offsets = [0, 2], sizes = [4, 1], strides = [1, 1]} : vector<4x4xf32> to vector<4x1xf32>
    %669 = vector.shape_cast %668 : vector<4x1xf32> to vector<1x4x1xf32>
    %670 = vector.broadcast %667 : vector<2x1x256xf32> to vector<2x4x256xf32>
    %671 = vector.broadcast %669 : vector<1x4x1xf32> to vector<2x4x256xf32>
    %672 = arith.mulf %670, %671 : vector<2x4x256xf32>
    %673 = arith.addf %666, %672 : vector<2x4x256xf32>
    %674 = vector.extract_strided_slice %652 {offsets = [0, 3, 0], sizes = [2, 1, 256], strides = [1, 1, 1]} : vector<2x4x256xf32> to vector<2x1x256xf32>
    %675 = vector.extract_strided_slice %653 {offsets = [0, 3], sizes = [4, 1], strides = [1, 1]} : vector<4x4xf32> to vector<4x1xf32>
    %676 = vector.shape_cast %675 : vector<4x1xf32> to vector<1x4x1xf32>
    %677 = vector.broadcast %674 : vector<2x1x256xf32> to vector<2x4x256xf32>
    %678 = vector.broadcast %676 : vector<1x4x1xf32> to vector<2x4x256xf32>
    %679 = arith.mulf %677, %678 : vector<2x4x256xf32>
    %680 = arith.addf %673, %679 : vector<2x4x256xf32>
    %cst_116 = arith.constant dense<0.000000e+00> : vector<2x4xf32>
    %681 = vector.multi_reduction <add>, %680, %cst_116 [2] : vector<2x4x256xf32> to vector<2x4xf32>
    %682 = vector.shape_cast %681 : vector<2x4xf32> to vector<2x4x1xf32>
    %cst_117 = arith.constant dense<0.000000e+00> : vector<4x1xf32>
    %683 = vector.multi_reduction <add>, %682, %cst_117 [0] : vector<2x4x1xf32> to vector<4x1xf32>
    %684 = vector.shape_cast %683 : vector<4x1xf32> to vector<1x4x1xf32>
    %cst_118 = arith.constant 0.001953125 : f32
    %685 = vector.broadcast %cst_118 : f32 to vector<1x4x1xf32>
    %686 = arith.mulf %684, %685 : vector<1x4x1xf32>
    %687 = vector.broadcast %686 : vector<1x4x1xf32> to vector<2x4x256xf32>
    %688 = arith.subf %680, %687 : vector<2x4x256xf32>
    %689 = arith.mulf %688, %688 : vector<2x4x256xf32>
    %cst_119 = arith.constant dense<0.000000e+00> : vector<2x4xf32>
    %690 = vector.multi_reduction <add>, %689, %cst_119 [2] : vector<2x4x256xf32> to vector<2x4xf32>
    %691 = vector.shape_cast %690 : vector<2x4xf32> to vector<2x4x1xf32>
    %cst_120 = arith.constant dense<0.000000e+00> : vector<4x1xf32>
    %692 = vector.multi_reduction <add>, %691, %cst_120 [0] : vector<2x4x1xf32> to vector<4x1xf32>
    %693 = vector.shape_cast %692 : vector<4x1xf32> to vector<1x4x1xf32>
    %cst_121 = arith.constant 0.001953125 : f32
    %694 = vector.broadcast %cst_121 : f32 to vector<1x4x1xf32>
    %695 = arith.mulf %693, %694 : vector<1x4x1xf32>
    %cst_122 = arith.constant 9.99999974E-6 : f32
    %696 = vector.broadcast %cst_122 : f32 to vector<1x4x1xf32>
    %697 = arith.addf %695, %696 : vector<1x4x1xf32>
    %698 = math.rsqrt %697 : vector<1x4x1xf32>
    %cst_123 = arith.constant 1.000000e+00 : f32
    %699 = vector.broadcast %cst_123 : f32 to vector<1x4x1xf32>
    %700 = arith.mulf %699, %698 : vector<1x4x1xf32>
    %701 = vector.broadcast %700 : vector<1x4x1xf32> to vector<2x4x256xf32>
    %702 = arith.mulf %688, %701 : vector<2x4x256xf32>
    %cst_124 = arith.constant 0.000000e+00 : f32
    %703 = vector.broadcast %cst_124 : f32 to vector<2x4x256xf32>
    %704 = arith.maximumf %702, %703 : vector<2x4x256xf32>
    %c0_125 = arith.constant 0 : index
    %c0_126 = arith.constant 0 : index
    %705 = vector.load %arg10[%c0_125, %c0_126] : memref<4x25xf32, #tpu.memory_space<vmem>>, vector<4x25xf32>
    %c34_i32_127 = arith.constant 34 : i32
    %706 = tpu.dynamic_rotate %704 by %c34_i32_127 dim 2 : vector<2x4x256xf32>, i32 -> vector<2x4x256xf32>
    %707 = vector.broadcast %454 : vector<1x1x256xf32> to vector<2x4x256xf32>
    %708 = arith.mulf %706, %707 : vector<2x4x256xf32>
    %709 = vector.extract_strided_slice %705 {offsets = [0, 0], sizes = [4, 1], strides = [1, 1]} : vector<4x25xf32> to vector<4x1xf32>
    %710 = vector.shape_cast %709 : vector<4x1xf32> to vector<1x4x1xf32>
    %711 = vector.broadcast %710 : vector<1x4x1xf32> to vector<2x4x256xf32>
    %712 = arith.mulf %708, %711 : vector<2x4x256xf32>
    %c33_i32_128 = arith.constant 33 : i32
    %713 = tpu.dynamic_rotate %704 by %c33_i32_128 dim 2 : vector<2x4x256xf32>, i32 -> vector<2x4x256xf32>
    %714 = vector.broadcast %462 : vector<1x1x256xf32> to vector<2x4x256xf32>
    %715 = arith.mulf %713, %714 : vector<2x4x256xf32>
    %716 = vector.extract_strided_slice %705 {offsets = [0, 1], sizes = [4, 1], strides = [1, 1]} : vector<4x25xf32> to vector<4x1xf32>
    %717 = vector.shape_cast %716 : vector<4x1xf32> to vector<1x4x1xf32>
    %718 = vector.broadcast %717 : vector<1x4x1xf32> to vector<2x4x256xf32>
    %719 = arith.mulf %715, %718 : vector<2x4x256xf32>
    %720 = arith.addf %712, %719 : vector<2x4x256xf32>
    %c32_i32_129 = arith.constant 32 : i32
    %721 = tpu.dynamic_rotate %704 by %c32_i32_129 dim 2 : vector<2x4x256xf32>, i32 -> vector<2x4x256xf32>
    %722 = vector.broadcast %445 : vector<1x1x256xf32> to vector<2x4x256xf32>
    %723 = arith.mulf %721, %722 : vector<2x4x256xf32>
    %724 = vector.extract_strided_slice %705 {offsets = [0, 2], sizes = [4, 1], strides = [1, 1]} : vector<4x25xf32> to vector<4x1xf32>
    %725 = vector.shape_cast %724 : vector<4x1xf32> to vector<1x4x1xf32>
    %726 = vector.broadcast %725 : vector<1x4x1xf32> to vector<2x4x256xf32>
    %727 = arith.mulf %723, %726 : vector<2x4x256xf32>
    %728 = arith.addf %720, %727 : vector<2x4x256xf32>
    %c31_i32_130 = arith.constant 31 : i32
    %729 = tpu.dynamic_rotate %704 by %c31_i32_130 dim 2 : vector<2x4x256xf32>, i32 -> vector<2x4x256xf32>
    %730 = vector.broadcast %479 : vector<1x1x256xf32> to vector<2x4x256xf32>
    %731 = arith.mulf %729, %730 : vector<2x4x256xf32>
    %732 = vector.extract_strided_slice %705 {offsets = [0, 3], sizes = [4, 1], strides = [1, 1]} : vector<4x25xf32> to vector<4x1xf32>
    %733 = vector.shape_cast %732 : vector<4x1xf32> to vector<1x4x1xf32>
    %734 = vector.broadcast %733 : vector<1x4x1xf32> to vector<2x4x256xf32>
    %735 = arith.mulf %731, %734 : vector<2x4x256xf32>
    %736 = arith.addf %728, %735 : vector<2x4x256xf32>
    %c30_i32_131 = arith.constant 30 : i32
    %737 = tpu.dynamic_rotate %704 by %c30_i32_131 dim 2 : vector<2x4x256xf32>, i32 -> vector<2x4x256xf32>
    %738 = vector.broadcast %496 : vector<1x1x256xf32> to vector<2x4x256xf32>
    %739 = arith.mulf %737, %738 : vector<2x4x256xf32>
    %740 = vector.extract_strided_slice %705 {offsets = [0, 4], sizes = [4, 1], strides = [1, 1]} : vector<4x25xf32> to vector<4x1xf32>
    %741 = vector.shape_cast %740 : vector<4x1xf32> to vector<1x4x1xf32>
    %742 = vector.broadcast %741 : vector<1x4x1xf32> to vector<2x4x256xf32>
    %743 = arith.mulf %739, %742 : vector<2x4x256xf32>
    %744 = arith.addf %736, %743 : vector<2x4x256xf32>
    %c18_i32_132 = arith.constant 18 : i32
    %745 = tpu.dynamic_rotate %704 by %c18_i32_132 dim 2 : vector<2x4x256xf32>, i32 -> vector<2x4x256xf32>
    %746 = vector.broadcast %505 : vector<1x1x256xf32> to vector<2x4x256xf32>
    %747 = arith.mulf %745, %746 : vector<2x4x256xf32>
    %748 = vector.extract_strided_slice %705 {offsets = [0, 5], sizes = [4, 1], strides = [1, 1]} : vector<4x25xf32> to vector<4x1xf32>
    %749 = vector.shape_cast %748 : vector<4x1xf32> to vector<1x4x1xf32>
    %750 = vector.broadcast %749 : vector<1x4x1xf32> to vector<2x4x256xf32>
    %751 = arith.mulf %747, %750 : vector<2x4x256xf32>
    %752 = arith.addf %744, %751 : vector<2x4x256xf32>
    %c17_i32_133 = arith.constant 17 : i32
    %753 = tpu.dynamic_rotate %704 by %c17_i32_133 dim 2 : vector<2x4x256xf32>, i32 -> vector<2x4x256xf32>
    %754 = vector.broadcast %22 : vector<1x1x256xf32> to vector<2x4x256xf32>
    %755 = arith.mulf %753, %754 : vector<2x4x256xf32>
    %756 = vector.extract_strided_slice %705 {offsets = [0, 6], sizes = [4, 1], strides = [1, 1]} : vector<4x25xf32> to vector<4x1xf32>
    %757 = vector.shape_cast %756 : vector<4x1xf32> to vector<1x4x1xf32>
    %758 = vector.broadcast %757 : vector<1x4x1xf32> to vector<2x4x256xf32>
    %759 = arith.mulf %755, %758 : vector<2x4x256xf32>
    %760 = arith.addf %752, %759 : vector<2x4x256xf32>
    %c16_i32_134 = arith.constant 16 : i32
    %761 = tpu.dynamic_rotate %704 by %c16_i32_134 dim 2 : vector<2x4x256xf32>, i32 -> vector<2x4x256xf32>
    %762 = vector.broadcast %13 : vector<1x1x256xf32> to vector<2x4x256xf32>
    %763 = arith.mulf %761, %762 : vector<2x4x256xf32>
    %764 = vector.extract_strided_slice %705 {offsets = [0, 7], sizes = [4, 1], strides = [1, 1]} : vector<4x25xf32> to vector<4x1xf32>
    %765 = vector.shape_cast %764 : vector<4x1xf32> to vector<1x4x1xf32>
    %766 = vector.broadcast %765 : vector<1x4x1xf32> to vector<2x4x256xf32>
    %767 = arith.mulf %763, %766 : vector<2x4x256xf32>
    %768 = arith.addf %760, %767 : vector<2x4x256xf32>
    %c15_i32_135 = arith.constant 15 : i32
    %769 = tpu.dynamic_rotate %704 by %c15_i32_135 dim 2 : vector<2x4x256xf32>, i32 -> vector<2x4x256xf32>
    %770 = vector.broadcast %52 : vector<1x1x256xf32> to vector<2x4x256xf32>
    %771 = arith.mulf %769, %770 : vector<2x4x256xf32>
    %772 = vector.extract_strided_slice %705 {offsets = [0, 8], sizes = [4, 1], strides = [1, 1]} : vector<4x25xf32> to vector<4x1xf32>
    %773 = vector.shape_cast %772 : vector<4x1xf32> to vector<1x4x1xf32>
    %774 = vector.broadcast %773 : vector<1x4x1xf32> to vector<2x4x256xf32>
    %775 = arith.mulf %771, %774 : vector<2x4x256xf32>
    %776 = arith.addf %768, %775 : vector<2x4x256xf32>
    %c14_i32_136 = arith.constant 14 : i32
    %777 = tpu.dynamic_rotate %704 by %c14_i32_136 dim 2 : vector<2x4x256xf32>, i32 -> vector<2x4x256xf32>
    %778 = vector.broadcast %529 : vector<1x1x256xf32> to vector<2x4x256xf32>
    %779 = arith.mulf %777, %778 : vector<2x4x256xf32>
    %780 = vector.extract_strided_slice %705 {offsets = [0, 9], sizes = [4, 1], strides = [1, 1]} : vector<4x25xf32> to vector<4x1xf32>
    %781 = vector.shape_cast %780 : vector<4x1xf32> to vector<1x4x1xf32>
    %782 = vector.broadcast %781 : vector<1x4x1xf32> to vector<2x4x256xf32>
    %783 = arith.mulf %779, %782 : vector<2x4x256xf32>
    %784 = arith.addf %776, %783 : vector<2x4x256xf32>
    %c2_i32_137 = arith.constant 2 : i32
    %785 = tpu.dynamic_rotate %704 by %c2_i32_137 dim 2 : vector<2x4x256xf32>, i32 -> vector<2x4x256xf32>
    %786 = vector.broadcast %453 : vector<1x1x256xf32> to vector<2x4x256xf32>
    %787 = arith.mulf %785, %786 : vector<2x4x256xf32>
    %788 = vector.extract_strided_slice %705 {offsets = [0, 10], sizes = [4, 1], strides = [1, 1]} : vector<4x25xf32> to vector<4x1xf32>
    %789 = vector.shape_cast %788 : vector<4x1xf32> to vector<1x4x1xf32>
    %790 = vector.broadcast %789 : vector<1x4x1xf32> to vector<2x4x256xf32>
    %791 = arith.mulf %787, %790 : vector<2x4x256xf32>
    %792 = arith.addf %784, %791 : vector<2x4x256xf32>
    %c1_i32_138 = arith.constant 1 : i32
    %793 = tpu.dynamic_rotate %704 by %c1_i32_138 dim 2 : vector<2x4x256xf32>, i32 -> vector<2x4x256xf32>
    %794 = vector.broadcast %21 : vector<1x1x256xf32> to vector<2x4x256xf32>
    %795 = arith.mulf %793, %794 : vector<2x4x256xf32>
    %796 = vector.extract_strided_slice %705 {offsets = [0, 11], sizes = [4, 1], strides = [1, 1]} : vector<4x25xf32> to vector<4x1xf32>
    %797 = vector.shape_cast %796 : vector<4x1xf32> to vector<1x4x1xf32>
    %798 = vector.broadcast %797 : vector<1x4x1xf32> to vector<2x4x256xf32>
    %799 = arith.mulf %795, %798 : vector<2x4x256xf32>
    %800 = arith.addf %792, %799 : vector<2x4x256xf32>
    %801 = vector.extract_strided_slice %705 {offsets = [0, 12], sizes = [4, 1], strides = [1, 1]} : vector<4x25xf32> to vector<4x1xf32>
    %802 = vector.shape_cast %801 : vector<4x1xf32> to vector<1x4x1xf32>
    %803 = vector.broadcast %802 : vector<1x4x1xf32> to vector<2x4x256xf32>
    %804 = arith.mulf %704, %803 : vector<2x4x256xf32>
    %805 = arith.addf %800, %804 : vector<2x4x256xf32>
    %c255_i32_139 = arith.constant 255 : i32
    %806 = tpu.dynamic_rotate %704 by %c255_i32_139 dim 2 : vector<2x4x256xf32>, i32 -> vector<2x4x256xf32>
    %807 = vector.broadcast %51 : vector<1x1x256xf32> to vector<2x4x256xf32>
    %808 = arith.mulf %806, %807 : vector<2x4x256xf32>
    %809 = vector.extract_strided_slice %705 {offsets = [0, 13], sizes = [4, 1], strides = [1, 1]} : vector<4x25xf32> to vector<4x1xf32>
    %810 = vector.shape_cast %809 : vector<4x1xf32> to vector<1x4x1xf32>
    %811 = vector.broadcast %810 : vector<1x4x1xf32> to vector<2x4x256xf32>
    %812 = arith.mulf %808, %811 : vector<2x4x256xf32>
    %813 = arith.addf %805, %812 : vector<2x4x256xf32>
    %c254_i32_140 = arith.constant 254 : i32
    %814 = tpu.dynamic_rotate %704 by %c254_i32_140 dim 2 : vector<2x4x256xf32>, i32 -> vector<2x4x256xf32>
    %815 = vector.broadcast %495 : vector<1x1x256xf32> to vector<2x4x256xf32>
    %816 = arith.mulf %814, %815 : vector<2x4x256xf32>
    %817 = vector.extract_strided_slice %705 {offsets = [0, 14], sizes = [4, 1], strides = [1, 1]} : vector<4x25xf32> to vector<4x1xf32>
    %818 = vector.shape_cast %817 : vector<4x1xf32> to vector<1x4x1xf32>
    %819 = vector.broadcast %818 : vector<1x4x1xf32> to vector<2x4x256xf32>
    %820 = arith.mulf %816, %819 : vector<2x4x256xf32>
    %821 = arith.addf %813, %820 : vector<2x4x256xf32>
    %c242_i32_141 = arith.constant 242 : i32
    %822 = tpu.dynamic_rotate %704 by %c242_i32_141 dim 2 : vector<2x4x256xf32>, i32 -> vector<2x4x256xf32>
    %823 = vector.broadcast %569 : vector<1x1x256xf32> to vector<2x4x256xf32>
    %824 = arith.mulf %822, %823 : vector<2x4x256xf32>
    %825 = vector.extract_strided_slice %705 {offsets = [0, 15], sizes = [4, 1], strides = [1, 1]} : vector<4x25xf32> to vector<4x1xf32>
    %826 = vector.shape_cast %825 : vector<4x1xf32> to vector<1x4x1xf32>
    %827 = vector.broadcast %826 : vector<1x4x1xf32> to vector<2x4x256xf32>
    %828 = arith.mulf %824, %827 : vector<2x4x256xf32>
    %829 = arith.addf %821, %828 : vector<2x4x256xf32>
    %c241_i32_142 = arith.constant 241 : i32
    %830 = tpu.dynamic_rotate %704 by %c241_i32_142 dim 2 : vector<2x4x256xf32>, i32 -> vector<2x4x256xf32>
    %831 = vector.broadcast %101 : vector<1x1x256xf32> to vector<2x4x256xf32>
    %832 = arith.mulf %830, %831 : vector<2x4x256xf32>
    %833 = vector.extract_strided_slice %705 {offsets = [0, 16], sizes = [4, 1], strides = [1, 1]} : vector<4x25xf32> to vector<4x1xf32>
    %834 = vector.shape_cast %833 : vector<4x1xf32> to vector<1x4x1xf32>
    %835 = vector.broadcast %834 : vector<1x4x1xf32> to vector<2x4x256xf32>
    %836 = arith.mulf %832, %835 : vector<2x4x256xf32>
    %837 = arith.addf %829, %836 : vector<2x4x256xf32>
    %c240_i32_143 = arith.constant 240 : i32
    %838 = tpu.dynamic_rotate %704 by %c240_i32_143 dim 2 : vector<2x4x256xf32>, i32 -> vector<2x4x256xf32>
    %839 = vector.broadcast %100 : vector<1x1x256xf32> to vector<2x4x256xf32>
    %840 = arith.mulf %838, %839 : vector<2x4x256xf32>
    %841 = vector.extract_strided_slice %705 {offsets = [0, 17], sizes = [4, 1], strides = [1, 1]} : vector<4x25xf32> to vector<4x1xf32>
    %842 = vector.shape_cast %841 : vector<4x1xf32> to vector<1x4x1xf32>
    %843 = vector.broadcast %842 : vector<1x4x1xf32> to vector<2x4x256xf32>
    %844 = arith.mulf %840, %843 : vector<2x4x256xf32>
    %845 = arith.addf %837, %844 : vector<2x4x256xf32>
    %c239_i32_144 = arith.constant 239 : i32
    %846 = tpu.dynamic_rotate %704 by %c239_i32_144 dim 2 : vector<2x4x256xf32>, i32 -> vector<2x4x256xf32>
    %847 = vector.broadcast %126 : vector<1x1x256xf32> to vector<2x4x256xf32>
    %848 = arith.mulf %846, %847 : vector<2x4x256xf32>
    %849 = vector.extract_strided_slice %705 {offsets = [0, 18], sizes = [4, 1], strides = [1, 1]} : vector<4x25xf32> to vector<4x1xf32>
    %850 = vector.shape_cast %849 : vector<4x1xf32> to vector<1x4x1xf32>
    %851 = vector.broadcast %850 : vector<1x4x1xf32> to vector<2x4x256xf32>
    %852 = arith.mulf %848, %851 : vector<2x4x256xf32>
    %853 = arith.addf %845, %852 : vector<2x4x256xf32>
    %c238_i32_145 = arith.constant 238 : i32
    %854 = tpu.dynamic_rotate %704 by %c238_i32_145 dim 2 : vector<2x4x256xf32>, i32 -> vector<2x4x256xf32>
    %855 = vector.broadcast %593 : vector<1x1x256xf32> to vector<2x4x256xf32>
    %856 = arith.mulf %854, %855 : vector<2x4x256xf32>
    %857 = vector.extract_strided_slice %705 {offsets = [0, 19], sizes = [4, 1], strides = [1, 1]} : vector<4x25xf32> to vector<4x1xf32>
    %858 = vector.shape_cast %857 : vector<4x1xf32> to vector<1x4x1xf32>
    %859 = vector.broadcast %858 : vector<1x4x1xf32> to vector<2x4x256xf32>
    %860 = arith.mulf %856, %859 : vector<2x4x256xf32>
    %861 = arith.addf %853, %860 : vector<2x4x256xf32>
    %c226_i32_146 = arith.constant 226 : i32
    %862 = tpu.dynamic_rotate %704 by %c226_i32_146 dim 2 : vector<2x4x256xf32>, i32 -> vector<2x4x256xf32>
    %863 = vector.broadcast %610 : vector<1x1x256xf32> to vector<2x4x256xf32>
    %864 = arith.mulf %862, %863 : vector<2x4x256xf32>
    %865 = vector.extract_strided_slice %705 {offsets = [0, 20], sizes = [4, 1], strides = [1, 1]} : vector<4x25xf32> to vector<4x1xf32>
    %866 = vector.shape_cast %865 : vector<4x1xf32> to vector<1x4x1xf32>
    %867 = vector.broadcast %866 : vector<1x4x1xf32> to vector<2x4x256xf32>
    %868 = arith.mulf %864, %867 : vector<2x4x256xf32>
    %869 = arith.addf %861, %868 : vector<2x4x256xf32>
    %c225_i32_147 = arith.constant 225 : i32
    %870 = tpu.dynamic_rotate %704 by %c225_i32_147 dim 2 : vector<2x4x256xf32>, i32 -> vector<2x4x256xf32>
    %871 = vector.broadcast %619 : vector<1x1x256xf32> to vector<2x4x256xf32>
    %872 = arith.mulf %870, %871 : vector<2x4x256xf32>
    %873 = vector.extract_strided_slice %705 {offsets = [0, 21], sizes = [4, 1], strides = [1, 1]} : vector<4x25xf32> to vector<4x1xf32>
    %874 = vector.shape_cast %873 : vector<4x1xf32> to vector<1x4x1xf32>
    %875 = vector.broadcast %874 : vector<1x4x1xf32> to vector<2x4x256xf32>
    %876 = arith.mulf %872, %875 : vector<2x4x256xf32>
    %877 = arith.addf %869, %876 : vector<2x4x256xf32>
    %c224_i32_148 = arith.constant 224 : i32
    %878 = tpu.dynamic_rotate %704 by %c224_i32_148 dim 2 : vector<2x4x256xf32>, i32 -> vector<2x4x256xf32>
    %879 = vector.broadcast %609 : vector<1x1x256xf32> to vector<2x4x256xf32>
    %880 = arith.mulf %878, %879 : vector<2x4x256xf32>
    %881 = vector.extract_strided_slice %705 {offsets = [0, 22], sizes = [4, 1], strides = [1, 1]} : vector<4x25xf32> to vector<4x1xf32>
    %882 = vector.shape_cast %881 : vector<4x1xf32> to vector<1x4x1xf32>
    %883 = vector.broadcast %882 : vector<1x4x1xf32> to vector<2x4x256xf32>
    %884 = arith.mulf %880, %883 : vector<2x4x256xf32>
    %885 = arith.addf %877, %884 : vector<2x4x256xf32>
    %c223_i32_149 = arith.constant 223 : i32
    %886 = tpu.dynamic_rotate %704 by %c223_i32_149 dim 2 : vector<2x4x256xf32>, i32 -> vector<2x4x256xf32>
    %887 = vector.broadcast %636 : vector<1x1x256xf32> to vector<2x4x256xf32>
    %888 = arith.mulf %886, %887 : vector<2x4x256xf32>
    %889 = vector.extract_strided_slice %705 {offsets = [0, 23], sizes = [4, 1], strides = [1, 1]} : vector<4x25xf32> to vector<4x1xf32>
    %890 = vector.shape_cast %889 : vector<4x1xf32> to vector<1x4x1xf32>
    %891 = vector.broadcast %890 : vector<1x4x1xf32> to vector<2x4x256xf32>
    %892 = arith.mulf %888, %891 : vector<2x4x256xf32>
    %893 = arith.addf %885, %892 : vector<2x4x256xf32>
    %c222_i32_150 = arith.constant 222 : i32
    %894 = tpu.dynamic_rotate %704 by %c222_i32_150 dim 2 : vector<2x4x256xf32>, i32 -> vector<2x4x256xf32>
    %895 = vector.broadcast %645 : vector<1x1x256xf32> to vector<2x4x256xf32>
    %896 = arith.mulf %894, %895 : vector<2x4x256xf32>
    %897 = vector.extract_strided_slice %705 {offsets = [0, 24], sizes = [4, 1], strides = [1, 1]} : vector<4x25xf32> to vector<4x1xf32>
    %898 = vector.shape_cast %897 : vector<4x1xf32> to vector<1x4x1xf32>
    %899 = vector.broadcast %898 : vector<1x4x1xf32> to vector<2x4x256xf32>
    %900 = arith.mulf %896, %899 : vector<2x4x256xf32>
    %901 = arith.addf %893, %900 : vector<2x4x256xf32>
    %c0_151 = arith.constant 0 : index
    %c0_152 = arith.constant 0 : index
    %902 = vector.load %arg11[%c0_151, %c0_152] : memref<4x4xf32, #tpu.memory_space<vmem>>, vector<4x4xf32>
    %903 = vector.extract_strided_slice %901 {offsets = [0, 0, 0], sizes = [2, 1, 256], strides = [1, 1, 1]} : vector<2x4x256xf32> to vector<2x1x256xf32>
    %904 = vector.extract_strided_slice %902 {offsets = [0, 0], sizes = [4, 1], strides = [1, 1]} : vector<4x4xf32> to vector<4x1xf32>
    %905 = vector.shape_cast %904 : vector<4x1xf32> to vector<1x4x1xf32>
    %906 = vector.broadcast %903 : vector<2x1x256xf32> to vector<2x4x256xf32>
    %907 = vector.broadcast %905 : vector<1x4x1xf32> to vector<2x4x256xf32>
    %908 = arith.mulf %906, %907 : vector<2x4x256xf32>
    %909 = vector.extract_strided_slice %901 {offsets = [0, 1, 0], sizes = [2, 1, 256], strides = [1, 1, 1]} : vector<2x4x256xf32> to vector<2x1x256xf32>
    %910 = vector.extract_strided_slice %902 {offsets = [0, 1], sizes = [4, 1], strides = [1, 1]} : vector<4x4xf32> to vector<4x1xf32>
    %911 = vector.shape_cast %910 : vector<4x1xf32> to vector<1x4x1xf32>
    %912 = vector.broadcast %909 : vector<2x1x256xf32> to vector<2x4x256xf32>
    %913 = vector.broadcast %911 : vector<1x4x1xf32> to vector<2x4x256xf32>
    %914 = arith.mulf %912, %913 : vector<2x4x256xf32>
    %915 = arith.addf %908, %914 : vector<2x4x256xf32>
    %916 = vector.extract_strided_slice %901 {offsets = [0, 2, 0], sizes = [2, 1, 256], strides = [1, 1, 1]} : vector<2x4x256xf32> to vector<2x1x256xf32>
    %917 = vector.extract_strided_slice %902 {offsets = [0, 2], sizes = [4, 1], strides = [1, 1]} : vector<4x4xf32> to vector<4x1xf32>
    %918 = vector.shape_cast %917 : vector<4x1xf32> to vector<1x4x1xf32>
    %919 = vector.broadcast %916 : vector<2x1x256xf32> to vector<2x4x256xf32>
    %920 = vector.broadcast %918 : vector<1x4x1xf32> to vector<2x4x256xf32>
    %921 = arith.mulf %919, %920 : vector<2x4x256xf32>
    %922 = arith.addf %915, %921 : vector<2x4x256xf32>
    %923 = vector.extract_strided_slice %901 {offsets = [0, 3, 0], sizes = [2, 1, 256], strides = [1, 1, 1]} : vector<2x4x256xf32> to vector<2x1x256xf32>
    %924 = vector.extract_strided_slice %902 {offsets = [0, 3], sizes = [4, 1], strides = [1, 1]} : vector<4x4xf32> to vector<4x1xf32>
    %925 = vector.shape_cast %924 : vector<4x1xf32> to vector<1x4x1xf32>
    %926 = vector.broadcast %923 : vector<2x1x256xf32> to vector<2x4x256xf32>
    %927 = vector.broadcast %925 : vector<1x4x1xf32> to vector<2x4x256xf32>
    %928 = arith.mulf %926, %927 : vector<2x4x256xf32>
    %929 = arith.addf %922, %928 : vector<2x4x256xf32>
    %cst_153 = arith.constant dense<0.000000e+00> : vector<2x4xf32>
    %930 = vector.multi_reduction <add>, %929, %cst_153 [2] : vector<2x4x256xf32> to vector<2x4xf32>
    %931 = vector.shape_cast %930 : vector<2x4xf32> to vector<2x4x1xf32>
    %cst_154 = arith.constant dense<0.000000e+00> : vector<4x1xf32>
    %932 = vector.multi_reduction <add>, %931, %cst_154 [0] : vector<2x4x1xf32> to vector<4x1xf32>
    %933 = vector.shape_cast %932 : vector<4x1xf32> to vector<1x4x1xf32>
    %cst_155 = arith.constant 0.001953125 : f32
    %934 = vector.broadcast %cst_155 : f32 to vector<1x4x1xf32>
    %935 = arith.mulf %933, %934 : vector<1x4x1xf32>
    %936 = vector.broadcast %935 : vector<1x4x1xf32> to vector<2x4x256xf32>
    %937 = arith.subf %929, %936 : vector<2x4x256xf32>
    %938 = arith.mulf %937, %937 : vector<2x4x256xf32>
    %cst_156 = arith.constant dense<0.000000e+00> : vector<2x4xf32>
    %939 = vector.multi_reduction <add>, %938, %cst_156 [2] : vector<2x4x256xf32> to vector<2x4xf32>
    %940 = vector.shape_cast %939 : vector<2x4xf32> to vector<2x4x1xf32>
    %cst_157 = arith.constant dense<0.000000e+00> : vector<4x1xf32>
    %941 = vector.multi_reduction <add>, %940, %cst_157 [0] : vector<2x4x1xf32> to vector<4x1xf32>
    %942 = vector.shape_cast %941 : vector<4x1xf32> to vector<1x4x1xf32>
    %cst_158 = arith.constant 0.001953125 : f32
    %943 = vector.broadcast %cst_158 : f32 to vector<1x4x1xf32>
    %944 = arith.mulf %942, %943 : vector<1x4x1xf32>
    %cst_159 = arith.constant 9.99999974E-6 : f32
    %945 = vector.broadcast %cst_159 : f32 to vector<1x4x1xf32>
    %946 = arith.addf %944, %945 : vector<1x4x1xf32>
    %947 = math.rsqrt %946 : vector<1x4x1xf32>
    %948 = vector.broadcast %435 : f32 to vector<1x4x1xf32>
    %949 = arith.mulf %948, %947 : vector<1x4x1xf32>
    %950 = vector.broadcast %949 : vector<1x4x1xf32> to vector<2x4x256xf32>
    %951 = arith.mulf %937, %950 : vector<2x4x256xf32>
    %952 = arith.addf %434, %951 : vector<2x4x256xf32>
    %c6 = arith.constant 6 : index
    %953 = memref.load %arg0[%c6] : memref<8xf32, #tpu.memory_space<smem>>
    %c0_160 = arith.constant 0 : index
    %c0_161 = arith.constant 0 : index
    %954 = vector.load %arg12[%c0_160, %c0_161] : memref<4x9xf32, #tpu.memory_space<vmem>>, vector<4x9xf32>
    %955 = vector.extract_strided_slice %954 {offsets = [0, 0], sizes = [4, 1], strides = [1, 1]} : vector<4x9xf32> to vector<4x1xf32>
    %956 = vector.shape_cast %955 : vector<4x1xf32> to vector<1x4x1xf32>
    %957 = vector.broadcast %956 : vector<1x4x1xf32> to vector<2x4x256xf32>
    %958 = arith.mulf %456, %957 : vector<2x4x256xf32>
    %959 = vector.extract_strided_slice %954 {offsets = [0, 1], sizes = [4, 1], strides = [1, 1]} : vector<4x9xf32> to vector<4x1xf32>
    %960 = vector.shape_cast %959 : vector<4x1xf32> to vector<1x4x1xf32>
    %961 = vector.broadcast %960 : vector<1x4x1xf32> to vector<2x4x256xf32>
    %962 = arith.mulf %472, %961 : vector<2x4x256xf32>
    %963 = arith.addf %958, %962 : vector<2x4x256xf32>
    %964 = vector.extract_strided_slice %954 {offsets = [0, 2], sizes = [4, 1], strides = [1, 1]} : vector<4x9xf32> to vector<4x1xf32>
    %965 = vector.shape_cast %964 : vector<4x1xf32> to vector<1x4x1xf32>
    %966 = vector.broadcast %965 : vector<1x4x1xf32> to vector<2x4x256xf32>
    %967 = arith.mulf %498, %966 : vector<2x4x256xf32>
    %968 = arith.addf %963, %967 : vector<2x4x256xf32>
    %969 = vector.extract_strided_slice %954 {offsets = [0, 3], sizes = [4, 1], strides = [1, 1]} : vector<4x9xf32> to vector<4x1xf32>
    %970 = vector.shape_cast %969 : vector<4x1xf32> to vector<1x4x1xf32>
    %971 = vector.broadcast %970 : vector<1x4x1xf32> to vector<2x4x256xf32>
    %972 = arith.mulf %539, %971 : vector<2x4x256xf32>
    %973 = arith.addf %968, %972 : vector<2x4x256xf32>
    %974 = vector.extract_strided_slice %954 {offsets = [0, 4], sizes = [4, 1], strides = [1, 1]} : vector<4x9xf32> to vector<4x1xf32>
    %975 = vector.shape_cast %974 : vector<4x1xf32> to vector<1x4x1xf32>
    %976 = vector.broadcast %975 : vector<1x4x1xf32> to vector<2x4x256xf32>
    %977 = arith.mulf %4, %976 : vector<2x4x256xf32>
    %978 = arith.addf %973, %977 : vector<2x4x256xf32>
    %979 = vector.extract_strided_slice %954 {offsets = [0, 5], sizes = [4, 1], strides = [1, 1]} : vector<4x9xf32> to vector<4x1xf32>
    %980 = vector.shape_cast %979 : vector<4x1xf32> to vector<1x4x1xf32>
    %981 = vector.broadcast %980 : vector<1x4x1xf32> to vector<2x4x256xf32>
    %982 = arith.mulf %562, %981 : vector<2x4x256xf32>
    %983 = arith.addf %978, %982 : vector<2x4x256xf32>
    %984 = vector.extract_strided_slice %954 {offsets = [0, 6], sizes = [4, 1], strides = [1, 1]} : vector<4x9xf32> to vector<4x1xf32>
    %985 = vector.shape_cast %984 : vector<4x1xf32> to vector<1x4x1xf32>
    %986 = vector.broadcast %985 : vector<1x4x1xf32> to vector<2x4x256xf32>
    %987 = arith.mulf %612, %986 : vector<2x4x256xf32>
    %988 = arith.addf %983, %987 : vector<2x4x256xf32>
    %989 = vector.extract_strided_slice %954 {offsets = [0, 7], sizes = [4, 1], strides = [1, 1]} : vector<4x9xf32> to vector<4x1xf32>
    %990 = vector.shape_cast %989 : vector<4x1xf32> to vector<1x4x1xf32>
    %991 = vector.broadcast %990 : vector<1x4x1xf32> to vector<2x4x256xf32>
    %992 = arith.mulf %629, %991 : vector<2x4x256xf32>
    %993 = arith.addf %988, %992 : vector<2x4x256xf32>
    %994 = vector.extract_strided_slice %954 {offsets = [0, 8], sizes = [4, 1], strides = [1, 1]} : vector<4x9xf32> to vector<4x1xf32>
    %995 = vector.shape_cast %994 : vector<4x1xf32> to vector<1x4x1xf32>
    %996 = vector.broadcast %995 : vector<1x4x1xf32> to vector<2x4x256xf32>
    %997 = arith.mulf %647, %996 : vector<2x4x256xf32>
    %998 = arith.addf %993, %997 : vector<2x4x256xf32>
    %c0_162 = arith.constant 0 : index
    %c0_163 = arith.constant 0 : index
    %999 = vector.load %arg13[%c0_162, %c0_163] : memref<4x4xf32, #tpu.memory_space<vmem>>, vector<4x4xf32>
    %1000 = vector.extract_strided_slice %998 {offsets = [0, 0, 0], sizes = [2, 1, 256], strides = [1, 1, 1]} : vector<2x4x256xf32> to vector<2x1x256xf32>
    %1001 = vector.extract_strided_slice %999 {offsets = [0, 0], sizes = [4, 1], strides = [1, 1]} : vector<4x4xf32> to vector<4x1xf32>
    %1002 = vector.shape_cast %1001 : vector<4x1xf32> to vector<1x4x1xf32>
    %1003 = vector.broadcast %1000 : vector<2x1x256xf32> to vector<2x4x256xf32>
    %1004 = vector.broadcast %1002 : vector<1x4x1xf32> to vector<2x4x256xf32>
    %1005 = arith.mulf %1003, %1004 : vector<2x4x256xf32>
    %1006 = vector.extract_strided_slice %998 {offsets = [0, 1, 0], sizes = [2, 1, 256], strides = [1, 1, 1]} : vector<2x4x256xf32> to vector<2x1x256xf32>
    %1007 = vector.extract_strided_slice %999 {offsets = [0, 1], sizes = [4, 1], strides = [1, 1]} : vector<4x4xf32> to vector<4x1xf32>
    %1008 = vector.shape_cast %1007 : vector<4x1xf32> to vector<1x4x1xf32>
    %1009 = vector.broadcast %1006 : vector<2x1x256xf32> to vector<2x4x256xf32>
    %1010 = vector.broadcast %1008 : vector<1x4x1xf32> to vector<2x4x256xf32>
    %1011 = arith.mulf %1009, %1010 : vector<2x4x256xf32>
    %1012 = arith.addf %1005, %1011 : vector<2x4x256xf32>
    %1013 = vector.extract_strided_slice %998 {offsets = [0, 2, 0], sizes = [2, 1, 256], strides = [1, 1, 1]} : vector<2x4x256xf32> to vector<2x1x256xf32>
    %1014 = vector.extract_strided_slice %999 {offsets = [0, 2], sizes = [4, 1], strides = [1, 1]} : vector<4x4xf32> to vector<4x1xf32>
    %1015 = vector.shape_cast %1014 : vector<4x1xf32> to vector<1x4x1xf32>
    %1016 = vector.broadcast %1013 : vector<2x1x256xf32> to vector<2x4x256xf32>
    %1017 = vector.broadcast %1015 : vector<1x4x1xf32> to vector<2x4x256xf32>
    %1018 = arith.mulf %1016, %1017 : vector<2x4x256xf32>
    %1019 = arith.addf %1012, %1018 : vector<2x4x256xf32>
    %1020 = vector.extract_strided_slice %998 {offsets = [0, 3, 0], sizes = [2, 1, 256], strides = [1, 1, 1]} : vector<2x4x256xf32> to vector<2x1x256xf32>
    %1021 = vector.extract_strided_slice %999 {offsets = [0, 3], sizes = [4, 1], strides = [1, 1]} : vector<4x4xf32> to vector<4x1xf32>
    %1022 = vector.shape_cast %1021 : vector<4x1xf32> to vector<1x4x1xf32>
    %1023 = vector.broadcast %1020 : vector<2x1x256xf32> to vector<2x4x256xf32>
    %1024 = vector.broadcast %1022 : vector<1x4x1xf32> to vector<2x4x256xf32>
    %1025 = arith.mulf %1023, %1024 : vector<2x4x256xf32>
    %1026 = arith.addf %1019, %1025 : vector<2x4x256xf32>
    %cst_164 = arith.constant dense<0.000000e+00> : vector<2x4xf32>
    %1027 = vector.multi_reduction <add>, %1026, %cst_164 [2] : vector<2x4x256xf32> to vector<2x4xf32>
    %1028 = vector.shape_cast %1027 : vector<2x4xf32> to vector<2x4x1xf32>
    %cst_165 = arith.constant dense<0.000000e+00> : vector<4x1xf32>
    %1029 = vector.multi_reduction <add>, %1028, %cst_165 [0] : vector<2x4x1xf32> to vector<4x1xf32>
    %1030 = vector.shape_cast %1029 : vector<4x1xf32> to vector<1x4x1xf32>
    %cst_166 = arith.constant 0.001953125 : f32
    %1031 = vector.broadcast %cst_166 : f32 to vector<1x4x1xf32>
    %1032 = arith.mulf %1030, %1031 : vector<1x4x1xf32>
    %1033 = vector.broadcast %1032 : vector<1x4x1xf32> to vector<2x4x256xf32>
    %1034 = arith.subf %1026, %1033 : vector<2x4x256xf32>
    %1035 = arith.mulf %1034, %1034 : vector<2x4x256xf32>
    %cst_167 = arith.constant dense<0.000000e+00> : vector<2x4xf32>
    %1036 = vector.multi_reduction <add>, %1035, %cst_167 [2] : vector<2x4x256xf32> to vector<2x4xf32>
    %1037 = vector.shape_cast %1036 : vector<2x4xf32> to vector<2x4x1xf32>
    %cst_168 = arith.constant dense<0.000000e+00> : vector<4x1xf32>
    %1038 = vector.multi_reduction <add>, %1037, %cst_168 [0] : vector<2x4x1xf32> to vector<4x1xf32>
    %1039 = vector.shape_cast %1038 : vector<4x1xf32> to vector<1x4x1xf32>
    %cst_169 = arith.constant 0.001953125 : f32
    %1040 = vector.broadcast %cst_169 : f32 to vector<1x4x1xf32>
    %1041 = arith.mulf %1039, %1040 : vector<1x4x1xf32>
    %cst_170 = arith.constant 9.99999974E-6 : f32
    %1042 = vector.broadcast %cst_170 : f32 to vector<1x4x1xf32>
    %1043 = arith.addf %1041, %1042 : vector<1x4x1xf32>
    %1044 = math.rsqrt %1043 : vector<1x4x1xf32>
    %1045 = vector.broadcast %953 : f32 to vector<1x4x1xf32>
    %1046 = arith.mulf %1045, %1044 : vector<1x4x1xf32>
    %1047 = vector.broadcast %1046 : vector<1x4x1xf32> to vector<2x4x256xf32>
    %1048 = arith.mulf %1034, %1047 : vector<2x4x256xf32>
    %1049 = arith.addf %952, %1048 : vector<2x4x256xf32>
    %c7 = arith.constant 7 : index
    %1050 = memref.load %arg0[%c7] : memref<8xf32, #tpu.memory_space<smem>>
    %c0_171 = arith.constant 0 : index
    %c0_172 = arith.constant 0 : index
    %1051 = vector.load %arg14[%c0_171, %c0_172] : memref<4x25xf32, #tpu.memory_space<vmem>>, vector<4x25xf32>
    %c68_i32 = arith.constant 68 : i32
    %1052 = tpu.dynamic_rotate %4 by %c68_i32 dim 2 : vector<2x4x256xf32>, i32 -> vector<2x4x256xf32>
    %cst_173 = arith.constant 4.000000e+00 : f32
    %1053 = vector.broadcast %cst_173 : f32 to vector<1x1x256xf32>
    %1054 = arith.cmpf oge, %1, %1053 : vector<1x1x256xf32>
    %cst_174 = arith.constant 1.900000e+01 : f32
    %1055 = vector.broadcast %cst_174 : f32 to vector<1x1x256xf32>
    %1056 = arith.cmpf ole, %1, %1055 : vector<1x1x256xf32>
    %1057 = arith.andi %1054, %1056 : vector<1x1x256xi1>
    %cst_175 = arith.constant 1.000000e+00 : f32
    %cst_176 = arith.constant 0.000000e+00 : f32
    %1058 = vector.broadcast %cst_175 : f32 to vector<1x1x256xf32>
    %1059 = vector.broadcast %cst_176 : f32 to vector<1x1x256xf32>
    %1060 = arith.select %1057, %1058, %1059 : vector<1x1x256xi1>, vector<1x1x256xf32>
    %cst_177 = arith.constant 4.000000e+00 : f32
    %1061 = vector.broadcast %cst_177 : f32 to vector<1x1x256xf32>
    %1062 = arith.cmpf oge, %2, %1061 : vector<1x1x256xf32>
    %cst_178 = arith.constant 1.900000e+01 : f32
    %1063 = vector.broadcast %cst_178 : f32 to vector<1x1x256xf32>
    %1064 = arith.cmpf ole, %2, %1063 : vector<1x1x256xf32>
    %1065 = arith.andi %1062, %1064 : vector<1x1x256xi1>
    %cst_179 = arith.constant 1.000000e+00 : f32
    %cst_180 = arith.constant 0.000000e+00 : f32
    %1066 = vector.broadcast %cst_179 : f32 to vector<1x1x256xf32>
    %1067 = vector.broadcast %cst_180 : f32 to vector<1x1x256xf32>
    %1068 = arith.select %1065, %1066, %1067 : vector<1x1x256xi1>, vector<1x1x256xf32>
    %1069 = arith.mulf %1060, %1068 : vector<1x1x256xf32>
    %1070 = vector.broadcast %1069 : vector<1x1x256xf32> to vector<2x4x256xf32>
    %1071 = arith.mulf %1052, %1070 : vector<2x4x256xf32>
    %1072 = vector.extract_strided_slice %1051 {offsets = [0, 0], sizes = [4, 1], strides = [1, 1]} : vector<4x25xf32> to vector<4x1xf32>
    %1073 = vector.shape_cast %1072 : vector<4x1xf32> to vector<1x4x1xf32>
    %1074 = vector.broadcast %1073 : vector<1x4x1xf32> to vector<2x4x256xf32>
    %1075 = arith.mulf %1071, %1074 : vector<2x4x256xf32>
    %c66_i32 = arith.constant 66 : i32
    %1076 = tpu.dynamic_rotate %4 by %c66_i32 dim 2 : vector<2x4x256xf32>, i32 -> vector<2x4x256xf32>
    %1077 = arith.mulf %1060, %453 : vector<1x1x256xf32>
    %1078 = vector.broadcast %1077 : vector<1x1x256xf32> to vector<2x4x256xf32>
    %1079 = arith.mulf %1076, %1078 : vector<2x4x256xf32>
    %1080 = vector.extract_strided_slice %1051 {offsets = [0, 1], sizes = [4, 1], strides = [1, 1]} : vector<4x25xf32> to vector<4x1xf32>
    %1081 = vector.shape_cast %1080 : vector<4x1xf32> to vector<1x4x1xf32>
    %1082 = vector.broadcast %1081 : vector<1x4x1xf32> to vector<2x4x256xf32>
    %1083 = arith.mulf %1079, %1082 : vector<2x4x256xf32>
    %1084 = arith.addf %1075, %1083 : vector<2x4x256xf32>
    %c64_i32 = arith.constant 64 : i32
    %1085 = tpu.dynamic_rotate %4 by %c64_i32 dim 2 : vector<2x4x256xf32>, i32 -> vector<2x4x256xf32>
    %1086 = vector.broadcast %1060 : vector<1x1x256xf32> to vector<2x4x256xf32>
    %1087 = arith.mulf %1085, %1086 : vector<2x4x256xf32>
    %1088 = vector.extract_strided_slice %1051 {offsets = [0, 2], sizes = [4, 1], strides = [1, 1]} : vector<4x25xf32> to vector<4x1xf32>
    %1089 = vector.shape_cast %1088 : vector<4x1xf32> to vector<1x4x1xf32>
    %1090 = vector.broadcast %1089 : vector<1x4x1xf32> to vector<2x4x256xf32>
    %1091 = arith.mulf %1087, %1090 : vector<2x4x256xf32>
    %1092 = arith.addf %1084, %1091 : vector<2x4x256xf32>
    %c62_i32 = arith.constant 62 : i32
    %1093 = tpu.dynamic_rotate %4 by %c62_i32 dim 2 : vector<2x4x256xf32>, i32 -> vector<2x4x256xf32>
    %1094 = arith.mulf %1060, %495 : vector<1x1x256xf32>
    %1095 = vector.broadcast %1094 : vector<1x1x256xf32> to vector<2x4x256xf32>
    %1096 = arith.mulf %1093, %1095 : vector<2x4x256xf32>
    %1097 = vector.extract_strided_slice %1051 {offsets = [0, 3], sizes = [4, 1], strides = [1, 1]} : vector<4x25xf32> to vector<4x1xf32>
    %1098 = vector.shape_cast %1097 : vector<4x1xf32> to vector<1x4x1xf32>
    %1099 = vector.broadcast %1098 : vector<1x4x1xf32> to vector<2x4x256xf32>
    %1100 = arith.mulf %1096, %1099 : vector<2x4x256xf32>
    %1101 = arith.addf %1092, %1100 : vector<2x4x256xf32>
    %c60_i32 = arith.constant 60 : i32
    %1102 = tpu.dynamic_rotate %4 by %c60_i32 dim 2 : vector<2x4x256xf32>, i32 -> vector<2x4x256xf32>
    %cst_181 = arith.constant -4.000000e+00 : f32
    %1103 = vector.broadcast %cst_181 : f32 to vector<1x1x256xf32>
    %1104 = arith.cmpf oge, %2, %1103 : vector<1x1x256xf32>
    %cst_182 = arith.constant 1.100000e+01 : f32
    %1105 = vector.broadcast %cst_182 : f32 to vector<1x1x256xf32>
    %1106 = arith.cmpf ole, %2, %1105 : vector<1x1x256xf32>
    %1107 = arith.andi %1104, %1106 : vector<1x1x256xi1>
    %cst_183 = arith.constant 1.000000e+00 : f32
    %cst_184 = arith.constant 0.000000e+00 : f32
    %1108 = vector.broadcast %cst_183 : f32 to vector<1x1x256xf32>
    %1109 = vector.broadcast %cst_184 : f32 to vector<1x1x256xf32>
    %1110 = arith.select %1107, %1108, %1109 : vector<1x1x256xi1>, vector<1x1x256xf32>
    %1111 = arith.mulf %1060, %1110 : vector<1x1x256xf32>
    %1112 = vector.broadcast %1111 : vector<1x1x256xf32> to vector<2x4x256xf32>
    %1113 = arith.mulf %1102, %1112 : vector<2x4x256xf32>
    %1114 = vector.extract_strided_slice %1051 {offsets = [0, 4], sizes = [4, 1], strides = [1, 1]} : vector<4x25xf32> to vector<4x1xf32>
    %1115 = vector.shape_cast %1114 : vector<4x1xf32> to vector<1x4x1xf32>
    %1116 = vector.broadcast %1115 : vector<1x4x1xf32> to vector<2x4x256xf32>
    %1117 = arith.mulf %1113, %1116 : vector<2x4x256xf32>
    %1118 = arith.addf %1101, %1117 : vector<2x4x256xf32>
    %c36_i32 = arith.constant 36 : i32
    %1119 = tpu.dynamic_rotate %4 by %c36_i32 dim 2 : vector<2x4x256xf32>, i32 -> vector<2x4x256xf32>
    %1120 = arith.mulf %445, %1068 : vector<1x1x256xf32>
    %1121 = vector.broadcast %1120 : vector<1x1x256xf32> to vector<2x4x256xf32>
    %1122 = arith.mulf %1119, %1121 : vector<2x4x256xf32>
    %1123 = vector.extract_strided_slice %1051 {offsets = [0, 5], sizes = [4, 1], strides = [1, 1]} : vector<4x25xf32> to vector<4x1xf32>
    %1124 = vector.shape_cast %1123 : vector<4x1xf32> to vector<1x4x1xf32>
    %1125 = vector.broadcast %1124 : vector<1x4x1xf32> to vector<2x4x256xf32>
    %1126 = arith.mulf %1122, %1125 : vector<2x4x256xf32>
    %1127 = arith.addf %1118, %1126 : vector<2x4x256xf32>
    %1128 = vector.extract_strided_slice %1051 {offsets = [0, 6], sizes = [4, 1], strides = [1, 1]} : vector<4x25xf32> to vector<4x1xf32>
    %1129 = vector.shape_cast %1128 : vector<4x1xf32> to vector<1x4x1xf32>
    %1130 = vector.broadcast %1129 : vector<1x4x1xf32> to vector<2x4x256xf32>
    %1131 = arith.mulf %456, %1130 : vector<2x4x256xf32>
    %1132 = arith.addf %1127, %1131 : vector<2x4x256xf32>
    %1133 = vector.extract_strided_slice %1051 {offsets = [0, 7], sizes = [4, 1], strides = [1, 1]} : vector<4x25xf32> to vector<4x1xf32>
    %1134 = vector.shape_cast %1133 : vector<4x1xf32> to vector<1x4x1xf32>
    %1135 = vector.broadcast %1134 : vector<1x4x1xf32> to vector<2x4x256xf32>
    %1136 = arith.mulf %472, %1135 : vector<2x4x256xf32>
    %1137 = arith.addf %1132, %1136 : vector<2x4x256xf32>
    %1138 = vector.extract_strided_slice %1051 {offsets = [0, 8], sizes = [4, 1], strides = [1, 1]} : vector<4x25xf32> to vector<4x1xf32>
    %1139 = vector.shape_cast %1138 : vector<4x1xf32> to vector<1x4x1xf32>
    %1140 = vector.broadcast %1139 : vector<1x4x1xf32> to vector<2x4x256xf32>
    %1141 = arith.mulf %498, %1140 : vector<2x4x256xf32>
    %1142 = arith.addf %1137, %1141 : vector<2x4x256xf32>
    %c28_i32 = arith.constant 28 : i32
    %1143 = tpu.dynamic_rotate %4 by %c28_i32 dim 2 : vector<2x4x256xf32>, i32 -> vector<2x4x256xf32>
    %1144 = arith.mulf %445, %1110 : vector<1x1x256xf32>
    %1145 = vector.broadcast %1144 : vector<1x1x256xf32> to vector<2x4x256xf32>
    %1146 = arith.mulf %1143, %1145 : vector<2x4x256xf32>
    %1147 = vector.extract_strided_slice %1051 {offsets = [0, 9], sizes = [4, 1], strides = [1, 1]} : vector<4x25xf32> to vector<4x1xf32>
    %1148 = vector.shape_cast %1147 : vector<4x1xf32> to vector<1x4x1xf32>
    %1149 = vector.broadcast %1148 : vector<1x4x1xf32> to vector<2x4x256xf32>
    %1150 = arith.mulf %1146, %1149 : vector<2x4x256xf32>
    %1151 = arith.addf %1142, %1150 : vector<2x4x256xf32>
    %c4_i32 = arith.constant 4 : i32
    %1152 = tpu.dynamic_rotate %4 by %c4_i32 dim 2 : vector<2x4x256xf32>, i32 -> vector<2x4x256xf32>
    %1153 = vector.broadcast %1068 : vector<1x1x256xf32> to vector<2x4x256xf32>
    %1154 = arith.mulf %1152, %1153 : vector<2x4x256xf32>
    %1155 = vector.extract_strided_slice %1051 {offsets = [0, 10], sizes = [4, 1], strides = [1, 1]} : vector<4x25xf32> to vector<4x1xf32>
    %1156 = vector.shape_cast %1155 : vector<4x1xf32> to vector<1x4x1xf32>
    %1157 = vector.broadcast %1156 : vector<1x4x1xf32> to vector<2x4x256xf32>
    %1158 = arith.mulf %1154, %1157 : vector<2x4x256xf32>
    %1159 = arith.addf %1151, %1158 : vector<2x4x256xf32>
    %1160 = vector.extract_strided_slice %1051 {offsets = [0, 11], sizes = [4, 1], strides = [1, 1]} : vector<4x25xf32> to vector<4x1xf32>
    %1161 = vector.shape_cast %1160 : vector<4x1xf32> to vector<1x4x1xf32>
    %1162 = vector.broadcast %1161 : vector<1x4x1xf32> to vector<2x4x256xf32>
    %1163 = arith.mulf %539, %1162 : vector<2x4x256xf32>
    %1164 = arith.addf %1159, %1163 : vector<2x4x256xf32>
    %1165 = vector.extract_strided_slice %1051 {offsets = [0, 12], sizes = [4, 1], strides = [1, 1]} : vector<4x25xf32> to vector<4x1xf32>
    %1166 = vector.shape_cast %1165 : vector<4x1xf32> to vector<1x4x1xf32>
    %1167 = vector.broadcast %1166 : vector<1x4x1xf32> to vector<2x4x256xf32>
    %1168 = arith.mulf %4, %1167 : vector<2x4x256xf32>
    %1169 = arith.addf %1164, %1168 : vector<2x4x256xf32>
    %1170 = vector.extract_strided_slice %1051 {offsets = [0, 13], sizes = [4, 1], strides = [1, 1]} : vector<4x25xf32> to vector<4x1xf32>
    %1171 = vector.shape_cast %1170 : vector<4x1xf32> to vector<1x4x1xf32>
    %1172 = vector.broadcast %1171 : vector<1x4x1xf32> to vector<2x4x256xf32>
    %1173 = arith.mulf %562, %1172 : vector<2x4x256xf32>
    %1174 = arith.addf %1169, %1173 : vector<2x4x256xf32>
    %c252_i32 = arith.constant 252 : i32
    %1175 = tpu.dynamic_rotate %4 by %c252_i32 dim 2 : vector<2x4x256xf32>, i32 -> vector<2x4x256xf32>
    %1176 = vector.broadcast %1110 : vector<1x1x256xf32> to vector<2x4x256xf32>
    %1177 = arith.mulf %1175, %1176 : vector<2x4x256xf32>
    %1178 = vector.extract_strided_slice %1051 {offsets = [0, 14], sizes = [4, 1], strides = [1, 1]} : vector<4x25xf32> to vector<4x1xf32>
    %1179 = vector.shape_cast %1178 : vector<4x1xf32> to vector<1x4x1xf32>
    %1180 = vector.broadcast %1179 : vector<1x4x1xf32> to vector<2x4x256xf32>
    %1181 = arith.mulf %1177, %1180 : vector<2x4x256xf32>
    %1182 = arith.addf %1174, %1181 : vector<2x4x256xf32>
    %c228_i32 = arith.constant 228 : i32
    %1183 = tpu.dynamic_rotate %4 by %c228_i32 dim 2 : vector<2x4x256xf32>, i32 -> vector<2x4x256xf32>
    %1184 = arith.mulf %609, %1068 : vector<1x1x256xf32>
    %1185 = vector.broadcast %1184 : vector<1x1x256xf32> to vector<2x4x256xf32>
    %1186 = arith.mulf %1183, %1185 : vector<2x4x256xf32>
    %1187 = vector.extract_strided_slice %1051 {offsets = [0, 15], sizes = [4, 1], strides = [1, 1]} : vector<4x25xf32> to vector<4x1xf32>
    %1188 = vector.shape_cast %1187 : vector<4x1xf32> to vector<1x4x1xf32>
    %1189 = vector.broadcast %1188 : vector<1x4x1xf32> to vector<2x4x256xf32>
    %1190 = arith.mulf %1186, %1189 : vector<2x4x256xf32>
    %1191 = arith.addf %1182, %1190 : vector<2x4x256xf32>
    %1192 = vector.extract_strided_slice %1051 {offsets = [0, 16], sizes = [4, 1], strides = [1, 1]} : vector<4x25xf32> to vector<4x1xf32>
    %1193 = vector.shape_cast %1192 : vector<4x1xf32> to vector<1x4x1xf32>
    %1194 = vector.broadcast %1193 : vector<1x4x1xf32> to vector<2x4x256xf32>
    %1195 = arith.mulf %612, %1194 : vector<2x4x256xf32>
    %1196 = arith.addf %1191, %1195 : vector<2x4x256xf32>
    %1197 = vector.extract_strided_slice %1051 {offsets = [0, 17], sizes = [4, 1], strides = [1, 1]} : vector<4x25xf32> to vector<4x1xf32>
    %1198 = vector.shape_cast %1197 : vector<4x1xf32> to vector<1x4x1xf32>
    %1199 = vector.broadcast %1198 : vector<1x4x1xf32> to vector<2x4x256xf32>
    %1200 = arith.mulf %629, %1199 : vector<2x4x256xf32>
    %1201 = arith.addf %1196, %1200 : vector<2x4x256xf32>
    %1202 = vector.extract_strided_slice %1051 {offsets = [0, 18], sizes = [4, 1], strides = [1, 1]} : vector<4x25xf32> to vector<4x1xf32>
    %1203 = vector.shape_cast %1202 : vector<4x1xf32> to vector<1x4x1xf32>
    %1204 = vector.broadcast %1203 : vector<1x4x1xf32> to vector<2x4x256xf32>
    %1205 = arith.mulf %647, %1204 : vector<2x4x256xf32>
    %1206 = arith.addf %1201, %1205 : vector<2x4x256xf32>
    %c220_i32 = arith.constant 220 : i32
    %1207 = tpu.dynamic_rotate %4 by %c220_i32 dim 2 : vector<2x4x256xf32>, i32 -> vector<2x4x256xf32>
    %1208 = arith.mulf %609, %1110 : vector<1x1x256xf32>
    %1209 = vector.broadcast %1208 : vector<1x1x256xf32> to vector<2x4x256xf32>
    %1210 = arith.mulf %1207, %1209 : vector<2x4x256xf32>
    %1211 = vector.extract_strided_slice %1051 {offsets = [0, 19], sizes = [4, 1], strides = [1, 1]} : vector<4x25xf32> to vector<4x1xf32>
    %1212 = vector.shape_cast %1211 : vector<4x1xf32> to vector<1x4x1xf32>
    %1213 = vector.broadcast %1212 : vector<1x4x1xf32> to vector<2x4x256xf32>
    %1214 = arith.mulf %1210, %1213 : vector<2x4x256xf32>
    %1215 = arith.addf %1206, %1214 : vector<2x4x256xf32>
    %c196_i32 = arith.constant 196 : i32
    %1216 = tpu.dynamic_rotate %4 by %c196_i32 dim 2 : vector<2x4x256xf32>, i32 -> vector<2x4x256xf32>
    %cst_185 = arith.constant -4.000000e+00 : f32
    %1217 = vector.broadcast %cst_185 : f32 to vector<1x1x256xf32>
    %1218 = arith.cmpf oge, %1, %1217 : vector<1x1x256xf32>
    %cst_186 = arith.constant 1.100000e+01 : f32
    %1219 = vector.broadcast %cst_186 : f32 to vector<1x1x256xf32>
    %1220 = arith.cmpf ole, %1, %1219 : vector<1x1x256xf32>
    %1221 = arith.andi %1218, %1220 : vector<1x1x256xi1>
    %cst_187 = arith.constant 1.000000e+00 : f32
    %cst_188 = arith.constant 0.000000e+00 : f32
    %1222 = vector.broadcast %cst_187 : f32 to vector<1x1x256xf32>
    %1223 = vector.broadcast %cst_188 : f32 to vector<1x1x256xf32>
    %1224 = arith.select %1221, %1222, %1223 : vector<1x1x256xi1>, vector<1x1x256xf32>
    %1225 = arith.mulf %1224, %1068 : vector<1x1x256xf32>
    %1226 = vector.broadcast %1225 : vector<1x1x256xf32> to vector<2x4x256xf32>
    %1227 = arith.mulf %1216, %1226 : vector<2x4x256xf32>
    %1228 = vector.extract_strided_slice %1051 {offsets = [0, 20], sizes = [4, 1], strides = [1, 1]} : vector<4x25xf32> to vector<4x1xf32>
    %1229 = vector.shape_cast %1228 : vector<4x1xf32> to vector<1x4x1xf32>
    %1230 = vector.broadcast %1229 : vector<1x4x1xf32> to vector<2x4x256xf32>
    %1231 = arith.mulf %1227, %1230 : vector<2x4x256xf32>
    %1232 = arith.addf %1215, %1231 : vector<2x4x256xf32>
    %c194_i32 = arith.constant 194 : i32
    %1233 = tpu.dynamic_rotate %4 by %c194_i32 dim 2 : vector<2x4x256xf32>, i32 -> vector<2x4x256xf32>
    %1234 = arith.mulf %1224, %453 : vector<1x1x256xf32>
    %1235 = vector.broadcast %1234 : vector<1x1x256xf32> to vector<2x4x256xf32>
    %1236 = arith.mulf %1233, %1235 : vector<2x4x256xf32>
    %1237 = vector.extract_strided_slice %1051 {offsets = [0, 21], sizes = [4, 1], strides = [1, 1]} : vector<4x25xf32> to vector<4x1xf32>
    %1238 = vector.shape_cast %1237 : vector<4x1xf32> to vector<1x4x1xf32>
    %1239 = vector.broadcast %1238 : vector<1x4x1xf32> to vector<2x4x256xf32>
    %1240 = arith.mulf %1236, %1239 : vector<2x4x256xf32>
    %1241 = arith.addf %1232, %1240 : vector<2x4x256xf32>
    %c192_i32 = arith.constant 192 : i32
    %1242 = tpu.dynamic_rotate %4 by %c192_i32 dim 2 : vector<2x4x256xf32>, i32 -> vector<2x4x256xf32>
    %1243 = vector.broadcast %1224 : vector<1x1x256xf32> to vector<2x4x256xf32>
    %1244 = arith.mulf %1242, %1243 : vector<2x4x256xf32>
    %1245 = vector.extract_strided_slice %1051 {offsets = [0, 22], sizes = [4, 1], strides = [1, 1]} : vector<4x25xf32> to vector<4x1xf32>
    %1246 = vector.shape_cast %1245 : vector<4x1xf32> to vector<1x4x1xf32>
    %1247 = vector.broadcast %1246 : vector<1x4x1xf32> to vector<2x4x256xf32>
    %1248 = arith.mulf %1244, %1247 : vector<2x4x256xf32>
    %1249 = arith.addf %1241, %1248 : vector<2x4x256xf32>
    %c190_i32 = arith.constant 190 : i32
    %1250 = tpu.dynamic_rotate %4 by %c190_i32 dim 2 : vector<2x4x256xf32>, i32 -> vector<2x4x256xf32>
    %1251 = arith.mulf %1224, %495 : vector<1x1x256xf32>
    %1252 = vector.broadcast %1251 : vector<1x1x256xf32> to vector<2x4x256xf32>
    %1253 = arith.mulf %1250, %1252 : vector<2x4x256xf32>
    %1254 = vector.extract_strided_slice %1051 {offsets = [0, 23], sizes = [4, 1], strides = [1, 1]} : vector<4x25xf32> to vector<4x1xf32>
    %1255 = vector.shape_cast %1254 : vector<4x1xf32> to vector<1x4x1xf32>
    %1256 = vector.broadcast %1255 : vector<1x4x1xf32> to vector<2x4x256xf32>
    %1257 = arith.mulf %1253, %1256 : vector<2x4x256xf32>
    %1258 = arith.addf %1249, %1257 : vector<2x4x256xf32>
    %c188_i32 = arith.constant 188 : i32
    %1259 = tpu.dynamic_rotate %4 by %c188_i32 dim 2 : vector<2x4x256xf32>, i32 -> vector<2x4x256xf32>
    %1260 = arith.mulf %1224, %1110 : vector<1x1x256xf32>
    %1261 = vector.broadcast %1260 : vector<1x1x256xf32> to vector<2x4x256xf32>
    %1262 = arith.mulf %1259, %1261 : vector<2x4x256xf32>
    %1263 = vector.extract_strided_slice %1051 {offsets = [0, 24], sizes = [4, 1], strides = [1, 1]} : vector<4x25xf32> to vector<4x1xf32>
    %1264 = vector.shape_cast %1263 : vector<4x1xf32> to vector<1x4x1xf32>
    %1265 = vector.broadcast %1264 : vector<1x4x1xf32> to vector<2x4x256xf32>
    %1266 = arith.mulf %1262, %1265 : vector<2x4x256xf32>
    %1267 = arith.addf %1258, %1266 : vector<2x4x256xf32>
    %c0_189 = arith.constant 0 : index
    %c0_190 = arith.constant 0 : index
    %1268 = vector.load %arg15[%c0_189, %c0_190] : memref<4x4xf32, #tpu.memory_space<vmem>>, vector<4x4xf32>
    %1269 = vector.extract_strided_slice %1267 {offsets = [0, 0, 0], sizes = [2, 1, 256], strides = [1, 1, 1]} : vector<2x4x256xf32> to vector<2x1x256xf32>
    %1270 = vector.extract_strided_slice %1268 {offsets = [0, 0], sizes = [4, 1], strides = [1, 1]} : vector<4x4xf32> to vector<4x1xf32>
    %1271 = vector.shape_cast %1270 : vector<4x1xf32> to vector<1x4x1xf32>
    %1272 = vector.broadcast %1269 : vector<2x1x256xf32> to vector<2x4x256xf32>
    %1273 = vector.broadcast %1271 : vector<1x4x1xf32> to vector<2x4x256xf32>
    %1274 = arith.mulf %1272, %1273 : vector<2x4x256xf32>
    %1275 = vector.extract_strided_slice %1267 {offsets = [0, 1, 0], sizes = [2, 1, 256], strides = [1, 1, 1]} : vector<2x4x256xf32> to vector<2x1x256xf32>
    %1276 = vector.extract_strided_slice %1268 {offsets = [0, 1], sizes = [4, 1], strides = [1, 1]} : vector<4x4xf32> to vector<4x1xf32>
    %1277 = vector.shape_cast %1276 : vector<4x1xf32> to vector<1x4x1xf32>
    %1278 = vector.broadcast %1275 : vector<2x1x256xf32> to vector<2x4x256xf32>
    %1279 = vector.broadcast %1277 : vector<1x4x1xf32> to vector<2x4x256xf32>
    %1280 = arith.mulf %1278, %1279 : vector<2x4x256xf32>
    %1281 = arith.addf %1274, %1280 : vector<2x4x256xf32>
    %1282 = vector.extract_strided_slice %1267 {offsets = [0, 2, 0], sizes = [2, 1, 256], strides = [1, 1, 1]} : vector<2x4x256xf32> to vector<2x1x256xf32>
    %1283 = vector.extract_strided_slice %1268 {offsets = [0, 2], sizes = [4, 1], strides = [1, 1]} : vector<4x4xf32> to vector<4x1xf32>
    %1284 = vector.shape_cast %1283 : vector<4x1xf32> to vector<1x4x1xf32>
    %1285 = vector.broadcast %1282 : vector<2x1x256xf32> to vector<2x4x256xf32>
    %1286 = vector.broadcast %1284 : vector<1x4x1xf32> to vector<2x4x256xf32>
    %1287 = arith.mulf %1285, %1286 : vector<2x4x256xf32>
    %1288 = arith.addf %1281, %1287 : vector<2x4x256xf32>
    %1289 = vector.extract_strided_slice %1267 {offsets = [0, 3, 0], sizes = [2, 1, 256], strides = [1, 1, 1]} : vector<2x4x256xf32> to vector<2x1x256xf32>
    %1290 = vector.extract_strided_slice %1268 {offsets = [0, 3], sizes = [4, 1], strides = [1, 1]} : vector<4x4xf32> to vector<4x1xf32>
    %1291 = vector.shape_cast %1290 : vector<4x1xf32> to vector<1x4x1xf32>
    %1292 = vector.broadcast %1289 : vector<2x1x256xf32> to vector<2x4x256xf32>
    %1293 = vector.broadcast %1291 : vector<1x4x1xf32> to vector<2x4x256xf32>
    %1294 = arith.mulf %1292, %1293 : vector<2x4x256xf32>
    %1295 = arith.addf %1288, %1294 : vector<2x4x256xf32>
    %cst_191 = arith.constant dense<0.000000e+00> : vector<2x4xf32>
    %1296 = vector.multi_reduction <add>, %1295, %cst_191 [2] : vector<2x4x256xf32> to vector<2x4xf32>
    %1297 = vector.shape_cast %1296 : vector<2x4xf32> to vector<2x4x1xf32>
    %cst_192 = arith.constant dense<0.000000e+00> : vector<4x1xf32>
    %1298 = vector.multi_reduction <add>, %1297, %cst_192 [0] : vector<2x4x1xf32> to vector<4x1xf32>
    %1299 = vector.shape_cast %1298 : vector<4x1xf32> to vector<1x4x1xf32>
    %cst_193 = arith.constant 0.001953125 : f32
    %1300 = vector.broadcast %cst_193 : f32 to vector<1x4x1xf32>
    %1301 = arith.mulf %1299, %1300 : vector<1x4x1xf32>
    %1302 = vector.broadcast %1301 : vector<1x4x1xf32> to vector<2x4x256xf32>
    %1303 = arith.subf %1295, %1302 : vector<2x4x256xf32>
    %1304 = arith.mulf %1303, %1303 : vector<2x4x256xf32>
    %cst_194 = arith.constant dense<0.000000e+00> : vector<2x4xf32>
    %1305 = vector.multi_reduction <add>, %1304, %cst_194 [2] : vector<2x4x256xf32> to vector<2x4xf32>
    %1306 = vector.shape_cast %1305 : vector<2x4xf32> to vector<2x4x1xf32>
    %cst_195 = arith.constant dense<0.000000e+00> : vector<4x1xf32>
    %1307 = vector.multi_reduction <add>, %1306, %cst_195 [0] : vector<2x4x1xf32> to vector<4x1xf32>
    %1308 = vector.shape_cast %1307 : vector<4x1xf32> to vector<1x4x1xf32>
    %cst_196 = arith.constant 0.001953125 : f32
    %1309 = vector.broadcast %cst_196 : f32 to vector<1x4x1xf32>
    %1310 = arith.mulf %1308, %1309 : vector<1x4x1xf32>
    %cst_197 = arith.constant 9.99999974E-6 : f32
    %1311 = vector.broadcast %cst_197 : f32 to vector<1x4x1xf32>
    %1312 = arith.addf %1310, %1311 : vector<1x4x1xf32>
    %1313 = math.rsqrt %1312 : vector<1x4x1xf32>
    %1314 = vector.broadcast %1050 : f32 to vector<1x4x1xf32>
    %1315 = arith.mulf %1314, %1313 : vector<1x4x1xf32>
    %1316 = vector.broadcast %1315 : vector<1x4x1xf32> to vector<2x4x256xf32>
    %1317 = arith.mulf %1303, %1316 : vector<2x4x256xf32>
    %1318 = arith.addf %1049, %1317 : vector<2x4x256xf32>
    %c0_198 = arith.constant 0 : index
    %c0_199 = arith.constant 0 : index
    %c0_200 = arith.constant 0 : index
    %1319 = vector.load %arg16[%c0_198, %c0_199, %c0_200] : memref<2x4x256xf32, #tpu.memory_space<vmem>>, vector<2x4x256xf32>
    tpu.vector_store %arg16[%c0_198, %c0_199, %c0_200], %1318 {strides = array<i32>} : memref<2x4x256xf32, #tpu.memory_space<vmem>>, vector<2x4x256xf32>,
    return
  }
}

</mosaic_0001>

<bundles_post_ra>
// kernel: tpu_custom_call.1
= control target key start
LH: loop header
LB: loop body
LE: loop exit
PB: predicated region body
PF: predicated region fallthrough
CT: control target
= control target key end

     0   :  { %s10106_s0 = inlined_call_operand.hbm [shape: f32[8], index: 0, kind: input, shape index: {}]   ;;  %s10107_s1 = inlined_call_operand.hbm [shape: f32[2,4,256], index: 1, kind: input, shape index: {}]   ;;  %s10108_s2 = inlined_call_operand.hbm [shape: f32[1,1,256], index: 2, kind: input, shape index: {}]   ;;  %s10109_s3 = inlined_call_operand.hbm [shape: f32[1,1,256], index: 3, kind: input, shape index: {}]   ;;  %s10110_s4 = inlined_call_operand.vmem [shape: f32[4,9], index: 4, kind: input, shape index: {}]   ;;  %s10111_s5 = inlined_call_operand.vmem [shape: f32[4,4], index: 5, kind: input, shape index: {}]   ;;  %s10112_s6 = inlined_call_operand.hbm [shape: f32[4,9], index: 6, kind: input, shape index: {}]   ;;  %s10113_s7 = inlined_call_operand.vmem [shape: f32[4,4], index: 7, kind: input, shape index: {}]   ;;  %s10114_s8 = inlined_call_operand.hbm [shape: f32[4,25], index: 8, kind: input, shape index: {}]   ;;  %s10115_s9 = inlined_call_operand.vmem [shape: f32[4,4], index: 9, kind: input, shape index: {}]   ;;  %s10116_s10 = inlined_call_operand.hbm [shape: f32[4,25], index: 10, kind: input, shape index: {}]   ;;  %s10117_s11 = inlined_call_operand.vmem [shape: f32[4,4], index: 11, kind: input, shape index: {}]   ;;  %s10118_s12 = inlined_call_operand.hbm [shape: f32[4,9], index: 12, kind: input, shape index: {}]   ;;  %s10119_s13 = inlined_call_operand.hbm [shape: f32[4,4], index: 13, kind: input, shape index: {}]   ;;  %s10120_s14 = inlined_call_operand.vmem [shape: f32[4,25], index: 14, kind: input, shape index: {}]   ;;  %s10121_s15 = inlined_call_operand.hbm [shape: f32[4,4], index: 15, kind: input, shape index: {}]   ;;  %s10122_s16 = inlined_call_operand.hbm [shape: f32[2,4,256], index: 16, kind: output, shape index: {}]  }
   0x1   :  { %10634 = sst [smem:[#allocation189_spill]] %s10106_s0 }
   0x2   :  { %21 = vsyncpa [#allocation5], 0 }
   0x3   :  { %22 = vsyncpa [#allocation3], 0 }
   0x4   :  { %23 = vsyncpa [#allocation8], 0 }
   0x5   :  { %24 = vsyncpa [#allocation11], 0 }
   0x6   :  { %25 = vsyncpa [#allocation14], 0 }
   0x7   :  { %26 = vsyncpa [#allocation17], 0 }
   0x8   :  { %27 = vsyncpa [#allocation4], 0  ;;  %s4993_s21 = smov [#allocation7]   ;;  %s4994_s23 = smov [#allocation10]  }
   0x9   :  { %s54_s22 = sshll.u32 %s4993_s21, 4  ;;  %s78_s24 = sshll.u32 %s4994_s23, 4  ;;  %s55_s22 = int_to_ptr.vmem [resolvable:$true] %s54_s22  ;;  %s79_s24 = int_to_ptr.vmem [resolvable:$true] %s78_s24 }
   0xa   :  { %s4779_s25 = scalar_lea.vmem %s55_s22, 32  ;;  %p4784_p1 = scmp.lt.s32.totalorder %s55_s22, %s55_s22 }
   0xb   :  { %p4780_p0 = scmp.ne.s32.totalorder %s55_s22, %s4779_s25  ;;  %p4785_p2 = scmp.lt.s32.totalorder %s4779_s25, %s4779_s25 }
   0xd   :  { %p4786_p3 = por %p4785_p2, %p4784_p1 }
   0xf   :  { %p4787_p4 = pnand %p4786_p3, %p4780_p0 }
  0x11   :  { %4790 = shalt.err (!%p4787_p4)
}
  0x12   :  { %57 = dma.hbm_to_vmem [thread:$0]  %s10108_s2, 32, %s55_s22, [#allocation8]  }
  0x13   :  { %s4799_s28 = scalar_lea.vmem %s79_s24, 64  ;;  %p4804_p6 = scmp.lt.s32.totalorder %s79_s24, %s79_s24 }
  0x14   :  { %p4800_p5 = scmp.ne.s32.totalorder %s79_s24, %s4799_s28  ;;  %p4805_p7 = scmp.lt.s32.totalorder %s4799_s28, %s4799_s28 }
  0x16   :  { %p4806_p8 = por %p4805_p7, %p4804_p6 }
  0x18   :  { %p4807_p9 = pnand %p4806_p8, %p4800_p5 }
  0x1a   :  { %4810 = shalt.err (!%p4807_p9)
}
  0x1b   :  { %81 = dma.hbm_to_vmem [thread:$0]  %s10112_s6, 64, %s79_s24, [#allocation11]  }
  0x1c   :  { %s4995_s0 = smov [#allocation13]   ;;  %s4996_s18 = smov [#allocation16]  }
  0x1d   :  { %s102_s17 = sshll.u32 %s4995_s0, 4  ;;  %s124_s19 = sshll.u32 %s4996_s18, 4  ;;  %s103_s17 = int_to_ptr.vmem [resolvable:$true] %s102_s17  ;;  %s125_s19 = int_to_ptr.vmem [resolvable:$true] %s124_s19 }
  0x1e   :  { %s4819_s20 = scalar_lea.vmem %s103_s17, 64  ;;  %p4824_p11 = scmp.lt.s32.totalorder %s103_s17, %s103_s17 }
  0x1f   :  { %p4820_p10 = scmp.ne.s32.totalorder %s103_s17, %s4819_s20  ;;  %p4825_p12 = scmp.lt.s32.totalorder %s4819_s20, %s4819_s20 }
  0x21   :  { %p4826_p13 = por %p4825_p12, %p4824_p11 }
  0x23   :  { %p4827_p0 = pnand %p4826_p13, %p4820_p10 }
  0x25   :  { %4830 = shalt.err (!%p4827_p0)
}
  0x26   :  { %105 = dma.hbm_to_vmem [thread:$0]  %s10116_s10, 64, %s103_s17, [#allocation14]  }
  0x27   :  { %s4839_s22 = scalar_lea.vmem %s125_s19, 64  ;;  %p4844_p2 = scmp.lt.s32.totalorder %s125_s19, %s125_s19 }
  0x28   :  { %p4840_p1 = scmp.ne.s32.totalorder %s125_s19, %s4839_s22  ;;  %p4845_p3 = scmp.lt.s32.totalorder %s4839_s22, %s4839_s22 }
  0x2a   :  { %p4846_p4 = por %p4845_p3, %p4844_p2 }
  0x2c   :  { %p4847_p5 = pnand %p4846_p4, %p4840_p1 }
  0x2e   :  { %4850 = shalt.err (!%p4847_p5)
}
  0x2f   :  { %127 = dma.hbm_to_vmem [thread:$0]  %s10119_s13, 64, %s125_s19, [#allocation17]  }
  0x30   :  { %s4997_s24 = smov [#allocation2]   ;;  %s10635_s27 = sld [smem:[#allocation189_spill]] }
  0x31   :  { %s4998_s28 = smov [#allocation6]  }
  0x32   :  { %s41_s29 = sshll.u32 %s4998_s28, 4  ;;  %s42_s29 = int_to_ptr.vmem [resolvable:$true] %s41_s29 }
  0x33   :  { %s4867_s10 = scalar_lea.vmem %s42_s29, 256  ;;  %p4872_p7 = scmp.lt.s32.totalorder %s42_s29, %s42_s29 }
  0x34   :  { %p4868_p6 = scmp.ne.s32.totalorder %s42_s29, %s4867_s10  ;;  %p4873_p8 = scmp.lt.s32.totalorder %s4867_s10, %s4867_s10 }
  0x36   :  { %35 = dma.hbm_to_smem %s10635_s27, 16, %s4997_s24, [#allocation5]  }
  0x37   :  { %p4874_p9 = por %p4873_p8, %p4872_p7 }
  0x39   :  { %p4875_p10 = pnand %p4874_p9, %p4868_p6 }
  0x3b   :  { %4878 = shalt.err (!%p4875_p10)
}
  0x3c   :  { %s10325_s30 = smov 128   ;;  %s5000_s0 = smov 8  }
  0x3d   :  { %47 = dma.hbm_to_vmem [thread:$0]  %s10107_s1, 256, %s42_s29, [#allocation3], %s10325_s30, %s10325_s30, %s5000_s0  }
  0x3e   :  { %s5001_s18 = smov [#allocation9]   ;;  %s5002_s20 = smov [#allocation12]  }
  0x3f   :  { %s64_s19 = sshll.u32 %s5001_s18, 4  ;;  %s90_s2 = sshll.u32 %s5002_s20, 4  ;;  %s65_s19 = int_to_ptr.vmem [resolvable:$true] %s64_s19  ;;  %s91_s2 = int_to_ptr.vmem [resolvable:$true] %s90_s2 }
  0x40   :  { %s4887_s21 = scalar_lea.vmem %s65_s19, 32  ;;  %p4892_p12 = scmp.lt.s32.totalorder %s65_s19, %s65_s19 }
  0x41   :  { %p4888_p11 = scmp.ne.s32.totalorder %s65_s19, %s4887_s21  ;;  %p4893_p13 = scmp.lt.s32.totalorder %s4887_s21, %s4887_s21 }
  0x43   :  { %p4894_p0 = por %p4893_p13, %p4892_p12 }
  0x45   :  { %p4895_p1 = pnand %p4894_p0, %p4888_p11 }
  0x47   :  { %4898 = shalt.err (!%p4895_p1)
}
  0x48   :  { %67 = dma.hbm_to_vmem [thread:$0]  %s10109_s3, 32, %s65_s19, [#allocation8]  }
  0x49   :  { %s4907_s23 = scalar_lea.vmem %s91_s2, 64  ;;  %p4912_p3 = scmp.lt.s32.totalorder %s91_s2, %s91_s2 }
  0x4a   :  { %p4908_p2 = scmp.ne.s32.totalorder %s91_s2, %s4907_s23  ;;  %p4913_p4 = scmp.lt.s32.totalorder %s4907_s23, %s4907_s23 }
  0x4c   :  { %p4914_p5 = por %p4913_p4, %p4912_p3 }
  0x4e   :  { %p4915_p6 = pnand %p4914_p5, %p4908_p2 }
  0x50   :  { %4918 = shalt.err (!%p4915_p6)
}
  0x51   :  { %93 = dma.hbm_to_vmem [thread:$0]  %s10114_s8, 64, %s91_s2, [#allocation11]  }
  0x52   :  { %s5003_s25 = smov [#allocation15]   ;;  %s5004_s27 = smov [#allocation18]  }
  0x53   :  { %s114_s26 = sshll.u32 %s5003_s25, 4  ;;  %s136_s28 = sshll.u32 %s5004_s27, 4  ;;  %s115_s26 = int_to_ptr.vmem [resolvable:$true] %s114_s26  ;;  %s137_s28 = int_to_ptr.vmem [resolvable:$true] %s136_s28 }
  0x54   :  { %s4927_s29 = scalar_lea.vmem %s115_s26, 64  ;;  %p4932_p8 = scmp.lt.s32.totalorder %s115_s26, %s115_s26 }
  0x55   :  { %p4928_p7 = scmp.ne.s32.totalorder %s115_s26, %s4927_s29  ;;  %p4933_p9 = scmp.lt.s32.totalorder %s4927_s29, %s4927_s29 }
  0x57   :  { %p4934_p10 = por %p4933_p9, %p4932_p8 }
  0x59   :  { %p4935_p11 = pnand %p4934_p10, %p4928_p7 }
  0x5b   :  { %4938 = shalt.err (!%p4935_p11)
}
  0x5c   :  { %117 = dma.hbm_to_vmem [thread:$0]  %s10118_s12, 64, %s115_s26, [#allocation14]  }
  0x5d   :  { %s4947_s13 = scalar_lea.vmem %s137_s28, 64  ;;  %p4952_p13 = scmp.lt.s32.totalorder %s137_s28, %s137_s28 }
  0x5e   :  { %p4948_p12 = scmp.ne.s32.totalorder %s137_s28, %s4947_s13  ;;  %p4953_p0 = scmp.lt.s32.totalorder %s4947_s13, %s4947_s13 }
  0x60   :  { %p4954_p1 = por %p4953_p0, %p4952_p13 }
  0x62   :  { %p4955_p2 = pnand %p4954_p1, %p4948_p12 }
  0x64   :  { %4958 = shalt.err (!%p4955_p2)
}
  0x65   :  { %139 = dma.hbm_to_vmem [thread:$0]  %s10121_s15, 64, %s137_s28, [#allocation17]  }
  0x66   :  { %4979 = dma.done.wait [#allocation5], 16  }
  0x67   :  { %4980 = vsyncadd [#allocation5], 4294967280 }
  0x68   :  { %4981 = dma.done.wait [#allocation3], 256  }
  0x69   :  { %4982 = vsyncadd [#allocation3], 4294967040 }
  0x6a   :  { %4983 = dma.done.wait [#allocation8], 64  }
  0x6b   :  { %4984 = vsyncadd [#allocation8], 4294967232 }
  0x6c   :  { %4985 = dma.done.wait [#allocation11], 128  }
  0x6d   :  { %4986 = vsyncadd [#allocation11], 4294967168 }
  0x6e   :  { %4987 = dma.done.wait [#allocation14], 128  }
  0x6f   :  { %4988 = vsyncadd [#allocation14], 4294967168 }
  0x70   :  { %4989 = dma.done.wait [#allocation17], 128  }
  0x71   :  { %4990 = vsyncadd [#allocation17], 4294967168 }
  0x72   :  { %170 = sfence }
  0x73   :  { %v5186_v0 = vld [vmem:[#allocation6] sm:$0xff]  ;;  %v5188_v1 = vld [vmem:[#allocation6 + $0x8] sm:$0xff]  ;;  %s5005_s12 = smov 17   ;;  %v10129_v4 = vmov 0   ;;  %s5007_s15 = smov 16   ;;  %v10123_v12 = vmov 0.0   ;;  %v191_v28 = vlaneseq }
  0x74   :  { %183 = vrot.lane.b32.xlu0 %v5186_v0, %s5005_s12  ;;  %v5194_v2 = vcombine.high %v5186_v0, %v5186_v0  ;;  %v5200_v3 = vcombine.high %v5188_v1, %v5188_v1  ;;  %s5008_s18 = smov 15   ;;  %s5009_s19 = smov 1   ;;  %v5262_v5 = vmax.f32 %v5186_v0, 0.0  ;;  %v5265_v6 = vmax.f32 %v5188_v1, 0.0  ;;  %v5274_v7 = vld [vmem:[%s10110_s4] sm:$0xf] }
  0x75   :  { %4628 = vset.pattern.permute.xlu0 %v10129_v4  ;;  %s5010_s20 = smov 127   ;;  %s5011_s2 = smov 113   ;;  %10638 = vst [vmem:[#allocation29_spill] sm:$0xff] %v5274_v7  ;;  %v173_v10 = vld [vmem:[#allocation7] sm:$0x3]  ;;  %v10125_v16 = vmov 4  }
  0x76   :  { %187 = vrot.lane.b32.xlu1 %v5194_v2, %s5005_s12  ;;  %s5012_s21 = smov 112   ;;  %s5013_s22 = smov 111   ;;  %10636 = vst [vmem:[#allocation27_spill] sm:$0xff] %v5262_v5  ;;  %10637 = vst [vmem:[#allocation28_spill] sm:$0xff] %v5265_v6  ;;  %v5280_v8 = vcombine.high %v5262_v5, %v5262_v5  ;;  %v5287_v9 = vcombine.high %v5265_v6, %v5265_v6  ;;  %v174_v11 = vld [vmem:[#allocation9] sm:$0x3] }
  0x77   :  { %vm198_vm0 = vcmp.ge.f32.partialorder %v173_v10, 1.0  ;;  %vm199_vm1 = vcmp.le.f32.partialorder %v173_v10, 16.0  ;;  %vm202_vm2 = vcmp.ge.f32.partialorder %v174_v11, 1.0  ;;  %vm203_vm3 = vcmp.le.f32.partialorder %v174_v11, 16.0  ;;  %4630 = vset.pattern.permute.xlu1 %v10125_v16  ;;  %s5025_s25 = smov 33   ;;  %s5026_s26 = smov 32  }
  0x78   :  { %185 = vrot.lane.b32.xlu0 %v5188_v1, %s5005_s12  ;;  %10639 = vst [vmem:[#allocation30_spill] sm:$0xff] %v5280_v8  ;;  %10640 = vst [vmem:[#allocation31_spill] sm:$0xff] %v5287_v9  ;;  %vm304_vm6 = vcmp.ge.f32.partialorder %v174_v11, -1.0  ;;  %vm305_vm7 = vcmp.le.f32.partialorder %v174_v11, 14.0  ;;  %v10127_v17 = vmov 3   ;;  %vm477_vm9 = vcmp.ge.f32.partialorder %v173_v10, -1.0 }
  0x79   :  { %vm200_vm4 = vmand %vm198_vm0, %vm199_vm1  ;;  %vm478_vm10 = vcmp.le.f32.partialorder %v173_v10, 14.0  ;;  %v5335_v32 = vshrl.u32 %v191_v28, 7  ;;  %v5347_v38 = vand.u32 127, %v191_v28  ;;  %s5027_s27 = smov 31   ;;  %s5028_s28 = smov 30  }
  0x7a   :  { %189 = vrot.lane.b32.xlu1 %v5200_v3, %s5005_s12  ;;  %vm204_vm5 = vmand %vm202_vm2, %vm203_vm3  ;;  %v5302_v13 = vsel %vm200_vm4, 1.0, %v10123_v12  ;;  %s5029_s29 = smov 18   ;;  %s5030_s3 = smov 14  }
  0x7b   :  { %10641 = vst [vmem:[#allocation32_spill] sm:$0xff] %v5302_v13  ;;  %v5305_v14 = vsel %vm204_vm5, 1.0, %v10123_v12  ;;  %vm306_vm8 = vmand %vm304_vm6, %vm305_vm7  ;;  %vm251_vm12 = vcmp.gt.f32.partialorder %v5302_v13, 0.5  ;;  %v5350_v39 = vsub.s32 0, %v5335_v32  ;;  %v5353_v40 = vsub.s32 1, %v5335_v32  ;;  %s5032_s10 = smov 2  }
  0x7c   :  { %238 = vrot.lane.b32.xlu0 %v5186_v0, %s5007_s15  ;;  %10642 = vst [vmem:[#allocation33_spill] sm:$0xff] %v5305_v14  ;;  %v206_v15 = vmul.f32 %v5305_v14, %v5302_v13  ;;  %v5312_v18 = vsel %vm306_vm8, 1.0, %v10123_v12  ;;  %vm479_vm11 = vmand %vm477_vm9, %vm478_vm10  ;;  %v252_v35 = vsel %vm251_vm12, 1, %v10129_v4  ;;  %vm193_vm15 = vcmp.lt.s32.totalorder %v5347_v38, 17  ;;  %s5035_s13 = smov 126   ;;  %s5037_s8 = smov 114  }
  0x7d   :  { %10643 = vst [vmem:[#allocation34_spill] sm:$0xff] %v5312_v18  ;;  %v5321_v22 = vmul.f32 %v5312_v18, %v5302_v13  ;;  %10644 = vst [vmem:[#allocation35_spill] sm:$0xff] %v5335_v32  ;;  %v5341_v34 = vsel %vm479_vm11, 1.0, %v10123_v12  ;;  %v256_v44 = vrot.slane %v252_v35, %v5350_v39  ;;  %v260_v45 = vrot.slane %v252_v35, %v5353_v40  ;;  %s5041_s17 = smov 110   ;;  %s5043_s6 = smov 98  }
  0x7e   :  { %240 = vrot.lane.b32.xlu1 %v5188_v1, %s5007_s15  ;;  %v290_v20 = vadd.f32 %v206_v15, %v5302_v13  ;;  %vm207_vm13 = vcmp.gt.f32.partialorder %v206_v15, 0.5  ;;  %10645 = vst [vmem:[#allocation36_spill] sm:$0xff] %v5341_v34  ;;  %10646 = vst [vmem:[#allocation37_spill] sm:$0xff] %v5350_v39  ;;  %v481_v43 = vmul.f32 %v5341_v34, %v5305_v14  ;;  %vm246_vm0 = vcmp.lt.s32.totalorder %v5347_v38, 16  ;;  %s5045_s23 = smov 97   ;;  %s5049_s4 = smov 96  }
  0x7f   :  { %10647 = vst [vmem:[#allocation38_spill] sm:$0xff] %v5353_v40  ;;  %v208_v41 = vsel %vm207_vm13, 1, %v10129_v4  ;;  %vm309_vm14 = vcmp.gt.f32.partialorder %v5321_v22, 0.5  ;;  %vm362_vm1 = vcmp.gt.f32.partialorder %v5305_v14, 0.5  ;;  %v5371_v50 = vrot.slane %v206_v15, %v5350_v39  ;;  %s5051_s1 = smov 95  }
  0x80   :  { %242 = vrot.lane.b32.xlu0 %v5194_v2, %s5007_s15  ;;  %v348_v24 = vadd.f32 %v5321_v22, %v290_v20  ;;  %v212_v48 = vrot.slane %v208_v41, %v5350_v39  ;;  %v216_v49 = vrot.slane %v208_v41, %v5353_v40  ;;  %v5375_v51 = vrot.slane %v5302_v13, %v5350_v39 }
  0x81   :  { %10648 = vst [vmem:[#allocation39_spill] sm:$0xff] %v5371_v50  ;;  %v5379_v52 = vrot.slane %v5302_v13, %v5353_v40  ;;  %v310_v53 = vsel %vm309_vm14, 1, %v10129_v4  ;;  %v5385_v55 = vrot.slane %v206_v15, %v5353_v40  ;;  %vm5387_vm2 = vcmp.eq.s32.totalorder %v256_v44, 1 }
  0x82   :  { %244 = vrot.lane.b32.xlu1 %v5200_v3, %s5007_s15  ;;  %v401_v27 = vadd.f32 %v348_v24, %v5305_v14  ;;  %10649 = vst [vmem:[#allocation40_spill] sm:$0xff] %v5375_v51  ;;  %vm5391_vm3 = vcmp.eq.s32.totalorder %v260_v45, 1  ;;  %vm424_vm4 = vcmp.gt.f32.partialorder %v5312_v18, 0.5  ;;  %v363_v59 = vsel %vm362_vm1, 1, %v10129_v4 }
  0x83   :  { %10650 = vst [vmem:[#allocation41_spill] sm:$0xff] %v5379_v52  ;;  %10651 = vst [vmem:[#allocation42_spill] sm:$0xff] %v5385_v55  ;;  %vm482_vm5 = vcmp.gt.f32.partialorder %v481_v43, 0.5  ;;  %v5401_v60 = vmul.f32 %v5341_v34, %v5312_v18  ;;  %vm5404_vm6 = vcmp.eq.s32.totalorder %v212_v48, 1  ;;  %vm5408_vm7 = vcmp.eq.s32.totalorder %v216_v49, 1 }
  0x84   :  { %291 = vrot.lane.b32.xlu0 %v5186_v0, %s5008_s18  ;;  %v410_v31 = vadd.f32 1.0, %v401_v27  ;;  %v314_v10 = vrot.slane %v310_v53, %v5350_v39  ;;  %v318_v11 = vrot.slane %v310_v53, %v5353_v40  ;;  %vm299_vm8 = vcmp.lt.s32.totalorder %v5347_v38, 15 }
  0x85   :  { %v5419_v20 = vrot.slane %v5305_v14, %v5350_v39  ;;  %v5423_v24 = vrot.slane %v5305_v14, %v5353_v40  ;;  %v425_v27 = vsel %vm424_vm4, 1, %v10129_v4  ;;  %vm535_vm9 = vcmp.gt.f32.partialorder %v5341_v34, 0.5 }
  0x86   :  { %293 = vrot.lane.b32.xlu1 %v5188_v1, %s5008_s18  ;;  %v463_v37 = vadd.f32 %v410_v31, %v5312_v18  ;;  %v5429_v28 = vrot.slane %v5321_v22, %v5350_v39  ;;  %v367_v31 = vrot.slane %v363_v59, %v5350_v39  ;;  %v371_v35 = vrot.slane %v363_v59, %v5353_v40 }
  0x87   :  { %10660 = vst [vmem:[#allocation43_spill] sm:$0xff] %v5419_v20  ;;  %10661 = vst [vmem:[#allocation44_spill] sm:$0xff] %v5423_v24  ;;  %v5439_v41 = vrot.slane %v5321_v22, %v5353_v40  ;;  %vm10484_vm10 = vcmp.lt.s32.totalorder %v5347_v38, 1  ;;  %v5444_v45 = vrot.slane %v5312_v18, %v5350_v39  ;;  %vm5451_vm11 = vcmp.eq.s32.totalorder %v314_v10, 1 }
  0x88   :  { %295 = vrot.lane.b32.xlu0 %v5194_v2, %s5008_s18  ;;  %v521_v47 = vadd.f32 %v481_v43, %v463_v37  ;;  %10662 = vst [vmem:[#allocation45_spill] sm:$0xff] %v5429_v28  ;;  %v5435_v37 = vsel %vm482_vm5, 1, %v10129_v4  ;;  %vm5455_vm12 = vcmp.eq.s32.totalorder %v318_v11, 1  ;;  %v429_v53 = vrot.slane %v425_v27, %v5350_v39 }
  0x89   :  { %10663 = vst [vmem:[#allocation46_spill] sm:$0xff] %v5439_v41  ;;  %10664 = vst [vmem:[#allocation47_spill] sm:$0xff] %v5444_v45  ;;  %v433_v59 = vrot.slane %v425_v27, %v5353_v40  ;;  %v5462_v12 = vrot.slane %v481_v43, %v5350_v39  ;;  %v5467_v16 = vsel %vm535_vm9, 1, %v10129_v4  ;;  %vm589_vm13 = vcmp.gt.f32.partialorder %v5401_v60, 0.5 }
  0x8a   :  { %297 = vrot.lane.b32.xlu1 %v5200_v3, %s5008_s18  ;;  %v574_v61 = vadd.f32 %v521_v47, %v5341_v34  ;;  %v5448_v47 = vrot.slane %v5312_v18, %v5353_v40  ;;  %vm5485_vm14 = vcmp.eq.s32.totalorder %v367_v31, 1  ;;  %vm5489_vm1 = vcmp.eq.s32.totalorder %v371_v35, 1 }
  0x8b   :  { %10670 = vst [vmem:[#allocation49_spill] sm:$0xff] %v5462_v12  ;;  %v5499_v13 = vrot.slane %v5341_v34, %v5353_v40  ;;  %vm10471_vm4 = vcmp.lt.s32.totalorder %v5347_v38, 127  ;;  %vm5583_vm5 = vcmp.eq.s32.totalorder %v429_v53, 1  ;;  %vm10336_vm9 = vcmp.lt.s32.totalorder %v5347_v38, 112 }
  0x8c   :  { %349 = vrot.lane.b32.xlu0 %v5186_v0, %s5009_s19  ;;  %10665 = vst [vmem:[#allocation48_spill] sm:$0xff] %v5448_v47  ;;  %v628_v48 = vadd.f32 %v5401_v60, %v574_v61  ;;  %v10693_v11 = vrot.slane %v5467_v16, %v5350_v39 }
  0x8d   :  { %10677 = vst [vmem:[#allocation52_spill] sm:$0xff] %v5499_v13 }
  0x8e   :  { %351 = vrot.lane.b32.xlu1 %v5188_v1, %s5009_s19  ;;  %4747 = vrcp.f32 %v628_v48 }
  0x90   :  { %353 = vrot.lane.b32.xlu0 %v5194_v2, %s5009_s19 }
  0x92   :  { %355 = vrot.lane.b32.xlu1 %v5200_v3, %s5009_s19 }
  0x94   :  { %411 = vrot.lane.b32.xlu0 %v5186_v0, %s5010_s20 }
  0x96   :  { %413 = vrot.lane.b32.xlu1 %v5188_v1, %s5010_s20 }
  0x98   :  { %415 = vrot.lane.b32.xlu0 %v5194_v2, %s5010_s20 }
  0x9a   :  { %417 = vrot.lane.b32.xlu1 %v5200_v3, %s5010_s20 }
  0x9c   :  { %464 = vrot.lane.b32.xlu0 %v5186_v0, %s5011_s2 }
  0x9e   :  { %466 = vrot.lane.b32.xlu1 %v5188_v1, %s5011_s2 }
  0xa0   :  { %468 = vrot.lane.b32.xlu0 %v5194_v2, %s5011_s2 }
  0xa2   :  { %470 = vrot.lane.b32.xlu1 %v5200_v3, %s5011_s2 }
  0xa4   :  { %522 = vrot.lane.b32.xlu0 %v5186_v0, %s5012_s21 }
  0xa6   :  { %524 = vrot.lane.b32.xlu1 %v5188_v1, %s5012_s21 }
  0xa8   :  { %526 = vrot.lane.b32.xlu0 %v5194_v2, %s5012_s21 }
  0xaa   :  { %528 = vrot.lane.b32.xlu1 %v5200_v3, %s5012_s21 }
  0xac   :  { %575 = vrot.lane.b32.xlu0 %v5186_v0, %s5013_s22 }
  0xae   :  { %577 = vrot.lane.b32.xlu1 %v5188_v1, %s5013_s22 }
  0xb0   :  { %579 = vrot.lane.b32.xlu0 %v5194_v2, %s5013_s22 }
  0xb2   :  { %581 = vrot.lane.b32.xlu1 %v5200_v3, %s5013_s22 }
  0xb4   :  { %771 = vrot.lane.b32.xlu0 %v5265_v6, %s5005_s12 }
  0xb6   :  { %769 = vrot.lane.b32.xlu1 %v5262_v5, %s5005_s12 }
  0xb8   :  { %787 = vperm.xlu0 %4628, %v5274_v7  }
  0xba   :  { %773 = vrot.lane.b32.xlu1 %v5280_v8, %s5005_s12 }
  0xbc   :  { %798 = vrot.lane.b32.xlu0 %v5280_v8, %s5007_s15 }
  0xbd   :  { %4629 = vset.pattern.permute.xlu0 %v10127_v17  ;;  %v5474_v17 = vrot.slane %v481_v43, %v5353_v40  ;;  %v5495_v43 = vrot.slane %v5341_v34, %v5350_v39 }
  0xbe   :  { %775 = vrot.lane.b32.xlu1 %v5287_v9, %s5005_s12 }
  0xbf   :  { %10671 = vst [vmem:[#allocation50_spill] sm:$0xff] %v5474_v17  ;;  %10676 = vst [vmem:[#allocation51_spill] sm:$0xff] %v5495_v43 }
  0xc2   :  { %794 = vrot.lane.b32.xlu1 %v5262_v5, %s5007_s15 }
  0xc6   :  { %796 = vrot.lane.b32.xlu1 %v5265_v6, %s5007_s15 }
  0xca   :  { %800 = vrot.lane.b32.xlu1 %v5287_v9, %s5007_s15 }
  0xce   :  { %822 = vrot.lane.b32.xlu1 %v5262_v5, %s5008_s18 }
  0xe6   :  { %v5314_v19 = vpop.permute.xlu0 %183 }
  0xe8   :  { %v5317_v21 = vpop.permute.xlu1 %187 }
  0xea   :  { %v5323_v23 = vpop.permute.xlu0 %185 }
  0xec   :  { %v5326_v25 = vpop.permute.xlu1 %189 }
  0xed   :  { %v5517_v34 = vsel %vm193_vm15, %v5323_v23, %v5326_v25  ;;  %v5523_v18 = vsel %vm193_vm15, %v5326_v25, %v5323_v23 }
  0xee   :  { %v5328_v26 = vpop.permute.xlu0 %238  ;;  %10678 = vst [vmem:[#allocation53_spill] sm:$0xff] %v5517_v34  ;;  %10679 = vst [vmem:[#allocation54_spill] sm:$0xff] %v5523_v18 }
  0xf0   :  { %v5331_v29 = vpop.permute.xlu1 %240 }
  0xf2   :  { %v5333_v30 = vpop.permute.xlu0 %242 }
  0xf3   :  { %v247_v27 = vsel %vm246_vm0, %v5328_v26, %v5333_v30  ;;  %v249_v4 = vsel %vm246_vm0, %v5333_v30, %v5328_v26  ;;  %v194_v26 = vsel %vm193_vm15, %v5314_v19, %v5317_v21  ;;  %v196_v30 = vsel %vm193_vm15, %v5317_v21, %v5314_v19 }
  0xf4   :  { %v5338_v33 = vpop.permute.xlu1 %244  ;;  %v10680_v21 = vmov 0   ;;  %v263_v48 = vsel %vm5387_vm2, %v249_v4, -inf  ;;  %v264_v35 = vsel %vm5391_vm3, %v247_v27, -inf  ;;  %v278_v32 = vmul.f32 %v5375_v51, %v249_v4 }
  0xf5   :  { %v5528_v14 = vsel %vm589_vm13, 1, %v10680_v21  ;;  %v279_v7 = vmul.f32 %v5379_v52, %v247_v27  ;;  %v219_v23 = vsel %vm5404_vm6, %v196_v30, -inf  ;;  %v220_v25 = vsel %vm5408_vm7, %v194_v26, -inf }
  0xf6   :  { %v5344_v36 = vpop.permute.xlu0 %291  ;;  %v234_v19 = vmul.f32 %v5371_v50, %v196_v30  ;;  %v235_v21 = vmul.f32 %v5385_v55, %v194_v26  ;;  %v221_v4 = vsel %vm5404_vm6, %v5523_v18, -inf  ;;  %v222_v27 = vsel %vm5408_vm7, %v5517_v34, -inf }
  0xf7   :  { %v5555_v9 = vsel %vm246_vm0, %v5331_v29, %v5338_v33  ;;  %v5561_v26 = vsel %vm246_vm0, %v5338_v33, %v5331_v29  ;;  %v282_v55 = vmax.f32 %v219_v23, %v263_v48  ;;  %v283_v62 = vmax.f32 %v220_v25, %v264_v35 }
  0xf8   :  { %v5356_v42 = vpop.permute.xlu1 %293  ;;  %v286_v50 = vadd.f32 %v278_v32, %v234_v19  ;;  %v287_v18 = vadd.f32 %v279_v7, %v235_v21  ;;  %vm5587_vm6 = vcmp.eq.s32.totalorder %v433_v59, 1  ;;  %v265_v32 = vsel %vm5387_vm2, %v5561_v26, -inf }
  0xf9   :  { %vm10433_vm2 = vcmp.lt.s32.totalorder %v5347_v38, 113  ;;  %vm10328_vm13 = vcmp.lt.s32.totalorder %v5347_v38, 111 }
  0xfa   :  { %v5363_v46 = vpop.permute.xlu0 %295 }
  0xfb   :  { %v300_v63 = vsel %vm299_vm8, %v5344_v36, %v5363_v46  ;;  %v302_v34 = vsel %vm299_vm8, %v5363_v46, %v5344_v36  ;;  %v266_v46 = vsel %vm5391_vm3, %v5555_v9, -inf }
  0xfc   :  { %v5382_v54 = vpop.permute.xlu1 %297  ;;  %v321_v53 = vsel %vm5451_vm11, %v302_v34, -inf  ;;  %v322_v59 = vsel %vm5455_vm12, %v300_v63, -inf  ;;  %v336_v56 = vmul.f32 %v5429_v28, %v302_v34  ;;  %v337_v19 = vmul.f32 %v5439_v41, %v300_v63 }
  0xfd   :  { %v5575_v29 = vsel %vm299_vm8, %v5356_v42, %v5382_v54  ;;  %v5581_v33 = vsel %vm299_vm8, %v5382_v54, %v5356_v42  ;;  %v284_v63 = vmax.f32 %v221_v4, %v265_v32  ;;  %v285_v41 = vmax.f32 %v222_v27, %v266_v46  ;;  %v4748_v32 = vpop.eup %4747 }
  0xfe   :  { %v5396_v58 = vpop.permute.xlu0 %349  ;;  %10681 = vst [vmem:[#allocation55_spill] sm:$0xff] %v5575_v29  ;;  %10682 = vst [vmem:[#allocation56_spill] sm:$0xff] %v5581_v33  ;;  %v323_v21 = vsel %vm5451_vm11, %v5581_v33, -inf  ;;  %v341_v28 = vmax.f32 %v283_v62, %v322_v59  ;;  %v10687_v33 = vrot.slane %v5435_v37, %v5350_v39  ;;  %v344_v4 = vadd.f32 %v336_v56, %v286_v50 }
  0xff   :  { %v345_v27 = vadd.f32 %v337_v19, %v287_v18  ;;  %v342_v46 = vmax.f32 %v284_v63, %v323_v21  ;;  %vm5662_vm11 = vcmp.eq.s32.totalorder %v10693_v11, 1 }
 0x100   :  { %v5415_v15 = vpop.permute.xlu1 %351  ;;  %vm5635_vm3 = vcmp.eq.s32.totalorder %v10687_v33, 1 }
 0x102   :  { %v354_v44 = vpop.permute.xlu0 %353 }
 0x103   :  { %v358_v42 = vsel %vm10484_vm10, %v5396_v58, %v354_v44  ;;  %v360_v54 = vsel %vm10484_vm10, %v354_v44, %v5396_v58  ;;  %v324_v58 = vsel %vm5455_vm12, %v5575_v29, -inf  ;;  %v340_v29 = vmax.f32 %v282_v55, %v321_v53 }
 0x104   :  { %v356_v61 = vpop.permute.xlu1 %355  ;;  %v374_v48 = vsel %vm5485_vm14, %v360_v54, -inf  ;;  %v375_v49 = vsel %vm5489_vm1, %v358_v42, -inf  ;;  %v389_v23 = vmul.f32 %v5419_v20, %v360_v54  ;;  %v390_v22 = vmul.f32 %v5423_v24, %v358_v42 }
 0x105   :  { %v5619_v44 = vsel %vm10484_vm10, %v5415_v15, %v356_v61  ;;  %v5624_v34 = vsel %vm10484_vm10, %v356_v61, %v5415_v15  ;;  %v10690_v61 = vrot.slane %v5435_v37, %v5353_v40  ;;  %v343_v37 = vmax.f32 %v285_v41, %v324_v58 }
 0x106   :  { %v5509_v31 = vpop.permute.xlu0 %411  ;;  %v376_v55 = vsel %vm5485_vm14, %v5624_v34, -inf  ;;  %v377_v62 = vsel %vm5489_vm1, %v5619_v44, -inf  ;;  %v393_v42 = vmax.f32 %v340_v29, %v374_v48  ;;  %v394_v54 = vmax.f32 %v341_v28, %v375_v49 }
 0x107   :  { %vm5642_vm7 = vcmp.eq.s32.totalorder %v10690_v61, 1  ;;  %v397_v53 = vadd.f32 %v389_v23, %v344_v4  ;;  %v398_v59 = vadd.f32 %v390_v22, %v345_v27  ;;  %v10696_v28 = vrot.slane %v5467_v16, %v5353_v40 }
 0x108   :  { %v5536_v5 = vpop.permute.xlu1 %413  ;;  %v395_v29 = vmax.f32 %v342_v46, %v376_v55  ;;  %v396_v19 = vmax.f32 %v343_v37, %v377_v62  ;;  %v5679_v58 = vrot.slane %v5401_v60, %v5350_v39  ;;  %v5683_v16 = vrot.slane %v5401_v60, %v5353_v40 }
 0x109   :  { %vm5669_vm12 = vcmp.eq.s32.totalorder %v10696_v28, 1  ;;  %v5686_v48 = vrot.slane %v4748_v32, %v5350_v39  ;;  %v5689_v49 = vrot.slane %v4748_v32, %v5353_v40  ;;  %v402_v23 = vmax.f32 %v393_v42, %v5186_v0 }
 0x10a   :  { %v416_v30 = vpop.permute.xlu0 %415  ;;  %10699 = vst [vmem:[#allocation57_spill] sm:$0xff] %v5679_v58  ;;  %10700 = vst [vmem:[#allocation58_spill] sm:$0xff] %v5683_v16  ;;  %v403_v22 = vmax.f32 %v394_v54, %v5194_v2  ;;  %v406_v61 = vadd.f32 %v397_v53, %v5186_v0  ;;  %v407_v60 = vadd.f32 %v398_v59, %v5194_v2 }
 0x10b   :  { %v420_v18 = vsel %vm10471_vm4, %v5509_v31, %v416_v30  ;;  %v422_v50 = vsel %vm10471_vm4, %v416_v30, %v5509_v31  ;;  %v594_v31 = vrot.slane %v5528_v14, %v5350_v39  ;;  %v598_v30 = vrot.slane %v5528_v14, %v5353_v40 }
 0x10c   :  { %v418_v7 = vpop.permute.xlu1 %417  ;;  %v436_v14 = vsel %vm5583_vm5, %v420_v18, -inf  ;;  %v437_v63 = vsel %vm5587_vm6, %v422_v50, -inf  ;;  %v404_v62 = vmax.f32 %v395_v29, %v5188_v1  ;;  %v405_v32 = vmax.f32 %v396_v19, %v5200_v3 }
 0x10d   :  { %v5702_v4 = vsel %vm10471_vm4, %v5536_v5, %v418_v7  ;;  %v5707_v27 = vsel %vm10471_vm4, %v418_v7, %v5536_v5  ;;  %vm5716_vm14 = vcmp.eq.s32.totalorder %v594_v31, 1  ;;  %vm5720_vm1 = vcmp.eq.s32.totalorder %v598_v30, 1 }
 0x10e   :  { %v465_v57 = vpop.permute.xlu0 %464  ;;  %v451_v7 = vmul.f32 %v5444_v45, %v420_v18  ;;  %v452_v37 = vmul.f32 %v5448_v47, %v422_v50  ;;  %v455_v42 = vmax.f32 %v402_v23, %v436_v14  ;;  %v456_v54 = vmax.f32 %v403_v22, %v437_v63 }
 0x10f   :  { %v438_v59 = vsel %vm5583_vm5, %v5702_v4, -inf  ;;  %vm651_vm5 = vcmask 1043456  }
 0x110   :  { %v467_v25 = vpop.permute.xlu1 %466  ;;  %v459_v31 = vadd.f32 %v451_v7, %v406_v61  ;;  %v460_v30 = vadd.f32 %v452_v37, %v407_v60  ;;  %v457_v14 = vmax.f32 %v404_v62, %v438_v59 }
 0x112   :  { %v469_v33 = vpop.permute.xlu0 %468 }
 0x113   :  { %v473_v0 = vsel %vm10433_vm2, %v465_v57, %v469_v33  ;;  %v475_v2 = vsel %vm10433_vm2, %v469_v33, %v465_v57  ;;  %v439_v57 = vsel %vm5587_vm6, %v5707_v27, -inf }
 0x114   :  { %v471_v10 = vpop.permute.xlu1 %470  ;;  %v494_v50 = vsel %vm5635_vm3, %v473_v0, -inf  ;;  %v495_v11 = vsel %vm5642_vm7, %v475_v2, -inf  ;;  %v509_v29 = vmul.f32 %v5462_v12, %v473_v0  ;;  %v510_v19 = vmul.f32 %v5474_v17, %v475_v2 }
 0x115   :  { %v5734_v33 = vsel %vm10433_vm2, %v467_v25, %v471_v10  ;;  %v5738_v18 = vsel %vm10433_vm2, %v471_v10, %v467_v25  ;;  %v458_v63 = vmax.f32 %v405_v32, %v439_v57  ;;  %v513_v2 = vmax.f32 %v455_v42, %v494_v50 }
 0x116   :  { %v523_v21 = vpop.permute.xlu0 %522  ;;  %v497_v23 = vsel %vm5642_vm7, %v5738_v18, -inf  ;;  %v514_v61 = vmax.f32 %v456_v54, %v495_v11  ;;  %v517_v7 = vadd.f32 %v509_v29, %v459_v31  ;;  %v518_v62 = vadd.f32 %v510_v19, %v460_v30 }
 0x117   :  { %v516_v37 = vmax.f32 %v458_v63, %v497_v23 }
 0x118   :  { %v525_v55 = vpop.permute.xlu1 %524 }
 0x11a   :  { %v527_v53 = vpop.permute.xlu0 %526 }
 0x11b   :  { %v531_v35 = vsel %vm10336_vm9, %v523_v21, %v527_v53  ;;  %v533_v36 = vsel %vm10336_vm9, %v527_v53, %v523_v21  ;;  %v496_v21 = vsel %vm5635_vm3, %v5734_v33, -inf }
 0x11c   :  { %v529_v28 = vpop.permute.xlu1 %528  ;;  %v547_v0 = vsel %vm5662_vm11, %v531_v35, -inf  ;;  %v515_v32 = vmax.f32 %v457_v14, %v496_v21  ;;  %v562_v53 = vmul.f32 %v5495_v43, %v531_v35  ;;  %v563_v59 = vmul.f32 %v5499_v13, %v533_v36 }
 0x11d   :  { %v5752_v25 = vsel %vm10336_vm9, %v525_v55, %v529_v28  ;;  %v5756_v10 = vsel %vm10336_vm9, %v529_v28, %v525_v55  ;;  %v548_v55 = vsel %vm5669_vm12, %v533_v36, -inf  ;;  %v566_v57 = vmax.f32 %v513_v2, %v547_v0 }
 0x11e   :  { %v576_v22 = vpop.permute.xlu0 %575  ;;  %v549_v15 = vsel %vm5662_vm11, %v5752_v25, -inf  ;;  %v550_v52 = vsel %vm5669_vm12, %v5756_v10, -inf  ;;  %v567_v42 = vmax.f32 %v514_v61, %v548_v55  ;;  %v571_v14 = vadd.f32 %v563_v59, %v518_v62 }
 0x11f   :  { %v568_v50 = vmax.f32 %v515_v32, %v549_v15  ;;  %v569_v11 = vmax.f32 %v516_v37, %v550_v52 }
 0x120   :  { %v578_v60 = vpop.permute.xlu1 %577 }
 0x122   :  { %v580_v54 = vpop.permute.xlu0 %579 }
 0x123   :  { %v584_v56 = vsel %vm10328_vm13, %v576_v22, %v580_v54  ;;  %v586_v41 = vsel %vm10328_vm13, %v580_v54, %v576_v22  ;;  %v570_v22 = vadd.f32 %v562_v53, %v517_v7  ;;  %v10711_v54 = vld [vmem:[#allocation41_spill] sm:$0xff] }
 0x124   :  { %v601_v28 = vsel %vm5716_vm14, %v584_v56, -inf  ;;  %v602_v29 = vsel %vm5720_vm1, %v586_v41, -inf  ;;  %v616_v35 = vmul.f32 %v5679_v58, %v584_v56  ;;  %v617_v36 = vmul.f32 %v5683_v16, %v586_v41  ;;  %v582_v19 = vpop.permute.xlu1 %581  ;;  %v10713_v56 = vld [vmem:[#allocation39_spill] sm:$0xff] }
 0x125   :  { %v585_v31 = vsel %vm10328_vm13, %v578_v60, %v582_v19  ;;  %v587_v30 = vsel %vm10328_vm13, %v582_v19, %v578_v60  ;;  %v5790_v21 = vmax.f32 %v566_v57, %v601_v28  ;;  %v5792_v23 = vmax.f32 %v567_v42, %v602_v29  ;;  %v10714_v28 = vld [vmem:[#allocation53_spill] sm:$0xff]  ;;  %v10715_v29 = vld [vmem:[#allocation42_spill] sm:$0xff] }
 0x126   :  { %v603_v63 = vsel %vm5716_vm14, %v585_v31, -inf  ;;  %v604_v0 = vsel %vm5720_vm1, %v587_v30, -inf  ;;  %v624_v60 = vadd.f32 %v616_v35, %v570_v22  ;;  %v625_v7 = vadd.f32 %v617_v36, %v571_v14  ;;  %v10716_v36 = vld [vmem:[#allocation56_spill] sm:$0xff]  ;;  %v10717_v19 = vld [vmem:[#allocation45_spill] sm:$0xff]  ;;  %v10718_v14 = vld [vmem:[#allocation55_spill] sm:$0xff] }
 0x127   :  { %10705 = vst [vmem:[#allocation59_spill] sm:$0xff] %v5790_v21  ;;  %10706 = vst [vmem:[#allocation60_spill] sm:$0xff] %v5792_v23  ;;  %v652_v55 = vsel %vm651_vm5, %v5790_v21, 0.0  ;;  %v653_v2 = vsel %vm651_vm5, %v5792_v23, 0.0  ;;  %v5802_v61 = vmax.f32 %v568_v50, %v603_v63  ;;  %v5804_v15 = vmax.f32 %v569_v11, %v604_v0  ;;  %v10712_v11 = vld [vmem:[#allocation54_spill] sm:$0xff] }
 0x128   :  { %v654_v52 = vadd.f32 %v653_v2, %v652_v55  ;;  %v5811_v32 = vmul.f32 %v5686_v48, %v624_v60  ;;  %v5814_v37 = vmul.f32 %v5689_v49, %v625_v7  ;;  %v280_v42 = vmul.f32 %v5375_v51, %v5561_v26  ;;  %v10719_v63 = vld [vmem:[#allocation46_spill] sm:$0xff]  ;;  %v10720_v26 = vld [vmem:[#allocation31_spill] sm:$0xff] }
 0x129   :  { %10707 = vst [vmem:[#allocation61_spill] sm:$0xff] %v5802_v61  ;;  %10708 = vst [vmem:[#allocation62_spill] sm:$0xff] %v5804_v15  ;;  %v657_v46 = vsel %vm651_vm5, %v5802_v61, 0.0  ;;  %v658_v5 = vsel %vm651_vm5, %v5804_v15, 0.0  ;;  %v281_v50 = vmul.f32 %v10711_v54, %v5555_v9  ;;  %v236_v41 = vmul.f32 %v10713_v56, %v10712_v11 }
 0x12a   :  { %655 = vadd.xlane.f32.xlu0 %v654_v52  ;;  %v659_v62 = vadd.f32 %v658_v5, %v657_v46  ;;  %10709 = vst [vmem:[#allocation63_spill] sm:$0xff] %v5811_v32  ;;  %10710 = vst [vmem:[#allocation64_spill] sm:$0xff] %v5814_v37  ;;  %v707_v53 = vsel %vm651_vm5, %v5811_v32, 0.0  ;;  %v708_v59 = vsel %vm651_vm5, %v5814_v37, 0.0  ;;  %v237_v35 = vmul.f32 %v10715_v29, %v10714_v28  ;;  %v10721_v46 = vld [vmem:[#allocation27_spill] sm:$0xff] }
 0x12b   :  { %v709_v57 = vadd.f32 %v708_v59, %v707_v53  ;;  %v338_v22 = vmul.f32 %v10717_v19, %v10716_v36  ;;  %v339_v0 = vmul.f32 %v10719_v63, %v10718_v14  ;;  %v288_v55 = vadd.f32 %v280_v42, %v236_v41 }
 0x12c   :  { %660 = vadd.xlane.f32.xlu1 %v659_v62  ;;  %v289_v9 = vadd.f32 %v281_v50, %v237_v35  ;;  %v391_v2 = vmul.f32 %v5419_v20, %v5624_v34  ;;  %v392_v52 = vmul.f32 %v5423_v24, %v5619_v44  ;;  %v453_v53 = vmul.f32 %v5444_v45, %v5702_v4 }
 0x12d   :  { %v346_v60 = vadd.f32 %v338_v22, %v288_v55  ;;  %v454_v59 = vmul.f32 %v5448_v47, %v5707_v27  ;;  %v512_v42 = vmul.f32 %v5474_v17, %v5738_v18  ;;  %v564_v4 = vmul.f32 %v5495_v43, %v5752_v25  ;;  %v10722_v18 = vld [vmem:[#allocation29_spill] sm:$0xff]  ;;  %v1013_v55 = vld [vmem:[%s10111_s5] sm:$0xf]  ;;  %s5054_s5 = smov 94  }
 0x12e   :  { %v347_v7 = vadd.f32 %v339_v0, %v289_v9  ;;  %v565_v27 = vmul.f32 %v5499_v13, %v5756_v10  ;;  %v10169_v14 = vmov 5   ;;  %v10163_v9 = vmov 1  }
 0x12f   :  { %v399_v5 = vadd.f32 %v391_v2, %v346_v60  ;;  %v10726_v2 = vmov 3   ;;  %v770_v60 = vpop.permute.xlu1 %769  ;;  %v5023_v32 = vmov 839922192  }
 0x130   :  { %710 = vadd.xlane.f32.xlu1 %v709_v57  ;;  %v400_v62 = vadd.f32 %v392_v52, %v347_v7  ;;  %v511_v57 = vmul.f32 %v5462_v12, %v5734_v33  ;;  %v619_v33 = vmul.f32 %v5683_v16, %v587_v30  ;;  %v10167_v52 = vmov 7  }
 0x131   :  { %v408_v34 = vadd.f32 %v399_v5, %v5188_v1  ;;  %v10161_v5 = vmov 8   ;;  %v882_v15 = vunpack.c.l.s4 %v5023_v32 }
 0x132   :  { %v409_v44 = vadd.f32 %v400_v62, %v5200_v3  ;;  %v618_v3 = vmul.f32 %v5679_v58, %v585_v31 }
 0x133   :  { %v461_v50 = vadd.f32 %v453_v53, %v408_v34  ;;  %v774_v7 = vpop.permute.xlu1 %773  ;;  %v10165_v53 = vmov 2  }
 0x134   :  { %v462_v11 = vadd.f32 %v454_v59, %v409_v44  ;;  %v779_v21 = vsel %vm193_vm15, %v774_v7, %v770_v60 }
 0x135   :  { %v519_v1 = vadd.f32 %v511_v57, %v461_v50 }
 0x136   :  { %v520_v41 = vadd.f32 %v512_v42, %v462_v11 }
 0x137   :  { %v572_v28 = vadd.f32 %v564_v4, %v519_v1  ;;  %v776_v62 = vpop.permute.xlu1 %775  ;;  %v772_v1 = vpop.permute.xlu0 %771 }
 0x138   :  { %v573_v35 = vadd.f32 %v565_v27, %v520_v41 }
 0x139   :  { %v626_v36 = vadd.f32 %v618_v3, %v572_v28 }
 0x13a   :  { %v627_v22 = vadd.f32 %v619_v33, %v573_v35 }
 0x13b   :  { %v5870_v25 = vmul.f32 %v5686_v48, %v626_v36  ;;  %v10725_v48 = vmov 0   ;;  %v795_v59 = vpop.permute.xlu1 %794  ;;  %v788_v3 = vpop.permute.xlu0 %787 }
 0x13c   :  { %v5873_v10 = vmul.f32 %v5689_v49, %v627_v22  ;;  %v10171_v49 = vmov 6  }
 0x13d   :  { %10723 = vst [vmem:[#allocation54_spill] sm:$0xff] %v5870_v25  ;;  %v712_v31 = vsel %vm651_vm5, %v5870_v25, 0.0 }
 0x13e   :  { %10724 = vst [vmem:[#allocation53_spill] sm:$0xff] %v5873_v10  ;;  %v713_v30 = vsel %vm651_vm5, %v5873_v10, 0.0 }
 0x13f   :  { %v714_v0 = vadd.f32 %v713_v30, %v712_v31  ;;  %v797_v34 = vpop.permute.xlu1 %796  ;;  %v799_v28 = vpop.permute.xlu0 %798 }
 0x140   :  { %826 = vrot.lane.b32.xlu0 %v5280_v8, %s5008_s18 }
 0x141   :  { %824 = vrot.lane.b32.xlu1 %v5265_v6, %s5008_s18 }
 0x143   :  { %v801_v44 = vpop.permute.xlu1 %800 }
 0x144   :  { %854 = vrot.lane.b32.xlu0 %v5280_v8, %s5009_s19 }
 0x145   :  { %828 = vrot.lane.b32.xlu1 %v10720_v26, %s5008_s18 }
 0x147   :  { %v5929_v57 = vpop.permute.xlu1 %822 }
 0x149   :  { %850 = vrot.lane.b32.xlu1 %v10721_v46, %s5009_s19 }
 0x14d   :  { %852 = vrot.lane.b32.xlu1 %v5265_v6, %s5009_s19 }
 0x151   :  { %856 = vrot.lane.b32.xlu1 %v10720_v26, %s5009_s19 }
 0x155   :  { %879 = vperm.xlu1 %4630, %v10722_v18  }
 0x159   :  { %901 = vrot.lane.b32.xlu1 %v10721_v46, %s5010_s20 }
 0x15a   :  { %4631 = vset.pattern.permute.xlu1 %v10169_v14 }
 0x15d   :  { %905 = vrot.lane.b32.xlu1 %v5280_v8, %s5010_s20 }
 0x161   :  { %918 = vperm.xlu1 %4631, %v10722_v18  }
 0x163   :  { %715 = vadd.xlane.f32.xlu0 %v714_v0 }
 0x165   :  { %931 = vrot.lane.b32.xlu1 %v5265_v6, %s5011_s2 }
 0x166   :  { %4636 = vset.pattern.permute.xlu1 %v10725_v48 }
 0x169   :  { %935 = vrot.lane.b32.xlu1 %v10720_v26, %s5011_s2 }
 0x16d   :  { %957 = vrot.lane.b32.xlu1 %v10721_v46, %s5012_s21 }
 0x171   :  { %959 = vrot.lane.b32.xlu1 %v5265_v6, %s5012_s21 }
 0x175   :  { %963 = vrot.lane.b32.xlu1 %v10720_v26, %s5012_s21 }
 0x179   :  { %867 = vperm.xlu0 %4629, %v10722_v18   ;;  %985 = vrot.lane.b32.xlu1 %v10721_v46, %s5013_s22 }
 0x17d   :  { %903 = vrot.lane.b32.xlu0 %v5265_v6, %s5010_s20  ;;  %987 = vrot.lane.b32.xlu1 %v5265_v6, %s5013_s22 }
 0x17e   :  { %4632 = vset.pattern.permute.xlu0 %v10171_v49 }
 0x181   :  { %907 = vrot.lane.b32.xlu0 %v10720_v26, %s5010_s20  ;;  %991 = vrot.lane.b32.xlu1 %v10720_v26, %s5013_s22 }
 0x185   :  { %929 = vrot.lane.b32.xlu0 %v10721_v46, %s5011_s2  ;;  %1032 = vperm.xlu1 %4636, %v1013_v55  }
 0x189   :  { %933 = vrot.lane.b32.xlu0 %v5280_v8, %s5011_s2  ;;  %4637 = vset.pattern.permute.xlu1 %v10163_v9 }
 0x18a   :  { %1056 = vperm.xlu1 %4637, %v1013_v55  }
 0x18d   :  { %946 = vperm.xlu0 %4632, %v10722_v18  }
 0x18e   :  { %4639 = vset.pattern.permute.xlu1 %v10726_v2  ;;  %v780_v2 = vsel %vm193_vm15, %v776_v62, %v772_v1 }
 0x18f   :  { %1112 = vperm.xlu1 %4639, %v1013_v55  }
 0x191   :  { %961 = vrot.lane.b32.xlu0 %v5280_v8, %s5012_s21 }
 0x192   :  { %4633 = vset.pattern.permute.xlu0 %v10167_v52 }
 0x193   :  { %4640 = vset.pattern.permute.xlu1 %v10725_v48 }
 0x195   :  { %974 = vperm.xlu0 %4633, %v10722_v18  }
 0x199   :  { %989 = vrot.lane.b32.xlu0 %v5280_v8, %s5013_s22 }
 0x19a   :  { %4634 = vset.pattern.permute.xlu0 %v10161_v5 }
 0x19d   :  { %1002 = vperm.xlu0 %4634, %v10722_v18  }
 0x1a1   :  { %4635 = vset.pattern.permute.xlu0 %v10165_v53 }
 0x1a2   :  { %839 = vperm.xlu0 %4635, %v10722_v18  }
 0x1a6   :  { %1084 = vperm.xlu0 %4635, %v1013_v55  }
 0x1aa   :  { %4638 = vset.pattern.permute.xlu0 %v10163_v9 }
 0x1ab   :  { %811 = vperm.xlu0 %4638, %v10722_v18  }
 0x1b3   :  { %v5943_v18 = vpop.xlane.xlu0 %655 }
 0x1b4   :  { %10729 = vst [vmem:[#allocation29_spill] sm:$0xff] %v5943_v18  ;;  %v778_v18 = vsel %vm193_vm15, %v772_v1, %v776_v62  ;;  %v804_v62 = vsel %vm246_vm0, %v799_v28, %v795_v59  ;;  %v803_v1 = vsel %vm246_vm0, %v797_v34, %v801_v44 }
 0x1b5   :  { %v5931_v42 = vpop.xlane.xlu1 %660 }
 0x1b6   :  { %10727 = vst [vmem:[#allocation56_spill] sm:$0xff] %v5931_v42  ;;  %v5982_v42 = vmul.f32 %v779_v21, %v10713_v56  ;;  %v802_v21 = vsel %vm246_vm0, %v795_v59, %v799_v28  ;;  %v6024_v28 = vmul.f32 %v804_v62, %v5375_v51 }
 0x1b7   :  { %v827_v22 = vpop.permute.xlu0 %826 }
 0x1b8   :  { %10731 = vst [vmem:[#allocation66_spill] sm:$0xff] %v5982_v42  ;;  %10737 = vst [vmem:[#allocation70_spill] sm:$0xff] %v6024_v28 }
 0x1b9   :  { %v5933_v50 = vpop.xlane.xlu1 %710 }
 0x1ba   :  { %10728 = vst [vmem:[#allocation55_spill] sm:$0xff] %v5933_v50  ;;  %v883_v50 = vunpack.c.0.s8 %v882_v15  ;;  %v5992_v15 = vmul.f32 %v780_v2, %v10713_v56  ;;  %v6009_v2 = vmul.f32 %v788_v3, %v5982_v42 }
 0x1bb   :  { %v855_v30 = vpop.permute.xlu0 %854 }
 0x1bc   :  { %10733 = vst [vmem:[#allocation68_spill] sm:$0xff] %v5992_v15 }
 0x1bd   :  { %v5935_v11 = vpop.permute.xlu1 %824 }
 0x1c1   :  { %v5937_v4 = vpop.permute.xlu1 %828 }
 0x1c5   :  { %v5939_v27 = vpop.permute.xlu1 %850 }
 0x1c9   :  { %v5941_v41 = vpop.permute.xlu1 %852 }
 0x1cd   :  { %v857_v33 = vpop.permute.xlu1 %856 }
 0x1d1   :  { %v880_v35 = vpop.permute.xlu1 %879 }
 0x1d5   :  { %v902_v36 = vpop.permute.xlu1 %901 }
 0x1d9   :  { %v906_v31 = vpop.permute.xlu1 %905 }
 0x1da   :  { %v909_v62 = vsel %vm10471_vm4, %v902_v36, %v906_v31 }
 0x1dd   :  { %v5947_v55 = vpop.permute.xlu1 %918 }
 0x1e1   :  { %v5951_v9 = vpop.permute.xlu1 %931 }
 0x1e5   :  { %v5957_v14 = vpop.permute.xlu1 %935 }
 0x1e9   :  { %v5961_v26 = vpop.permute.xlu1 %957 }
 0x1ec   :  { %v5945_v0 = vpop.xlane.xlu0 %715 }
 0x1ed   :  { %10730 = vst [vmem:[#allocation65_spill] sm:$0xff] %v5945_v0  ;;  %v5965_v10 = vpop.permute.xlu1 %959  ;;  %v777_v0 = vsel %vm193_vm15, %v770_v60, %v774_v7  ;;  %v5995_v60 = vmul.f32 %v778_v18, %v10715_v29  ;;  %v10735_v7 = vld [vmem:[#allocation35_spill] sm:$0xff] }
 0x1ee   :  { %v5989_v40 = vmul.f32 %v777_v0, %v10715_v29  ;;  %v5998_v39 = vsub.s32 %v883_v50, %v10735_v7  ;;  %v805_v0 = vsel %vm246_vm0, %v801_v44, %v797_v34  ;;  %v6017_v29 = vmul.f32 %v788_v3, %v5992_v15 }
 0x1ef   :  { %10734 = vst [vmem:[#allocation69_spill] sm:$0xff] %v5995_v60  ;;  %v6020_v56 = vmul.f32 %v788_v3, %v5995_v60  ;;  %v6027_v34 = vmul.f32 %v802_v21, %v10711_v54  ;;  %v6030_v44 = vmul.f32 %v805_v0, %v5375_v51  ;;  %v911_v21 = vsel %vm10471_vm4, %v906_v31, %v902_v36 }
 0x1f0   :  { %10732 = vst [vmem:[#allocation67_spill] sm:$0xff] %v5989_v40  ;;  %10736 = vst [vmem:[#allocation35_spill] sm:$0xff] %v5998_v39  ;;  %v6014_v50 = vmul.f32 %v788_v3, %v5989_v40  ;;  %v887_v59 = vrot.slane %v880_v35, %v5998_v39  ;;  %v6033_v40 = vmul.f32 %v803_v1, %v10711_v54 }
 0x1f1   :  { %v964_v61 = vpop.permute.xlu1 %963  ;;  %10738 = vst [vmem:[#allocation71_spill] sm:$0xff] %v6027_v34  ;;  %10739 = vst [vmem:[#allocation72_spill] sm:$0xff] %v6030_v44  ;;  %v830_v3 = vsel %vm299_vm8, %v5929_v57, %v827_v22  ;;  %v832_v35 = vsel %vm299_vm8, %v827_v22, %v5929_v57  ;;  %v831_v1 = vsel %vm299_vm8, %v5935_v11, %v5937_v4 }
 0x1f2   :  { %10740 = vst [vmem:[#allocation73_spill] sm:$0xff] %v6033_v40  ;;  %v833_v0 = vsel %vm299_vm8, %v5937_v4, %v5935_v11  ;;  %v858_v57 = vsel %vm10484_vm10, %v5939_v27, %v855_v30  ;;  %v860_v22 = vsel %vm10484_vm10, %v855_v30, %v5939_v27  ;;  %v859_v36 = vsel %vm10484_vm10, %v5941_v41, %v857_v33 }
 0x1f3   :  { %v861_v31 = vsel %vm10484_vm10, %v857_v33, %v5941_v41  ;;  %v6066_v39 = vmul.f32 %v887_v59, %v10721_v46  ;;  %v6069_v11 = vmul.f32 %v887_v59, %v5265_v6  ;;  %v6072_v60 = vmul.f32 %v832_v35, %v10717_v19 }
 0x1f4   :  { %v5949_v5 = vpop.permute.xlu0 %867  ;;  %v6075_v27 = vmul.f32 %v830_v3, %v10719_v63  ;;  %v6078_v30 = vmul.f32 %v909_v62, %v5444_v45  ;;  %v6081_v15 = vmul.f32 %v911_v21, %v5448_v47  ;;  %v6084_v41 = vmul.f32 %v833_v0, %v10717_v19 }
 0x1f5   :  { %v5984_v32 = vpop.permute.xlu1 %985  ;;  %10741 = vst [vmem:[#allocation74_spill] sm:$0xff] %v6072_v60  ;;  %v6087_v33 = vmul.f32 %v831_v1, %v10719_v63  ;;  %v6090_v59 = vmul.f32 %v860_v22, %v5419_v20  ;;  %v6093_v35 = vmul.f32 %v858_v57, %v5423_v24  ;;  %v6096_v3 = vmul.f32 %v861_v31, %v5419_v20 }
 0x1f6   :  { %10742 = vst [vmem:[#allocation75_spill] sm:$0xff] %v6075_v27  ;;  %10743 = vst [vmem:[#allocation76_spill] sm:$0xff] %v6078_v30  ;;  %v6099_v62 = vmul.f32 %v859_v36, %v5423_v24  ;;  %v938_v21 = vsel %vm10433_vm2, %v5951_v9, %v5957_v14  ;;  %v940_v1 = vsel %vm10433_vm2, %v5957_v14, %v5951_v9 }
 0x1f7   :  { %10744 = vst [vmem:[#allocation77_spill] sm:$0xff] %v6081_v15  ;;  %10745 = vst [vmem:[#allocation78_spill] sm:$0xff] %v6084_v41  ;;  %v893_v57 = vcombine.high %v6066_v39, %v6066_v39  ;;  %v894_v22 = vcombine.high %v6069_v11, %v6069_v11  ;;  %v966_v36 = vsel %vm10336_vm9, %v5965_v10, %v964_v61 }
 0x1f8   :  { %v5953_v53 = vpop.permute.xlu0 %903  ;;  %10746 = vst [vmem:[#allocation79_spill] sm:$0xff] %v6087_v33  ;;  %10747 = vst [vmem:[#allocation80_spill] sm:$0xff] %v6090_v59  ;;  %v968_v31 = vsel %vm10336_vm9, %v964_v61, %v5965_v10  ;;  %v921_v14 = vmul.f32 %v5947_v55, %v6078_v30  ;;  %v922_v9 = vmul.f32 %v5947_v55, %v6081_v15 }
 0x1f9   :  { %v988_v42 = vpop.permute.xlu1 %987  ;;  %10748 = vst [vmem:[#allocation81_spill] sm:$0xff] %v6093_v35  ;;  %10749 = vst [vmem:[#allocation82_spill] sm:$0xff] %v6096_v3  ;;  %v6134_v61 = vmul.f32 %v938_v21, %v5462_v12  ;;  %v6137_v10 = vmul.f32 %v940_v1, %v5474_v17  ;;  %v870_v19 = vmul.f32 %v5949_v5, %v6090_v59 }
 0x1fa   :  { %10750 = vst [vmem:[#allocation83_spill] sm:$0xff] %v6099_v62  ;;  %v871_v54 = vmul.f32 %v5949_v5, %v6093_v35  ;;  %v872_v21 = vmul.f32 %v5949_v5, %v6096_v3  ;;  %v873_v1 = vmul.f32 %v5949_v5, %v6099_v62 }
 0x1fb   :  { %10751 = vst [vmem:[#allocation84_spill] sm:$0xff] %v6134_v61  ;;  %10752 = vst [vmem:[#allocation85_spill] sm:$0xff] %v6137_v10 }
 0x1fc   :  { %v5955_v52 = vpop.permute.xlu0 %907 }
 0x1fd   :  { %v992_v0 = vpop.permute.xlu1 %991  ;;  %v910_v20 = vsel %vm10471_vm4, %v5953_v53, %v5955_v52  ;;  %v912_v63 = vsel %vm10471_vm4, %v5955_v52, %v5953_v53  ;;  %v6148_v52 = vmul.f32 %v966_v36, %v5495_v43  ;;  %v6151_v53 = vmul.f32 %v968_v31, %v5499_v13 }
 0x1fe   :  { %v994_v30 = vsel %vm10328_vm13, %v988_v42, %v992_v0  ;;  %v996_v15 = vsel %vm10328_vm13, %v992_v0, %v988_v42  ;;  %v6158_v42 = vmul.f32 %v910_v20, %v5444_v45  ;;  %v6161_v0 = vmul.f32 %v912_v63, %v5448_v47 }
 0x1ff   :  { %10753 = vst [vmem:[#allocation86_spill] sm:$0xff] %v6148_v52  ;;  %10754 = vst [vmem:[#allocation87_spill] sm:$0xff] %v6151_v53  ;;  %v6172_v3 = vmul.f32 %v994_v30, %v5679_v58  ;;  %v6175_v5 = vmul.f32 %v996_v15, %v5683_v16 }
 0x200   :  { %v5959_v49 = vpop.permute.xlu0 %929  ;;  %10755 = vst [vmem:[#allocation88_spill] sm:$0xff] %v6158_v42  ;;  %10756 = vst [vmem:[#allocation89_spill] sm:$0xff] %v6161_v0 }
 0x201   :  { %10757 = vst [vmem:[#allocation90_spill] sm:$0xff] %v6172_v3  ;;  %10758 = vst [vmem:[#allocation91_spill] sm:$0xff] %v6175_v5 }
 0x204   :  { %v5963_v8 = vpop.permute.xlu0 %933 }
 0x205   :  { %v937_v36 = vsel %vm10433_vm2, %v5959_v49, %v5963_v8  ;;  %v939_v31 = vsel %vm10433_vm2, %v5963_v8, %v5959_v49 }
 0x208   :  { %v5967_v25 = vpop.permute.xlu0 %946 }
 0x20c   :  { %v5969_v37 = vpop.permute.xlu0 %961 }
 0x210   :  { %v5971_v23 = vpop.permute.xlu0 %974 }
 0x214   :  { %v5986_v48 = vpop.permute.xlu0 %989 }
 0x218   :  { %v6011_v18 = vpop.permute.xlu0 %1002 }
 0x21d   :  { %v840_v4 = vpop.permute.xlu0 %839 }
 0x21e   :  { %v842_v47 = vmul.f32 %v840_v4, %v6072_v60  ;;  %v843_v45 = vmul.f32 %v840_v4, %v6075_v27  ;;  %v844_v8 = vmul.f32 %v840_v4, %v6084_v41  ;;  %v845_v49 = vmul.f32 %v840_v4, %v6087_v33 }
 0x21f   :  { %v10262_v41 = vmov 19   ;;  %v10267_v60 = vmov 20  }
 0x221   :  { %v6119_v24 = vpop.permute.xlu0 %1084 }
 0x226   :  { %v812_v20 = vpop.permute.xlu0 %811 }
 0x227   :  { %v814_v63 = vmul.f32 %v812_v20, %v6024_v28  ;;  %v815_v62 = vmul.f32 %v812_v20, %v6027_v34  ;;  %v816_v35 = vmul.f32 %v812_v20, %v6030_v44  ;;  %v817_v59 = vmul.f32 %v812_v20, %v6033_v40 }
 0x228   :  { %v6190_v44 = vmul.f32 %v937_v36, %v5462_v12  ;;  %v6193_v20 = vmul.f32 %v939_v31, %v5474_v17  ;;  %v965_v40 = vsel %vm10336_vm9, %v5961_v26, %v5969_v37 }
 0x229   :  { %v818_v15 = vadd.f32 %v814_v63, %v6009_v2  ;;  %v819_v30 = vadd.f32 %v815_v62, %v6014_v50  ;;  %v820_v28 = vadd.f32 %v816_v35, %v6017_v29  ;;  %v821_v34 = vadd.f32 %v817_v59, %v6020_v56 }
 0x22a   :  { %10759 = vst [vmem:[#allocation92_spill] sm:$0xff] %v6190_v44  ;;  %10760 = vst [vmem:[#allocation93_spill] sm:$0xff] %v6193_v20  ;;  %v967_v2 = vsel %vm10336_vm9, %v5969_v37, %v5961_v26  ;;  %v923_v59 = vmul.f32 %v5947_v55, %v6158_v42  ;;  %v924_v35 = vmul.f32 %v5947_v55, %v6161_v0  ;;  %v10258_v42 = vmov 18  }
 0x22b   :  { %v846_v50 = vadd.f32 %v842_v47, %v818_v15  ;;  %v847_v29 = vadd.f32 %v843_v45, %v819_v30  ;;  %v848_v4 = vadd.f32 %v844_v8, %v820_v28  ;;  %v849_v56 = vadd.f32 %v845_v49, %v821_v34  ;;  %v1033_v30 = vpop.permute.xlu1 %1032 }
 0x22c   :  { %v993_v62 = vsel %vm10328_vm13, %v5984_v32, %v5986_v48  ;;  %v995_v37 = vsel %vm10328_vm13, %v5986_v48, %v5984_v32  ;;  %v949_v34 = vmul.f32 %v5967_v25, %v6190_v44  ;;  %v950_v55 = vmul.f32 %v5967_v25, %v6193_v20 }
 0x22d   :  { %v874_v47 = vadd.f32 %v870_v19, %v846_v50  ;;  %v875_v45 = vadd.f32 %v871_v54, %v847_v29  ;;  %v876_v26 = vadd.f32 %v872_v21, %v848_v4  ;;  %v877_v28 = vadd.f32 %v873_v1, %v849_v56 }
 0x22e   :  { %v6220_v36 = vmul.f32 %v965_v40, %v5495_v43  ;;  %v6223_v31 = vmul.f32 %v967_v2, %v5499_v13  ;;  %v951_v48 = vmul.f32 %v5967_v25, %v6134_v61  ;;  %v952_v32 = vmul.f32 %v5967_v25, %v6137_v10 }
 0x22f   :  { %v897_v63 = vadd.f32 %v6066_v39, %v874_v47  ;;  %v898_v8 = vadd.f32 %v893_v57, %v875_v45  ;;  %v899_v19 = vadd.f32 %v6069_v11, %v876_v26  ;;  %v900_v54 = vadd.f32 %v894_v22, %v877_v28 }
 0x230   :  { %10761 = vst [vmem:[#allocation94_spill] sm:$0xff] %v6220_v36  ;;  %10762 = vst [vmem:[#allocation95_spill] sm:$0xff] %v6223_v31  ;;  %v6232_v21 = vmul.f32 %v993_v62, %v5679_v58  ;;  %v6235_v40 = vmul.f32 %v995_v37, %v5683_v16  ;;  %v977_v11 = vmul.f32 %v5971_v23, %v6220_v36  ;;  %v10243_v61 = vmov 13  }
 0x231   :  { %v925_v1 = vadd.f32 %v921_v14, %v897_v63  ;;  %v926_v49 = vadd.f32 %v922_v9, %v898_v8  ;;  %v927_v15 = vadd.f32 %v923_v59, %v899_v19  ;;  %v928_v39 = vadd.f32 %v924_v35, %v900_v54  ;;  %v10767_v8 = vld [vmem:[#allocation37_spill] sm:$0xff] }
 0x232   :  { %10763 = vst [vmem:[#allocation96_spill] sm:$0xff] %v6232_v21  ;;  %10764 = vst [vmem:[#allocation97_spill] sm:$0xff] %v6235_v40  ;;  %v978_v57 = vmul.f32 %v5971_v23, %v6223_v31  ;;  %v979_v22 = vmul.f32 %v5971_v23, %v6148_v52  ;;  %v980_v25 = vmul.f32 %v5971_v23, %v6151_v53  ;;  %v6257_v63 = vsub.s32 3, %v10735_v7 }
 0x233   :  { %v953_v2 = vadd.f32 %v949_v34, %v925_v1  ;;  %v954_v50 = vadd.f32 %v950_v55, %v926_v49  ;;  %v955_v29 = vadd.f32 %v951_v48, %v927_v15  ;;  %v956_v14 = vadd.f32 %v952_v32, %v928_v39  ;;  %v1057_v34 = vpop.permute.xlu1 %1056  ;;  %v10768_v32 = vld [vmem:[#allocation38_spill] sm:$0xff] }
 0x234   :  { %v1005_v9 = vmul.f32 %v6011_v18, %v6232_v21  ;;  %v1006_v4 = vmul.f32 %v6011_v18, %v6235_v40  ;;  %v1007_v56 = vmul.f32 %v6011_v18, %v6172_v3  ;;  %v1008_v59 = vmul.f32 %v6011_v18, %v6175_v5  ;;  %10766 = vst [vmem:[#allocation99_spill] sm:$0xff] %v6257_v63 }
 0x235   :  { %v981_v35 = vadd.f32 %v977_v11, %v953_v2  ;;  %v982_v62 = vadd.f32 %v978_v57, %v954_v50  ;;  %v983_v23 = vadd.f32 %v979_v22, %v955_v29  ;;  %v984_v37 = vadd.f32 %v980_v25, %v956_v14 }
 0x236   :  { %v6254_v55 = vsub.s32 2, %v10735_v7  ;;  %v10247_v44 = vmov 14   ;;  %v10252_v40 = vmov 15   ;;  %v10255_v21 = vmov 11  }
 0x237   :  { %v1009_v47 = vadd.f32 %v1005_v9, %v981_v35  ;;  %v1010_v45 = vadd.f32 %v1006_v4, %v982_v62  ;;  %v1011_v26 = vadd.f32 %v1007_v56, %v983_v23  ;;  %v1012_v28 = vadd.f32 %v1008_v59, %v984_v37  ;;  %v1113_v59 = vpop.permute.xlu1 %1112 }
 0x238   :  { %10765 = vst [vmem:[#allocation98_spill] sm:$0xff] %v6254_v55 }
 0x239   :  { %v1017_v19 = vrot.slane %v1009_v47, %v10767_v8  ;;  %v1021_v54 = vrot.slane %v1010_v45, %v10767_v8  ;;  %v1025_v18 = vrot.slane %v1011_v26, %v10767_v8  ;;  %v1029_v48 = vrot.slane %v1012_v28, %v10767_v8 }
 0x23a   :  { %v1042_v1 = vrot.slane %v1009_v47, %v10768_v32  ;;  %v1046_v49 = vrot.slane %v1010_v45, %v10768_v32  ;;  %v1050_v15 = vrot.slane %v1011_v26, %v10768_v32  ;;  %v1054_v39 = vrot.slane %v1012_v28, %v10768_v32 }
 0x23b   :  { %v1035_v11 = vmul.f32 %v1033_v30, %v1017_v19  ;;  %v1036_v57 = vmul.f32 %v1033_v30, %v1021_v54  ;;  %v1037_v7 = vmul.f32 %v1033_v30, %v1025_v18  ;;  %v1038_v22 = vmul.f32 %v1033_v30, %v1029_v48 }
 0x23c   :  { %v1059_v25 = vmul.f32 %v1057_v34, %v1042_v1  ;;  %v1060_v2 = vmul.f32 %v1057_v34, %v1046_v49  ;;  %v1061_v50 = vmul.f32 %v1057_v34, %v1050_v15  ;;  %v1062_v29 = vmul.f32 %v1057_v34, %v1054_v39 }
 0x23d   :  { %v1078_v14 = vrot.slane %v1011_v26, %v6254_v55  ;;  %v1082_v9 = vrot.slane %v1012_v28, %v6254_v55  ;;  %v1106_v4 = vrot.slane %v1011_v26, %v6257_v63  ;;  %v1110_v56 = vrot.slane %v1012_v28, %v6257_v63 }
 0x23e   :  { %v1065_v35 = vadd.f32 %v1061_v50, %v1037_v7  ;;  %v1066_v62 = vadd.f32 %v1062_v29, %v1038_v22  ;;  %v1063_v30 = vadd.f32 %v1059_v25, %v1035_v11  ;;  %v1064_v19 = vadd.f32 %v1060_v2, %v1036_v57 }
 0x23f   :  { %v1089_v23 = vmul.f32 %v6119_v24, %v1078_v14  ;;  %v1090_v37 = vmul.f32 %v6119_v24, %v1082_v9  ;;  %v1070_v54 = vrot.slane %v1009_v47, %v6254_v55  ;;  %v1074_v34 = vrot.slane %v1010_v45, %v6254_v55 }
 0x240   :  { %v1098_v18 = vrot.slane %v1009_v47, %v6257_v63  ;;  %v1102_v48 = vrot.slane %v1010_v45, %v6257_v63  ;;  %v1117_v28 = vmul.f32 %v1113_v59, %v1106_v4  ;;  %v1118_v49 = vmul.f32 %v1113_v59, %v1110_v56  ;;  %v6295_v56 = vld [vmem:[#allocation10] sm:$0xf] }
 0x241   :  { %v1093_v26 = vadd.f32 %v1089_v23, %v1065_v35  ;;  %v1094_v1 = vadd.f32 %v1090_v37, %v1066_v62  ;;  %v1087_v15 = vmul.f32 %v6119_v24, %v1070_v54  ;;  %v1088_v39 = vmul.f32 %v6119_v24, %v1074_v34  ;;  %v1403_v37 = vld [vmem:[%s10113_s7] sm:$0xf]  ;;  %s5024_s7 = smov 34   ;;  %v10842_v63 = vld [vmem:[#allocation46_spill] sm:$0xff] }
 0x242   :  { %v1115_v25 = vmul.f32 %v1113_v59, %v1098_v18  ;;  %v1116_v2 = vmul.f32 %v1113_v59, %v1102_v48  ;;  %v10769_v59 = vmov 4   ;;  %v10770_v35 = vmov 6   ;;  %v10776_v34 = vld [vmem:[#allocation56_spill] sm:$0xff] }
 0x243   :  { %v6279_v7 = vadd.f32 %v1117_v28, %v1093_v26  ;;  %v6281_v11 = vadd.f32 %v1118_v49, %v1094_v1  ;;  %v1091_v57 = vadd.f32 %v1087_v15, %v1063_v30  ;;  %v1092_v22 = vadd.f32 %v1088_v39, %v1064_v19  ;;  %v10778_v26 = vld [vmem:[#allocation29_spill] sm:$0xff] }
 0x244   :  { %v10771_v62 = vmov 5   ;;  %v10772_v23 = vmov 7   ;;  %v10773_v30 = vmov 0   ;;  %v10774_v19 = vmov 2   ;;  %v10779_v15 = vld [vmem:[#allocation65_spill] sm:$0xff] }
 0x245   :  { %v1128_v47 = vsel %vm651_vm5, %v6279_v7, 0.0  ;;  %v1129_v45 = vsel %vm651_vm5, %v6281_v11, 0.0  ;;  %v6287_v29 = vadd.f32 %v1115_v25, %v1091_v57  ;;  %v6289_v14 = vadd.f32 %v1116_v2, %v1092_v22  ;;  %v10780_v57 = vld [vmem:[#allocation55_spill] sm:$0xff] }
 0x246   :  { %v1130_v50 = vadd.f32 %v1129_v45, %v1128_v47  ;;  %v10775_v54 = vmov 1   ;;  %v663_v18 = vsel %vm651_vm5, %v10776_v34, 0.0  ;;  %v10777_v48 = vmov 3   ;;  %v10781_v25 = vld [vmem:[#allocation59_spill] sm:$0xff]  ;;  %v10783_v47 = vld [vmem:[#allocation60_spill] sm:$0xff] }
 0x247   :  { %v1123_v24 = vsel %vm651_vm5, %v6287_v29, 0.0  ;;  %v1124_v9 = vsel %vm651_vm5, %v6289_v14, 0.0  ;;  %v662_v1 = vsel %vm651_vm5, %v10778_v26, 0.0  ;;  %v718_v39 = vsel %vm651_vm5, %v10779_v15, 0.0 }
 0x248   :  { %1131 = vadd.xlane.f32.xlu0 %v1130_v50  ;;  %v1125_v4 = vadd.f32 %v1124_v9, %v1123_v24  ;;  %v664_v28 = vadd.f32 %v663_v18, %v662_v1  ;;  %v717_v22 = vsel %vm651_vm5, %v10780_v57, 0.0  ;;  %v10787_v18 = vld [vmem:[#allocation62_spill] sm:$0xff] }
 0x249   :  { %v719_v50 = vadd.f32 %v718_v39, %v717_v22  ;;  %v10789_v22 = vld [vmem:[#allocation63_spill] sm:$0xff] }
 0x24a   :  { %1126 = vadd.xlane.f32.xlu1 %v1125_v4  ;;  %v665_v49 = vmul.f32 0.001953125, %v664_v28  ;;  %v10785_v4 = vld [vmem:[#allocation61_spill] sm:$0xff] }
 0x24b   :  { %v720_v1 = vmul.f32 0.001953125, %v719_v50  ;;  %v10795_v50 = vld [vmem:[#allocation53_spill] sm:$0xff] }
 0x24c   :  { %v6324_v2 = vsub.f32 %v10781_v25, %v665_v49  ;;  %v6327_v45 = vsub.f32 %v10783_v47, %v665_v49  ;;  %v6334_v34 = vsub.f32 %v10785_v4, %v665_v49  ;;  %v6337_v26 = vsub.f32 %v10787_v18, %v665_v49  ;;  %v10791_v47 = vld [vmem:[#allocation64_spill] sm:$0xff] }
 0x24d   :  { %v6346_v25 = vsub.f32 %v10789_v22, %v720_v1  ;;  %v6349_v4 = vsub.f32 %v10791_v47, %v720_v1  ;;  %v6355_v18 = vsub.f32 %v10795_v50, %v720_v1 }
 0x24e   :  { %10782 = vst [vmem:[#allocation56_spill] sm:$0xff] %v6324_v2  ;;  %10784 = vst [vmem:[#allocation29_spill] sm:$0xff] %v6327_v45  ;;  %v670_v24 = vmul.f32 %v6324_v2, %v6324_v2  ;;  %v671_v9 = vmul.f32 %v6327_v45, %v6327_v45  ;;  %v672_v39 = vmul.f32 %v6334_v34, %v6334_v34  ;;  %v10793_v45 = vld [vmem:[#allocation54_spill] sm:$0xff] }
 0x24f   :  { %10786 = vst [vmem:[#allocation65_spill] sm:$0xff] %v6334_v34  ;;  %10788 = vst [vmem:[#allocation55_spill] sm:$0xff] %v6337_v26  ;;  %v673_v57 = vmul.f32 %v6337_v26, %v6337_v26  ;;  %v6352_v49 = vsub.f32 %v10793_v45, %v720_v1  ;;  %v725_v26 = vmul.f32 %v6346_v25, %v6346_v25 }
 0x250   :  { %v674_v28 = vsel %vm651_vm5, %v670_v24, 0.0  ;;  %v675_v15 = vsel %vm651_vm5, %v671_v9, 0.0  ;;  %10790 = vst [vmem:[#allocation59_spill] sm:$0xff] %v6346_v25  ;;  %10792 = vst [vmem:[#allocation60_spill] sm:$0xff] %v6349_v4  ;;  %v679_v9 = vsel %vm651_vm5, %v672_v39, 0.0  ;;  %v726_v22 = vmul.f32 %v6349_v4, %v6349_v4 }
 0x251   :  { %10794 = vst [vmem:[#allocation61_spill] sm:$0xff] %v6352_v49  ;;  %10796 = vst [vmem:[#allocation62_spill] sm:$0xff] %v6355_v18  ;;  %v676_v24 = vadd.f32 %v675_v15, %v674_v28  ;;  %v680_v34 = vsel %vm651_vm5, %v673_v57, 0.0  ;;  %v727_v47 = vmul.f32 %v6352_v49, %v6352_v49  ;;  %v728_v45 = vmul.f32 %v6355_v18, %v6355_v18 }
 0x252   :  { %v681_v1 = vadd.f32 %v680_v34, %v679_v9  ;;  %v729_v28 = vsel %vm651_vm5, %v725_v26, 0.0  ;;  %v730_v15 = vsel %vm651_vm5, %v726_v22, 0.0 }
 0x253   :  { %v734_v39 = vsel %vm651_vm5, %v727_v47, 0.0  ;;  %v735_v57 = vsel %vm651_vm5, %v728_v45, 0.0  ;;  %v731_v50 = vadd.f32 %v730_v15, %v729_v28 }
 0x254   :  { %v736_v25 = vadd.f32 %v735_v57, %v734_v39 }
 0x25b   :  { %1188 = vperm.xlu1 %4640, %v6295_v56  }
 0x25e   :  { %1212 = vperm.xlu0 %4638, %v6295_v56  }
 0x25f   :  { %4641 = vset.pattern.permute.xlu1 %v10769_v59 }
 0x260   :  { %1280 = vperm.xlu1 %4641, %v6295_v56  }
 0x262   :  { %4643 = vset.pattern.permute.xlu0 %v10770_v35 }
 0x263   :  { %1336 = vperm.xlu0 %4643, %v6295_v56  }
 0x264   :  { %4642 = vset.pattern.permute.xlu1 %v10771_v62 }
 0x265   :  { %1308 = vperm.xlu1 %4642, %v6295_v56  }
 0x267   :  { %4644 = vset.pattern.permute.xlu0 %v10772_v23 }
 0x268   :  { %1364 = vperm.xlu0 %4644, %v6295_v56  }
 0x269   :  { %4646 = vset.pattern.permute.xlu1 %v10773_v30 }
 0x26a   :  { %1422 = vperm.xlu1 %4646, %v1403_v37  }
 0x26c   :  { %4645 = vset.pattern.permute.xlu0 %v10774_v19 }
 0x26d   :  { %1240 = vperm.xlu0 %4645, %v6295_v56  }
 0x26e   :  { %4647 = vset.pattern.permute.xlu1 %v10775_v54  ;;  %v10838_v54 = vld [vmem:[#allocation41_spill] sm:$0xff] }
 0x26f   :  { %1446 = vperm.xlu1 %4647, %v1403_v37  }
 0x273   :  { %4649 = vset.pattern.permute.xlu1 %v10777_v48 }
 0x28c   :  { %677 = vadd.xlane.f32.xlu0 %v676_v24 }
 0x290   :  { %682 = vadd.xlane.f32.xlu0 %v681_v1 }
 0x293   :  { %732 = vadd.xlane.f32.xlu1 %v731_v50 }
 0x294   :  { %737 = vadd.xlane.f32.xlu0 %v736_v25 }
 0x2a4   :  { %1502 = vperm.xlu1 %4649, %v1403_v37  }
 0x2a8   :  { %1571 = vrot.lane.b32.xlu1 %v5265_v6, %s5024_s7 }
 0x2a9   :  { %4650 = vset.pattern.permute.xlu1 %v10773_v30 }
 0x2aa   :  { %1474 = vperm.xlu0 %4645, %v1403_v37  }
 0x2ae   :  { %4648 = vset.pattern.permute.xlu0 %v10777_v48 }
 0x2d1   :  { %v1132_v34 = vpop.xlane.xlu0 %1131 }
 0x2d2   :  { %v1134_v26 = vsel %vm651_vm5, %v1132_v34, 0.0 }
 0x2d3   :  { %v1127_v24 = vpop.xlane.xlu1 %1126 }
 0x2d4   :  { %v1133_v9 = vsel %vm651_vm5, %v1127_v24, 0.0  ;;  %v6403_v24 = vld [vmem:[#allocation12] sm:$0xf] }
 0x2d5   :  { %v1135_v22 = vadd.f32 %v1134_v26, %v1133_v9  ;;  %v10797_v26 = vld [vmem:[#allocation30_spill] sm:$0xff]  ;;  %10798 = vst [vmem:[#allocation63_spill] sm:$0xff] %v6403_v24  ;;  %v10799_v9 = vld [vmem:[#allocation31_spill] sm:$0xff] }
 0x2d7   :  { %v1136_v47 = vmul.f32 0.001953125, %v1135_v22  ;;  %v10800_v22 = vmov 8  }
 0x2d9   :  { %v6378_v25 = vsub.f32 %v6279_v7, %v1136_v47  ;;  %v6381_v45 = vsub.f32 %v6281_v11, %v1136_v47  ;;  %v6384_v37 = vsub.f32 %v6287_v29, %v1136_v47  ;;  %v6387_v1 = vsub.f32 %v6289_v14, %v1136_v47  ;;  %v6461_v47 = vpop.permute.xlu1 %1188 }
 0x2db   :  { %v1143_v28 = vmul.f32 %v6378_v25, %v6378_v25  ;;  %v1144_v15 = vmul.f32 %v6381_v45, %v6381_v45  ;;  %v1141_v39 = vmul.f32 %v6384_v37, %v6384_v37  ;;  %v1142_v7 = vmul.f32 %v6387_v1, %v6387_v1 }
 0x2dd   :  { %v1150_v11 = vsel %vm651_vm5, %v1143_v28, 0.0  ;;  %v1151_v29 = vsel %vm651_vm5, %v1144_v15, 0.0  ;;  %v1145_v57 = vsel %vm651_vm5, %v1141_v39, 0.0  ;;  %v1146_v14 = vsel %vm651_vm5, %v1142_v7, 0.0  ;;  %v6463_v28 = vpop.permute.xlu0 %1212  ;;  %v6465_v15 = vpop.permute.xlu1 %1280 }
 0x2de   :  { %v1152_v50 = vadd.f32 %v1151_v29, %v1150_v11  ;;  %v1147_v34 = vadd.f32 %v1146_v14, %v1145_v57 }
 0x2e0   :  { %1153 = vadd.xlane.f32.xlu1 %v1152_v50  ;;  %1148 = vadd.xlane.f32.xlu0 %v1147_v34 }
 0x2e1   :  { %v6467_v39 = vpop.permute.xlu0 %1336  ;;  %v6469_v7 = vpop.permute.xlu1 %1308 }
 0x2e5   :  { %v6473_v11 = vpop.permute.xlu1 %1422 }
 0x2e6   :  { %10801 = vst [vmem:[#allocation64_spill] sm:$0xff] %v6473_v11 }
 0x2ea   :  { %v6479_v14 = vpop.permute.xlu1 %1446 }
 0x2eb   :  { %10803 = vst [vmem:[#allocation53_spill] sm:$0xff] %v6479_v14 }
 0x2f1   :  { %1573 = vrot.lane.b32.xlu1 %v10797_v26, %s5024_s7 }
 0x2f5   :  { %1608 = vperm.xlu1 %4650, %v6403_v24  }
 0x2f6   :  { %1268 = vperm.xlu0 %4648, %v6295_v56  }
 0x2f9   :  { %1617 = vrot.lane.b32.xlu1 %v5265_v6, %s5025_s25 }
 0x2fa   :  { %1569 = vrot.lane.b32.xlu0 %v10721_v46, %s5024_s7  ;;  %4654 = vset.pattern.permute.xlu1 %v10770_v35 }
 0x2fd   :  { %1621 = vrot.lane.b32.xlu1 %v10799_v9, %s5025_s25 }
 0x2fe   :  { %1575 = vrot.lane.b32.xlu0 %v10799_v9, %s5024_s7 }
 0x301   :  { %1656 = vrot.lane.b32.xlu1 %v10721_v46, %s5026_s26 }
 0x302   :  { %1615 = vrot.lane.b32.xlu0 %v10721_v46, %s5025_s25 }
 0x305   :  { %1658 = vrot.lane.b32.xlu1 %v5265_v6, %s5026_s26 }
 0x306   :  { %1619 = vrot.lane.b32.xlu0 %v10797_v26, %s5025_s25 }
 0x309   :  { %1662 = vrot.lane.b32.xlu1 %v10799_v9, %s5026_s26 }
 0x30a   :  { %1660 = vrot.lane.b32.xlu0 %v10797_v26, %s5026_s26 }
 0x30d   :  { %1696 = vrot.lane.b32.xlu1 %v10721_v46, %s5027_s27 }
 0x30e   :  { %1700 = vrot.lane.b32.xlu0 %v10797_v26, %s5027_s27 }
 0x311   :  { %1698 = vrot.lane.b32.xlu1 %v5265_v6, %s5027_s27 }
 0x312   :  { %1726 = vperm.xlu0 %4648, %v6403_v24  }
 0x315   :  { %1702 = vrot.lane.b32.xlu1 %v10799_v9, %s5027_s27 }
 0x316   :  { %1741 = vrot.lane.b32.xlu0 %v10797_v26, %s5028_s28 }
 0x317   :  { %4651 = vset.pattern.permute.xlu0 %v10769_v59 }
 0x319   :  { %1737 = vrot.lane.b32.xlu1 %v10721_v46, %s5028_s28 }
 0x31a   :  { %1771 = vperm.xlu0 %4651, %v6403_v24  }
 0x31c   :  { %v6483_v34 = vpop.xlane.xlu1 %732 }
 0x31d   :  { %1739 = vrot.lane.b32.xlu1 %v5265_v6, %s5028_s28  ;;  %10805 = vst [vmem:[#allocation101_spill] sm:$0xff] %v6483_v34 }
 0x31e   :  { %1786 = vrot.lane.b32.xlu0 %v10797_v26, %s5029_s29 }
 0x31f   :  { %4652 = vset.pattern.permute.xlu0 %v10771_v62 }
 0x320   :  { %v6485_v18 = vpop.permute.xlu1 %1502 }
 0x321   :  { %1743 = vrot.lane.b32.xlu1 %v10799_v9, %s5028_s28  ;;  %10806 = vst [vmem:[#allocation102_spill] sm:$0xff] %v6485_v18 }
 0x322   :  { %1812 = vperm.xlu0 %4652, %v6403_v24  }
 0x324   :  { %v6491_v2 = vpop.permute.xlu1 %1571 }
 0x325   :  { %1782 = vrot.lane.b32.xlu1 %v10721_v46, %s5029_s29  ;;  %10809 = vst [vmem:[#allocation105_spill] sm:$0xff] %v6491_v2 }
 0x326   :  { %4653 = vset.pattern.permute.xlu0 %v10800_v22 }
 0x327   :  { %1392 = vperm.xlu0 %4653, %v6295_v56   ;;  %v6471_v56 = vpop.permute.xlu0 %1364 }
 0x329   :  { %1784 = vrot.lane.b32.xlu1 %v5265_v6, %s5029_s29 }
 0x32b   :  { %v6475_v29 = vpop.permute.xlu0 %1240 }
 0x32d   :  { %1788 = vrot.lane.b32.xlu1 %v10799_v9, %s5029_s29 }
 0x32f   :  { %v6477_v57 = vpop.xlane.xlu0 %677 }
 0x330   :  { %10802 = vst [vmem:[#allocation54_spill] sm:$0xff] %v6477_v57 }
 0x331   :  { %1824 = vperm.xlu1 %4654, %v6403_v24  }
 0x333   :  { %v6481_v50 = vpop.xlane.xlu0 %682 }
 0x334   :  { %10804 = vst [vmem:[#allocation100_spill] sm:$0xff] %v6481_v50 }
 0x335   :  { %4655 = vset.pattern.permute.xlu1 %v10772_v23 }
 0x337   :  { %v6487_v49 = vpop.xlane.xlu0 %737 }
 0x338   :  { %10807 = vst [vmem:[#allocation103_spill] sm:$0xff] %v6487_v49 }
 0x33b   :  { %v6489_v4 = vpop.permute.xlu0 %1474 }
 0x33c   :  { %10808 = vst [vmem:[#allocation104_spill] sm:$0xff] %v6489_v4  ;;  %v10841_v4 = vld [vmem:[#allocation45_spill] sm:$0xff] }
 0x369   :  { %v1149_v22 = vpop.xlane.xlu0 %1148  ;;  %v1154_v23 = vpop.xlane.xlu1 %1153 }
 0x36a   :  { %v1155_v35 = vsel %vm651_vm5, %v1149_v22, 0.0  ;;  %v1156_v57 = vsel %vm651_vm5, %v1154_v23, 0.0 }
 0x36b   :  { %v1157_v62 = vadd.f32 %v1156_v57, %v1155_v35  ;;  %v10239_v57 = vmov 10  }
 0x36d   :  { %v1158_v59 = vmul.f32 0.001953125, %v1157_v62 }
 0x36f   :  { %v1159_v53 = vadd.f32 1e-05, %v1158_v59 }
 0x371   :  { %4749 = vrsqrt.f32 %v1159_v53 }
 0x37e   :  { %v4750_v50 = vpop.eup %4749 }
 0x37f   :  { %v1163_v34 = vmul.f32 %v4750_v50, %v6378_v25  ;;  %v1161_v52 = vmul.f32 %v4750_v50, %v6384_v37  ;;  %v1162_v36 = vmul.f32 %v4750_v50, %v6387_v1  ;;  %v1164_v10 = vmul.f32 %v4750_v50, %v6381_v45  ;;  %v6576_v45 = vpop.permute.xlu0 %1268 }
 0x380   :  { %v10235_v37 = vmov 9  }
 0x381   :  { %v6497_v49 = vmax.f32 %v1163_v34, 0.0  ;;  %v6499_v31 = vmax.f32 %v1161_v52, 0.0  ;;  %v6507_v53 = vmax.f32 %v1162_v36, 0.0  ;;  %v6509_v59 = vmax.f32 %v1164_v10, 0.0  ;;  %v6523_v10 = vpop.permute.xlu1 %1573 }
 0x382   :  { %10810 = vst [vmem:[#allocation106_spill] sm:$0xff] %v6523_v10 }
 0x383   :  { %1172 = vrot.lane.b32.xlu1 %v6497_v49, %s5005_s12  ;;  %1170 = vrot.lane.b32.xlu0 %v6499_v31, %s5005_s12  ;;  %v6584_v22 = vpop.permute.xlu0 %1569 }
 0x384   :  { %10818 = vst [vmem:[#allocation114_spill] sm:$0xff] %v6584_v22 }
 0x385   :  { %v6529_v52 = vpop.permute.xlu1 %1608 }
 0x386   :  { %10811 = vst [vmem:[#allocation107_spill] sm:$0xff] %v6529_v52 }
 0x387   :  { %1174 = vrot.lane.b32.xlu1 %v6507_v53, %s5005_s12  ;;  %1176 = vrot.lane.b32.xlu0 %v6509_v59, %s5005_s12  ;;  %v6596_v34 = vpop.permute.xlu0 %1575 }
 0x388   :  { %10820 = vst [vmem:[#allocation116_spill] sm:$0xff] %v6596_v34 }
 0x389   :  { %v6539_v36 = vpop.permute.xlu1 %1617 }
 0x38a   :  { %10812 = vst [vmem:[#allocation108_spill] sm:$0xff] %v6539_v36 }
 0x38b   :  { %1197 = vrot.lane.b32.xlu1 %v6497_v49, %s5007_s15  ;;  %1195 = vrot.lane.b32.xlu0 %v6499_v31, %s5007_s15  ;;  %v6603_v20 = vpop.permute.xlu0 %1615 }
 0x38c   :  { %10822 = vst [vmem:[#allocation118_spill] sm:$0xff] %v6603_v20 }
 0x38d   :  { %v6545_v35 = vpop.permute.xlu1 %1621 }
 0x38e   :  { %10813 = vst [vmem:[#allocation109_spill] sm:$0xff] %v6545_v35 }
 0x38f   :  { %1201 = vrot.lane.b32.xlu1 %v6509_v59, %s5007_s15  ;;  %1199 = vrot.lane.b32.xlu0 %v6507_v53, %s5007_s15  ;;  %v6613_v5 = vpop.permute.xlu0 %1619 }
 0x390   :  { %10824 = vst [vmem:[#allocation120_spill] sm:$0xff] %v6613_v5 }
 0x391   :  { %v6555_v62 = vpop.permute.xlu1 %1656 }
 0x392   :  { %10814 = vst [vmem:[#allocation110_spill] sm:$0xff] %v6555_v62 }
 0x393   :  { %1223 = vrot.lane.b32.xlu1 %v6499_v31, %s5008_s18  ;;  %1227 = vrot.lane.b32.xlu0 %v6507_v53, %s5008_s18  ;;  %v6621_v3 = vpop.permute.xlu0 %1660 }
 0x394   :  { %10826 = vst [vmem:[#allocation122_spill] sm:$0xff] %v6621_v3 }
 0x395   :  { %v6561_v23 = vpop.permute.xlu1 %1658 }
 0x396   :  { %10815 = vst [vmem:[#allocation111_spill] sm:$0xff] %v6561_v23 }
 0x397   :  { %1225 = vrot.lane.b32.xlu1 %v6497_v49, %s5008_s18  ;;  %1255 = vrot.lane.b32.xlu0 %v6507_v53, %s5009_s19 }
 0x399   :  { %v6570_v25 = vpop.permute.xlu1 %1662 }
 0x39a   :  { %10816 = vst [vmem:[#allocation112_spill] sm:$0xff] %v6570_v25  ;;  %v10298_v25 = vmov 17  }
 0x39b   :  { %1229 = vrot.lane.b32.xlu1 %v6509_v59, %s5008_s18  ;;  %1293 = vrot.lane.b32.xlu0 %v6497_v49, %s5010_s20 }
 0x39d   :  { %v6579_v1 = vpop.permute.xlu1 %1696 }
 0x39e   :  { %10817 = vst [vmem:[#allocation113_spill] sm:$0xff] %v6579_v1 }
 0x39f   :  { %1251 = vrot.lane.b32.xlu1 %v6499_v31, %s5009_s19  ;;  %1297 = vrot.lane.b32.xlu0 %v6509_v59, %s5010_s20 }
 0x3a1   :  { %v6591_v50 = vpop.permute.xlu1 %1698 }
 0x3a2   :  { %10819 = vst [vmem:[#allocation115_spill] sm:$0xff] %v6591_v50 }
 0x3a3   :  { %1253 = vrot.lane.b32.xlu1 %v6497_v49, %s5009_s19  ;;  %1319 = vrot.lane.b32.xlu0 %v6499_v31, %s5011_s2 }
 0x3a7   :  { %1257 = vrot.lane.b32.xlu1 %v6509_v59, %s5009_s19  ;;  %1323 = vrot.lane.b32.xlu0 %v6507_v53, %s5011_s2 }
 0x3ab   :  { %1291 = vrot.lane.b32.xlu1 %v6499_v31, %s5010_s20  ;;  %1351 = vrot.lane.b32.xlu0 %v6507_v53, %s5012_s21 }
 0x3af   :  { %1295 = vrot.lane.b32.xlu1 %v6507_v53, %s5010_s20  ;;  %1379 = vrot.lane.b32.xlu0 %v6507_v53, %s5013_s22 }
 0x3b3   :  { %1321 = vrot.lane.b32.xlu1 %v6497_v49, %s5011_s2  ;;  %1848 = vperm.xlu0 %4653, %v6403_v24  }
 0x3b7   :  { %1325 = vrot.lane.b32.xlu1 %v6509_v59, %s5011_s2  ;;  %1863 = vrot.lane.b32.xlu0 %v10797_v26, %s5030_s3 }
 0x3b8   :  { %4656 = vset.pattern.permute.xlu0 %v10235_v37  ;;  %v6598_v37 = vpop.permute.xlu1 %1702 }
 0x3b9   :  { %10821 = vst [vmem:[#allocation117_spill] sm:$0xff] %v6598_v37 }
 0x3bb   :  { %1347 = vrot.lane.b32.xlu1 %v6499_v31, %s5012_s21  ;;  %1889 = vperm.xlu0 %4656, %v6403_v24  }
 0x3bf   :  { %1349 = vrot.lane.b32.xlu1 %v6497_v49, %s5012_s21  ;;  %1904 = vrot.lane.b32.xlu0 %v10797_v26, %s5032_s10 }
 0x3c0   :  { %4657 = vset.pattern.permute.xlu0 %v10239_v57  ;;  %v6610_v57 = vpop.permute.xlu1 %1737 }
 0x3c1   :  { %10823 = vst [vmem:[#allocation119_spill] sm:$0xff] %v6610_v57  ;;  %v10280_v57 = vmov 16  }
 0x3c3   :  { %1353 = vrot.lane.b32.xlu1 %v6509_v59, %s5012_s21  ;;  %1929 = vperm.xlu0 %4657, %v6403_v24  }
 0x3c7   :  { %1375 = vrot.lane.b32.xlu1 %v6499_v31, %s5013_s22  ;;  %4660 = vset.pattern.permute.xlu0 %v10243_v61  ;;  %v6618_v61 = vpop.permute.xlu1 %1739 }
 0x3c8   :  { %1976 = vperm.xlu0 %4660, %v6403_v24   ;;  %10825 = vst [vmem:[#allocation121_spill] sm:$0xff] %v6618_v61  ;;  %v10292_v61 = vmov 23  }
 0x3cb   :  { %1377 = vrot.lane.b32.xlu1 %v6497_v49, %s5013_s22  ;;  %v6632_v0 = vpop.permute.xlu1 %1743 }
 0x3cc   :  { %1991 = vrot.lane.b32.xlu0 %v10797_v26, %s5035_s13  ;;  %10828 = vst [vmem:[#allocation124_spill] sm:$0xff] %v6632_v0 }
 0x3cd   :  { %4661 = vset.pattern.permute.xlu0 %v10247_v44  ;;  %v6628_v44 = vpop.permute.xlu0 %1700 }
 0x3ce   :  { %10827 = vst [vmem:[#allocation123_spill] sm:$0xff] %v6628_v44 }
 0x3cf   :  { %1381 = vrot.lane.b32.xlu1 %v6509_v59, %s5013_s22  ;;  %v6640_v33 = vpop.permute.xlu1 %1782 }
 0x3d0   :  { %2016 = vperm.xlu0 %4661, %v6403_v24   ;;  %10830 = vst [vmem:[#allocation126_spill] sm:$0xff] %v6640_v33 }
 0x3d3   :  { %1836 = vperm.xlu1 %4655, %v6403_v24  }
 0x3d4   :  { %2031 = vrot.lane.b32.xlu0 %v10797_v26, %s5037_s8 }
 0x3d5   :  { %4662 = vset.pattern.permute.xlu0 %v10252_v40  ;;  %v6638_v40 = vpop.permute.xlu0 %1726 }
 0x3d6   :  { %10829 = vst [vmem:[#allocation125_spill] sm:$0xff] %v6638_v40 }
 0x3d7   :  { %1859 = vrot.lane.b32.xlu1 %v10721_v46, %s5030_s3 }
 0x3d8   :  { %2057 = vperm.xlu0 %4662, %v6403_v24   ;;  %4658 = vset.pattern.permute.xlu1 %v10255_v21 }
 0x3d9   :  { %v6646_v21 = vpop.permute.xlu0 %1741 }
 0x3da   :  { %10831 = vst [vmem:[#allocation127_spill] sm:$0xff] %v6646_v21 }
 0x3db   :  { %1861 = vrot.lane.b32.xlu1 %v5265_v6, %s5030_s3 }
 0x3dc   :  { %4665 = vset.pattern.permute.xlu0 %v10258_v42  ;;  %v6651_v42 = vpop.permute.xlu1 %1784 }
 0x3dd   :  { %2093 = vperm.xlu0 %4665, %v6403_v24   ;;  %10832 = vst [vmem:[#allocation128_spill] sm:$0xff] %v6651_v42  ;;  %v6656_v27 = vpop.permute.xlu0 %1771 }
 0x3de   :  { %10833 = vst [vmem:[#allocation129_spill] sm:$0xff] %v6656_v27 }
 0x3df   :  { %1865 = vrot.lane.b32.xlu1 %v10799_v9, %s5030_s3 }
 0x3e1   :  { %2108 = vrot.lane.b32.xlu0 %v10797_v26, %s5041_s17  ;;  %v6665_v40 = vpop.permute.xlu0 %1786 }
 0x3e2   :  { %4666 = vset.pattern.permute.xlu0 %v10262_v41  ;;  %v6661_v41 = vpop.permute.xlu1 %1788  ;;  %10835 = vst [vmem:[#allocation131_spill] sm:$0xff] %v6665_v40 }
 0x3e3   :  { %1900 = vrot.lane.b32.xlu1 %v10721_v46, %s5032_s10  ;;  %10834 = vst [vmem:[#allocation130_spill] sm:$0xff] %v6661_v41  ;;  %v10276_v41 = vmov 12  }
 0x3e5   :  { %2134 = vperm.xlu0 %4666, %v6403_v24   ;;  %v6673_v27 = vpop.permute.xlu0 %1812 }
 0x3e6   :  { %v6669_v42 = vpop.permute.xlu1 %1824  ;;  %10837 = vst [vmem:[#allocation133_spill] sm:$0xff] %v6673_v27 }
 0x3e7   :  { %1902 = vrot.lane.b32.xlu1 %v5265_v6, %s5032_s10  ;;  %10836 = vst [vmem:[#allocation132_spill] sm:$0xff] %v6669_v42 }
 0x3e9   :  { %2149 = vrot.lane.b32.xlu0 %v10797_v26, %s5043_s6  ;;  %v6679_v40 = vpop.permute.xlu0 %1392 }
 0x3ea   :  { %4667 = vset.pattern.permute.xlu0 %v10267_v60  ;;  %v10274_v60 = vmov 21  }
 0x3eb   :  { %1906 = vrot.lane.b32.xlu1 %v10799_v9, %s5032_s10 }
 0x3ed   :  { %2179 = vperm.xlu0 %4667, %v6403_v24  }
 0x3ef   :  { %1941 = vperm.xlu1 %4658, %v6403_v24  }
 0x3f1   :  { %2194 = vrot.lane.b32.xlu0 %v10797_v26, %s5045_s23 }
 0x3f2   :  { %4668 = vset.pattern.permute.xlu0 %v10274_v60  ;;  %v10283_v60 = vmov 22  }
 0x3f3   :  { %4659 = vset.pattern.permute.xlu1 %v10276_v41 }
 0x3f4   :  { %1953 = vperm.xlu1 %4659, %v6403_v24  }
 0x3f5   :  { %v1173_v33 = vpop.permute.xlu1 %1172  ;;  %2220 = vperm.xlu0 %4668, %v6403_v24   ;;  %v1171_v41 = vpop.permute.xlu0 %1170 }
 0x3f8   :  { %1987 = vrot.lane.b32.xlu1 %v10721_v46, %s5035_s13 }
 0x3f9   :  { %v1175_v42 = vpop.permute.xlu1 %1174  ;;  %4663 = vset.pattern.permute.xlu1 %v10280_v57  ;;  %2235 = vrot.lane.b32.xlu0 %v10797_v26, %s5049_s4  ;;  %v1177_v57 = vpop.permute.xlu0 %1176 }
 0x3fa   :  { %4669 = vset.pattern.permute.xlu0 %v10283_v60  ;;  %v1179_v34 = vsel %vm193_vm15, %v1173_v33, %v1177_v57  ;;  %v1181_v22 = vsel %vm193_vm15, %v1177_v57, %v1173_v33  ;;  %v10839_v57 = vld [vmem:[#allocation39_spill] sm:$0xff] }
 0x3fc   :  { %1989 = vrot.lane.b32.xlu1 %v5265_v6, %s5035_s13 }
 0x3fd   :  { %v1198_v27 = vpop.permute.xlu1 %1197  ;;  %2260 = vperm.xlu0 %4669, %v6403_v24   ;;  %v1196_v0 = vpop.permute.xlu0 %1195 }
 0x400   :  { %1993 = vrot.lane.b32.xlu1 %v10799_v9, %s5035_s13 }
 0x401   :  { %v1202_v21 = vpop.permute.xlu1 %1201  ;;  %2275 = vrot.lane.b32.xlu0 %v10797_v26, %s5051_s1  ;;  %v1200_v62 = vpop.permute.xlu0 %1199  ;;  %v1184_v26 = vmul.f32 %v1181_v22, %v10839_v57 }
 0x402   :  { %4670 = vset.pattern.permute.xlu0 %v10292_v61  ;;  %v1204_v36 = vsel %vm246_vm0, %v1198_v27, %v1202_v21  ;;  %v1206_v35 = vsel %vm246_vm0, %v1202_v21, %v1198_v27  ;;  %v1203_v10 = vsel %vm246_vm0, %v1196_v0, %v1200_v62 }
 0x403   :  { %v1209_v48 = vmul.f32 %v1206_v35, %v5375_v51  ;;  %v1210_v19 = vmul.f32 %v1204_v36, %v10838_v54  ;;  %v1180_v36 = vsel %vm193_vm15, %v1175_v42, %v1171_v41 }
 0x404   :  { %2027 = vrot.lane.b32.xlu1 %v10721_v46, %s5037_s8 }
 0x405   :  { %v1224_v60 = vpop.permute.xlu1 %1223  ;;  %v1228_v23 = vpop.permute.xlu0 %1227 }
 0x408   :  { %2029 = vrot.lane.b32.xlu1 %v5265_v6, %s5037_s8 }
 0x409   :  { %v1226_v50 = vpop.permute.xlu1 %1225  ;;  %v1256_v44 = vpop.permute.xlu0 %1255 }
 0x40c   :  { %2033 = vrot.lane.b32.xlu1 %v10799_v9, %s5037_s8 }
 0x40d   :  { %v1230_v37 = vpop.permute.xlu1 %1229  ;;  %v1294_v20 = vpop.permute.xlu0 %1293 }
 0x40e   :  { %v1232_v27 = vsel %vm299_vm8, %v1226_v50, %v1230_v37  ;;  %v1234_v21 = vsel %vm299_vm8, %v1230_v37, %v1226_v50  ;;  %v1231_v37 = vsel %vm299_vm8, %v1224_v60, %v1228_v23  ;;  %v1233_v50 = vsel %vm299_vm8, %v1228_v23, %v1224_v60 }
 0x40f   :  { %v1237_v22 = vmul.f32 %v1234_v21, %v10841_v4  ;;  %v1218_v60 = vmul.f32 %v6463_v28, %v1210_v19  ;;  %v10843_v19 = vld [vmem:[#allocation43_spill] sm:$0xff] }
 0x410   :  { %2069 = vperm.xlu1 %4663, %v6403_v24  }
 0x411   :  { %v1252_v3 = vpop.permute.xlu1 %1251  ;;  %v1298_v2 = vpop.permute.xlu0 %1297 }
 0x414   :  { %4664 = vset.pattern.permute.xlu1 %v10298_v25 }
 0x415   :  { %2081 = vperm.xlu1 %4664, %v6403_v24   ;;  %v1254_v61 = vpop.permute.xlu1 %1253  ;;  %v10840_v24 = vld [vmem:[#allocation42_spill] sm:$0xff]  ;;  %v6755_v14 = vpop.permute.xlu0 %1319 }
 0x416   :  { %v1185_v18 = vmul.f32 %v1179_v34, %v10840_v24  ;;  %v1238_v34 = vmul.f32 %v1232_v27, %v10842_v63  ;;  %v1193_v27 = vmul.f32 %v6461_v47, %v1184_v26 }
 0x418   :  { %v1194_v21 = vmul.f32 %v6461_v47, %v1185_v18  ;;  %v1245_v18 = vmul.f32 %v6475_v29, %v1237_v22 }
 0x419   :  { %2104 = vrot.lane.b32.xlu1 %v10721_v46, %s5041_s17  ;;  %v1258_v1 = vpop.permute.xlu1 %1257 }
 0x41a   :  { %4673 = vset.pattern.permute.xlu1 %v10773_v30  ;;  %v1205_v30 = vsel %vm246_vm0, %v1200_v62, %v1196_v0  ;;  %v1178_v0 = vsel %vm193_vm15, %v1171_v41, %v1175_v42  ;;  %v1208_v62 = vmul.f32 %v1203_v10, %v10838_v54  ;;  %v1260_v11 = vsel %vm10484_vm10, %v1254_v61, %v1258_v1 }
 0x41b   :  { %v1207_v35 = vmul.f32 %v1205_v30, %v5375_v51  ;;  %v1262_v41 = vsel %vm10484_vm10, %v1258_v1, %v1254_v61  ;;  %v1182_v42 = vmul.f32 %v1180_v36, %v10839_v57  ;;  %v1183_v30 = vmul.f32 %v1178_v0, %v10840_v24  ;;  %v10844_v36 = vld [vmem:[#allocation44_spill] sm:$0xff] }
 0x41c   :  { %v1217_v10 = vmul.f32 %v6463_v28, %v1209_v48  ;;  %v1235_v54 = vmul.f32 %v1233_v50, %v10841_v4  ;;  %v1236_v61 = vmul.f32 %v1231_v37, %v10842_v63  ;;  %v1259_v1 = vsel %vm10484_vm10, %v1252_v3, %v1256_v44 }
 0x41d   :  { %2106 = vrot.lane.b32.xlu1 %v5265_v6, %s5041_s17  ;;  %v6709_v52 = vpop.permute.xlu1 %1291  ;;  %v1261_v48 = vsel %vm10484_vm10, %v1256_v44, %v1252_v3  ;;  %v1265_v0 = vmul.f32 %v1262_v41, %v10843_v19  ;;  %v1266_v51 = vmul.f32 %v1260_v11, %v10844_v36  ;;  %v1215_v24 = vmul.f32 %v6463_v28, %v1207_v35 }
 0x41e   :  { %v1216_v26 = vmul.f32 %v6463_v28, %v1208_v62  ;;  %v1246_v50 = vmul.f32 %v6475_v29, %v1238_v34  ;;  %v1191_v37 = vmul.f32 %v6461_v47, %v1182_v42  ;;  %v1192_v63 = vmul.f32 %v6461_v47, %v1183_v30  ;;  %v1324_v62 = vpop.permute.xlu0 %1323 }
 0x41f   :  { %v1221_v4 = vadd.f32 %v1217_v10, %v1193_v27  ;;  %v1222_v57 = vadd.f32 %v1218_v60, %v1194_v21  ;;  %v1300_v3 = vsel %vm10471_vm4, %v1294_v20, %v1298_v2  ;;  %v1302_v28 = vsel %vm10471_vm4, %v1298_v2, %v1294_v20  ;;  %v10845_v27 = vld [vmem:[#allocation47_spill] sm:$0xff]  ;;  %v10846_v20 = vld [vmem:[#allocation48_spill] sm:$0xff] }
 0x420   :  { %v1263_v11 = vmul.f32 %v1261_v48, %v10843_v19  ;;  %v1264_v35 = vmul.f32 %v1259_v1, %v10844_v36  ;;  %v1243_v22 = vmul.f32 %v6475_v29, %v1235_v54  ;;  %v1244_v47 = vmul.f32 %v6475_v29, %v1236_v61 }
 0x421   :  { %2110 = vrot.lane.b32.xlu1 %v10799_v9, %s5041_s17  ;;  %v6713_v25 = vpop.permute.xlu1 %1295  ;;  %v1273_v34 = vmul.f32 %v6576_v45, %v1265_v0  ;;  %v1274_v41 = vmul.f32 %v6576_v45, %v1266_v51  ;;  %v1219_v42 = vadd.f32 %v1215_v24, %v1191_v37  ;;  %v1220_v30 = vadd.f32 %v1216_v26, %v1192_v63 }
 0x422   :  { %v1249_v10 = vadd.f32 %v1245_v18, %v1221_v4  ;;  %v1250_v60 = vadd.f32 %v1246_v50, %v1222_v57  ;;  %v1305_v21 = vmul.f32 %v1300_v3, %v10845_v27  ;;  %v1306_v2 = vmul.f32 %v1302_v28, %v10846_v20  ;;  %v1352_v26 = vpop.permute.xlu0 %1351 }
 0x423   :  { %v1299_v1 = vsel %vm10471_vm4, %v6709_v52, %v6713_v25  ;;  %v1301_v54 = vsel %vm10471_vm4, %v6713_v25, %v6709_v52  ;;  %v1271_v63 = vmul.f32 %v6576_v45, %v1263_v11  ;;  %v1272_v4 = vmul.f32 %v6576_v45, %v1264_v35 }
 0x424   :  { %v1285_v24 = vmul.f32 %v6465_v15, %v6497_v49  ;;  %v1286_v29 = vmul.f32 %v6465_v15, %v6509_v59  ;;  %v1247_v57 = vadd.f32 %v1243_v22, %v1219_v42  ;;  %v1248_v61 = vadd.f32 %v1244_v47, %v1220_v30 }
 0x425   :  { %2145 = vrot.lane.b32.xlu1 %v10721_v46, %s5043_s6  ;;  %v6717_v5 = vpop.permute.xlu1 %1321  ;;  %v1277_v48 = vadd.f32 %v1273_v34, %v1249_v10  ;;  %v1278_v0 = vadd.f32 %v1274_v41, %v1250_v60  ;;  %v1303_v52 = vmul.f32 %v1299_v1, %v10845_v27  ;;  %v1304_v25 = vmul.f32 %v1301_v54, %v10846_v20 }
 0x426   :  { %v1313_v59 = vmul.f32 %v6469_v7, %v1305_v21  ;;  %v1314_v18 = vmul.f32 %v6469_v7, %v1306_v2  ;;  %v1283_v50 = vmul.f32 %v6465_v15, %v6499_v31  ;;  %v1284_v37 = vmul.f32 %v6465_v15, %v6507_v53  ;;  %v1380_v60 = vpop.permute.xlu0 %1379 }
 0x427   :  { %v1275_v28 = vadd.f32 %v1271_v63, %v1247_v57  ;;  %v1276_v11 = vadd.f32 %v1272_v4, %v1248_v61  ;;  %v1329_v31 = vsel %vm10433_vm2, %v1324_v62, %v6755_v14  ;;  %v1289_v22 = vadd.f32 %v1285_v24, %v1277_v48 }
 0x428   :  { %v1290_v47 = vadd.f32 %v1286_v29, %v1278_v0  ;;  %v1311_v34 = vmul.f32 %v6469_v7, %v1303_v52  ;;  %v1312_v41 = vmul.f32 %v6469_v7, %v1304_v25  ;;  %v1332_v7 = vmul.f32 %v1329_v31, %v5474_v17 }
 0x429   :  { %2147 = vrot.lane.b32.xlu1 %v5265_v6, %s5043_s6  ;;  %v6739_v33 = vpop.permute.xlu1 %1325  ;;  %v1287_v21 = vadd.f32 %v1283_v50, %v1275_v28  ;;  %v1288_v2 = vadd.f32 %v1284_v37, %v1276_v11  ;;  %v1317_v63 = vadd.f32 %v1313_v59, %v1289_v22  ;;  %vm10496_vm4 = vcmp.lt.s32.totalorder %v5347_v38, 98 }
 0x42a   :  { %v1328_v45 = vsel %vm10433_vm2, %v6717_v5, %v6739_v33  ;;  %v1330_v49 = vsel %vm10433_vm2, %v6739_v33, %v6717_v5  ;;  %v1327_v33 = vsel %vm10433_vm2, %v6755_v14, %v1324_v62  ;;  %v1318_v4 = vadd.f32 %v1314_v18, %v1290_v47 }
 0x42b   :  { %v1333_v15 = vmul.f32 %v1328_v45, %v5462_v12  ;;  %v1334_v53 = vmul.f32 %v1330_v49, %v5474_v17  ;;  %v1331_v10 = vmul.f32 %v1327_v33, %v5462_v12  ;;  %v1315_v57 = vadd.f32 %v1311_v34, %v1287_v21  ;;  %v10881_v17 = vld [vmem:[#allocation33_spill] sm:$0xff] }
 0x42c   :  { %v1316_v61 = vadd.f32 %v1312_v41, %v1288_v2  ;;  %v1340_v28 = vmul.f32 %v6467_v39, %v1332_v7  ;;  %v10847_v2 = vld [vmem:[#allocation64_spill] sm:$0xff]  ;;  %vm10463_vm2 = vcmp.lt.s32.totalorder %v5347_v38, 114  ;;  %vm10497_vm10 = vcmp.lt.s32.totalorder %v5347_v38, 97 }
 0x42d   :  { %2151 = vrot.lane.b32.xlu1 %v10799_v9, %s5043_s6  ;;  %v6767_v23 = vpop.permute.xlu1 %1347  ;;  %v1341_v1 = vmul.f32 %v6467_v39, %v1333_v15  ;;  %v1342_v54 = vmul.f32 %v6467_v39, %v1334_v53 }
 0x42e   :  { %v1357_v42 = vsel %vm10336_vm9, %v1352_v26, %v6767_v23  ;;  %v1344_v22 = vadd.f32 %v1340_v28, %v1316_v61  ;;  %v10850_v61 = vld [vmem:[#allocation104_spill] sm:$0xff] }
 0x42f   :  { %v1360_v29 = vmul.f32 %v1357_v42, %v5499_v13  ;;  %v1345_v59 = vadd.f32 %v1341_v1, %v1317_v63  ;;  %v1346_v18 = vadd.f32 %v1342_v54, %v1318_v4  ;;  %v10848_v54 = vld [vmem:[#allocation53_spill] sm:$0xff]  ;;  %v10849_v63 = vld [vmem:[#allocation99_spill] sm:$0xff] }
 0x431   :  { %2190 = vrot.lane.b32.xlu1 %v10721_v46, %s5045_s23  ;;  %v1350_v44 = vpop.permute.xlu1 %1349 }
 0x435   :  { %2192 = vrot.lane.b32.xlu1 %v5265_v6, %s5045_s23  ;;  %v1354_v51 = vpop.permute.xlu1 %1353 }
 0x436   :  { %v1356_v35 = vsel %vm10336_vm9, %v1350_v44, %v1354_v51  ;;  %v1358_v5 = vsel %vm10336_vm9, %v1354_v51, %v1350_v44  ;;  %v1355_v44 = vsel %vm10336_vm9, %v6767_v23, %v1352_v26 }
 0x437   :  { %v1361_v14 = vmul.f32 %v1356_v35, %v5495_v43  ;;  %v1362_v62 = vmul.f32 %v1358_v5, %v5499_v13  ;;  %v1359_v24 = vmul.f32 %v1355_v44, %v5495_v43  ;;  %v1368_v35 = vmul.f32 %v6471_v56, %v1360_v29 }
 0x439   :  { %2196 = vrot.lane.b32.xlu1 %v10799_v9, %s5045_s23  ;;  %v1376_v3 = vpop.permute.xlu1 %1375  ;;  %v1369_v48 = vmul.f32 %v6471_v56, %v1361_v14  ;;  %v1370_v0 = vmul.f32 %v6471_v56, %v1362_v62  ;;  %v1367_v11 = vmul.f32 %v6471_v56, %v1359_v24  ;;  %v1372_v42 = vadd.f32 %v1368_v35, %v1344_v22 }
 0x43a   :  { %v1383_v23 = vsel %vm10328_vm13, %v1376_v3, %v1380_v60  ;;  %v1385_v51 = vsel %vm10328_vm13, %v1380_v60, %v1376_v3  ;;  %v1339_v3 = vmul.f32 %v6467_v39, %v1331_v10 }
 0x43b   :  { %v1387_v52 = vmul.f32 %v1383_v23, %v5679_v58  ;;  %v1388_v25 = vmul.f32 %v1385_v51, %v5683_v16  ;;  %v1373_v5 = vadd.f32 %v1369_v48, %v1345_v59  ;;  %v1374_v33 = vadd.f32 %v1370_v0, %v1346_v18  ;;  %v10851_v18 = vld [vmem:[#allocation102_spill] sm:$0xff] }
 0x43c   :  { %v1343_v53 = vadd.f32 %v1339_v3, %v1315_v57 }
 0x43d   :  { %2231 = vrot.lane.b32.xlu1 %v10721_v46, %s5049_s4  ;;  %v1378_v30 = vpop.permute.xlu1 %1377  ;;  %v1395_v47 = vmul.f32 %v6679_v40, %v1387_v52  ;;  %v1396_v34 = vmul.f32 %v6679_v40, %v1388_v25 }
 0x43e   :  { %v1371_v44 = vadd.f32 %v1367_v11, %v1343_v53 }
 0x43f   :  { %v1400_v7 = vadd.f32 %v1396_v34, %v1372_v42 }
 0x440   :  { %v1399_v10 = vadd.f32 %v1395_v47, %v1371_v44 }
 0x441   :  { %2233 = vrot.lane.b32.xlu1 %v5265_v6, %s5049_s4  ;;  %v1382_v26 = vpop.permute.xlu1 %1381  ;;  %v1411_v52 = vrot.slane %v1400_v7, %v10767_v8  ;;  %v1464_v34 = vrot.slane %v1400_v7, %v6254_v55 }
 0x442   :  { %v1384_v45 = vsel %vm10328_vm13, %v1378_v30, %v1382_v26  ;;  %v1386_v49 = vsel %vm10328_vm13, %v1382_v26, %v1378_v30  ;;  %v1407_v26 = vrot.slane %v1399_v10, %v10767_v8  ;;  %v1432_v25 = vrot.slane %v1399_v10, %v10768_v32 }
 0x443   :  { %v1389_v50 = vmul.f32 %v1384_v45, %v5679_v58  ;;  %v1390_v37 = vmul.f32 %v1386_v49, %v5683_v16  ;;  %v1436_v45 = vrot.slane %v1400_v7, %v10768_v32  ;;  %v1460_v47 = vrot.slane %v1399_v10, %v6254_v55 }
 0x444   :  { %v1425_v35 = vmul.f32 %v10847_v2, %v1407_v26 }
 0x445   :  { %v1397_v31 = vmul.f32 %v6679_v40, %v1389_v50  ;;  %v1398_v15 = vmul.f32 %v6679_v40, %v1390_v37  ;;  %2237 = vrot.lane.b32.xlu1 %v10799_v9, %s5049_s4  ;;  %v1450_v53 = vmul.f32 %v10848_v54, %v1436_v45  ;;  %v1477_v42 = vmul.f32 %v10850_v61, %v1460_v47  ;;  %v2353_v45 = vld [vmem:[%s10115_s9] sm:$0xf] }
 0x446   :  { %v10862_v47 = vmov 3  }
 0x447   :  { %v1401_v39 = vadd.f32 %v1397_v31, %v1373_v5  ;;  %v1402_v41 = vadd.f32 %v1398_v15, %v1374_v33  ;;  %v1426_v5 = vmul.f32 %v10847_v2, %v1411_v52  ;;  %v1449_v15 = vmul.f32 %v10848_v54, %v1432_v25 }
 0x448   :  { %v10858_v52 = vmov 2  }
 0x449   :  { %v1415_v56 = vrot.slane %v1401_v39, %v10767_v8  ;;  %v1419_v14 = vrot.slane %v1402_v41, %v10767_v8  ;;  %v1440_v62 = vrot.slane %v1401_v39, %v10768_v32  ;;  %v1444_v30 = vrot.slane %v1402_v41, %v10768_v32 }
 0x44a   :  { %v1468_v60 = vrot.slane %v1401_v39, %v6254_v55  ;;  %v1472_v21 = vrot.slane %v1402_v41, %v6254_v55  ;;  %v1496_v4 = vrot.slane %v1401_v39, %v10849_v63  ;;  %v1500_v24 = vrot.slane %v1402_v41, %v10849_v63  ;;  %v10892_v55 = vld [vmem:[#allocation116_spill] sm:$0xff] }
 0x44b   :  { %v1427_v40 = vmul.f32 %v10847_v2, %v1415_v56  ;;  %v1428_v1 = vmul.f32 %v10847_v2, %v1419_v14  ;;  %v1451_v23 = vmul.f32 %v10848_v54, %v1440_v62  ;;  %v1452_v51 = vmul.f32 %v10848_v54, %v1444_v30 }
 0x44c   :  { %v1479_v48 = vmul.f32 %v10850_v61, %v1468_v60  ;;  %v1480_v0 = vmul.f32 %v10850_v61, %v1472_v21  ;;  %v1507_v50 = vmul.f32 %v10851_v18, %v1496_v4  ;;  %v1508_v37 = vmul.f32 %v10851_v18, %v1500_v24  ;;  %v10856_v24 = vld [vmem:[#allocation63_spill] sm:$0xff] }
 0x44d   :  { %v1455_v29 = vadd.f32 %v1451_v23, %v1427_v40  ;;  %v1456_v57 = vadd.f32 %v1452_v51, %v1428_v1  ;;  %v1453_v41 = vadd.f32 %v1449_v15, %v1425_v35  ;;  %v1454_v44 = vadd.f32 %v1450_v53, %v1426_v5 }
 0x44e   :  { %v6909_v3 = vpop.permute.xlu1 %1836  ;;  %v1478_v56 = vmul.f32 %v10850_v61, %v1464_v34  ;;  %v1488_v14 = vrot.slane %v1399_v10, %v10849_v63  ;;  %v1492_v62 = vrot.slane %v1400_v7, %v10849_v63  ;;  %v10857_v61 = vld [vmem:[#allocation30_spill] sm:$0xff]  ;;  %v10893_v63 = vld [vmem:[#allocation105_spill] sm:$0xff] }
 0x44f   :  { %v1483_v49 = vadd.f32 %v1479_v48, %v1455_v29  ;;  %v1484_v59 = vadd.f32 %v1480_v0, %v1456_v57  ;;  %v1481_v30 = vadd.f32 %v1477_v42, %v1453_v41  ;;  %v6950_v57 = vpop.permute.xlu0 %1848  ;;  %v10326_v48 = vmov 24  }
 0x450   :  { %v1482_v60 = vadd.f32 %v1478_v56, %v1454_v44  ;;  %v1505_v2 = vmul.f32 %v10851_v18, %v1488_v14  ;;  %v1506_v40 = vmul.f32 %v10851_v18, %v1492_v62  ;;  %v10864_v44 = vmov 0  }
 0x451   :  { %v6911_v28 = vadd.f32 %v1507_v50, %v1483_v49  ;;  %v6913_v11 = vadd.f32 %v1508_v37, %v1484_v59  ;;  %v10859_v50 = vmov 1  }
 0x452   :  { %v6925_v39 = vpop.permute.xlu1 %1859  ;;  %v6935_v1 = vadd.f32 %v1505_v2, %v1481_v30  ;;  %v6937_v54 = vadd.f32 %v1506_v40, %v1482_v60 }
 0x453   :  { %10852 = vst [vmem:[#allocation64_spill] sm:$0xff] %v6911_v28  ;;  %10853 = vst [vmem:[#allocation53_spill] sm:$0xff] %v6913_v11  ;;  %v1518_v33 = vsel %vm651_vm5, %v6911_v28, 0.0  ;;  %v1519_v31 = vsel %vm651_vm5, %v6913_v11, 0.0  ;;  %v6958_v26 = vpop.permute.xlu0 %1863  ;;  %v10889_v28 = vld [vmem:[#allocation34_spill] sm:$0xff] }
 0x454   :  { %v1520_v22 = vadd.f32 %v1519_v31, %v1518_v33  ;;  %10854 = vst [vmem:[#allocation104_spill] sm:$0xff] %v6935_v1  ;;  %10855 = vst [vmem:[#allocation102_spill] sm:$0xff] %v6937_v54  ;;  %v1513_v51 = vsel %vm651_vm5, %v6935_v1, 0.0  ;;  %v1514_v10 = vsel %vm651_vm5, %v6937_v54, 0.0 }
 0x455   :  { %v1515_v7 = vadd.f32 %v1514_v10, %v1513_v51 }
 0x456   :  { %1521 = vadd.xlane.f32.xlu0 %v1520_v22  ;;  %v6931_v21 = vpop.permute.xlu1 %1861 }
 0x457   :  { %v6969_v49 = vpop.permute.xlu0 %1889 }
 0x45a   :  { %v6939_v23 = vpop.permute.xlu1 %1865 }
 0x45b   :  { %v6975_v18 = vpop.permute.xlu0 %1904 }
 0x45e   :  { %v6945_v4 = vpop.permute.xlu1 %1900 }
 0x45f   :  { %v6985_v35 = vpop.permute.xlu0 %1929 }
 0x462   :  { %v6948_v29 = vpop.permute.xlu1 %1902 }
 0x463   :  { %v6991_v33 = vpop.permute.xlu0 %1976 }
 0x466   :  { %v6955_v0 = vpop.permute.xlu1 %1906 }
 0x467   :  { %v6997_v15 = vpop.permute.xlu0 %1991 }
 0x469   :  { %1516 = vadd.xlane.f32.xlu1 %v1515_v7  ;;  %v7030_v7 = vld [vmem:[#allocation7] sm:$0x3] }
 0x46a   :  { %v6964_v25 = vpop.permute.xlu1 %1941  ;;  %vm1582_vm6 = vcmp.ge.f32.partialorder %v7030_v7, 2.0  ;;  %vm1583_vm3 = vcmp.le.f32.partialorder %v7030_v7, 17.0 }
 0x46b   :  { %v7002_v22 = vpop.permute.xlu0 %2016  ;;  %vm1584_vm12 = vmand %vm1582_vm6, %vm1583_vm3  ;;  %vm1577_vm6 = vcmp.lt.s32.totalorder %v5347_v38, 34  ;;  %vm1704_vm3 = vcmp.lt.s32.totalorder %v5347_v38, 31 }
 0x46c   :  { %2301 = vperm.xlu0 %4670, %v10856_v24   ;;  %10861 = vst [vmem:[#allocation134_spill] sm:$0xff] %v7002_v22 }
 0x46f   :  { %v6973_v59 = vpop.permute.xlu1 %1953  ;;  %v7007_v41 = vpop.permute.xlu0 %2031 }
 0x470   :  { %2316 = vrot.lane.b32.xlu0 %v10857_v61, %s5054_s5  ;;  %v10877_v61 = vmov 0.0  }
 0x471   :  { %4671 = vset.pattern.permute.xlu0 %v10326_v48  ;;  %v7041_v16 = vsel %vm1584_vm12, 1.0, %v10877_v61  ;;  %vm2158_vm12 = vcmp.ge.f32.partialorder %v7030_v7, -2.0 }
 0x472   :  { %10878 = vst [vmem:[#allocation148_spill] sm:$0xff] %v7041_v16  ;;  %v1628_v12 = vmul.f32 %v7041_v16, %v10881_v17  ;;  %v1709_v54 = vmul.f32 %v7041_v16, %v10889_v28 }
 0x473   :  { %v6983_v37 = vpop.permute.xlu1 %1987  ;;  %v7012_v56 = vpop.permute.xlu0 %2057 }
 0x474   :  { %2342 = vperm.xlu0 %4671, %v10856_v24   ;;  %10866 = vst [vmem:[#allocation137_spill] sm:$0xff] %v7012_v56 }
 0x477   :  { %v6989_v5 = vpop.permute.xlu1 %1989  ;;  %v7016_v62 = vpop.permute.xlu0 %2093 }
 0x478   :  { %4672 = vset.pattern.permute.xlu0 %v10858_v52  ;;  %v10888_v52 = vld [vmem:[#allocation114_spill] sm:$0xff] }
 0x479   :  { %1685 = vperm.xlu0 %4672, %v10856_v24  }
 0x47a   :  { %2271 = vrot.lane.b32.xlu1 %v10721_v46, %s5051_s1 }
 0x47b   :  { %v6995_v31 = vpop.permute.xlu1 %1993  ;;  %v7018_v30 = vpop.permute.xlu0 %2108 }
 0x47c   :  { %10868 = vst [vmem:[#allocation139_spill] sm:$0xff] %v7018_v30 }
 0x47d   :  { %2424 = vperm.xlu0 %4672, %v2353_v45  }
 0x47e   :  { %2273 = vrot.lane.b32.xlu1 %v5265_v6, %s5051_s1 }
 0x47f   :  { %v7000_v53 = vpop.permute.xlu1 %2027  ;;  %v7022_v2 = vpop.permute.xlu0 %2134 }
 0x480   :  { %10860 = vst [vmem:[#allocation63_spill] sm:$0xff] %v7000_v53  ;;  %10870 = vst [vmem:[#allocation141_spill] sm:$0xff] %v7022_v2  ;;  %v10898_v2 = vld [vmem:[#allocation32_spill] sm:$0xff] }
 0x481   :  { %4675 = vset.pattern.permute.xlu0 %v10859_v50 }
 0x482   :  { %2277 = vrot.lane.b32.xlu1 %v10799_v9, %s5051_s1  ;;  %1645 = vperm.xlu0 %4675, %v10856_v24  }
 0x483   :  { %v7005_v34 = vpop.permute.xlu1 %2029  ;;  %v7026_v51 = vpop.permute.xlu0 %2149 }
 0x484   :  { %10863 = vst [vmem:[#allocation135_spill] sm:$0xff] %v7005_v34  ;;  %10872 = vst [vmem:[#allocation143_spill] sm:$0xff] %v7026_v51  ;;  %v10938_v34 = vld [vmem:[#allocation130_spill] sm:$0xff] }
 0x486   :  { %2312 = vrot.lane.b32.xlu1 %v10721_v46, %s5054_s5 }
 0x487   :  { %v7010_v42 = vpop.permute.xlu1 %2033  ;;  %v7034_v24 = vpop.permute.xlu0 %2179 }
 0x488   :  { %10865 = vst [vmem:[#allocation136_spill] sm:$0xff] %v7010_v42  ;;  %10874 = vst [vmem:[#allocation145_spill] sm:$0xff] %v7034_v24 }
 0x48a   :  { %2314 = vrot.lane.b32.xlu1 %v5265_v6, %s5054_s5 }
 0x48b   :  { %v7014_v14 = vpop.permute.xlu1 %2069 }
 0x48c   :  { %10867 = vst [vmem:[#allocation138_spill] sm:$0xff] %v7014_v14 }
 0x48e   :  { %2318 = vrot.lane.b32.xlu1 %v10799_v9, %s5054_s5  ;;  %v7038_v9 = vpop.permute.xlu0 %2194 }
 0x48f   :  { %10876 = vst [vmem:[#allocation147_spill] sm:$0xff] %v7038_v9 }
 0x490   :  { %v7020_v60 = vpop.permute.xlu1 %2081 }
 0x491   :  { %10869 = vst [vmem:[#allocation140_spill] sm:$0xff] %v7020_v60 }
 0x492   :  { %2372 = vperm.xlu1 %4673, %v2353_v45  }
 0x494   :  { %v7024_v40 = vpop.permute.xlu1 %2104 }
 0x495   :  { %10871 = vst [vmem:[#allocation142_spill] sm:$0xff] %v7024_v40 }
 0x496   :  { %4674 = vset.pattern.permute.xlu1 %v10859_v50  ;;  %v10887_v50 = vld [vmem:[#allocation106_spill] sm:$0xff] }
 0x497   :  { %2396 = vperm.xlu1 %4674, %v2353_v45   ;;  %v1580_v11 = vsel %vm1577_vm6, %v10887_v50, %v10888_v52 }
 0x498   :  { %v7028_v10 = vpop.permute.xlu1 %2106 }
 0x499   :  { %10873 = vst [vmem:[#allocation144_spill] sm:$0xff] %v7028_v10  ;;  %v10907_v10 = vld [vmem:[#allocation108_spill] sm:$0xff] }
 0x49b   :  { %4676 = vset.pattern.permute.xlu1 %v10862_v47  ;;  %v7083_v47 = vrot.slane %v1628_v12, %v10768_v32 }
 0x49c   :  { %2452 = vperm.xlu1 %4676, %v2353_v45   ;;  %v4766_v45 = vld [vmem:[#allocation9] sm:$0x3]  ;;  %v7036_v48 = vpop.permute.xlu1 %2110 }
 0x49d   :  { %vm1586_vm7 = vcmp.ge.f32.partialorder %v4766_v45, 2.0  ;;  %vm1587_vm11 = vcmp.le.f32.partialorder %v4766_v45, 17.0  ;;  %10875 = vst [vmem:[#allocation146_spill] sm:$0xff] %v7036_v48  ;;  %vm1750_vm1 = vcmp.ge.f32.partialorder %v4766_v45, -2.0  ;;  %vm1751_vm13 = vcmp.le.f32.partialorder %v4766_v45, 13.0  ;;  %v7055_v45 = vpop.permute.xlu0 %2220  ;;  %10891 = vst [vmem:[#allocation114_spill] sm:$0xff] %v7083_v47 }
 0x49e   :  { %vm1588_vm14 = vmand %vm1586_vm7, %vm1587_vm11  ;;  %10883 = vst [vmem:[#allocation151_spill] sm:$0xff] %v7055_v45  ;;  %v7096_v45 = vrot.slane %v7041_v16, %v10767_v8  ;;  %vm1745_vm7 = vcmp.lt.s32.totalorder %v5347_v38, 30  ;;  %vm1790_vm11 = vcmp.lt.s32.totalorder %v5347_v38, 18 }
 0x49f   :  { %v7044_v58 = vsel %vm1588_vm14, 1.0, %v10877_v61  ;;  %vm1752_vm9 = vmand %vm1750_vm1, %vm1751_vm13  ;;  %vm1664_vm13 = vcmp.lt.s32.totalorder %v5347_v38, 32  ;;  %vm2159_vm14 = vcmp.le.f32.partialorder %v7030_v7, 13.0 }
 0x4a0   :  { %4677 = vset.pattern.permute.xlu1 %v10864_v44  ;;  %10879 = vst [vmem:[#allocation149_spill] sm:$0xff] %v7044_v58  ;;  %v7046_v13 = vpop.permute.xlu1 %2145  ;;  %v1590_v43 = vmul.f32 %v7044_v58, %v7041_v16  ;;  %v7053_v20 = vsel %vm1752_vm9, 1.0, %v10877_v61  ;;  %v1578_v44 = vsel %vm1577_vm6, %v10888_v52, %v10887_v50  ;;  %vm1623_vm9 = vcmp.lt.s32.totalorder %v5347_v38, 33  ;;  %10894 = vst [vmem:[#allocation34_spill] sm:$0xff] %v7096_v45 }
 0x4a1   :  { %10880 = vst [vmem:[#allocation150_spill] sm:$0xff] %v7046_v13  ;;  %10882 = vst [vmem:[#allocation33_spill] sm:$0xff] %v7053_v20  ;;  %v1754_v1 = vmul.f32 %v7053_v20, %v7041_v16  ;;  %v1579_v52 = vsel %vm1577_vm6, %v10893_v63, %v10892_v55  ;;  %v1581_v50 = vsel %vm1577_vm6, %v10892_v55, %v10893_v63  ;;  %v7111_v55 = vpop.permute.xlu0 %2235 }
 0x4a2   :  { %v7061_v36 = vrot.slane %v1590_v43, %v10767_v8  ;;  %v7064_v19 = vrot.slane %v1590_v43, %v10768_v32  ;;  %v7080_v43 = vrot.slane %v1628_v12, %v10767_v8  ;;  %v7100_v12 = vrot.slane %v7041_v16, %v10768_v32  ;;  %10899 = vst [vmem:[#allocation32_spill] sm:$0xff] %v7111_v55  ;;  %v10906_v55 = vld [vmem:[#allocation109_spill] sm:$0xff]  ;;  %vm2160_vm1 = vmand %vm2158_vm12, %vm2159_vm14 }
 0x4a3   :  { %v7114_v63 = vrot.slane %v1709_v54, %v10767_v8  ;;  %v7117_v13 = vrot.slane %v1709_v54, %v10768_v32  ;;  %v1625_v48 = vsel %vm1623_vm9, %v10907_v10, %v10906_v55  ;;  %v1627_v54 = vsel %vm1623_vm9, %v10906_v55, %v10907_v10 }
 0x4a4   :  { %v7057_v27 = vpop.permute.xlu1 %2147  ;;  %10885 = vst [vmem:[#allocation153_spill] sm:$0xff] %v7061_v36  ;;  %10886 = vst [vmem:[#allocation154_spill] sm:$0xff] %v7064_v19  ;;  %v7103_v9 = vmul.f32 %v7061_v36, %v1580_v11  ;;  %v7106_v24 = vmul.f32 %v7064_v19, %v1578_v44  ;;  %v7121_v11 = vrot.slane %v1754_v1, %v10767_v8  ;;  %vm1867_vm12 = vcmp.lt.s32.totalorder %v5347_v38, 14 }
 0x4a5   :  { %10884 = vst [vmem:[#allocation152_spill] sm:$0xff] %v7057_v27  ;;  %10890 = vst [vmem:[#allocation106_spill] sm:$0xff] %v7080_v43  ;;  %v1795_v27 = vmul.f32 %v7044_v58, %v10898_v2  ;;  %v7126_v16 = vmul.f32 %v7061_v36, %v1581_v50  ;;  %v7129_v51 = vmul.f32 %v7064_v19, %v1579_v52  ;;  %v10909_v50 = vld [vmem:[#allocation120_spill] sm:$0xff]  ;;  %v10910_v36 = vld [vmem:[#allocation118_spill] sm:$0xff]  ;;  %vm1908_vm14 = vcmp.lt.s32.totalorder %v5347_v38, 2 }
 0x4a6   :  { %10895 = vst [vmem:[#allocation116_spill] sm:$0xff] %v7100_v12  ;;  %10896 = vst [vmem:[#allocation105_spill] sm:$0xff] %v7103_v9  ;;  %v7140_v40 = vrot.slane %v1754_v1, %v10768_v32  ;;  %v1624_v52 = vsel %vm1623_vm9, %v10910_v36, %v10909_v50  ;;  %v1626_v19 = vsel %vm1623_vm9, %v10909_v50, %v10910_v36  ;;  %v10918_v36 = vld [vmem:[#allocation123_spill] sm:$0xff]  ;;  %v10919_v50 = vld [vmem:[#allocation113_spill] sm:$0xff] }
 0x4a7   :  { %10897 = vst [vmem:[#allocation155_spill] sm:$0xff] %v7106_v24  ;;  %10900 = vst [vmem:[#allocation156_spill] sm:$0xff] %v7114_v63  ;;  %v7160_v10 = vrot.slane %v1795_v27, %v10767_v8  ;;  %v7163_v55 = vrot.slane %v1795_v27, %v10768_v32  ;;  %v7166_v60 = vmul.f32 %v7080_v43, %v1627_v54 }
 0x4a8   :  { %10901 = vst [vmem:[#allocation157_spill] sm:$0xff] %v7117_v13  ;;  %10902 = vst [vmem:[#allocation158_spill] sm:$0xff] %v7121_v11  ;;  %v7123_v44 = vpop.permute.xlu1 %2151  ;;  %v7169_v14 = vmul.f32 %v7083_v47, %v1625_v48  ;;  %v7188_v48 = vmul.f32 %v7080_v43, %v1626_v19  ;;  %v7191_v56 = vmul.f32 %v7083_v47, %v1624_v52  ;;  %v10930_v47 = vld [vmem:[#allocation117_spill] sm:$0xff]  ;;  %v10931_v43 = vld [vmem:[#allocation115_spill] sm:$0xff] }
 0x4a9   :  { %10903 = vst [vmem:[#allocation159_spill] sm:$0xff] %v7123_v44  ;;  %10904 = vst [vmem:[#allocation160_spill] sm:$0xff] %v7126_v16  ;;  %v10911_v44 = vld [vmem:[#allocation107_spill] sm:$0xff] }
 0x4aa   :  { %10905 = vst [vmem:[#allocation161_spill] sm:$0xff] %v7129_v51  ;;  %10908 = vst [vmem:[#allocation109_spill] sm:$0xff] %v7140_v40  ;;  %v7153_v30 = vmul.f32 %v10911_v44, %v7103_v9  ;;  %v7157_v1 = vmul.f32 %v10911_v44, %v7106_v24  ;;  %v1705_v9 = vsel %vm1704_vm3, %v10919_v50, %v10918_v36 }
 0x4ab   :  { %10914 = vst [vmem:[#allocation118_spill] sm:$0xff] %v7160_v10  ;;  %10915 = vst [vmem:[#allocation107_spill] sm:$0xff] %v7163_v55  ;;  %v1707_v24 = vsel %vm1704_vm3, %v10918_v36, %v10919_v50  ;;  %v7181_v27 = vmul.f32 %v10911_v44, %v7126_v16  ;;  %v7185_v54 = vmul.f32 %v10911_v44, %v7129_v51  ;;  %v10927_v44 = vld [vmem:[#allocation122_spill] sm:$0xff] }
 0x4ac   :  { %10912 = vst [vmem:[#allocation108_spill] sm:$0xff] %v7153_v30  ;;  %10913 = vst [vmem:[#allocation120_spill] sm:$0xff] %v7157_v1  ;;  %v7193_v1 = vpop.permute.xlu0 %2260  ;;  %v10925_v30 = vld [vmem:[#allocation112_spill] sm:$0xff]  ;;  %v10928_v51 = vld [vmem:[#allocation110_spill] sm:$0xff]  ;;  %v7211_v16 = vpop.permute.xlu1 %2190 }
 0x4ad   :  { %10916 = vst [vmem:[#allocation162_spill] sm:$0xff] %v7166_v60  ;;  %10917 = vst [vmem:[#allocation163_spill] sm:$0xff] %v7169_v14  ;;  %v10926_v14 = vld [vmem:[#allocation111_spill] sm:$0xff]  ;;  %v1665_v19 = vsel %vm1664_vm13, %v10928_v51, %v10927_v44  ;;  %v1667_v52 = vsel %vm1664_vm13, %v10927_v44, %v10928_v51  ;;  %v10933_v60 = vld [vmem:[#allocation121_spill] sm:$0xff] }
 0x4ae   :  { %10920 = vst [vmem:[#allocation123_spill] sm:$0xff] %v7181_v27  ;;  %10921 = vst [vmem:[#allocation113_spill] sm:$0xff] %v7185_v54  ;;  %v1666_v36 = vsel %vm1664_vm13, %v10926_v14, %v10925_v30  ;;  %v1668_v50 = vsel %vm1664_vm13, %v10925_v30, %v10926_v14  ;;  %v1708_v14 = vsel %vm1704_vm3, %v10930_v47, %v10931_v43  ;;  %v10932_v27 = vld [vmem:[#allocation124_spill] sm:$0xff] }
 0x4af   :  { %10922 = vst [vmem:[#allocation164_spill] sm:$0xff] %v7188_v48  ;;  %10923 = vst [vmem:[#allocation165_spill] sm:$0xff] %v7191_v56  ;;  %v1721_v30 = vmul.f32 %v7114_v63, %v1707_v24  ;;  %v1722_v54 = vmul.f32 %v7117_v13, %v1705_v9  ;;  %v1747_v51 = vsel %vm1745_vm7, %v10933_v60, %v10932_v27  ;;  %v10935_v56 = vld [vmem:[#allocation119_spill] sm:$0xff]  ;;  %v10937_v24 = vld [vmem:[#allocation126_spill] sm:$0xff] }
 0x4b0   :  { %10924 = vst [vmem:[#allocation166_spill] sm:$0xff] %v7193_v1  ;;  %10929 = vst [vmem:[#allocation112_spill] sm:$0xff] %v7211_v16  ;;  %v1706_v1 = vsel %vm1704_vm3, %v10931_v43, %v10930_v47  ;;  %v1749_v44 = vsel %vm1745_vm7, %v10932_v27, %v10933_v60  ;;  %v10934_v16 = vld [vmem:[#allocation127_spill] sm:$0xff]  ;;  %v1723_v27 = vmul.f32 %v7114_v63, %v1708_v14 }
 0x4b1   :  { %v1746_v48 = vsel %vm1745_vm7, %v10935_v56, %v10934_v16  ;;  %v1748_v9 = vsel %vm1745_vm7, %v10934_v16, %v10935_v56  ;;  %v10936_v47 = vld [vmem:[#allocation131_spill] sm:$0xff]  ;;  %v1724_v22 = vmul.f32 %v7117_v13, %v1706_v1  ;;  %v10939_v16 = vld [vmem:[#allocation128_spill] sm:$0xff]  ;;  %v7271_v13 = vpop.permute.xlu0 %2275  ;;  %v7274_v63 = vmul.f32 %v7121_v11, %v1749_v44 }
 0x4b2   :  { %v1791_v43 = vsel %vm1790_vm11, %v10937_v24, %v10936_v47  ;;  %v1793_v60 = vsel %vm1790_vm11, %v10936_v47, %v10937_v24  ;;  %v1792_v56 = vsel %vm1790_vm11, %v10939_v16, %v10938_v34  ;;  %v1794_v42 = vsel %vm1790_vm11, %v10938_v34, %v10939_v16  ;;  %10944 = vst [vmem:[#allocation115_spill] sm:$0xff] %v7271_v13 }
 0x4b3   :  { %v7260_v47 = vmul.f32 %v7096_v45, %v1668_v50  ;;  %v7263_v24 = vmul.f32 %v7100_v12, %v1666_v36  ;;  %v7266_v14 = vmul.f32 %v7121_v11, %v1748_v9  ;;  %v7269_v1 = vmul.f32 %v7140_v40, %v1746_v48  ;;  %10945 = vst [vmem:[#allocation124_spill] sm:$0xff] %v7274_v63  ;;  %v7283_v36 = vpop.permute.xlu1 %2192  ;;  %v10959_v11 = vld [vmem:[#allocation36_spill] sm:$0xff] }
 0x4b4   :  { %v7277_v53 = vmul.f32 %v7140_v40, %v1747_v51  ;;  %v1807_v34 = vmul.f32 %v7160_v10, %v1793_v60  ;;  %v1808_v50 = vmul.f32 %v7163_v55, %v1791_v43  ;;  %10947 = vst [vmem:[#allocation127_spill] sm:$0xff] %v7283_v36  ;;  %v1809_v48 = vmul.f32 %v7160_v10, %v1794_v42  ;;  %v10950_v51 = vld [vmem:[#allocation125_spill] sm:$0xff] }
 0x4b5   :  { %10940 = vst [vmem:[#allocation111_spill] sm:$0xff] %v7260_v47  ;;  %10941 = vst [vmem:[#allocation122_spill] sm:$0xff] %v7263_v24  ;;  %v1810_v9 = vmul.f32 %v7163_v55, %v1792_v56  ;;  %v7288_v16 = vmul.f32 %v7096_v45, %v1667_v52  ;;  %v7291_v44 = vmul.f32 %v7100_v12, %v1665_v19  ;;  %v10951_v42 = vld [vmem:[#allocation129_spill] sm:$0xff]  ;;  %v10956_v55 = vld [vmem:[#allocation132_spill] sm:$0xff] }
 0x4b6   :  { %10942 = vst [vmem:[#allocation110_spill] sm:$0xff] %v7266_v14  ;;  %10943 = vst [vmem:[#allocation117_spill] sm:$0xff] %v7269_v1  ;;  %v7294_v40 = vmul.f32 %v10950_v51, %v1721_v30  ;;  %v7297_v43 = vmul.f32 %v10950_v51, %v1722_v54  ;;  %v7300_v7 = vmul.f32 %v10950_v51, %v1723_v27  ;;  %v7316_v54 = vsel %vm2160_vm1, 1.0, %v10877_v61  ;;  %v10962_v12 = vld [vmem:[#allocation68_spill] sm:$0xff] }
 0x4b7   :  { %10946 = vst [vmem:[#allocation121_spill] sm:$0xff] %v7277_v53  ;;  %10948 = vst [vmem:[#allocation119_spill] sm:$0xff] %v7288_v16  ;;  %v7303_v60 = vmul.f32 %v10950_v51, %v1724_v22  ;;  %v7307_v56 = vmul.f32 %v10951_v42, %v7266_v14  ;;  %v7311_v19 = vmul.f32 %v10951_v42, %v7269_v1  ;;  %v10954_v51 = vld [vmem:[#allocation133_spill] sm:$0xff]  ;;  %v7358_v45 = vpop.permute.xlu1 %2196  ;;  %vm1995_vm1 = vcmp.lt.s32.totalorder %v5347_v38, 126 }
 0x4b8   :  { %10949 = vst [vmem:[#allocation131_spill] sm:$0xff] %v7291_v44  ;;  %v1872_v52 = vmul.f32 %v7053_v20, %v10898_v2  ;;  %10952 = vst [vmem:[#allocation126_spill] sm:$0xff] %v7316_v54  ;;  %v7322_v22 = vmul.f32 %v10951_v42, %v7274_v63  ;;  %v7326_v27 = vmul.f32 %v10951_v42, %v7277_v53  ;;  %v10955_v2 = vld [vmem:[#allocation66_spill] sm:$0xff]  ;;  %v10960_v53 = vld [vmem:[#allocation67_spill] sm:$0xff] }
 0x4b9   :  { %v7329_v14 = vmul.f32 %v10954_v51, %v1807_v34  ;;  %v7332_v1 = vmul.f32 %v10954_v51, %v1808_v50  ;;  %v7336_v61 = vmul.f32 %v10956_v55, %v10955_v2  ;;  %v7339_v10 = vmul.f32 %v10954_v51, %v1809_v48  ;;  %10964 = vst [vmem:[#allocation66_spill] sm:$0xff] %v7358_v45 }
 0x4ba   :  { %v7342_v63 = vmul.f32 %v10954_v51, %v1810_v9  ;;  %v2040_v42 = vmul.f32 %v7044_v58, %v10959_v11  ;;  %v7348_v34 = vmul.f32 %v10956_v55, %v10960_v53  ;;  %v7352_v50 = vmul.f32 %v10956_v55, %v10962_v12  ;;  %v10965_v9 = vld [vmem:[#allocation69_spill] sm:$0xff] }
 0x4bb   :  { %10957 = vst [vmem:[#allocation128_spill] sm:$0xff] %v7336_v61  ;;  %v2117_v2 = vmul.f32 %v7053_v20, %v10959_v11  ;;  %v2162_v48 = vmul.f32 %v7316_v54, %v7044_v58  ;;  %v7362_v51 = vmul.f32 %v10956_v55, %v10965_v9  ;;  %v7366_v53 = vrot.slane %v1872_v52, %v10767_v8 }
 0x4bc   :  { %10958 = vst [vmem:[#allocation125_spill] sm:$0xff] %v7342_v63  ;;  %10961 = vst [vmem:[#allocation129_spill] sm:$0xff] %v7348_v34  ;;  %v2203_v12 = vmul.f32 %v7316_v54, %v10881_v17  ;;  %v7373_v11 = vrot.slane %v1872_v52, %v10768_v32  ;;  %v7378_v13 = vrot.slane %v7044_v58, %v10767_v8  ;;  %v10986_v63 = vld [vmem:[#allocation78_spill] sm:$0xff] }
 0x4bd   :  { %10963 = vst [vmem:[#allocation133_spill] sm:$0xff] %v7352_v50  ;;  %10966 = vst [vmem:[#allocation132_spill] sm:$0xff] %v7362_v51  ;;  %v7382_v55 = vrot.slane %v7044_v58, %v10768_v32  ;;  %v7387_v17 = vrot.slane %v7053_v20, %v10767_v8  ;;  %v7391_v52 = vrot.slane %v7053_v20, %v10768_v32 }
 0x4be   :  { %10967 = vst [vmem:[#allocation36_spill] sm:$0xff] %v7366_v53  ;;  %10969 = vst [vmem:[#allocation68_spill] sm:$0xff] %v7373_v11  ;;  %v7394_v9 = vrot.slane %v2040_v42, %v10767_v8  ;;  %v7400_v36 = vrot.slane %v2117_v2, %v10767_v8  ;;  %v7403_v58 = vrot.slane %v2117_v2, %v10768_v32  ;;  %v10983_v2 = vld [vmem:[#allocation74_spill] sm:$0xff] }
 0x4bf   :  { %10970 = vst [vmem:[#allocation69_spill] sm:$0xff] %v7378_v13  ;;  %10971 = vst [vmem:[#allocation167_spill] sm:$0xff] %v7382_v55  ;;  %v7406_v45 = vrot.slane %v2162_v48, %v10767_v8  ;;  %v1870_v51 = vsel %vm1867_vm12, %v6958_v26, %v6925_v39  ;;  %v7413_v50 = vrot.slane %v2162_v48, %v10768_v32 }
 0x4c0   :  { %10972 = vst [vmem:[#allocation168_spill] sm:$0xff] %v7387_v17  ;;  %10973 = vst [vmem:[#allocation169_spill] sm:$0xff] %v7391_v52  ;;  %v7419_v34 = vrot.slane %v2203_v12, %v10768_v32  ;;  %v7433_v48 = vmul.f32 %v6950_v57, %v10986_v63  ;;  %v7455_v63 = vrot.slane %v7316_v54, %v10768_v32 }
 0x4c1   :  { %10974 = vst [vmem:[#allocation170_spill] sm:$0xff] %v7394_v9  ;;  %10976 = vst [vmem:[#allocation172_spill] sm:$0xff] %v7400_v36 }
 0x4c2   :  { %10977 = vst [vmem:[#allocation173_spill] sm:$0xff] %v7403_v58  ;;  %10978 = vst [vmem:[#allocation174_spill] sm:$0xff] %v7406_v45  ;;  %v7425_v58 = vmul.f32 %v6950_v57, %v10983_v2  ;;  %v10984_v45 = vld [vmem:[#allocation75_spill] sm:$0xff]  ;;  %v10991_v2 = vld [vmem:[#allocation76_spill] sm:$0xff] }
 0x4c3   :  { %10979 = vst [vmem:[#allocation175_spill] sm:$0xff] %v7413_v50  ;;  %10981 = vst [vmem:[#allocation177_spill] sm:$0xff] %v7419_v34  ;;  %v7429_v61 = vmul.f32 %v6950_v57, %v10984_v45  ;;  %v7439_v34 = vpop.permute.xlu1 %2231  ;;  %v7447_v50 = vmul.f32 %v6991_v33, %v10991_v2  ;;  %v7451_v45 = vrot.slane %v7316_v54, %v10767_v8 }
 0x4c4   :  { %10987 = vst [vmem:[#allocation75_spill] sm:$0xff] %v7433_v48  ;;  %10988 = vst [vmem:[#allocation78_spill] sm:$0xff] %v7439_v34  ;;  %v10995_v48 = vld [vmem:[#allocation77_spill] sm:$0xff] }
 0x4c5   :  { %10985 = vst [vmem:[#allocation74_spill] sm:$0xff] %v7429_v61  ;;  %10992 = vst [vmem:[#allocation76_spill] sm:$0xff] %v7447_v50  ;;  %v11002_v50 = vld [vmem:[#allocation70_spill] sm:$0xff] }
 0x4c6   :  { %10993 = vst [vmem:[#allocation179_spill] sm:$0xff] %v7451_v45  ;;  %10994 = vst [vmem:[#allocation180_spill] sm:$0xff] %v7455_v63  ;;  %v1912_v63 = vsel %vm1908_vm14, %v6955_v0, %v6948_v29  ;;  %v11000_v45 = vld [vmem:[#allocation89_spill] sm:$0xff]  ;;  %v7496_v34 = vmul.f32 %v6909_v3, %v11002_v50 }
 0x4df   :  { %v7318_v30 = vpop.xlane.xlu0 %1521 }
 0x4e0   :  { %10953 = vst [vmem:[#allocation130_spill] sm:$0xff] %v7318_v30 }
 0x4e7   :  { %v7370_v30 = vpop.permute.xlu0 %2301 }
 0x4e8   :  { %10968 = vst [vmem:[#allocation67_spill] sm:$0xff] %v7370_v30  ;;  %v7397_v30 = vrot.slane %v2040_v42, %v10768_v32  ;;  %v7416_v42 = vrot.slane %v2203_v12, %v10767_v8  ;;  %v1868_v12 = vsel %vm1867_vm12, %v6925_v39, %v6958_v26  ;;  %v7459_v39 = vmul.f32 %v6991_v33, %v10995_v48 }
 0x4e9   :  { %v1884_v26 = vmul.f32 %v7366_v53, %v1870_v51  ;;  %v1885_v2 = vmul.f32 %v7373_v11, %v1868_v12  ;;  %v1909_v48 = vsel %vm1908_vm14, %v6945_v4, %v6975_v18  ;;  %v1911_v51 = vsel %vm1908_vm14, %v6975_v18, %v6945_v4  ;;  %v11003_v4 = vld [vmem:[#allocation71_spill] sm:$0xff] }
 0x4ea   :  { %10975 = vst [vmem:[#allocation171_spill] sm:$0xff] %v7397_v30  ;;  %10980 = vst [vmem:[#allocation176_spill] sm:$0xff] %v7416_v42  ;;  %v7500_v18 = vmul.f32 %v6909_v3, %v11003_v4  ;;  %v7513_v50 = vmul.f32 %v7378_v13, %v1911_v51  ;;  %v7519_v4 = vmul.f32 %v7378_v13, %v1912_v63  ;;  %v11013_v63 = vld [vmem:[#allocation97_spill] sm:$0xff] }
 0x4eb   :  { %v7421_v36 = vpop.permute.xlu0 %2316  ;;  %10996 = vst [vmem:[#allocation77_spill] sm:$0xff] %v7459_v39  ;;  %v7492_v39 = vmul.f32 %v6991_v33, %v11000_v45  ;;  %v7516_v45 = vmul.f32 %v7382_v55, %v1909_v48  ;;  %v11011_v48 = vld [vmem:[#allocation96_spill] sm:$0xff]  ;;  %v7541_v13 = vmul.f32 %v7016_v62, %v11013_v63  ;;  %v11018_v63 = vld [vmem:[#allocation91_spill] sm:$0xff] }
 0x4ec   :  { %10982 = vst [vmem:[#allocation178_spill] sm:$0xff] %v7421_v36  ;;  %v10989_v36 = vld [vmem:[#allocation79_spill] sm:$0xff]  ;;  %11005 = vst [vmem:[#allocation70_spill] sm:$0xff] %v7513_v50  ;;  %v7537_v51 = vmul.f32 %v7016_v62, %v11011_v48 }
 0x4ed   :  { %v7443_v42 = vmul.f32 %v6950_v57, %v10989_v36  ;;  %v1869_v57 = vsel %vm1867_vm12, %v6931_v21, %v6939_v23  ;;  %v1871_v36 = vsel %vm1867_vm12, %v6939_v23, %v6931_v21  ;;  %v10998_v23 = vld [vmem:[#allocation88_spill] sm:$0xff]  ;;  %11001 = vst [vmem:[#allocation89_spill] sm:$0xff] %v7492_v39  ;;  %11006 = vst [vmem:[#allocation71_spill] sm:$0xff] %v7516_v45 }
 0x4ee   :  { %v7488_v12 = vmul.f32 %v6991_v33, %v10998_v23  ;;  %v1887_v23 = vmul.f32 %v7373_v11, %v1869_v57  ;;  %v1910_v33 = vsel %vm1908_vm14, %v6948_v29, %v6955_v0  ;;  %v11010_v57 = vld [vmem:[#allocation73_spill] sm:$0xff]  ;;  %v7530_v29 = vmul.f32 %v6969_v49, %v1884_v26  ;;  %11014 = vst [vmem:[#allocation96_spill] sm:$0xff] %v7541_v13  ;;  %v11030_v13 = vld [vmem:[#allocation135_spill] sm:$0xff] }
 0x4ef   :  { %10990 = vst [vmem:[#allocation79_spill] sm:$0xff] %v7443_v42  ;;  %v7484_v21 = vpop.permute.xlu0 %2342  ;;  %v11004_v42 = vld [vmem:[#allocation72_spill] sm:$0xff]  ;;  %v7527_v11 = vmul.f32 %v6909_v3, %v11010_v57  ;;  %v7533_v0 = vmul.f32 %v6969_v49, %v1885_v2  ;;  %11012 = vst [vmem:[#allocation73_spill] sm:$0xff] %v7537_v51  ;;  %v1998_v26 = vsel %vm1995_vm1, %v6997_v15, %v6983_v37  ;;  %v11016_v57 = vld [vmem:[#allocation90_spill] sm:$0xff] }
 0x4f0   :  { %10997 = vst [vmem:[#allocation181_spill] sm:$0xff] %v7484_v21  ;;  %10999 = vst [vmem:[#allocation88_spill] sm:$0xff] %v7488_v12  ;;  %v7504_v61 = vmul.f32 %v6909_v3, %v11004_v42  ;;  %v1886_v21 = vmul.f32 %v7366_v53, %v1871_v36  ;;  %v11008_v42 = vld [vmem:[#allocation35_spill] sm:$0xff]  ;;  %v7523_v36 = vpop.permute.xlu1 %2233  ;;  %v1996_v3 = vsel %vm1995_vm1, %v6983_v37, %v6997_v15 }
 0x4f1   :  { %11007 = vst [vmem:[#allocation72_spill] sm:$0xff] %v7519_v4  ;;  %v1961_v39 = vrot.slane %v6973_v59, %v11008_v42  ;;  %11009 = vst [vmem:[#allocation182_spill] sm:$0xff] %v7523_v36  ;;  %v7544_v59 = vmul.f32 %v7382_v55, %v1910_v33  ;;  %v7556_v48 = vmul.f32 %v7016_v62, %v11016_v57  ;;  %v11045_v36 = vld [vmem:[#allocation123_spill] sm:$0xff] }
 0x4f2   :  { %v7560_v42 = vmul.f32 %v7016_v62, %v11018_v63  ;;  %v7563_v33 = vmul.f32 %v6969_v49, %v1886_v21  ;;  %v7566_v55 = vmul.f32 %v6969_v49, %v1887_v23  ;;  %v7570_v53 = vmul.f32 %v6985_v35, %v7513_v50  ;;  %v11023_v50 = vld [vmem:[#allocation81_spill] sm:$0xff] }
 0x4f3   :  { %11015 = vst [vmem:[#allocation97_spill] sm:$0xff] %v7544_v59  ;;  %11017 = vst [vmem:[#allocation90_spill] sm:$0xff] %v7556_v48  ;;  %v7574_v37 = vmul.f32 %v6985_v35, %v7516_v45  ;;  %v7578_v15 = vmul.f32 %v6985_v35, %v7519_v4  ;;  %v7581_v62 = vmul.f32 %v1961_v39, %v10721_v46  ;;  %v11022_v4 = vld [vmem:[#allocation80_spill] sm:$0xff] }
 0x4f4   :  { %v1686_v2 = vpop.permute.xlu0 %1685  ;;  %11019 = vst [vmem:[#allocation91_spill] sm:$0xff] %v7560_v42  ;;  %v7584_v21 = vmul.f32 %v1961_v39, %v5265_v6  ;;  %v7587_v49 = vmul.f32 %v7387_v17, %v1996_v3  ;;  %v7590_v23 = vmul.f32 %v7391_v52, %v1998_v26  ;;  %v2284_v57 = vmul.f32 %v7316_v54, %v10889_v28  ;;  %v11024_v3 = vld [vmem:[#allocation82_spill] sm:$0xff]  ;;  %v7610_v26 = vpop.permute.xlu1 %2237  ;;  %v11027_v28 = vld [vmem:[#allocation83_spill] sm:$0xff] }
 0x4f5   :  { %v7596_v63 = vmul.f32 %v6985_v35, %v7544_v59  ;;  %v7600_v45 = vmul.f32 %v6964_v25, %v11022_v4  ;;  %v7604_v39 = vmul.f32 %v6964_v25, %v11023_v50  ;;  %v7608_v6 = vmul.f32 %v6964_v25, %v11024_v3  ;;  %11025 = vst [vmem:[#allocation80_spill] sm:$0xff] %v7610_v26  ;;  %v11028_v3 = vld [vmem:[#allocation63_spill] sm:$0xff]  ;;  %v11046_v26 = vld [vmem:[#allocation113_spill] sm:$0xff] }
 0x4f6   :  { %11020 = vst [vmem:[#allocation183_spill] sm:$0xff] %v7587_v49  ;;  %11021 = vst [vmem:[#allocation184_spill] sm:$0xff] %v7590_v23  ;;  %v7616_v35 = vmul.f32 %v6964_v25, %v11027_v28  ;;  %v1997_v4 = vsel %vm1995_vm1, %v6989_v5, %v6995_v31  ;;  %v1999_v50 = vsel %vm1995_vm1, %v6995_v31, %v6989_v5  ;;  %v11029_v28 = vld [vmem:[#allocation136_spill] sm:$0xff] }
 0x4f7   :  { %v2036_v59 = vsel %vm10463_vm2, %v11028_v3, %v7007_v41  ;;  %v2038_v25 = vsel %vm10463_vm2, %v7007_v41, %v11028_v3  ;;  %v2037_v51 = vsel %vm10463_vm2, %v11030_v13, %v11029_v28  ;;  %v2039_v5 = vsel %vm10463_vm2, %v11029_v28, %v11030_v13 }
 0x4f8   :  { %v7612_v46 = vpop.permute.xlu0 %2424  ;;  %v7655_v3 = vrot.slane %v2284_v57, %v10767_v8  ;;  %v7658_v48 = vmul.f32 %v7387_v17, %v1997_v4  ;;  %v7661_v12 = vmul.f32 %v7391_v52, %v1999_v50  ;;  %v2052_v13 = vmul.f32 %v7394_v9, %v2036_v59  ;;  %v7664_v28 = vpop.xlane.xlu1 %1516  ;;  %v11039_v50 = vld [vmem:[#allocation164_spill] sm:$0xff]  ;;  %v11040_v59 = vld [vmem:[#allocation165_spill] sm:$0xff] }
 0x4f9   :  { %11026 = vst [vmem:[#allocation81_spill] sm:$0xff] %v7612_v46  ;;  %v11031_v46 = vld [vmem:[#allocation134_spill] sm:$0xff]  ;;  %v7667_v31 = vrot.slane %v2284_v57, %v10768_v32  ;;  %v2325_v4 = vmul.f32 %v7316_v54, %v7053_v20  ;;  %vm10489_vm2 = vcmp.lt.s32.totalorder %v5347_v38, 110  ;;  %v11042_v57 = vld [vmem:[#allocation163_spill] sm:$0xff]  ;;  %v11043_v54 = vld [vmem:[#allocation108_spill] sm:$0xff] }
 0x4fa   :  { %v7648_v42 = vmul.f32 %v11031_v46, %v7587_v49  ;;  %v7652_v41 = vmul.f32 %v11031_v46, %v7590_v23  ;;  %11034 = vst [vmem:[#allocation63_spill] sm:$0xff] %v7655_v3  ;;  %11035 = vst [vmem:[#allocation136_spill] sm:$0xff] %v7658_v48  ;;  %v2053_v49 = vmul.f32 %v7397_v30, %v2038_v25 }
 0x4fb   :  { %11036 = vst [vmem:[#allocation135_spill] sm:$0xff] %v7661_v12  ;;  %11037 = vst [vmem:[#allocation134_spill] sm:$0xff] %v7664_v28  ;;  %v2054_v23 = vmul.f32 %v7394_v9, %v2037_v51  ;;  %v11041_v28 = vld [vmem:[#allocation162_spill] sm:$0xff]  ;;  %v1688_v25 = vmul.f32 %v1686_v2, %v7288_v16  ;;  %v1689_v51 = vmul.f32 %v1686_v2, %v7291_v44  ;;  %v11044_v9 = vld [vmem:[#allocation120_spill] sm:$0xff] }
 0x4fc   :  { %11032 = vst [vmem:[#allocation82_spill] sm:$0xff] %v7648_v42  ;;  %11033 = vst [vmem:[#allocation83_spill] sm:$0xff] %v7652_v41  ;;  %v2055_v41 = vmul.f32 %v7397_v30, %v2039_v5  ;;  %v1690_v5 = vmul.f32 %v1686_v2, %v7260_v47  ;;  %v1691_v30 = vmul.f32 %v1686_v2, %v7263_v24  ;;  %v11047_v47 = vld [vmem:[#allocation137_spill] sm:$0xff] }
 0x4fd   :  { %11038 = vst [vmem:[#allocation185_spill] sm:$0xff] %v7667_v31  ;;  %v1646_v3 = vpop.permute.xlu0 %1645  ;;  %v7697_v2 = vmul.f32 %v11047_v47, %v2052_v13  ;;  %v7700_v24 = vmul.f32 %v11047_v47, %v2053_v49 }
 0x4fe   :  { %v1648_v52 = vmul.f32 %v1646_v3, %v11039_v50  ;;  %v1649_v17 = vmul.f32 %v1646_v3, %v11040_v59  ;;  %v1650_v42 = vmul.f32 %v1646_v3, %v11041_v28  ;;  %v1651_v31 = vmul.f32 %v1646_v3, %v11042_v57 }
 0x4ff   :  { %v7690_v3 = vmul.f32 %v11031_v46, %v7658_v48  ;;  %v7694_v57 = vmul.f32 %v11031_v46, %v7661_v12  ;;  %v7711_v46 = vrot.slane %v2325_v4, %v10767_v8  ;;  %v11072_v48 = vld [vmem:[#allocation152_spill] sm:$0xff]  ;;  %v11076_v8 = vld [vmem:[#allocation75_spill] sm:$0xff] }
 0x500   :  { %v1652_v20 = vadd.f32 %v1648_v52, %v11043_v54  ;;  %v1653_v50 = vadd.f32 %v1649_v17, %v11044_v9  ;;  %v1654_v59 = vadd.f32 %v1650_v42, %v11045_v36  ;;  %v1655_v28 = vadd.f32 %v1651_v31, %v11046_v26  ;;  %v7702_v54 = vpop.permute.xlu1 %2271 }
 0x501   :  { %v7705_v36 = vmul.f32 %v11047_v47, %v2054_v23  ;;  %v7708_v26 = vmul.f32 %v11047_v47, %v2055_v41  ;;  %11048 = vst [vmem:[#allocation164_spill] sm:$0xff] %v7711_v46  ;;  %v7714_v31 = vrot.slane %v2325_v4, %v10768_v32  ;;  %v11051_v23 = vld [vmem:[#allocation138_spill] sm:$0xff]  ;;  %v11052_v47 = vld [vmem:[#allocation93_spill] sm:$0xff] }
 0x502   :  { %v1692_v17 = vadd.f32 %v1688_v25, %v1652_v20  ;;  %v1693_v52 = vadd.f32 %v1689_v51, %v1653_v50  ;;  %v1694_v9 = vadd.f32 %v1690_v5, %v1654_v59  ;;  %v1695_v42 = vadd.f32 %v1691_v30, %v1655_v28  ;;  %v11050_v25 = vld [vmem:[#allocation92_spill] sm:$0xff]  ;;  %v11054_v50 = vld [vmem:[#allocation85_spill] sm:$0xff]  ;;  %v11055_v28 = vld [vmem:[#allocation94_spill] sm:$0xff] }
 0x503   :  { %11049 = vst [vmem:[#allocation165_spill] sm:$0xff] %v7714_v31  ;;  %v7722_v51 = vmul.f32 %v11051_v23, %v11050_v25  ;;  %v7726_v41 = vmul.f32 %v11051_v23, %v11052_v47  ;;  %v11053_v5 = vld [vmem:[#allocation84_spill] sm:$0xff]  ;;  %v11058_v25 = vld [vmem:[#allocation86_spill] sm:$0xff]  ;;  %v11059_v47 = vld [vmem:[#allocation87_spill] sm:$0xff] }
 0x504   :  { %v1733_v49 = vadd.f32 %v7294_v40, %v1692_v17  ;;  %v1734_v13 = vadd.f32 %v7297_v43, %v1693_v52  ;;  %v1735_v20 = vadd.f32 %v7300_v7, %v1694_v9  ;;  %v1736_v30 = vadd.f32 %v7303_v60, %v1695_v42  ;;  %v11056_v17 = vld [vmem:[#allocation140_spill] sm:$0xff]  ;;  %v11057_v9 = vld [vmem:[#allocation95_spill] sm:$0xff] }
 0x505   :  { %v7730_v4 = vmul.f32 %v11051_v23, %v11053_v5  ;;  %v7734_v40 = vmul.f32 %v11051_v23, %v11054_v50  ;;  %v7742_v52 = vmul.f32 %v11056_v17, %v11055_v28  ;;  %v7746_v42 = vmul.f32 %v11056_v17, %v11057_v9  ;;  %v11062_v5 = vld [vmem:[#allocation142_spill] sm:$0xff]  ;;  %v11064_v9 = vld [vmem:[#allocation144_spill] sm:$0xff] }
 0x506   :  { %v1778_v43 = vadd.f32 %v7307_v56, %v1733_v49  ;;  %v1779_v7 = vadd.f32 %v7311_v19, %v1734_v13  ;;  %v1780_v60 = vadd.f32 %v7322_v22, %v1735_v20  ;;  %v1781_v59 = vadd.f32 %v7326_v27, %v1736_v30  ;;  %v7756_v19 = vpop.permute.xlu1 %2273  ;;  %v11060_v13 = vld [vmem:[#allocation125_spill] sm:$0xff]  ;;  %v11061_v30 = vld [vmem:[#allocation139_spill] sm:$0xff] }
 0x507   :  { %v7750_v23 = vmul.f32 %v11056_v17, %v11058_v25  ;;  %v7754_v56 = vmul.f32 %v11056_v17, %v11059_v47  ;;  %v2113_v50 = vsel %vm10489_vm2, %v11062_v5, %v11061_v30  ;;  %v2115_v28 = vsel %vm10489_vm2, %v11061_v30, %v11062_v5  ;;  %v11063_v17 = vld [vmem:[#allocation146_spill] sm:$0xff]  ;;  %v11068_v47 = vld [vmem:[#allocation132_spill] sm:$0xff]  ;;  %v11069_v30 = vld [vmem:[#allocation143_spill] sm:$0xff] }
 0x508   :  { %v1819_v22 = vadd.f32 %v7329_v14, %v1778_v43  ;;  %v1820_v27 = vadd.f32 %v7332_v1, %v1779_v7  ;;  %v1821_v49 = vadd.f32 %v7339_v10, %v1780_v60  ;;  %v1822_v20 = vadd.f32 %v11060_v13, %v1781_v59  ;;  %v11065_v1 = vld [vmem:[#allocation128_spill] sm:$0xff]  ;;  %v11066_v7 = vld [vmem:[#allocation129_spill] sm:$0xff]  ;;  %v11070_v5 = vld [vmem:[#allocation150_spill] sm:$0xff] }
 0x509   :  { %v2114_v14 = vsel %vm10489_vm2, %v11064_v9, %v11063_v17  ;;  %v2116_v10 = vsel %vm10489_vm2, %v11063_v17, %v11064_v9  ;;  %v11067_v59 = vld [vmem:[#allocation133_spill] sm:$0xff]  ;;  %v2154_v12 = vsel %vm10496_vm4, %v11070_v5, %v11069_v30  ;;  %v2156_v17 = vsel %vm10496_vm4, %v11069_v30, %v11070_v5  ;;  %v11071_v9 = vld [vmem:[#allocation159_spill] sm:$0xff] }
 0x50a   :  { %v1831_v43 = vadd.f32 %v11065_v1, %v1819_v22  ;;  %v1832_v60 = vadd.f32 %v11066_v7, %v1820_v27  ;;  %v1833_v25 = vadd.f32 %v11067_v59, %v1821_v49  ;;  %v1834_v13 = vadd.f32 %v11068_v47, %v1822_v20  ;;  %v11073_v59 = vld [vmem:[#allocation172_spill] sm:$0xff]  ;;  %v11074_v30 = vld [vmem:[#allocation173_spill] sm:$0xff] }
 0x50b   :  { %v2155_v22 = vsel %vm10496_vm4, %v11072_v48, %v11071_v9  ;;  %v2157_v27 = vsel %vm10496_vm4, %v11071_v9, %v11072_v48  ;;  %vm2239_vm2 = vcmp.lt.s32.totalorder %v5347_v38, 96  ;;  %v2129_v47 = vmul.f32 %v11073_v59, %v2113_v50  ;;  %v11075_v9 = vld [vmem:[#allocation74_spill] sm:$0xff]  ;;  %v11080_v50 = vld [vmem:[#allocation175_spill] sm:$0xff] }
 0x50c   :  { %v1843_v49 = vadd.f32 %v7496_v34, %v1831_v43  ;;  %v1844_v20 = vadd.f32 %v7500_v18, %v1832_v60  ;;  %v1845_v1 = vadd.f32 %v7504_v61, %v1833_v25  ;;  %v1846_v7 = vadd.f32 %v7527_v11, %v1834_v13  ;;  %v11077_v43 = vld [vmem:[#allocation79_spill] sm:$0xff]  ;;  %v7812_v60 = vpop.permute.xlu1 %2277  ;;  %v11078_v61 = vld [vmem:[#allocation174_spill] sm:$0xff] }
 0x50d   :  { %v2130_v5 = vmul.f32 %v11074_v30, %v2115_v28  ;;  %v2131_v44 = vmul.f32 %v11073_v59, %v2114_v14  ;;  %v2132_v16 = vmul.f32 %v11074_v30, %v2116_v10  ;;  %v7815_v11 = vmul.f32 %v11078_v61, %v2154_v12 }
 0x50e   :  { %v1855_v48 = vadd.f32 %v7425_v58, %v1843_v49  ;;  %v1856_v32 = vadd.f32 %v11075_v9, %v1844_v20  ;;  %v1857_v34 = vadd.f32 %v11076_v8, %v1845_v1  ;;  %v1858_v18 = vadd.f32 %v11077_v43, %v1846_v7  ;;  %v11084_v49 = vld [vmem:[#allocation141_spill] sm:$0xff] }
 0x50f   :  { %11079 = vst [vmem:[#allocation162_spill] sm:$0xff] %v7815_v11  ;;  %v7818_v25 = vmul.f32 %v11080_v50, %v2156_v17  ;;  %v7821_v28 = vmul.f32 %v11078_v61, %v2155_v22  ;;  %v7824_v14 = vmul.f32 %v11080_v50, %v2157_v27  ;;  %v7831_v12 = vmul.f32 %v11084_v49, %v2129_v47  ;;  %v11086_v47 = vld [vmem:[#allocation147_spill] sm:$0xff] }
 0x510   :  { %v1896_v58 = vadd.f32 %v7530_v29, %v1855_v48  ;;  %v1897_v8 = vadd.f32 %v7533_v0, %v1856_v32  ;;  %v1898_v10 = vadd.f32 %v7563_v33, %v1857_v34  ;;  %v1899_v13 = vadd.f32 %v7566_v55, %v1858_v18  ;;  %v11085_v33 = vld [vmem:[#allocation145_spill] sm:$0xff]  ;;  %v7866_v7 = vpop.permute.xlu1 %2312  ;;  %v11088_v34 = vld [vmem:[#allocation66_spill] sm:$0xff] }
 0x511   :  { %11081 = vst [vmem:[#allocation163_spill] sm:$0xff] %v7818_v25  ;;  %11082 = vst [vmem:[#allocation108_spill] sm:$0xff] %v7821_v28  ;;  %v7834_v17 = vmul.f32 %v11084_v49, %v2130_v5  ;;  %v7837_v22 = vmul.f32 %v11084_v49, %v2131_v44  ;;  %v7840_v27 = vmul.f32 %v11084_v49, %v2132_v16  ;;  %v11087_v5 = vld [vmem:[#allocation112_spill] sm:$0xff]  ;;  %vm2279_vm4 = vcmp.lt.s32.totalorder %v5347_v38, 95  ;;  %v11093_v49 = vld [vmem:[#allocation78_spill] sm:$0xff] }
 0x512   :  { %11083 = vst [vmem:[#allocation120_spill] sm:$0xff] %v7824_v14  ;;  %v1936_v29 = vadd.f32 %v7570_v53, %v1896_v58  ;;  %v1937_v32 = vadd.f32 %v7574_v37, %v1897_v8  ;;  %v1938_v0 = vadd.f32 %v7578_v15, %v1898_v10  ;;  %v1939_v55 = vadd.f32 %v7596_v63, %v1899_v13  ;;  %v11092_v13 = vld [vmem:[#allocation32_spill] sm:$0xff] }
 0x513   :  { %v7848_v20 = vmul.f32 %v11085_v33, %v7815_v11  ;;  %v7852_v1 = vmul.f32 %v11085_v33, %v7818_v25  ;;  %v7856_v16 = vmul.f32 %v11085_v33, %v7821_v28  ;;  %v7860_v44 = vmul.f32 %v11085_v33, %v7824_v14  ;;  %v11096_v33 = vld [vmem:[#allocation88_spill] sm:$0xff] }
 0x514   :  { %v1948_v53 = vadd.f32 %v7600_v45, %v1936_v29  ;;  %v1949_v37 = vadd.f32 %v7604_v39, %v1937_v32  ;;  %v1950_v15 = vadd.f32 %v7608_v6, %v1938_v0  ;;  %v1951_v63 = vadd.f32 %v7616_v35, %v1939_v55  ;;  %v11089_v45 = vld [vmem:[#allocation127_spill] sm:$0xff]  ;;  %v11094_v0 = vld [vmem:[#allocation80_spill] sm:$0xff]  ;;  %v11095_v55 = vld [vmem:[#allocation182_spill] sm:$0xff] }
 0x515   :  { %v2199_v48 = vsel %vm10497_vm10, %v11087_v5, %v11086_v47  ;;  %v2201_v9 = vsel %vm10497_vm10, %v11086_v47, %v11087_v5  ;;  %v2200_v39 = vsel %vm10497_vm10, %v11089_v45, %v11088_v34  ;;  %v2202_v6 = vsel %vm10497_vm10, %v11088_v34, %v11089_v45  ;;  %v11099_v5 = vld [vmem:[#allocation77_spill] sm:$0xff]  ;;  %v11100_v45 = vld [vmem:[#allocation176_spill] sm:$0xff] }
 0x516   :  { %v1971_v35 = vadd.f32 %v7581_v62, %v1948_v53  ;;  %v11090_v43 = vcombine.high %v7581_v62, %v7581_v62  ;;  %v1973_v58 = vadd.f32 %v7584_v21, %v1950_v15  ;;  %v11091_v8 = vcombine.high %v7584_v21, %v7584_v21 }
 0x517   :  { %v2240_v29 = vsel %vm2239_vm2, %v11093_v49, %v11092_v13  ;;  %v2242_v32 = vsel %vm2239_vm2, %v11092_v13, %v11093_v49  ;;  %v2241_v62 = vsel %vm2239_vm2, %v11095_v55, %v11094_v0  ;;  %v2243_v21 = vsel %vm2239_vm2, %v11094_v0, %v11095_v55  ;;  %v11102_v55 = vld [vmem:[#allocation82_spill] sm:$0xff] }
 0x518   :  { %v1972_v18 = vadd.f32 %v11090_v43, %v1949_v37  ;;  %v1974_v10 = vadd.f32 %v11091_v8, %v1951_v63  ;;  %v1985_v53 = vadd.f32 %v11096_v33, %v1973_v58  ;;  %v11097_v37 = vld [vmem:[#allocation89_spill] sm:$0xff]  ;;  %v11098_v63 = vld [vmem:[#allocation76_spill] sm:$0xff]  ;;  %vm2320_vm10 = vcmp.lt.s32.totalorder %v5347_v38, 94  ;;  %v11103_v33 = vld [vmem:[#allocation83_spill] sm:$0xff] }
 0x519   :  { %v1983_v47 = vadd.f32 %v11098_v63, %v1971_v35  ;;  %v2215_v43 = vmul.f32 %v11100_v45, %v2199_v48  ;;  %v11101_v8 = vld [vmem:[#allocation177_spill] sm:$0xff]  ;;  %v2217_v49 = vmul.f32 %v11100_v45, %v2200_v39  ;;  %v11163_v28 = vmov 20  }
 0x51a   :  { %v1986_v15 = vadd.f32 %v11097_v37, %v1974_v10  ;;  %v1984_v34 = vadd.f32 %v11099_v5, %v1972_v18  ;;  %v2216_v13 = vmul.f32 %v11101_v8, %v2201_v9  ;;  %v2218_v14 = vmul.f32 %v11101_v8, %v2202_v6  ;;  %v2315_v37 = vpop.permute.xlu1 %2314  ;;  %v11104_v18 = vld [vmem:[#allocation179_spill] sm:$0xff]  ;;  %v11106_v5 = vld [vmem:[#allocation180_spill] sm:$0xff] }
 0x51b   :  { %v2025_v0 = vadd.f32 %v7690_v3, %v1985_v53  ;;  %v2023_v10 = vadd.f32 %v11102_v55, %v1983_v47  ;;  %v7923_v63 = vmul.f32 %v11104_v18, %v2240_v29  ;;  %v7926_v48 = vmul.f32 %v11106_v5, %v2242_v32 }
 0x51c   :  { %v2026_v58 = vadd.f32 %v7694_v57, %v1986_v15  ;;  %v2024_v35 = vadd.f32 %v11103_v33, %v1984_v34  ;;  %v7929_v9 = vmul.f32 %v11104_v18, %v2241_v62  ;;  %v7932_v39 = vmul.f32 %v11106_v5, %v2243_v21  ;;  %v11110_v15 = vld [vmem:[#allocation151_spill] sm:$0xff] }
 0x51d   :  { %11105 = vst [vmem:[#allocation123_spill] sm:$0xff] %v7923_v63  ;;  %11107 = vst [vmem:[#allocation113_spill] sm:$0xff] %v7926_v48  ;;  %v2066_v3 = vadd.f32 %v7705_v36, %v2025_v0  ;;  %v2064_v6 = vadd.f32 %v7697_v2, %v2023_v10  ;;  %v2223_v29 = vmul.f32 %v11110_v15, %v2215_v43  ;;  %v11111_v2 = vld [vmem:[#allocation166_spill] sm:$0xff]  ;;  %v11114_v10 = vld [vmem:[#allocation91_spill] sm:$0xff]  ;;  %v11164_v25 = vmov 0  }
 0x51e   :  { %11108 = vst [vmem:[#allocation137_spill] sm:$0xff] %v7929_v9  ;;  %11109 = vst [vmem:[#allocation92_spill] sm:$0xff] %v7932_v39  ;;  %v2067_v57 = vadd.f32 %v7708_v26, %v2026_v58  ;;  %v2065_v53 = vadd.f32 %v7700_v24, %v2024_v35  ;;  %v2224_v47 = vmul.f32 %v11110_v15, %v2216_v13  ;;  %v2319_v13 = vpop.permute.xlu1 %2318  ;;  %v11115_v35 = vld [vmem:[#allocation73_spill] sm:$0xff] }
 0x51f   :  { %v2225_v32 = vmul.f32 %v11110_v15, %v2217_v49  ;;  %v2226_v62 = vmul.f32 %v11110_v15, %v2218_v14  ;;  %v2078_v34 = vadd.f32 %v7730_v4, %v2066_v3  ;;  %v2076_v36 = vadd.f32 %v7722_v51, %v2064_v6  ;;  %v11112_v49 = vld [vmem:[#allocation115_spill] sm:$0xff] }
 0x520   :  { %v2079_v21 = vadd.f32 %v7734_v40, %v2067_v57  ;;  %v2077_v26 = vadd.f32 %v7726_v41, %v2065_v53  ;;  %v2263_v0 = vmul.f32 %v11111_v2, %v7923_v63  ;;  %v2264_v24 = vmul.f32 %v11111_v2, %v7926_v48  ;;  %v11116_v57 = vld [vmem:[#allocation96_spill] sm:$0xff]  ;;  %v11117_v53 = vld [vmem:[#allocation178_spill] sm:$0xff] }
 0x521   :  { %v2265_v43 = vmul.f32 %v11111_v2, %v7929_v9  ;;  %v2266_v14 = vmul.f32 %v11111_v2, %v7932_v39  ;;  %v2090_v4 = vadd.f32 %v7750_v23, %v2078_v34  ;;  %v2088_v51 = vadd.f32 %v7742_v52, %v2076_v36  ;;  %v11118_v2 = vld [vmem:[#allocation63_spill] sm:$0xff] }
 0x522   :  { %v2091_v40 = vadd.f32 %v7754_v56, %v2079_v21  ;;  %v2089_v41 = vadd.f32 %v7746_v42, %v2077_v26  ;;  %v2280_v58 = vsel %vm2279_vm4, %v7702_v54, %v11112_v49  ;;  %v2282_v55 = vsel %vm2279_vm4, %v11112_v49, %v7702_v54  ;;  %v11113_v42 = vld [vmem:[#allocation90_spill] sm:$0xff] }
 0x523   :  { %v2281_v23 = vsel %vm2279_vm4, %v7756_v19, %v7812_v60  ;;  %v2283_v52 = vsel %vm2279_vm4, %v7812_v60, %v7756_v19  ;;  %v2102_v56 = vadd.f32 %v11113_v42, %v2090_v4  ;;  %v2100_v3 = vadd.f32 %v11115_v35, %v2088_v51 }
 0x524   :  { %v2103_v33 = vadd.f32 %v11114_v10, %v2091_v40  ;;  %v2101_v6 = vadd.f32 %v11116_v57, %v2089_v41  ;;  %v2321_v54 = vsel %vm2320_vm10, %v7866_v7, %v11117_v53  ;;  %v2323_v15 = vsel %vm2320_vm10, %v11117_v53, %v7866_v7  ;;  %v11119_v40 = vld [vmem:[#allocation185_spill] sm:$0xff] }
 0x525   :  { %v2322_v19 = vsel %vm2320_vm10, %v2315_v37, %v2319_v13  ;;  %v2324_v60 = vsel %vm2320_vm10, %v2319_v13, %v2315_v37  ;;  %v2143_v34 = vadd.f32 %v7837_v22, %v2102_v56  ;;  %v2141_v36 = vadd.f32 %v7831_v12, %v2100_v3  ;;  %v11125_v57 = vld [vmem:[#allocation181_spill] sm:$0xff] }
 0x526   :  { %v2144_v21 = vadd.f32 %v7840_v27, %v2103_v33  ;;  %v2142_v26 = vadd.f32 %v7834_v17, %v2101_v6  ;;  %v2296_v4 = vmul.f32 %v11118_v2, %v2280_v58  ;;  %v2297_v51 = vmul.f32 %v11119_v40, %v2282_v55 }
 0x527   :  { %v2298_v7 = vmul.f32 %v11118_v2, %v2281_v23  ;;  %v2299_v41 = vmul.f32 %v11119_v40, %v2283_v52  ;;  %v2188_v49 = vadd.f32 %v7856_v16, %v2143_v34  ;;  %v2186_v22 = vadd.f32 %v7848_v20, %v2141_v36  ;;  %v11124_v52 = vld [vmem:[#allocation67_spill] sm:$0xff] }
 0x528   :  { %v2189_v37 = vadd.f32 %v7860_v44, %v2144_v21  ;;  %v2187_v27 = vadd.f32 %v7852_v1, %v2142_v26  ;;  %v8003_v12 = vmul.f32 %v7711_v46, %v2321_v54  ;;  %v8006_v17 = vmul.f32 %v7714_v31, %v2323_v15 }
 0x529   :  { %v8009_v13 = vmul.f32 %v7711_v46, %v2322_v19  ;;  %v8012_v58 = vmul.f32 %v7714_v31, %v2324_v60  ;;  %v2229_v55 = vadd.f32 %v2225_v32, %v2188_v49  ;;  %v2227_v23 = vadd.f32 %v2223_v29, %v2186_v22  ;;  %v11126_v60 = vld [vmem:[#allocation37_spill] sm:$0xff] }
 0x52a   :  { %11120 = vst [vmem:[#allocation138_spill] sm:$0xff] %v8003_v12  ;;  %11121 = vst [vmem:[#allocation93_spill] sm:$0xff] %v8006_v17  ;;  %v2230_v16 = vadd.f32 %v2226_v62, %v2189_v37  ;;  %v2228_v44 = vadd.f32 %v2224_v47, %v2187_v27  ;;  %v2304_v20 = vmul.f32 %v11124_v52, %v2296_v4  ;;  %v2373_v62 = vpop.permute.xlu1 %2372  ;;  %v11127_v4 = vld [vmem:[#allocation38_spill] sm:$0xff]  ;;  %v11161_v39 = vmov 19  }
 0x52b   :  { %11122 = vst [vmem:[#allocation84_spill] sm:$0xff] %v8009_v13  ;;  %11123 = vst [vmem:[#allocation85_spill] sm:$0xff] %v8012_v58  ;;  %v2305_v1 = vmul.f32 %v11124_v52, %v2297_v51  ;;  %v2306_v42 = vmul.f32 %v11124_v52, %v2298_v7  ;;  %v2307_v56 = vmul.f32 %v11124_v52, %v2299_v41 }
 0x52c   :  { %v2269_v10 = vadd.f32 %v2265_v43, %v2229_v55  ;;  %v2270_v33 = vadd.f32 %v2266_v14, %v2230_v16  ;;  %v2267_v35 = vadd.f32 %v2263_v0, %v2227_v23  ;;  %v2268_v3 = vadd.f32 %v2264_v24, %v2228_v44 }
 0x52d   :  { %v2345_v6 = vmul.f32 %v11125_v57, %v8003_v12  ;;  %v2346_v32 = vmul.f32 %v11125_v57, %v8006_v17  ;;  %v2347_v29 = vmul.f32 %v11125_v57, %v8009_v13  ;;  %v2348_v47 = vmul.f32 %v11125_v57, %v8012_v58 }
 0x52e   :  { %v2310_v53 = vadd.f32 %v2306_v42, %v2269_v10  ;;  %v2311_v54 = vadd.f32 %v2307_v56, %v2270_v33  ;;  %v2308_v15 = vadd.f32 %v2304_v20, %v2267_v35  ;;  %v2309_v43 = vadd.f32 %v2305_v1, %v2268_v3  ;;  %v2397_v37 = vpop.permute.xlu1 %2396  ;;  %v11128_v1 = vld [vmem:[#allocation99_spill] sm:$0xff] }
 0x52f   :  { %v11160_v12 = vmov 13  }
 0x530   :  { %v2349_v14 = vadd.f32 %v2345_v6, %v2308_v15  ;;  %v2350_v0 = vadd.f32 %v2346_v32, %v2309_v43  ;;  %v2351_v24 = vadd.f32 %v2347_v29, %v2310_v53  ;;  %v2352_v19 = vadd.f32 %v2348_v47, %v2311_v54  ;;  %v11129_v29 = vld [vmem:[#allocation98_spill] sm:$0xff]  ;;  %v11130_v15 = vld [vmem:[#allocation81_spill] sm:$0xff] }
 0x532   :  { %v2357_v34 = vrot.slane %v2349_v14, %v11126_v60  ;;  %v2361_v21 = vrot.slane %v2350_v0, %v11126_v60  ;;  %v2365_v36 = vrot.slane %v2351_v24, %v11126_v60  ;;  %v2369_v26 = vrot.slane %v2352_v19, %v11126_v60  ;;  %v2453_v32 = vpop.permute.xlu1 %2452 }
 0x533   :  { %v2382_v51 = vrot.slane %v2349_v14, %v11127_v4  ;;  %v2386_v7 = vrot.slane %v2350_v0, %v11127_v4  ;;  %v2390_v41 = vrot.slane %v2351_v24, %v11127_v4  ;;  %v2394_v49 = vrot.slane %v2352_v19, %v11127_v4 }
 0x534   :  { %v2375_v22 = vmul.f32 %v2373_v62, %v2357_v34  ;;  %v2376_v27 = vmul.f32 %v2373_v62, %v2361_v21  ;;  %v2377_v55 = vmul.f32 %v2373_v62, %v2365_v36  ;;  %v2378_v16 = vmul.f32 %v2373_v62, %v2369_v26 }
 0x535   :  { %v2399_v23 = vmul.f32 %v2397_v37, %v2382_v51  ;;  %v2400_v44 = vmul.f32 %v2397_v37, %v2386_v7  ;;  %v2401_v52 = vmul.f32 %v2397_v37, %v2390_v41  ;;  %v2402_v20 = vmul.f32 %v2397_v37, %v2394_v49 }
 0x536   :  { %v2438_v42 = vrot.slane %v2349_v14, %v11128_v1  ;;  %v2442_v56 = vrot.slane %v2350_v0, %v11128_v1  ;;  %v2446_v10 = vrot.slane %v2351_v24, %v11128_v1  ;;  %v2450_v33 = vrot.slane %v2352_v19, %v11128_v1 }
 0x537   :  { %v2403_v35 = vadd.f32 %v2399_v23, %v2375_v22  ;;  %v2404_v3 = vadd.f32 %v2400_v44, %v2376_v27  ;;  %v2405_v57 = vadd.f32 %v2401_v52, %v2377_v55  ;;  %v2406_v6 = vadd.f32 %v2402_v20, %v2378_v16 }
 0x538   :  { %v2418_v47 = vrot.slane %v2351_v24, %v11129_v29  ;;  %v2422_v62 = vrot.slane %v2352_v19, %v11129_v29  ;;  %v2410_v53 = vrot.slane %v2349_v14, %v11129_v29  ;;  %v2414_v54 = vrot.slane %v2350_v0, %v11129_v29 }
 0x539   :  { %v2455_v26 = vmul.f32 %v2453_v32, %v2438_v42  ;;  %v2456_v51 = vmul.f32 %v2453_v32, %v2442_v56  ;;  %v2457_v7 = vmul.f32 %v2453_v32, %v2446_v10  ;;  %v2458_v41 = vmul.f32 %v2453_v32, %v2450_v33 }
 0x53a   :  { %v2429_v43 = vmul.f32 %v11130_v15, %v2418_v47  ;;  %v2430_v34 = vmul.f32 %v11130_v15, %v2422_v62  ;;  %v2427_v21 = vmul.f32 %v11130_v15, %v2410_v53  ;;  %v2428_v36 = vmul.f32 %v11130_v15, %v2414_v54 }
 0x53c   :  { %v2433_v49 = vadd.f32 %v2429_v43, %v2405_v57  ;;  %v2434_v24 = vadd.f32 %v2430_v34, %v2406_v6  ;;  %v2431_v37 = vadd.f32 %v2427_v21, %v2403_v35  ;;  %v2432_v19 = vadd.f32 %v2428_v36, %v2404_v3 }
 0x53e   :  { %v2461_v22 = vadd.f32 %v2457_v7, %v2433_v49  ;;  %v2462_v14 = vadd.f32 %v2458_v41, %v2434_v24  ;;  %v2459_v27 = vadd.f32 %v2455_v26, %v2431_v37  ;;  %v2460_v0 = vadd.f32 %v2456_v51, %v2432_v19 }
 0x540   :  { %v2468_v55 = vsel %vm651_vm5, %v2461_v22, 0.0  ;;  %v2469_v16 = vsel %vm651_vm5, %v2462_v14, 0.0  ;;  %v2463_v23 = vsel %vm651_vm5, %v2459_v27, 0.0  ;;  %v2464_v44 = vsel %vm651_vm5, %v2460_v0, 0.0 }
 0x541   :  { %v2470_v52 = vadd.f32 %v2469_v16, %v2468_v55  ;;  %v2465_v20 = vadd.f32 %v2464_v44, %v2463_v23 }
 0x543   :  { %2471 = vadd.xlane.f32.xlu0 %v2470_v52  ;;  %2466 = vadd.xlane.f32.xlu1 %v2465_v20 }
 0x5cc   :  { %v2472_v42 = vpop.xlane.xlu0 %2471  ;;  %v2467_v56 = vpop.xlane.xlu1 %2466 }
 0x5cd   :  { %v2474_v10 = vsel %vm651_vm5, %v2472_v42, 0.0  ;;  %v2473_v33 = vsel %vm651_vm5, %v2467_v56, 0.0  ;;  %v8074_v42 = vld [vmem:[#allocation13] sm:$0xf]  ;;  %v11135_v56 = vmov 12  }
 0x5ce   :  { %v2475_v35 = vadd.f32 %v2474_v10, %v2473_v33  ;;  %v11136_v10 = vmov 3   ;;  %v11137_v33 = vmov 4  }
 0x5d0   :  { %v2476_v3 = vmul.f32 0.001953125, %v2475_v35  ;;  %v11138_v35 = vmov 5  }
 0x5d2   :  { %v2479_v57 = vsub.f32 %v2461_v22, %v2476_v3  ;;  %v2480_v6 = vsub.f32 %v2462_v14, %v2476_v3  ;;  %v2477_v32 = vsub.f32 %v2459_v27, %v2476_v3  ;;  %v2478_v47 = vsub.f32 %v2460_v0, %v2476_v3  ;;  %v11139_v3 = vld [vmem:[#allocation134_spill] sm:$0xff] }
 0x5d4   :  { %v2483_v62 = vmul.f32 %v2479_v57, %v2479_v57  ;;  %v2484_v53 = vmul.f32 %v2480_v6, %v2480_v6  ;;  %v2481_v54 = vmul.f32 %v2477_v32, %v2477_v32  ;;  %v2482_v15 = vmul.f32 %v2478_v47, %v2478_v47 }
 0x5d6   :  { %v2490_v43 = vsel %vm651_vm5, %v2483_v62, 0.0  ;;  %v2491_v34 = vsel %vm651_vm5, %v2484_v53, 0.0  ;;  %v2485_v21 = vsel %vm651_vm5, %v2481_v54, 0.0  ;;  %v2486_v36 = vsel %vm651_vm5, %v2482_v15, 0.0  ;;  %v11141_v53 = vld [vmem:[#allocation104_spill] sm:$0xff]  ;;  %v11143_v15 = vld [vmem:[#allocation102_spill] sm:$0xff] }
 0x5d7   :  { %v2492_v26 = vadd.f32 %v2491_v34, %v2490_v43  ;;  %v2487_v51 = vadd.f32 %v2486_v36, %v2485_v21 }
 0x5d9   :  { %2493 = vadd.xlane.f32.xlu1 %v2492_v26  ;;  %2488 = vadd.xlane.f32.xlu0 %v2487_v51 }
 0x662   :  { %v2494_v7 = vpop.xlane.xlu1 %2493  ;;  %v2489_v41 = vpop.xlane.xlu0 %2488 }
 0x663   :  { %v2496_v49 = vsel %vm651_vm5, %v2494_v7, 0.0  ;;  %v2495_v24 = vsel %vm651_vm5, %v2489_v41, 0.0  ;;  %v11145_v7 = vld [vmem:[#allocation64_spill] sm:$0xff] }
 0x664   :  { %v2497_v37 = vadd.f32 %v2496_v49, %v2495_v24  ;;  %v11147_v49 = vld [vmem:[#allocation53_spill] sm:$0xff] }
 0x666   :  { %v2498_v19 = vmul.f32 0.001953125, %v2497_v37 }
 0x668   :  { %v2499_v22 = vadd.f32 1e-05, %v2498_v19 }
 0x66a   :  { %4751 = vrsqrt.f32 %v2499_v22 }
 0x677   :  { %v4752_v14 = vpop.eup %4751 }
 0x678   :  { %v2501_v27 = vmul.f32 %v4752_v14, %v2477_v32  ;;  %v2503_v0 = vmul.f32 %v4752_v14, %v2479_v57  ;;  %v2502_v55 = vmul.f32 %v4752_v14, %v2478_v47  ;;  %v2504_v16 = vmul.f32 %v4752_v14, %v2480_v6  ;;  %v11140_v6 = vld [vmem:[#allocation130_spill] sm:$0xff] }
 0x679   :  { %v1523_v57 = vsel %vm651_vm5, %v11139_v3, 0.0  ;;  %v1524_v32 = vsel %vm651_vm5, %v11140_v6, 0.0  ;;  %v11152_v3 = vmov 9   ;;  %v11154_v6 = vmov 11  }
 0x67a   :  { %v8058_v23 = vmax.f32 %v2501_v27, 0.0  ;;  %v8060_v44 = vmax.f32 %v2503_v0, 0.0  ;;  %v8066_v52 = vmax.f32 %v2502_v55, 0.0  ;;  %v8068_v20 = vmax.f32 %v2504_v16, 0.0 }
 0x67b   :  { %v1525_v47 = vadd.f32 %v1524_v32, %v1523_v57  ;;  %v11149_v0 = vmov 6   ;;  %v11150_v55 = vmov 7   ;;  %v11151_v16 = vmov 8  }
 0x67c   :  { %11131 = vst [vmem:[#allocation94_spill] sm:$0xff] %v8058_v23  ;;  %11132 = vst [vmem:[#allocation140_spill] sm:$0xff] %v8060_v44  ;;  %2512 = vrot.lane.b32.xlu1 %v8060_v44, %s5024_s7  ;;  %2510 = vrot.lane.b32.xlu0 %v8058_v23, %s5024_s7  ;;  %v11153_v57 = vmov 10  }
 0x67d   :  { %11133 = vst [vmem:[#allocation95_spill] sm:$0xff] %v8066_v52  ;;  %11134 = vst [vmem:[#allocation86_spill] sm:$0xff] %v8068_v20  ;;  %v1526_v62 = vmul.f32 0.001953125, %v1525_v47  ;;  %v11155_v47 = vmov 14  }
 0x67f   :  { %v8121_v54 = vsub.f32 %v11141_v53, %v1526_v62  ;;  %v8124_v43 = vsub.f32 %v11143_v15, %v1526_v62  ;;  %v8133_v41 = vsub.f32 %v11145_v7, %v1526_v62  ;;  %v8136_v24 = vsub.f32 %v11147_v49, %v1526_v62 }
 0x680   :  { %2514 = vrot.lane.b32.xlu1 %v8066_v52, %s5024_s7  ;;  %2516 = vrot.lane.b32.xlu0 %v8068_v20, %s5024_s7  ;;  %s5064_s7 = smov 124  }
 0x681   :  { %11142 = vst [vmem:[#allocation87_spill] sm:$0xff] %v8121_v54  ;;  %11144 = vst [vmem:[#allocation125_spill] sm:$0xff] %v8124_v43  ;;  %v1531_v34 = vmul.f32 %v8121_v54, %v8121_v54  ;;  %v1532_v21 = vmul.f32 %v8124_v43, %v8124_v43  ;;  %v1533_v37 = vmul.f32 %v8133_v41, %v8133_v41  ;;  %v11159_v43 = vmov 18  }
 0x682   :  { %11146 = vst [vmem:[#allocation139_spill] sm:$0xff] %v8133_v41  ;;  %11148 = vst [vmem:[#allocation142_spill] sm:$0xff] %v8136_v24  ;;  %v1534_v19 = vmul.f32 %v8136_v24, %v8136_v24 }
 0x683   :  { %v1535_v36 = vsel %vm651_vm5, %v1531_v34, 0.0  ;;  %v1536_v26 = vsel %vm651_vm5, %v1532_v21, 0.0  ;;  %v1540_v22 = vsel %vm651_vm5, %v1533_v37, 0.0 }
 0x684   :  { %2528 = vperm.xlu1 %4677, %v8074_v42   ;;  %2535 = vrot.lane.b32.xlu0 %v8058_v23, %s5025_s25  ;;  %v1537_v51 = vadd.f32 %v1536_v26, %v1535_v36  ;;  %v1541_v14 = vsel %vm651_vm5, %v1534_v19, 0.0  ;;  %v11156_v26 = vmov 15   ;;  %v11157_v19 = vmov 16  }
 0x685   :  { %v1542_v27 = vadd.f32 %v1541_v14, %v1540_v22 }
 0x688   :  { %2537 = vrot.lane.b32.xlu1 %v8060_v44, %s5025_s25  ;;  %2539 = vrot.lane.b32.xlu0 %v8066_v52, %s5025_s25 }
 0x689   :  { %4687 = vset.pattern.permute.xlu1 %v11135_v56 }
 0x68c   :  { %2541 = vrot.lane.b32.xlu1 %v8068_v20, %s5025_s25  ;;  %2552 = vperm.xlu0 %4675, %v8074_v42   ;;  %s5065_s25 = smov 100  }
 0x690   :  { %2563 = vrot.lane.b32.xlu1 %v8058_v23, %s5026_s26  ;;  %2567 = vrot.lane.b32.xlu0 %v8066_v52, %s5026_s26 }
 0x691   :  { %4678 = vset.pattern.permute.xlu0 %v11136_v10 }
 0x694   :  { %2565 = vrot.lane.b32.xlu1 %v8060_v44, %s5026_s26  ;;  %2595 = vrot.lane.b32.xlu0 %v8066_v52, %s5027_s27 }
 0x698   :  { %2569 = vrot.lane.b32.xlu1 %v8068_v20, %s5026_s26  ;;  %2608 = vperm.xlu0 %4678, %v8074_v42   ;;  %s5066_s26 = smov 92  }
 0x69c   :  { %2591 = vrot.lane.b32.xlu1 %v8058_v23, %s5027_s27  ;;  %2623 = vrot.lane.b32.xlu0 %v8066_v52, %s5028_s28 }
 0x69d   :  { %4679 = vset.pattern.permute.xlu0 %v11137_v33 }
 0x6a0   :  { %2593 = vrot.lane.b32.xlu1 %v8060_v44, %s5027_s27  ;;  %2636 = vperm.xlu0 %4679, %v8074_v42  }
 0x6a4   :  { %2597 = vrot.lane.b32.xlu1 %v8068_v20, %s5027_s27  ;;  %4680 = vset.pattern.permute.xlu0 %v11138_v35  ;;  %s4547_s27 = sld [smem:[#allocation2 + $0x1]] }
 0x6a8   :  { %2619 = vrot.lane.b32.xlu1 %v8058_v23, %s5028_s28 }
 0x6ac   :  { %2621 = vrot.lane.b32.xlu1 %v8060_v44, %s5028_s28 }
 0x6b0   :  { %2625 = vrot.lane.b32.xlu1 %v8068_v20, %s5028_s28  ;;  %s4548_s28 = sld [smem:[#allocation2 + $0x2]] }
 0x6bf   :  { %1538 = vadd.xlane.f32.xlu0 %v1537_v51 }
 0x6d4   :  { %1543 = vadd.xlane.f32.xlu1 %v1542_v27  ;;  %v11158_v27 = vmov 17  }
 0x6d5   :  { %2651 = vrot.lane.b32.xlu0 %v8066_v52, %s5029_s29 }
 0x6d9   :  { %2664 = vperm.xlu0 %4680, %v8074_v42  }
 0x6dd   :  { %2679 = vrot.lane.b32.xlu0 %v8066_v52, %s5005_s12 }
 0x6de   :  { %4681 = vset.pattern.permute.xlu0 %v11149_v0 }
 0x6e1   :  { %2692 = vperm.xlu0 %4681, %v8074_v42  }
 0x6e5   :  { %2647 = vrot.lane.b32.xlu1 %v8058_v23, %s5029_s29  ;;  %2707 = vrot.lane.b32.xlu0 %v8066_v52, %s5007_s15 }
 0x6e6   :  { %4682 = vset.pattern.permute.xlu0 %v11150_v55  ;;  %v11171_v55 = vmov 2  }
 0x6e9   :  { %2649 = vrot.lane.b32.xlu1 %v8060_v44, %s5029_s29  ;;  %2720 = vperm.xlu0 %4682, %v8074_v42  }
 0x6ed   :  { %2653 = vrot.lane.b32.xlu1 %v8068_v20, %s5029_s29  ;;  %2735 = vrot.lane.b32.xlu0 %v8066_v52, %s5008_s18  ;;  %s4549_s29 = sld [smem:[#allocation2 + $0x4]] }
 0x6ee   :  { %4683 = vset.pattern.permute.xlu0 %v11151_v16  ;;  %v8191_v32 = vpop.permute.xlu1 %2512  ;;  %v8204_v53 = vpop.permute.xlu0 %2510 }
 0x6f1   :  { %2675 = vrot.lane.b32.xlu1 %v8058_v23, %s5005_s12  ;;  %2748 = vperm.xlu0 %4683, %v8074_v42  }
 0x6f2   :  { %v8202_v62 = vpop.permute.xlu1 %2514  ;;  %v8216_v34 = vpop.permute.xlu0 %2516 }
 0x6f5   :  { %2677 = vrot.lane.b32.xlu1 %v8060_v44, %s5005_s12  ;;  %2763 = vrot.lane.b32.xlu0 %v8066_v52, %s5030_s3 }
 0x6f6   :  { %4684 = vset.pattern.permute.xlu0 %v11152_v3  ;;  %v8223_v36 = vpop.permute.xlu0 %2535 }
 0x6f9   :  { %2681 = vrot.lane.b32.xlu1 %v8068_v20, %s5005_s12  ;;  %2776 = vperm.xlu0 %4684, %v8074_v42  }
 0x6fa   :  { %v8235_v7 = vpop.permute.xlu0 %2539 }
 0x6fd   :  { %2703 = vrot.lane.b32.xlu1 %v8058_v23, %s5007_s15  ;;  %2791 = vrot.lane.b32.xlu0 %v8066_v52, %s5032_s10 }
 0x6fe   :  { %4685 = vset.pattern.permute.xlu0 %v11153_v57 }
 0x6ff   :  { %v8210_v15 = vpop.permute.xlu1 %2528 }
 0x701   :  { %2705 = vrot.lane.b32.xlu1 %v8060_v44, %s5007_s15  ;;  %2804 = vperm.xlu0 %4685, %v8074_v42  }
 0x703   :  { %v8218_v21 = vpop.permute.xlu1 %2537 }
 0x705   :  { %2709 = vrot.lane.b32.xlu1 %v8068_v20, %s5007_s15  ;;  %2819 = vrot.lane.b32.xlu0 %v8066_v52, %s5009_s19  ;;  %s5056_s15 = smov 68  }
 0x706   :  { %4686 = vset.pattern.permute.xlu0 %v11154_v6 }
 0x707   :  { %v8230_v51 = vpop.permute.xlu1 %2541  ;;  %v8243_v37 = vpop.permute.xlu0 %2552 }
 0x709   :  { %2731 = vrot.lane.b32.xlu1 %v8058_v23, %s5008_s18  ;;  %2832 = vperm.xlu0 %4686, %v8074_v42  }
 0x70b   :  { %v8237_v49 = vpop.permute.xlu1 %2563  ;;  %v8251_v14 = vpop.permute.xlu0 %2567 }
 0x70d   :  { %2733 = vrot.lane.b32.xlu1 %v8060_v44, %s5008_s18  ;;  %2857 = vrot.lane.b32.xlu0 %v8060_v44, %s5010_s20 }
 0x70e   :  { %4689 = vset.pattern.permute.xlu0 %v11155_v47 }
 0x70f   :  { %v8249_v22 = vpop.permute.xlu1 %2565  ;;  %v8263_v41 = vpop.permute.xlu0 %2595 }
 0x711   :  { %2737 = vrot.lane.b32.xlu1 %v8068_v20, %s5008_s18  ;;  %2861 = vrot.lane.b32.xlu0 %v8068_v20, %s5010_s20  ;;  %s5057_s18 = smov 66  }
 0x713   :  { %v8258_v24 = vpop.permute.xlu1 %2569  ;;  %v8271_v17 = vpop.permute.xlu0 %2608 }
 0x715   :  { %2759 = vrot.lane.b32.xlu1 %v8058_v23, %s5030_s3  ;;  %2883 = vrot.lane.b32.xlu0 %v8058_v23, %s5035_s13 }
 0x717   :  { %v8269_v54 = vpop.permute.xlu1 %2591  ;;  %v8283_v13 = vpop.permute.xlu0 %2623 }
 0x719   :  { %2761 = vrot.lane.b32.xlu1 %v8060_v44, %s5030_s3  ;;  %2887 = vrot.lane.b32.xlu0 %v8066_v52, %s5035_s13 }
 0x71b   :  { %v8277_v58 = vpop.permute.xlu1 %2593  ;;  %v8288_v9 = vpop.permute.xlu0 %2636 }
 0x71d   :  { %2765 = vrot.lane.b32.xlu1 %v8068_v20, %s5030_s3  ;;  %2900 = vperm.xlu0 %4689, %v8074_v42   ;;  %s10062_s3 = sld [smem:[#allocation2 + $0x3]] }
 0x71f   :  { %v8290_v48 = vpop.permute.xlu1 %2597 }
 0x721   :  { %2787 = vrot.lane.b32.xlu1 %v8058_v23, %s5032_s10  ;;  %2915 = vrot.lane.b32.xlu0 %v8066_v52, %s5037_s8 }
 0x722   :  { %4690 = vset.pattern.permute.xlu0 %v11156_v26 }
 0x723   :  { %v8300_v11 = vpop.permute.xlu1 %2619 }
 0x725   :  { %2789 = vrot.lane.b32.xlu1 %v8060_v44, %s5032_s10  ;;  %2928 = vperm.xlu0 %4690, %v8074_v42  }
 0x729   :  { %2793 = vrot.lane.b32.xlu1 %v8068_v20, %s5032_s10  ;;  %2943 = vrot.lane.b32.xlu0 %v8066_v52, %s5011_s2  ;;  %s10064_s10 = sld [smem:[#allocation2 + $0x5]] }
 0x72a   :  { %4691 = vset.pattern.permute.xlu0 %v11157_v19 }
 0x72d   :  { %2815 = vrot.lane.b32.xlu1 %v8058_v23, %s5009_s19  ;;  %2956 = vperm.xlu0 %4691, %v8074_v42  }
 0x731   :  { %2817 = vrot.lane.b32.xlu1 %v8060_v44, %s5009_s19  ;;  %2971 = vrot.lane.b32.xlu0 %v8066_v52, %s5012_s21 }
 0x732   :  { %4692 = vset.pattern.permute.xlu0 %v11158_v27 }
 0x735   :  { %2821 = vrot.lane.b32.xlu1 %v8068_v20, %s5009_s19  ;;  %2984 = vperm.xlu0 %4692, %v8074_v42   ;;  %s5059_s19 = smov 62  }
 0x739   :  { %2844 = vperm.xlu1 %4687, %v8074_v42   ;;  %2999 = vrot.lane.b32.xlu0 %v8066_v52, %s5013_s22 }
 0x73a   :  { %4693 = vset.pattern.permute.xlu0 %v11159_v43 }
 0x73d   :  { %2855 = vrot.lane.b32.xlu1 %v8058_v23, %s5010_s20  ;;  %3012 = vperm.xlu0 %4693, %v8074_v42  }
 0x73e   :  { %4688 = vset.pattern.permute.xlu1 %v11160_v12 }
 0x741   :  { %2859 = vrot.lane.b32.xlu1 %v8066_v52, %s5010_s20  ;;  %3027 = vrot.lane.b32.xlu0 %v8066_v52, %s5041_s17  ;;  %s5060_s20 = smov 60  }
 0x742   :  { %4694 = vset.pattern.permute.xlu0 %v11161_v39 }
 0x745   :  { %2872 = vperm.xlu1 %4688, %v8074_v42   ;;  %3040 = vperm.xlu0 %4694, %v8074_v42  }
 0x748   :  { %v8296_v63 = vpop.xlane.xlu0 %1538 }
 0x749   :  { %2885 = vrot.lane.b32.xlu1 %v8060_v44, %s5035_s13  ;;  %3055 = vrot.lane.b32.xlu0 %v8066_v52, %s5043_s6  ;;  %11162 = vst [vmem:[#allocation146_spill] sm:$0xff] %v8296_v63  ;;  %v11165_v63 = vmov 21  }
 0x74a   :  { %4695 = vset.pattern.permute.xlu0 %v11163_v28  ;;  %4701 = vset.pattern.permute.xlu1 %v11164_v25  ;;  %v8312_v28 = vpop.permute.xlu1 %2621 }
 0x74c   :  { %v8305_v43 = vpop.permute.xlu0 %2651 }
 0x74d   :  { %2889 = vrot.lane.b32.xlu1 %v8068_v20, %s5035_s13  ;;  %3068 = vperm.xlu0 %4695, %v8074_v42   ;;  %s10068_s13 = sld [smem:[#allocation2 + $0x6]] }
 0x74e   :  { %v8321_v6 = vpop.permute.xlu1 %2625 }
 0x751   :  { %2911 = vrot.lane.b32.xlu1 %v8058_v23, %s5037_s8  ;;  %3083 = vrot.lane.b32.xlu0 %v8066_v52, %s5045_s23 }
 0x752   :  { %4696 = vset.pattern.permute.xlu0 %v11165_v63  ;;  %v11166_v63 = vmov 22  }
 0x754   :  { %v8314_v26 = vpop.permute.xlu0 %2664 }
 0x755   :  { %2913 = vrot.lane.b32.xlu1 %v8060_v44, %s5037_s8  ;;  %3096 = vperm.xlu0 %4696, %v8074_v42  }
 0x758   :  { %v8319_v47 = vpop.permute.xlu0 %2679 }
 0x759   :  { %2917 = vrot.lane.b32.xlu1 %v8068_v20, %s5037_s8  ;;  %3111 = vrot.lane.b32.xlu0 %v8066_v52, %s5049_s4  ;;  %s10081_s8 = sld [smem:[#allocation2 + $0x7]] }
 0x75a   :  { %4697 = vset.pattern.permute.xlu0 %v11166_v63  ;;  %v11168_v63 = vmov 23  }
 0x75c   :  { %v8328_v0 = vpop.permute.xlu0 %2692 }
 0x75d   :  { %2939 = vrot.lane.b32.xlu1 %v8058_v23, %s5011_s2  ;;  %v8332_v56 = vpop.xlane.xlu1 %1543  ;;  %3124 = vperm.xlu0 %4697, %v8074_v42  }
 0x75e   :  { %11167 = vst [vmem:[#allocation144_spill] sm:$0xff] %v8332_v56 }
 0x760   :  { %v8335_v39 = vpop.permute.xlu0 %2707 }
 0x761   :  { %2941 = vrot.lane.b32.xlu1 %v8060_v44, %s5011_s2  ;;  %v8339_v27 = vpop.permute.xlu1 %2647  ;;  %3139 = vrot.lane.b32.xlu0 %v8066_v52, %s5051_s1 }
 0x762   :  { %4698 = vset.pattern.permute.xlu0 %v11168_v63  ;;  %v11169_v63 = vmov 24  }
 0x764   :  { %v8344_v16 = vpop.permute.xlu0 %2720 }
 0x765   :  { %2945 = vrot.lane.b32.xlu1 %v8068_v20, %s5011_s2  ;;  %v8348_v56 = vpop.permute.xlu1 %2649  ;;  %3152 = vperm.xlu0 %4698, %v8074_v42   ;;  %s5061_s2 = smov 36  }
 0x768   :  { %v8351_v19 = vpop.permute.xlu0 %2735 }
 0x769   :  { %2967 = vrot.lane.b32.xlu1 %v8058_v23, %s5012_s21  ;;  %v8355_v12 = vpop.permute.xlu1 %2653  ;;  %3167 = vrot.lane.b32.xlu0 %v8066_v52, %s5054_s5 }
 0x76a   :  { %4699 = vset.pattern.permute.xlu0 %v11169_v63  ;;  %v8378_v63 = vld [vmem:[%s10117_s11] sm:$0xf] }
 0x76c   :  { %v8360_v57 = vpop.permute.xlu0 %2748 }
 0x76d   :  { %11170 = vst [vmem:[#allocation128_spill] sm:$0xff] %v8360_v57  ;;  %2969 = vrot.lane.b32.xlu1 %v8060_v44, %s5012_s21  ;;  %v8364_v3 = vpop.permute.xlu1 %2675  ;;  %3180 = vperm.xlu0 %4699, %v8074_v42  }
 0x770   :  { %v8367_v35 = vpop.permute.xlu0 %2763 }
 0x771   :  { %2973 = vrot.lane.b32.xlu1 %v8068_v20, %s5012_s21  ;;  %v8371_v33 = vpop.permute.xlu1 %2677  ;;  %4700 = vset.pattern.permute.xlu0 %v11171_v55  ;;  %s5062_s21 = smov 28  }
 0x772   :  { %2580 = vperm.xlu0 %4700, %v8074_v42  }
 0x774   :  { %v8380_v1 = vpop.permute.xlu0 %2776 }
 0x775   :  { %11172 = vst [vmem:[#allocation129_spill] sm:$0xff] %v8380_v1  ;;  %2995 = vrot.lane.b32.xlu1 %v8058_v23, %s5013_s22  ;;  %v8384_v4 = vpop.permute.xlu1 %2681 }
 0x776   :  { %3262 = vperm.xlu0 %4700, %v8378_v63  }
 0x778   :  { %v8387_v60 = vpop.permute.xlu0 %2791 }
 0x779   :  { %11173 = vst [vmem:[#allocation133_spill] sm:$0xff] %v8387_v60  ;;  %2997 = vrot.lane.b32.xlu1 %v8060_v44, %s5013_s22  ;;  %v8391_v42 = vpop.permute.xlu1 %2703 }
 0x77a   :  { %4704 = vset.pattern.permute.xlu0 %v11164_v25 }
 0x77c   :  { %v8394_v55 = vpop.permute.xlu0 %2804 }
 0x77d   :  { %11174 = vst [vmem:[#allocation132_spill] sm:$0xff] %v8394_v55  ;;  %3001 = vrot.lane.b32.xlu1 %v8068_v20, %s5013_s22  ;;  %v8398_v29 = vpop.permute.xlu1 %2705  ;;  %s5063_s22 = smov 4  }
 0x780   :  { %v8400_v31 = vpop.permute.xlu0 %2819 }
 0x781   :  { %11175 = vst [vmem:[#allocation143_spill] sm:$0xff] %v8400_v31  ;;  %3023 = vrot.lane.b32.xlu1 %v8058_v23, %s5041_s17  ;;  %v8404_v46 = vpop.permute.xlu1 %2709 }
 0x784   :  { %v8406_v40 = vpop.permute.xlu0 %2832 }
 0x785   :  { %11176 = vst [vmem:[#allocation150_spill] sm:$0xff] %v8406_v40  ;;  %3025 = vrot.lane.b32.xlu1 %v8060_v44, %s5041_s17  ;;  %v8410_v2 = vpop.permute.xlu1 %2731 }
 0x788   :  { %v8412_v5 = vpop.permute.xlu0 %2857 }
 0x789   :  { %11177 = vst [vmem:[#allocation159_spill] sm:$0xff] %v8412_v5  ;;  %3029 = vrot.lane.b32.xlu1 %v8068_v20, %s5041_s17  ;;  %v8416_v18 = vpop.permute.xlu1 %2733  ;;  %s5067_s17 = smov [#allocation19]  }
 0x78c   :  { %v8418_v50 = vpop.permute.xlu0 %2861 }
 0x78d   :  { %11178 = vst [vmem:[#allocation152_spill] sm:$0xff] %v8418_v50  ;;  %3051 = vrot.lane.b32.xlu1 %v8058_v23, %s5043_s6  ;;  %v8422_v61 = vpop.permute.xlu1 %2737 }
 0x790   :  { %v8424_v30 = vpop.permute.xlu0 %2883 }
 0x791   :  { %11179 = vst [vmem:[#allocation74_spill] sm:$0xff] %v8424_v30  ;;  %3053 = vrot.lane.b32.xlu1 %v8060_v44, %s5043_s6  ;;  %v8428_v59 = vpop.permute.xlu1 %2759 }
 0x794   :  { %v8430_v8 = vpop.permute.xlu0 %2887 }
 0x795   :  { %11180 = vst [vmem:[#allocation75_spill] sm:$0xff] %v8430_v8  ;;  %3057 = vrot.lane.b32.xlu1 %v8068_v20, %s5043_s6  ;;  %v8434_v45 = vpop.permute.xlu1 %2761  ;;  %s4529_s6 = sshll.u32 %s5067_s17, 4  ;;  %s4530_s6 = int_to_ptr.vmem [resolvable:$true] %s4529_s6 }
 0x796   :  { %p4964_p4 = scmp.lt.s32.totalorder %s4530_s6, %s4530_s6 }
 0x798   :  { %v8436_v52 = vpop.permute.xlu0 %2900 }
 0x799   :  { %11181 = vst [vmem:[#allocation79_spill] sm:$0xff] %v8436_v52  ;;  %3079 = vrot.lane.b32.xlu1 %v8058_v23, %s5045_s23  ;;  %v8440_v40 = vpop.permute.xlu1 %2765 }
 0x79c   :  { %v8442_v5 = vpop.permute.xlu0 %2915 }
 0x79d   :  { %11182 = vst [vmem:[#allocation141_spill] sm:$0xff] %v8442_v5  ;;  %3081 = vrot.lane.b32.xlu1 %v8060_v44, %s5045_s23  ;;  %v8446_v50 = vpop.permute.xlu1 %2787 }
 0x79e   :  { %11183 = vst [vmem:[#allocation145_spill] sm:$0xff] %v8446_v50 }
 0x7a0   :  { %v8448_v55 = vpop.permute.xlu0 %2928 }
 0x7a1   :  { %11184 = vst [vmem:[#allocation147_spill] sm:$0xff] %v8448_v55  ;;  %3085 = vrot.lane.b32.xlu1 %v8068_v20, %s5045_s23  ;;  %v8452_v31 = vpop.permute.xlu1 %2789  ;;  %s4959_s23 = scalar_lea.vmem %s4530_s6, 256 }
 0x7a2   :  { %11185 = vst [vmem:[#allocation112_spill] sm:$0xff] %v8452_v31  ;;  %p4960_p3 = scmp.ne.s32.totalorder %s4530_s6, %s4959_s23  ;;  %p4965_p5 = scmp.lt.s32.totalorder %s4959_s23, %s4959_s23 }
 0x7a4   :  { %v8454_v52 = vpop.permute.xlu0 %2943  ;;  %p4966_p6 = por %p4965_p5, %p4964_p4 }
 0x7a5   :  { %11186 = vst [vmem:[#allocation66_spill] sm:$0xff] %v8454_v52  ;;  %3107 = vrot.lane.b32.xlu1 %v8058_v23, %s5049_s4  ;;  %v8458_v30 = vpop.permute.xlu1 %2793 }
 0x7a6   :  { %11187 = vst [vmem:[#allocation127_spill] sm:$0xff] %v8458_v30  ;;  %p4967_p7 = pnand %p4966_p6, %p4960_p3 }
 0x7a8   :  { %v8460_v5 = vpop.permute.xlu0 %2956 }
 0x7a9   :  { %11188 = vst [vmem:[#allocation32_spill] sm:$0xff] %v8460_v5  ;;  %3109 = vrot.lane.b32.xlu1 %v8060_v44, %s5049_s4  ;;  %v8464_v8 = vpop.permute.xlu1 %2815 }
 0x7aa   :  { %11189 = vst [vmem:[#allocation78_spill] sm:$0xff] %v8464_v8 }
 0x7ac   :  { %v8466_v55 = vpop.permute.xlu0 %2971 }
 0x7ad   :  { %11190 = vst [vmem:[#allocation80_spill] sm:$0xff] %v8466_v55  ;;  %3113 = vrot.lane.b32.xlu1 %v8068_v20, %s5049_s4  ;;  %v8470_v31 = vpop.permute.xlu1 %2817 }
 0x7ae   :  { %11191 = vst [vmem:[#allocation182_spill] sm:$0xff] %v8470_v31 }
 0x7b0   :  { %v8472_v52 = vpop.permute.xlu0 %2984 }
 0x7b1   :  { %11192 = vst [vmem:[#allocation88_spill] sm:$0xff] %v8472_v52  ;;  %3135 = vrot.lane.b32.xlu1 %v8058_v23, %s5051_s1  ;;  %v8476_v30 = vpop.permute.xlu1 %2821 }
 0x7b2   :  { %11193 = vst [vmem:[#allocation89_spill] sm:$0xff] %v8476_v30 }
 0x7b4   :  { %v8478_v5 = vpop.permute.xlu0 %2999 }
 0x7b5   :  { %11194 = vst [vmem:[#allocation76_spill] sm:$0xff] %v8478_v5  ;;  %3137 = vrot.lane.b32.xlu1 %v8060_v44, %s5051_s1  ;;  %v8482_v8 = vpop.permute.xlu1 %2844 }
 0x7b6   :  { %11195 = vst [vmem:[#allocation77_spill] sm:$0xff] %v8482_v8 }
 0x7b8   :  { %v8484_v55 = vpop.permute.xlu0 %3012 }
 0x7b9   :  { %11196 = vst [vmem:[#allocation82_spill] sm:$0xff] %v8484_v55  ;;  %3141 = vrot.lane.b32.xlu1 %v8068_v20, %s5051_s1  ;;  %v8488_v31 = vpop.permute.xlu1 %2855 }
 0x7ba   :  { %11197 = vst [vmem:[#allocation83_spill] sm:$0xff] %v8488_v31 }
 0x7bc   :  { %v8490_v52 = vpop.permute.xlu0 %3027 }
 0x7bd   :  { %11198 = vst [vmem:[#allocation151_spill] sm:$0xff] %v8490_v52  ;;  %3163 = vrot.lane.b32.xlu1 %v8058_v23, %s5054_s5  ;;  %v8494_v30 = vpop.permute.xlu1 %2859 }
 0x7be   :  { %11199 = vst [vmem:[#allocation166_spill] sm:$0xff] %v8494_v30 }
 0x7c0   :  { %v8496_v5 = vpop.permute.xlu0 %3040 }
 0x7c1   :  { %11200 = vst [vmem:[#allocation115_spill] sm:$0xff] %v8496_v5  ;;  %3165 = vrot.lane.b32.xlu1 %v8060_v44, %s5054_s5  ;;  %v8500_v8 = vpop.permute.xlu1 %2872  ;;  %v11207_v5 = vmov 1  }
 0x7c2   :  { %11201 = vst [vmem:[#allocation90_spill] sm:$0xff] %v8500_v8 }
 0x7c4   :  { %v8502_v55 = vpop.permute.xlu0 %3055 }
 0x7c5   :  { %11202 = vst [vmem:[#allocation91_spill] sm:$0xff] %v8502_v55  ;;  %3169 = vrot.lane.b32.xlu1 %v8068_v20, %s5054_s5  ;;  %v8506_v31 = vpop.permute.xlu1 %2885 }
 0x7c6   :  { %11203 = vst [vmem:[#allocation73_spill] sm:$0xff] %v8506_v31 }
 0x7c8   :  { %v8508_v52 = vpop.permute.xlu0 %3068 }
 0x7c9   :  { %11204 = vst [vmem:[#allocation96_spill] sm:$0xff] %v8508_v52  ;;  %3210 = vperm.xlu1 %4701, %v8378_v63   ;;  %v8511_v23 = vpop.permute.xlu1 %2889 }
 0x7ca   :  { %11205 = vst [vmem:[#allocation178_spill] sm:$0xff] %v8511_v23  ;;  %v11222_v23 = vld [vmem:[#allocation154_spill] sm:$0xff] }
 0x7cc   :  { %v8513_v30 = vpop.permute.xlu0 %3083 }
 0x7cd   :  { %11206 = vst [vmem:[#allocation67_spill] sm:$0xff] %v8513_v30  ;;  %4702 = vset.pattern.permute.xlu1 %v11207_v5  ;;  %v8516_v44 = vpop.permute.xlu1 %2911 }
 0x7ce   :  { %11208 = vst [vmem:[#allocation181_spill] sm:$0xff] %v8516_v44  ;;  %3234 = vperm.xlu1 %4702, %v8378_v63  }
 0x7d0   :  { %v8519_v55 = vpop.permute.xlu0 %3096 }
 0x7d1   :  { %11209 = vst [vmem:[#allocation81_spill] sm:$0xff] %v8519_v55  ;;  %v8521_v8 = vpop.permute.xlu1 %2913 }
 0x7d2   :  { %11210 = vst [vmem:[#allocation134_spill] sm:$0xff] %v8521_v8  ;;  %4703 = vset.pattern.permute.xlu1 %v11136_v10  ;;  %v2544_v10 = vsel %vm1623_vm9, %v8218_v21, %v8230_v51 }
 0x7d3   :  { %3290 = vperm.xlu1 %4703, %v8378_v63   ;;  %v2546_v63 = vsel %vm1623_vm9, %v8230_v51, %v8218_v21  ;;  %v2520_v21 = vsel %vm1577_vm6, %v8202_v62, %v8204_v53  ;;  %v2519_v51 = vsel %vm1577_vm6, %v8191_v32, %v8216_v34 }
 0x7d4   :  { %v8525_v52 = vpop.permute.xlu0 %3111  ;;  %v2525_v60 = vmul.f32 %v2519_v51, %v11222_v23 }
 0x7d5   :  { %11211 = vst [vmem:[#allocation130_spill] sm:$0xff] %v8525_v52  ;;  %v8527_v20 = vpop.permute.xlu1 %2917 }
 0x7d6   :  { %11212 = vst [vmem:[#allocation104_spill] sm:$0xff] %v8527_v20 }
 0x7d7   :  { %4705 = vset.pattern.permute.xlu1 %v11164_v25  ;;  %v2543_v25 = vsel %vm1623_vm9, %v8223_v36, %v8235_v7 }
 0x7d8   :  { %v8530_v30 = vpop.permute.xlu0 %3124 }
 0x7d9   :  { %11213 = vst [vmem:[#allocation102_spill] sm:$0xff] %v8530_v30  ;;  %v8532_v5 = vpop.permute.xlu1 %2939  ;;  %v2545_v30 = vsel %vm1623_vm9, %v8235_v7, %v8223_v36  ;;  %v2521_v36 = vsel %vm1577_vm6, %v8216_v34, %v8191_v32  ;;  %v11219_v7 = vld [vmem:[#allocation106_spill] sm:$0xff]  ;;  %v2534_v34 = vmul.f32 %v8210_v15, %v2525_v60  ;;  %v11224_v60 = vld [vmem:[#allocation156_spill] sm:$0xff]  ;;  %vm11263_vm9 = vcmp.lt.s32.totalorder %v5347_v38, 127 }
 0x7da   :  { %11214 = vst [vmem:[#allocation64_spill] sm:$0xff] %v8532_v5  ;;  %v2547_v8 = vmul.f32 %v2545_v30, %v11219_v7  ;;  %v2599_v30 = vsel %vm1704_vm3, %v8269_v54, %v8263_v41 }
 0x7dc   :  { %v8534_v44 = vpop.permute.xlu0 %3139  ;;  %v2555_v32 = vmul.f32 %v8243_v37, %v2547_v8 }
 0x7dd   :  { %11215 = vst [vmem:[#allocation53_spill] sm:$0xff] %v8534_v44  ;;  %v8536_v31 = vpop.permute.xlu1 %2941 }
 0x7de   :  { %11216 = vst [vmem:[#allocation186_spill] sm:$0xff] %v8536_v31  ;;  %v2518_v31 = vsel %vm1577_vm6, %v8204_v53, %v8202_v62  ;;  %v11221_v62 = vld [vmem:[#allocation153_spill] sm:$0xff] }
 0x7df   :  { %v2522_v53 = vmul.f32 %v2520_v21, %v11221_v62  ;;  %v2523_v1 = vmul.f32 %v2518_v31, %v11222_v23  ;;  %v2524_v50 = vmul.f32 %v2521_v36, %v11221_v62  ;;  %v2601_v31 = vsel %vm1704_vm3, %v8263_v41, %v8269_v54  ;;  %v11226_v36 = vld [vmem:[#allocation34_spill] sm:$0xff] }
 0x7e0   :  { %v8546_v52 = vpop.permute.xlu0 %3152  ;;  %v2573_v54 = vsel %vm1664_vm13, %v8251_v14, %v8237_v49 }
 0x7e1   :  { %11217 = vst [vmem:[#allocation187_spill] sm:$0xff] %v8546_v52  ;;  %v8556_v44 = vpop.permute.xlu1 %2945  ;;  %v2549_v52 = vmul.f32 %v2546_v63, %v11219_v7  ;;  %v2532_v23 = vmul.f32 %v8210_v15, %v2523_v1  ;;  %v2571_v63 = vsel %vm1664_vm13, %v8237_v49, %v8251_v14  ;;  %v2603_v1 = vmul.f32 %v2601_v31, %v11224_v60 }
 0x7e2   :  { %11218 = vst [vmem:[#allocation188_spill] sm:$0xff] %v8556_v44  ;;  %v11220_v44 = vld [vmem:[#allocation114_spill] sm:$0xff]  ;;  %v2600_v49 = vsel %vm1704_vm3, %v8277_v58, %v8290_v48  ;;  %v2602_v14 = vsel %vm1704_vm3, %v8290_v48, %v8277_v58  ;;  %v2629_v48 = vsel %vm1745_vm7, %v8283_v13, %v8300_v11  ;;  %vm11272_vm3 = vmmov %vm11263_vm9 }
 0x7e3   :  { %v2550_v5 = vmul.f32 %v2544_v10, %v11220_v44  ;;  %v2548_v20 = vmul.f32 %v2543_v25, %v11220_v44  ;;  %v2531_v25 = vmul.f32 %v8210_v15, %v2522_v53  ;;  %v2557_v44 = vmul.f32 %v8243_v37, %v2549_v52  ;;  %v11225_v52 = vld [vmem:[#allocation157_spill] sm:$0xff] }
 0x7e4   :  { %v8578_v55 = vpop.permute.xlu0 %3167  ;;  %v2611_v58 = vmul.f32 %v8271_v17, %v2603_v1  ;;  %v2655_v1 = vsel %vm1790_vm11, %v8339_v27, %v8305_v43 }
 0x7e5   :  { %v8584_v57 = vpop.permute.xlu1 %2967  ;;  %v2556_v10 = vmul.f32 %v8243_v37, %v2548_v20  ;;  %v2558_v8 = vmul.f32 %v8243_v37, %v2550_v5  ;;  %v2533_v20 = vmul.f32 %v8210_v15, %v2524_v50  ;;  %v2572_v5 = vsel %vm1664_vm13, %v8249_v22, %v8258_v24 }
 0x7e6   :  { %v2574_v50 = vsel %vm1664_vm13, %v8258_v24, %v8249_v22  ;;  %v2604_v15 = vmul.f32 %v2599_v30, %v11225_v52  ;;  %v2559_v21 = vadd.f32 %v2555_v32, %v2531_v25  ;;  %v2575_v24 = vmul.f32 %v2573_v54, %v11226_v36  ;;  %v11227_v22 = vld [vmem:[#allocation116_spill] sm:$0xff]  ;;  %v11229_v54 = vld [vmem:[#allocation109_spill] sm:$0xff]  ;;  %vm11264_vm13 = vmmov %vm11263_vm9 }
 0x7e7   :  { %v2560_v51 = vadd.f32 %v2556_v10, %v2532_v23  ;;  %v2576_v7 = vmul.f32 %v2571_v63, %v11227_v22  ;;  %v2561_v62 = vadd.f32 %v2557_v44, %v2533_v20  ;;  %v2562_v53 = vadd.f32 %v2558_v8, %v2534_v34  ;;  %v11228_v34 = vld [vmem:[#allocation158_spill] sm:$0xff] }
 0x7e8   :  { %v8610_v41 = vpop.permute.xlu0 %3180  ;;  %v2577_v30 = vmul.f32 %v2574_v50, %v11226_v36  ;;  %v2578_v31 = vmul.f32 %v2572_v5, %v11227_v22  ;;  %v2612_v32 = vmul.f32 %v8271_v17, %v2604_v15  ;;  %v2605_v10 = vmul.f32 %v2602_v14, %v11224_v60 }
 0x7e9   :  { %11223 = vst [vmem:[#allocation106_spill] sm:$0xff] %v8610_v41  ;;  %v8622_v37 = vpop.permute.xlu1 %2969  ;;  %v2627_v41 = vsel %vm1745_vm7, %v8300_v11, %v8283_v13  ;;  %v2606_v25 = vmul.f32 %v2600_v49, %v11225_v52  ;;  %v2628_v8 = vsel %vm1745_vm7, %v8312_v28, %v8321_v6  ;;  %v2630_v11 = vsel %vm1745_vm7, %v8321_v6, %v8312_v28  ;;  %vm11273_vm7 = vmmov %vm11272_vm3 }
 0x7ea   :  { %v2631_v63 = vmul.f32 %v2629_v48, %v11228_v34  ;;  %v2632_v5 = vmul.f32 %v2627_v41, %v11229_v54  ;;  %v2657_v52 = vsel %vm1790_vm11, %v8305_v43, %v8339_v27  ;;  %v2633_v6 = vmul.f32 %v2630_v11, %v11228_v34 }
 0x7eb   :  { %v2634_v49 = vmul.f32 %v2628_v8, %v11229_v54  ;;  %v2614_v22 = vmul.f32 %v8271_v17, %v2606_v25  ;;  %v2656_v27 = vsel %vm1790_vm11, %v8348_v56, %v8355_v12 }
 0x7ed   :  { %v8648_v23 = vpop.permute.xlu1 %2973  ;;  %v2581_v44 = vpop.permute.xlu0 %2580 }
 0x7ee   :  { %v2583_v13 = vmul.f32 %v2581_v44, %v2575_v24  ;;  %v2584_v20 = vmul.f32 %v2581_v44, %v2576_v7  ;;  %v2585_v50 = vmul.f32 %v2581_v44, %v2577_v30  ;;  %v2586_v60 = vmul.f32 %v2581_v44, %v2578_v31  ;;  %v11230_v31 = vld [vmem:[#allocation118_spill] sm:$0xff]  ;;  %v11231_v44 = vld [vmem:[#allocation107_spill] sm:$0xff] }
 0x7ef   :  { %v2613_v24 = vmul.f32 %v8271_v17, %v2605_v10  ;;  %v2659_v48 = vmul.f32 %v2657_v52, %v11230_v31  ;;  %v2660_v43 = vmul.f32 %v2655_v1, %v11231_v44  ;;  %v2640_v17 = vmul.f32 %v8288_v9, %v2632_v5 }
 0x7f0   :  { %v2587_v15 = vadd.f32 %v2583_v13, %v2559_v21  ;;  %v2588_v28 = vadd.f32 %v2584_v20, %v2560_v51  ;;  %v2589_v14 = vadd.f32 %v2585_v50, %v2561_v62  ;;  %v2590_v41 = vadd.f32 %v2586_v60, %v2562_v53 }
 0x7f1   :  { %v8670_v36 = vpop.permute.xlu1 %2995  ;;  %v2658_v21 = vsel %vm1790_vm11, %v8355_v12, %v8348_v56  ;;  %v2639_v51 = vmul.f32 %v8288_v9, %v2631_v63  ;;  %v2683_v62 = vsel %vm193_vm15, %v8364_v3, %v8319_v47  ;;  %v2685_v53 = vsel %vm193_vm15, %v8319_v47, %v8364_v3  ;;  %v11232_v63 = vld [vmem:[#allocation39_spill] sm:$0xff]  ;;  %v11233_v47 = vld [vmem:[#allocation42_spill] sm:$0xff] }
 0x7f2   :  { %v2615_v7 = vadd.f32 %v2611_v58, %v2587_v15  ;;  %v2616_v30 = vadd.f32 %v2612_v32, %v2588_v28  ;;  %v2641_v58 = vmul.f32 %v8288_v9, %v2633_v6  ;;  %v2642_v32 = vmul.f32 %v8288_v9, %v2634_v49 }
 0x7f3   :  { %v2617_v10 = vadd.f32 %v2613_v24, %v2589_v14  ;;  %v2618_v12 = vadd.f32 %v2614_v22, %v2590_v41  ;;  %v2661_v25 = vmul.f32 %v2658_v21, %v11230_v31  ;;  %v2662_v8 = vmul.f32 %v2656_v27, %v11231_v44  ;;  %v11234_v41 = vld [vmem:[#allocation40_spill] sm:$0xff]  ;;  %v11235_v22 = vld [vmem:[#allocation41_spill] sm:$0xff] }
 0x7f4   :  { %v2643_v11 = vadd.f32 %v2639_v51, %v2615_v7  ;;  %v2644_v13 = vadd.f32 %v2640_v17, %v2616_v30  ;;  %v2667_v20 = vmul.f32 %v8314_v26, %v2659_v48  ;;  %v2668_v34 = vmul.f32 %v8314_v26, %v2660_v43 }
 0x7f5   :  { %v8696_v56 = vpop.permute.xlu1 %2997  ;;  %v2687_v3 = vmul.f32 %v2685_v53, %v11232_v63  ;;  %v2688_v54 = vmul.f32 %v2683_v62, %v11233_v47  ;;  %v2684_v9 = vsel %vm193_vm15, %v8371_v33, %v8384_v4  ;;  %v2686_v5 = vsel %vm193_vm15, %v8384_v4, %v8371_v33 }
 0x7f6   :  { %v2711_v50 = vsel %vm246_vm0, %v8391_v42, %v8335_v39  ;;  %v2713_v60 = vsel %vm246_vm0, %v8335_v39, %v8391_v42  ;;  %v2712_v1 = vsel %vm246_vm0, %v8398_v29, %v8404_v46  ;;  %v2714_v4 = vsel %vm246_vm0, %v8404_v46, %v8398_v29 }
 0x7f7   :  { %v2645_v33 = vadd.f32 %v2641_v58, %v2617_v10  ;;  %v2646_v52 = vadd.f32 %v2642_v32, %v2618_v12  ;;  %v2669_v28 = vmul.f32 %v8314_v26, %v2661_v25  ;;  %v2670_v6 = vmul.f32 %v8314_v26, %v2662_v8  ;;  %v11236_v32 = vld [vmem:[#allocation45_spill] sm:$0xff]  ;;  %v11237_v12 = vld [vmem:[#allocation46_spill] sm:$0xff] }
 0x7f8   :  { %v2671_v49 = vadd.f32 %v2667_v20, %v2643_v11  ;;  %v2672_v39 = vadd.f32 %v2668_v34, %v2644_v13  ;;  %v2689_v42 = vmul.f32 %v2686_v5, %v11232_v63  ;;  %v2690_v14 = vmul.f32 %v2684_v9, %v11233_v47  ;;  %v11239_v5 = vld [vmem:[#allocation68_spill] sm:$0xff] }
 0x7f9   :  { %v8728_v15 = vpop.permute.xlu1 %3001  ;;  %v2715_v24 = vmul.f32 %v2713_v60, %v11234_v41  ;;  %v2716_v7 = vmul.f32 %v2711_v50, %v11235_v22  ;;  %v2695_v46 = vmul.f32 %v8328_v0, %v2687_v3  ;;  %v2696_v29 = vmul.f32 %v8328_v0, %v2688_v54  ;;  %v11238_v54 = vld [vmem:[#allocation36_spill] sm:$0xff] }
 0x7fa   :  { %v2717_v30 = vmul.f32 %v2714_v4, %v11234_v41  ;;  %v2718_v31 = vmul.f32 %v2712_v1, %v11235_v22  ;;  %v2739_v26 = vsel %vm299_vm8, %v8410_v2, %v8351_v19  ;;  %v2741_v48 = vsel %vm299_vm8, %v8351_v19, %v8410_v2  ;;  %v11240_v60 = vld [vmem:[#allocation128_spill] sm:$0xff]  ;;  %v11241_v4 = vld [vmem:[#allocation133_spill] sm:$0xff] }
 0x7fb   :  { %v2673_v44 = vadd.f32 %v2669_v28, %v2645_v33  ;;  %v2674_v43 = vadd.f32 %v2670_v6, %v2646_v52  ;;  %v2740_v21 = vsel %vm299_vm8, %v8416_v18, %v8422_v61  ;;  %v2742_v51 = vsel %vm299_vm8, %v8422_v61, %v8416_v18  ;;  %v11242_v33 = vld [vmem:[#allocation145_spill] sm:$0xff] }
 0x7fc   :  { %v2699_v17 = vadd.f32 %v2695_v46, %v2671_v49  ;;  %v2700_v62 = vadd.f32 %v2696_v29, %v2672_v39  ;;  %v2697_v53 = vmul.f32 %v8328_v0, %v2689_v42  ;;  %v2698_v2 = vmul.f32 %v8328_v0, %v2690_v14  ;;  %v11243_v22 = vld [vmem:[#allocation129_spill] sm:$0xff] }
 0x7fd   :  { %v8748_v27 = vpop.permute.xlu1 %3023  ;;  %v2723_v19 = vmul.f32 %v8344_v16, %v2715_v24  ;;  %v2724_v58 = vmul.f32 %v8344_v16, %v2716_v7  ;;  %v2743_v10 = vmul.f32 %v2741_v48, %v11236_v32  ;;  %v2744_v25 = vmul.f32 %v2739_v26, %v11237_v12  ;;  %v11244_v29 = vld [vmem:[#allocation69_spill] sm:$0xff]  ;;  %v11246_v48 = vld [vmem:[#allocation75_spill] sm:$0xff] }
 0x7fe   :  { %v2767_v8 = vsel %vm1867_vm12, %v8428_v59, %v8367_v35  ;;  %v2769_v61 = vsel %vm1867_vm12, %v8367_v35, %v8428_v59  ;;  %v2745_v18 = vmul.f32 %v2742_v51, %v11236_v32  ;;  %v2746_v0 = vmul.f32 %v2740_v21, %v11237_v12  ;;  %v11248_v51 = vld [vmem:[#allocation127_spill] sm:$0xff] }
 0x7ff   :  { %v2701_v11 = vadd.f32 %v2697_v53, %v2673_v44  ;;  %v2702_v13 = vadd.f32 %v2698_v2, %v2674_v43  ;;  %v2725_v34 = vmul.f32 %v8344_v16, %v2717_v30  ;;  %v2726_v63 = vmul.f32 %v8344_v16, %v2718_v31  ;;  %v11245_v31 = vld [vmem:[#allocation167_spill] sm:$0xff]  ;;  %v11247_v44 = vld [vmem:[#allocation74_spill] sm:$0xff] }
 0x800   :  { %v2727_v3 = vadd.f32 %v2723_v19, %v2699_v17  ;;  %v2728_v47 = vadd.f32 %v2724_v58, %v2700_v62  ;;  %v2771_v9 = vmul.f32 %v2769_v61, %v11238_v54  ;;  %v2772_v50 = vmul.f32 %v2767_v8, %v11239_v5  ;;  %v11249_v17 = vld [vmem:[#allocation112_spill] sm:$0xff]  ;;  %v11250_v2 = vld [vmem:[#allocation143_spill] sm:$0xff]  ;;  %v11251_v19 = vld [vmem:[#allocation78_spill] sm:$0xff] }
 0x801   :  { %v8774_v20 = vpop.permute.xlu1 %3025  ;;  %v2768_v59 = vsel %vm1867_vm12, %v8434_v45, %v8440_v40  ;;  %v2770_v35 = vsel %vm1867_vm12, %v8440_v40, %v8434_v45  ;;  %v2751_v1 = vmul.f32 %v11240_v60, %v2743_v10  ;;  %v2752_v16 = vmul.f32 %v11240_v60, %v2744_v25 }
 0x802   :  { %v2795_v52 = vsel %vm1908_vm14, %v11242_v33, %v11241_v4  ;;  %v2797_v28 = vsel %vm1908_vm14, %v11241_v4, %v11242_v33  ;;  %v2753_v6 = vmul.f32 %v11240_v60, %v2745_v18  ;;  %v2754_v49 = vmul.f32 %v11240_v60, %v2746_v0 }
 0x803   :  { %v2729_v39 = vadd.f32 %v2725_v34, %v2701_v11  ;;  %v2730_v45 = vadd.f32 %v2726_v63, %v2702_v13  ;;  %v2773_v42 = vmul.f32 %v2770_v35, %v11238_v54  ;;  %v2774_v14 = vmul.f32 %v2768_v59, %v11239_v5  ;;  %v11254_v11 = vld [vmem:[#allocation132_spill] sm:$0xff]  ;;  %v11258_v59 = vld [vmem:[#allocation182_spill] sm:$0xff] }
 0x804   :  { %v2755_v41 = vadd.f32 %v2751_v1, %v2727_v3  ;;  %v2756_v24 = vadd.f32 %v2752_v16, %v2728_v47  ;;  %v2779_v7 = vmul.f32 %v11243_v22, %v2771_v9  ;;  %v2780_v46 = vmul.f32 %v11243_v22, %v2772_v50  ;;  %v11255_v47 = vld [vmem:[#allocation43_spill] sm:$0xff]  ;;  %v11256_v9 = vld [vmem:[#allocation44_spill] sm:$0xff]  ;;  %v11257_v50 = vld [vmem:[#allocation89_spill] sm:$0xff] }
 0x805   :  { %v8800_v40 = vpop.permute.xlu1 %3029  ;;  %v2799_v30 = vmul.f32 %v2797_v28, %v11244_v29  ;;  %v2800_v26 = vmul.f32 %v2795_v52, %v11245_v31  ;;  %v2891_v43 = vsel %vm1995_vm1, %v11247_v44, %v11246_v48  ;;  %v2893_v21 = vsel %vm1995_vm1, %v11246_v48, %v11247_v44  ;;  %v11261_v1 = vld [vmem:[#allocation152_spill] sm:$0xff]  ;;  %v11262_v16 = vld [vmem:[#allocation159_spill] sm:$0xff]  ;;  %v11269_v48 = vld [vmem:[#allocation150_spill] sm:$0xff] }
 0x806   :  { %v2796_v62 = vsel %vm1908_vm14, %v11249_v17, %v11248_v51  ;;  %v2798_v53 = vsel %vm1908_vm14, %v11248_v51, %v11249_v17  ;;  %vm11252_vm15 = vcmp.lt.s32.totalorder %v5347_v38, 1  ;;  %v2757_v10 = vadd.f32 %v2753_v6, %v2729_v39  ;;  %v11270_v51 = vld [vmem:[#allocation166_spill] sm:$0xff] }
 0x807   :  { %v2823_v58 = vsel %vm11252_vm15, %v11251_v19, %v11250_v2  ;;  %vm11253_vm0 = vmmov %vm11252_vm15  ;;  %v2758_v12 = vadd.f32 %v2754_v49, %v2730_v45  ;;  %v2781_v8 = vmul.f32 %v11243_v22, %v2773_v42  ;;  %v2782_v61 = vmul.f32 %v11243_v22, %v2774_v14  ;;  %v11265_v49 = vld [vmem:[#allocation168_spill] sm:$0xff]  ;;  %v11266_v45 = vld [vmem:[#allocation169_spill] sm:$0xff] }
 0x808   :  { %v2825_v32 = vsel %vm11253_vm0, %v11250_v2, %v11251_v19  ;;  %v2783_v18 = vadd.f32 %v2779_v7, %v2755_v41  ;;  %v2784_v0 = vadd.f32 %v2780_v46, %v2756_v24  ;;  %v2807_v13 = vmul.f32 %v11254_v11, %v2799_v30  ;;  %vm11259_vm8 = vmmov %vm11253_vm0 }
 0x809   :  { %v8832_v25 = vpop.permute.xlu1 %3051  ;;  %v2808_v34 = vmul.f32 %v11254_v11, %v2800_v26  ;;  %v2801_v63 = vmul.f32 %v2798_v53, %v11244_v29  ;;  %v2802_v3 = vmul.f32 %v2796_v62, %v11245_v31  ;;  %v2827_v54 = vmul.f32 %v2825_v32, %v11255_v47  ;;  %vm11260_vm6 = vmmov %vm11253_vm0  ;;  %v11267_v29 = vld [vmem:[#allocation47_spill] sm:$0xff]  ;;  %v11268_v31 = vld [vmem:[#allocation48_spill] sm:$0xff] }
 0x80a   :  { %v2828_v5 = vmul.f32 %v2823_v58, %v11256_v9  ;;  %v2824_v35 = vsel %vm11259_vm8, %v11258_v59, %v11257_v50  ;;  %v2826_v60 = vsel %vm11260_vm6, %v11257_v50, %v11258_v59  ;;  %v2864_v4 = vsel %vm11263_vm9, %v11262_v16, %v11261_v1  ;;  %v11274_v58 = vld [vmem:[#allocation79_spill] sm:$0xff]  ;;  %v11280_v59 = vld [vmem:[#allocation140_spill] sm:$0xff] }
 0x80b   :  { %v2866_v33 = vsel %vm11264_vm13, %v11261_v1, %v11262_v16  ;;  %v2785_v52 = vadd.f32 %v2781_v8, %v2757_v10  ;;  %v2786_v28 = vadd.f32 %v2782_v61, %v2758_v12  ;;  %v2895_v39 = vmul.f32 %v2891_v43, %v11265_v49 }
 0x80c   :  { %v2896_v42 = vmul.f32 %v2893_v21, %v11266_v45  ;;  %v2811_v14 = vadd.f32 %v2807_v13, %v2783_v18  ;;  %v2812_v41 = vadd.f32 %v2808_v34, %v2784_v0  ;;  %v2809_v24 = vmul.f32 %v11254_v11, %v2801_v63  ;;  %v11271_v21 = vld [vmem:[#allocation83_spill] sm:$0xff]  ;;  %v11275_v0 = vld [vmem:[#allocation94_spill] sm:$0xff] }
 0x80d   :  { %v8858_v6 = vpop.permute.xlu1 %3053  ;;  %v2810_v22 = vmul.f32 %v11254_v11, %v2802_v3  ;;  %v2829_v7 = vmul.f32 %v2826_v60, %v11255_v47  ;;  %v2830_v46 = vmul.f32 %v2824_v35, %v11256_v9  ;;  %v2869_v30 = vmul.f32 %v2864_v4, %v11267_v29  ;;  %v11276_v11 = vld [vmem:[#allocation77_spill] sm:$0xff]  ;;  %v11277_v34 = vld [vmem:[#allocation95_spill] sm:$0xff]  ;;  %v11281_v60 = vld [vmem:[#allocation86_spill] sm:$0xff] }
 0x80e   :  { %v2870_v26 = vmul.f32 %v2866_v33, %v11268_v31  ;;  %v2835_v44 = vmul.f32 %v11269_v48, %v2827_v54  ;;  %v2836_v43 = vmul.f32 %v11269_v48, %v2828_v5  ;;  %v2863_v17 = vsel %vm11272_vm3, %v11271_v21, %v11270_v51  ;;  %v11278_v54 = vld [vmem:[#allocation178_spill] sm:$0xff]  ;;  %v11279_v9 = vld [vmem:[#allocation73_spill] sm:$0xff] }
 0x80f   :  { %v2865_v62 = vsel %vm11273_vm7, %v11270_v51, %v11271_v21  ;;  %v2813_v53 = vadd.f32 %v2809_v24, %v2785_v52  ;;  %v2814_v2 = vadd.f32 %v2810_v22, %v2786_v28  ;;  %v2903_v32 = vmul.f32 %v11274_v58, %v2895_v39  ;;  %v11282_v39 = vld [vmem:[#allocation67_spill] sm:$0xff]  ;;  %v11285_v22 = vld [vmem:[#allocation176_spill] sm:$0xff]  ;;  %v11289_v51 = vld [vmem:[#allocation181_spill] sm:$0xff] }
 0x810   :  { %v2904_v10 = vmul.f32 %v11274_v58, %v2896_v42  ;;  %v2839_v12 = vadd.f32 %v2835_v44, %v2811_v14  ;;  %v2840_v8 = vadd.f32 %v2836_v43, %v2812_v41  ;;  %v2837_v61 = vmul.f32 %v11269_v48, %v2829_v7  ;;  %v11288_v43 = vld [vmem:[#allocation141_spill] sm:$0xff] }
 0x811   :  { %v8878_v19 = vpop.permute.xlu1 %3057  ;;  %v2838_v18 = vmul.f32 %v11269_v48, %v2830_v46  ;;  %v2847_v13 = vmul.f32 %v11276_v11, %v11275_v0  ;;  %v2848_v63 = vmul.f32 %v11276_v11, %v11277_v34  ;;  %v2867_v3 = vmul.f32 %v2863_v17, %v11267_v29  ;;  %v11286_v46 = vld [vmem:[#allocation177_spill] sm:$0xff]  ;;  %v11293_v34 = vld [vmem:[#allocation104_spill] sm:$0xff] }
 0x812   :  { %v2868_v47 = vmul.f32 %v2865_v62, %v11268_v31  ;;  %v2892_v5 = vsel %vm1995_vm1, %v11279_v9, %v11278_v54  ;;  %v2894_v50 = vsel %vm1995_vm1, %v11278_v54, %v11279_v9  ;;  %v2849_v35 = vmul.f32 %v11276_v11, %v11280_v59  ;;  %v11287_v31 = vld [vmem:[#allocation90_spill] sm:$0xff]  ;;  %v11292_v62 = vld [vmem:[#allocation81_spill] sm:$0xff]  ;;  %v11298_v9 = vld [vmem:[#allocation171_spill] sm:$0xff] }
 0x813   :  { %v2850_v1 = vmul.f32 %v11276_v11, %v11281_v60  ;;  %v2841_v16 = vadd.f32 %v2837_v61, %v2813_v53  ;;  %v2842_v4 = vadd.f32 %v2838_v18, %v2814_v2  ;;  %v2851_v52 = vadd.f32 %v2847_v13, %v2839_v12  ;;  %v11297_v54 = vld [vmem:[#allocation170_spill] sm:$0xff] }
 0x814   :  { %v2852_v28 = vadd.f32 %v2848_v63, %v2840_v8  ;;  %vm11283_vm11 = vcmp.lt.s32.totalorder %v5347_v38, 97  ;;  %v2897_v41 = vmul.f32 %v2892_v5, %v11265_v49  ;;  %v2898_v24 = vmul.f32 %v2894_v50, %v11266_v45  ;;  %v11294_v63 = vld [vmem:[#allocation134_spill] sm:$0xff]  ;;  %v11300_v50 = vld [vmem:[#allocation64_spill] sm:$0xff] }
 0x815   :  { %v3080_v33 = vpop.permute.xlu1 %3079  ;;  %vm11284_vm12 = vmmov %vm11283_vm11  ;;  %v2875_v48 = vmul.f32 %v11287_v31, %v2867_v3  ;;  %v2876_v44 = vmul.f32 %v11287_v31, %v2868_v47  ;;  %vm11290_vm14 = vcmp.lt.s32.totalorder %v5347_v38, 114  ;;  %v2853_v17 = vadd.f32 %v2849_v35, %v2841_v16  ;;  %v11299_v5 = vld [vmem:[#allocation66_spill] sm:$0xff]  ;;  %v11303_v35 = vld [vmem:[#allocation188_spill] sm:$0xff] }
 0x816   :  { %v3087_v42 = vsel %vm11283_vm11, %v3080_v33, %v11282_v39  ;;  %v3089_v14 = vsel %vm11284_vm12, %v11282_v39, %v3080_v33  ;;  %v2919_v21 = vsel %vm11290_vm14, %v11289_v51, %v11288_v43  ;;  %vm11291_vm1 = vmmov %vm11290_vm14  ;;  %v2854_v45 = vadd.f32 %v2850_v1, %v2842_v4  ;;  %v11304_v60 = vld [vmem:[#allocation186_spill] sm:$0xff] }
 0x817   :  { %v3091_v7 = vmul.f32 %v3087_v42, %v11285_v22  ;;  %v3092_v29 = vmul.f32 %v3089_v14, %v11286_v46  ;;  %v2921_v49 = vsel %vm11291_vm1, %v11288_v43, %v11289_v51  ;;  %v2877_v8 = vmul.f32 %v11287_v31, %v2869_v30  ;;  %vm11295_vm15 = vmmov %vm11291_vm1  ;;  %v11312_v43 = vld [vmem:[#allocation147_spill] sm:$0xff] }
 0x818   :  { %v2878_v61 = vmul.f32 %v11287_v31, %v2870_v26  ;;  %v2879_v18 = vadd.f32 %v2875_v48, %v2851_v52  ;;  %v2880_v0 = vadd.f32 %v2876_v44, %v2852_v28  ;;  %v2905_v11 = vmul.f32 %v11274_v58, %v2897_v41  ;;  %vm11296_vm0 = vmmov %vm11291_vm1  ;;  %v11307_v41 = vld [vmem:[#allocation49_spill] sm:$0xff]  ;;  %v11309_v31 = vld [vmem:[#allocation80_spill] sm:$0xff] }
 0x819   :  { %v8923_v53 = vmul.f32 %v11292_v62, %v3091_v7  ;;  %v8926_v2 = vmul.f32 %v11292_v62, %v3092_v29  ;;  %v8928_v12 = vpop.permute.xlu1 %3081  ;;  %v2906_v13 = vmul.f32 %v11274_v58, %v2898_v24  ;;  %v2920_v3 = vsel %vm11295_vm15, %v11294_v63, %v11293_v34  ;;  %v11308_v7 = vld [vmem:[#allocation50_spill] sm:$0xff] }
 0x81a   :  { %v2922_v47 = vsel %vm11296_vm0, %v11293_v34, %v11294_v63  ;;  %v2923_v30 = vmul.f32 %v2919_v21, %v11297_v54  ;;  %v2924_v26 = vmul.f32 %v2921_v49, %v11298_v9  ;;  %vm11301_vm8 = vcmp.lt.s32.totalorder %v5347_v38, 113 }
 0x81b   :  { %v2947_v59 = vsel %vm11301_vm8, %v11300_v50, %v11299_v5  ;;  %vm11302_vm6 = vmmov %vm11301_vm8  ;;  %v2881_v4 = vadd.f32 %v2877_v8, %v2853_v17  ;;  %v2882_v33 = vadd.f32 %v2878_v61, %v2854_v45  ;;  %v2925_v28 = vmul.f32 %v2920_v3, %v11297_v54  ;;  %v11315_v61 = vld [vmem:[#allocation51_spill] sm:$0xff] }
 0x81c   :  { %v2949_v58 = vsel %vm11302_vm6, %v11299_v5, %v11300_v50  ;;  %vm11305_vm9 = vmmov %vm11302_vm6  ;;  %v2926_v39 = vmul.f32 %v2922_v47, %v11298_v9  ;;  %v2907_v42 = vadd.f32 %v2903_v32, %v2879_v18  ;;  %v2908_v14 = vadd.f32 %v2904_v10, %v2880_v0  ;;  %v11316_v0 = vld [vmem:[#allocation52_spill] sm:$0xff] }
 0x81d   :  { %v2948_v1 = vsel %vm11305_vm9, %v11304_v60, %v11303_v35  ;;  %vm11306_vm13 = vmmov %vm11302_vm6  ;;  %v8960_v52 = vpop.permute.xlu1 %3085  ;;  %v2951_v24 = vmul.f32 %v2947_v59, %v11307_v41  ;;  %v2952_v29 = vmul.f32 %v2949_v58, %v11308_v7  ;;  %vm11310_vm3 = vcmp.lt.s32.totalorder %v5347_v38, 112 }
 0x81e   :  { %v2950_v16 = vsel %vm11306_vm13, %v11303_v35, %v11304_v60  ;;  %v2975_v48 = vsel %vm11310_vm3, %v8584_v57, %v11309_v31  ;;  %vm11311_vm7 = vmmov %vm11310_vm3  ;;  %v2931_v51 = vmul.f32 %v11312_v43, %v2923_v30  ;;  %v2932_v21 = vmul.f32 %v11312_v43, %v2924_v26  ;;  %v11317_v30 = vld [vmem:[#allocation32_spill] sm:$0xff] }
 0x81f   :  { %v2977_v44 = vsel %vm11311_vm7, %v11309_v31, %v8584_v57  ;;  %v2953_v32 = vmul.f32 %v2948_v1, %v11307_v41  ;;  %v2954_v10 = vmul.f32 %v2950_v16, %v11308_v7  ;;  %vm11313_vm11 = vmmov %vm11310_vm3  ;;  %v2909_v45 = vadd.f32 %v2905_v11, %v2881_v4  ;;  %v11318_v11 = vld [vmem:[#allocation76_spill] sm:$0xff]  ;;  %v11326_v31 = vld [vmem:[#allocation151_spill] sm:$0xff] }
 0x820   :  { %v2976_v49 = vsel %vm11313_vm11, %v8622_v37, %v8648_v23  ;;  %vm11314_vm12 = vmmov %vm11310_vm3  ;;  %v2910_v57 = vadd.f32 %v2906_v13, %v2882_v33  ;;  %v2979_v18 = vmul.f32 %v2975_v48, %v11315_v61  ;;  %v2980_v34 = vmul.f32 %v2977_v44, %v11316_v0  ;;  %v11321_v1 = vld [vmem:[#allocation88_spill] sm:$0xff] }
 0x821   :  { %v2978_v17 = vsel %vm11314_vm12, %v8648_v23, %v8622_v37  ;;  %v8986_v8 = vpop.permute.xlu1 %3107  ;;  %v2935_v63 = vadd.f32 %v2931_v51, %v2907_v42  ;;  %v2936_v3 = vadd.f32 %v2932_v21, %v2908_v14  ;;  %v2933_v47 = vmul.f32 %v11312_v43, %v2925_v28  ;;  %v11323_v14 = vld [vmem:[#allocation58_spill] sm:$0xff] }
 0x822   :  { %v2934_v54 = vmul.f32 %v11312_v43, %v2926_v39  ;;  %v2959_v9 = vmul.f32 %v11317_v30, %v2951_v24  ;;  %v2960_v26 = vmul.f32 %v11317_v30, %v2952_v29  ;;  %v2981_v37 = vmul.f32 %v2976_v49, %v11315_v61  ;;  %v11322_v39 = vld [vmem:[#allocation57_spill] sm:$0xff]  ;;  %v11332_v61 = vld [vmem:[#allocation172_spill] sm:$0xff] }
 0x823   :  { %v2982_v23 = vmul.f32 %v2978_v17, %v11316_v0  ;;  %vm11319_vm14 = vcmp.lt.s32.totalorder %v5347_v38, 111  ;;  %v2961_v50 = vmul.f32 %v11317_v30, %v2953_v32  ;;  %v2962_v59 = vmul.f32 %v11317_v30, %v2954_v10  ;;  %v11333_v0 = vld [vmem:[#allocation173_spill] sm:$0xff] }
 0x824   :  { %v3003_v13 = vsel %vm11319_vm14, %v8670_v36, %v11318_v11  ;;  %vm11320_vm1 = vmmov %vm11319_vm14  ;;  %v2937_v58 = vadd.f32 %v2933_v47, %v2909_v45  ;;  %v2938_v35 = vadd.f32 %v2934_v54, %v2910_v57  ;;  %v2987_v16 = vmul.f32 %v11321_v1, %v2979_v18 }
 0x825   :  { %v3005_v5 = vsel %vm11320_vm1, %v11318_v11, %v8670_v36  ;;  %v9006_v60 = vpop.permute.xlu1 %3109  ;;  %v2988_v4 = vmul.f32 %v11321_v1, %v2980_v34  ;;  %v2963_v33 = vadd.f32 %v2959_v9, %v2935_v63  ;;  %v2964_v28 = vadd.f32 %v2960_v26, %v2936_v3  ;;  %vm11324_vm15 = vmmov %vm11320_vm1 }
 0x826   :  { %v3007_v42 = vmul.f32 %v3003_v13, %v11322_v39  ;;  %v3008_v41 = vmul.f32 %v3005_v5, %v11323_v14  ;;  %v3004_v36 = vsel %vm11324_vm15, %v8696_v56, %v8728_v15  ;;  %vm11325_vm0 = vmmov %vm11320_vm1  ;;  %v2989_v7 = vmul.f32 %v11321_v1, %v2981_v37  ;;  %v11337_v13 = vld [vmem:[#allocation115_spill] sm:$0xff] }
 0x827   :  { %v3006_v24 = vsel %vm11325_vm0, %v8728_v15, %v8696_v56  ;;  %v2990_v29 = vmul.f32 %v11321_v1, %v2982_v23  ;;  %vm11327_vm8 = vcmp.lt.s32.totalorder %v5347_v38, 110  ;;  %v2965_v43 = vadd.f32 %v2961_v50, %v2937_v58 }
 0x828   :  { %v3031_v48 = vsel %vm11327_vm8, %v8748_v27, %v11326_v31  ;;  %vm11328_vm6 = vmmov %vm11327_vm8  ;;  %v2966_v51 = vadd.f32 %v2962_v59, %v2938_v35  ;;  %v2991_v32 = vadd.f32 %v2987_v16, %v2963_v33  ;;  %v2992_v10 = vadd.f32 %v2988_v4, %v2964_v28  ;;  %v11338_v59 = vld [vmem:[#allocation174_spill] sm:$0xff]  ;;  %v11339_v35 = vld [vmem:[#allocation175_spill] sm:$0xff] }
 0x829   :  { %v3033_v44 = vsel %vm11328_vm6, %v11326_v31, %v8748_v27  ;;  %vm11329_vm9 = vmmov %vm11328_vm6  ;;  %v3114_v21 = vpop.permute.xlu1 %3113  ;;  %v3009_v49 = vmul.f32 %v3004_v36, %v11322_v39  ;;  %v3010_v17 = vmul.f32 %v3006_v24, %v11323_v14  ;;  %v11331_v27 = vld [vmem:[#allocation82_spill] sm:$0xff]  ;;  %v3035_v18 = vmul.f32 %v3031_v48, %v11332_v61 }
 0x82a   :  { %v3032_v56 = vsel %vm11329_vm9, %v8774_v20, %v8800_v40  ;;  %vm11330_vm13 = vmmov %vm11328_vm6  ;;  %v3015_v45 = vmul.f32 %v11331_v27, %v3007_v42  ;;  %v3016_v57 = vmul.f32 %v11331_v27, %v3008_v41  ;;  %v3036_v34 = vmul.f32 %v3033_v44, %v11333_v0  ;;  %v11342_v42 = vld [vmem:[#allocation130_spill] sm:$0xff] }
 0x82b   :  { %v3034_v15 = vsel %vm11330_vm13, %v8800_v40, %v8774_v20  ;;  %v3037_v63 = vmul.f32 %v3032_v56, %v11332_v61  ;;  %v11334_v20 = vld [vmem:[#allocation91_spill] sm:$0xff]  ;;  %vm11335_vm3 = vcmp.lt.s32.totalorder %v5347_v38, 98  ;;  %v2993_v54 = vadd.f32 %v2989_v7, %v2965_v43 }
 0x82c   :  { %v3038_v3 = vmul.f32 %v3034_v15, %v11333_v0  ;;  %v3059_v40 = vsel %vm11335_vm3, %v8832_v25, %v11334_v20  ;;  %vm11336_vm7 = vmmov %vm11335_vm3  ;;  %v2994_v30 = vadd.f32 %v2990_v29, %v2966_v51  ;;  %v3019_v26 = vadd.f32 %v3015_v45, %v2991_v32  ;;  %v11343_v29 = vld [vmem:[#allocation53_spill] sm:$0xff]  ;;  %v11347_v15 = vld [vmem:[#allocation179_spill] sm:$0xff] }
 0x82d   :  { %v3061_v47 = vsel %vm11336_vm7, %v11334_v20, %v8832_v25  ;;  %v3136_v9 = vpop.permute.xlu1 %3135  ;;  %v3020_v37 = vadd.f32 %v3016_v57, %v2992_v10  ;;  %v3017_v23 = vmul.f32 %v11331_v27, %v3009_v49  ;;  %v3018_v11 = vmul.f32 %v11331_v27, %v3010_v17  ;;  %vm11340_vm11 = vmmov %vm11335_vm3  ;;  %v11348_v10 = vld [vmem:[#allocation180_spill] sm:$0xff]  ;;  %v11349_v17 = vld [vmem:[#allocation63_spill] sm:$0xff] }
 0x82e   :  { %v3043_v5 = vmul.f32 %v11337_v13, %v3035_v18  ;;  %v3044_v50 = vmul.f32 %v11337_v13, %v3036_v34  ;;  %v3063_v58 = vmul.f32 %v3059_v40, %v11338_v59  ;;  %v3064_v1 = vmul.f32 %v3061_v47, %v11339_v35  ;;  %vm11341_vm12 = vmmov %vm11335_vm3  ;;  %v11350_v45 = vld [vmem:[#allocation185_spill] sm:$0xff] }
 0x82f   :  { %v3045_v16 = vmul.f32 %v11337_v13, %v3037_v63  ;;  %v3046_v25 = vmul.f32 %v11337_v13, %v3038_v3  ;;  %v3060_v4 = vsel %vm11340_vm11, %v8858_v6, %v8878_v19  ;;  %v3062_v33 = vsel %vm11341_vm12, %v8878_v19, %v8858_v6  ;;  %v11344_v19 = vld [vmem:[#allocation96_spill] sm:$0xff] }
 0x830   :  { %v3021_v28 = vadd.f32 %v3017_v23, %v2993_v54  ;;  %v3022_v39 = vadd.f32 %v3018_v11, %v2994_v30  ;;  %v3115_v14 = vsel %vm2239_vm2, %v8986_v8, %v11342_v42  ;;  %v3117_v41 = vsel %vm2239_vm2, %v11342_v42, %v8986_v8  ;;  %v11352_v23 = vld [vmem:[#allocation187_spill] sm:$0xff] }
 0x831   :  { %v3138_v36 = vpop.permute.xlu1 %3137  ;;  %v3047_v24 = vadd.f32 %v3043_v5, %v3019_v26  ;;  %v3048_v7 = vadd.f32 %v3044_v50, %v3020_v37  ;;  %v3143_v31 = vsel %vm2279_vm4, %v3136_v9, %v11343_v29  ;;  %v3145_v6 = vsel %vm2279_vm4, %v11343_v29, %v3136_v9 }
 0x832   :  { %v3071_v48 = vmul.f32 %v11344_v19, %v3063_v58  ;;  %v3072_v44 = vmul.f32 %v11344_v19, %v3064_v1  ;;  %v3065_v43 = vmul.f32 %v3060_v4, %v11338_v59  ;;  %v3066_v51 = vmul.f32 %v3062_v33, %v11339_v35  ;;  %v11354_v58 = vld [vmem:[#allocation165_spill] sm:$0xff] }
 0x833   :  { %vm11345_vm14 = vcmp.lt.s32.totalorder %v5347_v38, 97  ;;  %v3119_v32 = vmul.f32 %v3115_v14, %v11347_v15  ;;  %v3120_v49 = vmul.f32 %v3117_v41, %v11348_v10  ;;  %v3147_v27 = vmul.f32 %v3143_v31, %v11349_v17 }
 0x834   :  { %v3088_v8 = vsel %vm11345_vm14, %v8928_v12, %v8960_v52  ;;  %vm11346_vm1 = vmmov %vm11345_vm14  ;;  %v3148_v57 = vmul.f32 %v3145_v6, %v11350_v45  ;;  %v3049_v18 = vadd.f32 %v3045_v16, %v3021_v28  ;;  %v3050_v0 = vadd.f32 %v3046_v25, %v3022_v39  ;;  %v11355_v39 = vld [vmem:[#allocation106_spill] sm:$0xff] }
 0x835   :  { %v3090_v56 = vsel %vm11346_vm1, %v8960_v52, %v8928_v12  ;;  %v3142_v61 = vpop.permute.xlu1 %3141  ;;  %v3075_v34 = vadd.f32 %v3071_v48, %v3047_v24  ;;  %v3076_v63 = vadd.f32 %v3072_v44, %v3048_v7  ;;  %v3073_v3 = vmul.f32 %v11344_v19, %v3065_v43  ;;  %v11351_v52 = vld [vmem:[#allocation102_spill] sm:$0xff] }
 0x836   :  { %v3074_v20 = vmul.f32 %v11344_v19, %v3066_v51  ;;  %v3093_v40 = vmul.f32 %v3088_v8, %v11285_v22  ;;  %v3094_v12 = vmul.f32 %v3090_v56, %v11286_v46  ;;  %v3127_v47 = vmul.f32 %v11351_v52, %v3119_v32 }
 0x837   :  { %v3128_v54 = vmul.f32 %v11351_v52, %v3120_v49  ;;  %v3116_v30 = vsel %vm2239_vm2, %v9006_v60, %v3114_v21  ;;  %v3118_v9 = vsel %vm2239_vm2, %v3114_v21, %v9006_v60  ;;  %v3103_v26 = vadd.f32 %v8923_v53, %v3075_v34  ;;  %v11353_v21 = vld [vmem:[#allocation164_spill] sm:$0xff] }
 0x838   :  { %v3104_v37 = vadd.f32 %v8926_v2, %v3076_v63  ;;  %v3155_v22 = vmul.f32 %v11352_v23, %v3147_v27  ;;  %v3156_v46 = vmul.f32 %v11352_v23, %v3148_v57  ;;  %v3144_v13 = vsel %vm2279_vm4, %v3138_v36, %v3142_v61  ;;  %v11357_v63 = vld [vmem:[#allocation37_spill] sm:$0xff] }
 0x839   :  { %v3164_v11 = vpop.permute.xlu1 %3163  ;;  %v3146_v5 = vsel %vm2279_vm4, %v3142_v61, %v3138_v36  ;;  %v3121_v2 = vmul.f32 %v3116_v30, %v11347_v15  ;;  %v3122_v60 = vmul.f32 %v3118_v9, %v11348_v10  ;;  %v3101_v1 = vmul.f32 %v11292_v62, %v3093_v40  ;;  %v3263_v40 = vpop.permute.xlu0 %3262  ;;  %v11359_v9 = vld [vmem:[#allocation99_spill] sm:$0xff] }
 0x83a   :  { %v3171_v50 = vsel %vm2320_vm10, %v3164_v11, %v8578_v55  ;;  %v3173_v53 = vsel %vm2320_vm10, %v8578_v55, %v3164_v11  ;;  %v3102_v16 = vmul.f32 %v11292_v62, %v3094_v12  ;;  %v3131_v25 = vadd.f32 %v3127_v47, %v3103_v26  ;;  %v11358_v47 = vld [vmem:[#allocation38_spill] sm:$0xff] }
 0x83b   :  { %v3175_v59 = vmul.f32 %v3171_v50, %v11353_v21  ;;  %v3176_v35 = vmul.f32 %v3173_v53, %v11354_v58  ;;  %v3132_v4 = vadd.f32 %v3128_v54, %v3104_v37  ;;  %v3149_v33 = vmul.f32 %v3144_v13, %v11349_v17  ;;  %v11356_v17 = vld [vmem:[#allocation98_spill] sm:$0xff] }
 0x83c   :  { %v3150_v28 = vmul.f32 %v3146_v5, %v11350_v45  ;;  %v3159_v41 = vadd.f32 %v3155_v22, %v3131_v25  ;;  %v3077_v24 = vadd.f32 %v3073_v3, %v3049_v18  ;;  %v3078_v7 = vadd.f32 %v3074_v20, %v3050_v0 }
 0x83d   :  { %v3183_v55 = vmul.f32 %v11355_v39, %v3175_v59  ;;  %v3184_v42 = vmul.f32 %v11355_v39, %v3176_v35  ;;  %v3166_v14 = vpop.permute.xlu1 %3165  ;;  %v3160_v36 = vadd.f32 %v3156_v46, %v3132_v4  ;;  %v3129_v29 = vmul.f32 %v11351_v52, %v3121_v2 }
 0x83e   :  { %v3130_v31 = vmul.f32 %v11351_v52, %v3122_v60  ;;  %v3105_v19 = vadd.f32 %v3101_v1, %v3077_v24  ;;  %v3106_v48 = vadd.f32 %v3102_v16, %v3078_v7  ;;  %v3157_v44 = vmul.f32 %v11352_v23, %v3149_v33 }
 0x83f   :  { %v3187_v62 = vadd.f32 %v3183_v55, %v3159_v41  ;;  %v3188_v6 = vadd.f32 %v3184_v42, %v3160_v36  ;;  %v3158_v43 = vmul.f32 %v11352_v23, %v3150_v28  ;;  %vm3693_vm6 = vcmp.lt.s32.totalorder %v5347_v38, 66 }
 0x840   :  { %v3133_v15 = vadd.f32 %v3129_v29, %v3105_v19  ;;  %v3134_v32 = vadd.f32 %v3130_v31, %v3106_v48  ;;  %vm3647_vm9 = vcmp.lt.s32.totalorder %v5347_v38, 68  ;;  %vm3734_vm13 = vcmp.lt.s32.totalorder %v5347_v38, 64 }
 0x841   :  { %v3170_v51 = vpop.permute.xlu1 %3169  ;;  %v3248_v27 = vrot.slane %v3187_v62, %v11356_v17  ;;  %v3252_v45 = vrot.slane %v3188_v6, %v11356_v17  ;;  %v3195_v3 = vrot.slane %v3187_v62, %v11357_v63  ;;  %v3199_v20 = vrot.slane %v3188_v6, %v11357_v63 }
 0x842   :  { %v3172_v8 = vsel %vm2320_vm10, %v3166_v14, %v3170_v51  ;;  %v3174_v56 = vsel %vm2320_vm10, %v3170_v51, %v3166_v14  ;;  %v3161_v57 = vadd.f32 %v3157_v44, %v3133_v15  ;;  %v3162_v61 = vadd.f32 %v3158_v43, %v3134_v32 }
 0x843   :  { %v3177_v10 = vmul.f32 %v3172_v8, %v11353_v21  ;;  %v3178_v49 = vmul.f32 %v3174_v56, %v11354_v58  ;;  %v3220_v54 = vrot.slane %v3187_v62, %v11358_v47  ;;  %v3224_v30 = vrot.slane %v3188_v6, %v11358_v47 }
 0x844   :  { %v3276_v26 = vrot.slane %v3187_v62, %v11359_v9  ;;  %v3280_v37 = vrot.slane %v3188_v6, %v11359_v9  ;;  %v3265_v23 = vmul.f32 %v3263_v40, %v3248_v27  ;;  %v3266_v22 = vmul.f32 %v3263_v40, %v3252_v45 }
 0x845   :  { %v3185_v18 = vmul.f32 %v11355_v39, %v3177_v10  ;;  %v3186_v0 = vmul.f32 %v11355_v39, %v3178_v49  ;;  %v3211_v34 = vpop.permute.xlu1 %3210  ;;  %vm3774_vm11 = vcmp.lt.s32.totalorder %v5347_v38, 62  ;;  %vm3815_vm14 = vcmp.lt.s32.totalorder %v5347_v38, 60 }
 0x846   :  { %v3213_v53 = vmul.f32 %v3211_v34, %v3195_v3  ;;  %v3214_v2 = vmul.f32 %v3211_v34, %v3199_v20  ;;  %vm3860_vm1 = vcmp.lt.s32.totalorder %v5347_v38, 36 }
 0x847   :  { %v3189_v12 = vadd.f32 %v3185_v18, %v3161_v57  ;;  %v3190_v52 = vadd.f32 %v3186_v0, %v3162_v61 }
 0x849   :  { %v3203_v46 = vrot.slane %v3189_v12, %v11357_v63  ;;  %v3207_v11 = vrot.slane %v3190_v52, %v11357_v63  ;;  %v3235_v13 = vpop.permute.xlu1 %3234  ;;  %v3228_v5 = vrot.slane %v3189_v12, %v11358_v47  ;;  %v3232_v50 = vrot.slane %v3190_v52, %v11358_v47 }
 0x84a   :  { %v3237_v60 = vmul.f32 %v3235_v13, %v3220_v54  ;;  %v3238_v21 = vmul.f32 %v3235_v13, %v3224_v30  ;;  %v3256_v4 = vrot.slane %v3189_v12, %v11356_v17  ;;  %v3260_v33 = vrot.slane %v3190_v52, %v11356_v17 }
 0x84b   :  { %v3215_v59 = vmul.f32 %v3211_v34, %v3203_v46  ;;  %v3216_v58 = vmul.f32 %v3211_v34, %v3207_v11  ;;  %v3239_v35 = vmul.f32 %v3235_v13, %v3228_v5  ;;  %v3240_v1 = vmul.f32 %v3235_v13, %v3232_v50  ;;  %v9193_v5 = vld [vmem:[%s10120_s14] sm:$0xf]  ;;  %v9196_v50 = vld [vmem:[#allocation15] sm:$0xf]  ;;  %s5058_s14 = smov 64  }
 0x84c   :  { %v3241_v16 = vadd.f32 %v3237_v60, %v3213_v53  ;;  %v3242_v25 = vadd.f32 %v3238_v21, %v3214_v2  ;;  %v3284_v55 = vrot.slane %v3189_v12, %v11359_v9  ;;  %v3288_v42 = vrot.slane %v3190_v52, %v11359_v9  ;;  %v11365_v2 = vld [vmem:[#allocation27_spill] sm:$0xff]  ;;  %v11366_v60 = vld [vmem:[#allocation30_spill] sm:$0xff] }
 0x84d   :  { %v3243_v28 = vadd.f32 %v3239_v35, %v3215_v59  ;;  %v3244_v39 = vadd.f32 %v3240_v1, %v3216_v58  ;;  %v3267_v41 = vmul.f32 %v3263_v40, %v3256_v4  ;;  %v3268_v36 = vmul.f32 %v3263_v40, %v3260_v33  ;;  %v11369_v58 = vld [vmem:[#allocation28_spill] sm:$0xff]  ;;  %v11371_v1 = vld [vmem:[#allocation31_spill] sm:$0xff] }
 0x84e   :  { %v3291_v14 = vpop.permute.xlu1 %3290  ;;  %v3269_v24 = vadd.f32 %v3265_v23, %v3241_v16  ;;  %v3270_v7 = vadd.f32 %v3266_v22, %v3242_v25  ;;  %v11364_v53 = vmov 1   ;;  %v11367_v21 = vmov 2  }
 0x84f   :  { %v3293_v29 = vmul.f32 %v3291_v14, %v3276_v26  ;;  %v3294_v31 = vmul.f32 %v3291_v14, %v3280_v37  ;;  %v3295_v62 = vmul.f32 %v3291_v14, %v3284_v55  ;;  %v3296_v6 = vmul.f32 %v3291_v14, %v3288_v42 }
 0x850   :  { %v3271_v19 = vadd.f32 %v3267_v41, %v3243_v28  ;;  %v3272_v48 = vadd.f32 %v3268_v36, %v3244_v39  ;;  %v11368_v59 = vmov 7   ;;  %v11370_v35 = vmov 3  }
 0x851   :  { %v3297_v44 = vadd.f32 %v3293_v29, %v3269_v24  ;;  %v3298_v43 = vadd.f32 %v3294_v31, %v3270_v7  ;;  %v11372_v16 = vmov 4   ;;  %v11373_v25 = vmov 5  }
 0x852   :  { %v3299_v51 = vadd.f32 %v3295_v62, %v3271_v19  ;;  %v3300_v8 = vadd.f32 %v3296_v6, %v3272_v48  ;;  %v11374_v4 = vmov 9   ;;  %v11375_v33 = vmov 10   ;;  %v9296_v48 = vld [vmem:[#allocation16] sm:$0xf] }
 0x853   :  { %v3301_v56 = vsel %vm651_vm5, %v3297_v44, 0.0  ;;  %v3302_v15 = vsel %vm651_vm5, %v3298_v43, 0.0  ;;  %v11376_v28 = vmov 13   ;;  %v11377_v39 = vmov 16  }
 0x854   :  { %v3306_v32 = vsel %vm651_vm5, %v3299_v51, 0.0  ;;  %v3307_v10 = vsel %vm651_vm5, %v3300_v8, 0.0  ;;  %v3303_v49 = vadd.f32 %v3302_v15, %v3301_v56  ;;  %v11378_v55 = vmov 8  }
 0x855   :  { %v3308_v27 = vadd.f32 %v3307_v10, %v3306_v32  ;;  %v11379_v42 = vmov 17   ;;  %v11380_v14 = vmov 19   ;;  %v11381_v41 = vmov 12   ;;  %v9318_v10 = vld [vmem:[#allocation7] sm:$0x3] }
 0x856   :  { %3304 = vadd.xlane.f32.xlu1 %v3303_v49  ;;  %v11382_v36 = vmov 6   ;;  %v11383_v24 = vmov 11   ;;  %v11384_v7 = vmov 22   ;;  %v11386_v31 = vmov 24  }
 0x857   :  { %3309 = vadd.xlane.f32.xlu0 %v3308_v27  ;;  %v11387_v62 = vmov 14   ;;  %vm3652_vm10 = vcmp.ge.f32.partialorder %v9318_v10, 4.0  ;;  %vm3653_vm4 = vcmp.le.f32.partialorder %v9318_v10, 19.0 }
 0x858   :  { %vm3654_vm0 = vmand %vm3652_vm10, %vm3653_vm4  ;;  %vm3937_vm10 = vcmp.lt.s32.totalorder %v5347_v38, 28  ;;  %vm3978_vm4 = vcmp.lt.s32.totalorder %v5347_v38, 4 }
 0x8df   :  { %v3305_v45 = vpop.xlane.xlu1 %3304 }
 0x8e0   :  { %v3310_v57 = vpop.xlane.xlu0 %3309  ;;  %v3311_v61 = vsel %vm651_vm5, %v3305_v45, 0.0  ;;  %v9323_v45 = vld [vmem:[#allocation9] sm:$0x3] }
 0x8e1   :  { %v3312_v18 = vsel %vm651_vm5, %v3310_v57, 0.0  ;;  %vm3656_vm2 = vcmp.ge.f32.partialorder %v9323_v45, 4.0  ;;  %vm3657_vm15 = vcmp.le.f32.partialorder %v9323_v45, 19.0  ;;  %vm3820_vm3 = vcmp.ge.f32.partialorder %v9323_v45, -4.0 }
 0x8e2   :  { %v3313_v0 = vadd.f32 %v3312_v18, %v3311_v61  ;;  %vm3658_vm8 = vmand %vm3656_vm2, %vm3657_vm15  ;;  %v11390_v18 = vmov 0.0   ;;  %vm3821_vm7 = vcmp.le.f32.partialorder %v9323_v45, 11.0  ;;  %vm4065_vm2 = vcmp.lt.s32.totalorder %v5347_v38, 124 }
 0x8e3   :  { %vm3822_vm12 = vmand %vm3820_vm3, %vm3821_vm7  ;;  %vm4105_vm15 = vcmp.lt.s32.totalorder %v5347_v38, 100 }
 0x8e4   :  { %v3314_v34 = vmul.f32 0.001953125, %v3313_v0  ;;  %v9334_v0 = vsel %vm3654_vm0, 1.0, %v11390_v18  ;;  %vm4215_vm0 = vcmp.ge.f32.partialorder %v9318_v10, -4.0 }
 0x8e6   :  { %v9170_v3 = vsub.f32 %v3299_v51, %v3314_v34  ;;  %v9172_v20 = vsub.f32 %v3300_v8, %v3314_v34  ;;  %v9174_v40 = vsub.f32 %v3297_v44, %v3314_v34  ;;  %v9176_v12 = vsub.f32 %v3298_v43, %v3314_v34 }
 0x8e7   :  { %v11389_v51 = vmov 15   ;;  %v9337_v34 = vsel %vm3658_vm8, 1.0, %v11390_v18  ;;  %vm4216_vm8 = vcmp.le.f32.partialorder %v9318_v10, 11.0 }
 0x8e8   :  { %11360 = vst [vmem:[#allocation114_spill] sm:$0xff] %v9170_v3  ;;  %11361 = vst [vmem:[#allocation153_spill] sm:$0xff] %v9172_v20  ;;  %v3321_v52 = vmul.f32 %v9170_v3, %v9170_v3  ;;  %v3322_v54 = vmul.f32 %v9172_v20, %v9172_v20  ;;  %v3319_v30 = vmul.f32 %v9174_v40, %v9174_v40 }
 0x8e9   :  { %11362 = vst [vmem:[#allocation154_spill] sm:$0xff] %v9174_v40  ;;  %11363 = vst [vmem:[#allocation156_spill] sm:$0xff] %v9176_v12  ;;  %v3320_v26 = vmul.f32 %v9176_v12, %v9176_v12 }
 0x8ea   :  { %v3328_v37 = vsel %vm651_vm5, %v3321_v52, 0.0  ;;  %v3329_v23 = vsel %vm651_vm5, %v3322_v54, 0.0  ;;  %v3323_v22 = vsel %vm651_vm5, %v3319_v30, 0.0  ;;  %v11391_v52 = vld [vmem:[#allocation149_spill] sm:$0xff] }
 0x8eb   :  { %v3324_v46 = vsel %vm651_vm5, %v3320_v26, 0.0  ;;  %v3330_v11 = vadd.f32 %v3329_v23, %v3328_v37  ;;  %v3698_v54 = vmul.f32 %v9334_v0, %v11391_v52  ;;  %v3660_v37 = vmul.f32 %v9337_v34, %v9334_v0 }
 0x8ec   :  { %v3325_v13 = vadd.f32 %v3324_v46, %v3323_v22 }
 0x8ed   :  { %3331 = vadd.xlane.f32.xlu1 %v3330_v11  ;;  %v9351_v23 = vrot.slane %v3698_v54, %v11357_v63  ;;  %v9354_v22 = vrot.slane %v3698_v54, %v11358_v47 }
 0x8ee   :  { %3326 = vadd.xlane.f32.xlu0 %v3325_v13 }
 0x8fe   :  { %3678 = vperm.xlu1 %4705, %v9193_v5  }
 0x902   :  { %4706 = vset.pattern.permute.xlu1 %v11364_v53 }
 0x903   :  { %3715 = vperm.xlu1 %4706, %v9193_v5  }
 0x904   :  { %3359 = vperm.xlu0 %4704, %v9196_v50  }
 0x907   :  { %3639 = vrot.lane.b32.xlu1 %v11365_v2, %s5056_s15 }
 0x908   :  { %3689 = vrot.lane.b32.xlu0 %v11366_v60, %s5057_s18  ;;  %4711 = vset.pattern.permute.xlu1 %v11368_v59 }
 0x909   :  { %4707 = vset.pattern.permute.xlu0 %v11367_v21 }
 0x90b   :  { %3641 = vrot.lane.b32.xlu1 %v11369_v58, %s5056_s15 }
 0x90c   :  { %3755 = vperm.xlu0 %4707, %v9193_v5  }
 0x90f   :  { %3643 = vrot.lane.b32.xlu1 %v11366_v60, %s5056_s15 }
 0x910   :  { %3730 = vrot.lane.b32.xlu0 %v11366_v60, %s5058_s14 }
 0x911   :  { %4708 = vset.pattern.permute.xlu0 %v11370_v35 }
 0x913   :  { %3645 = vrot.lane.b32.xlu1 %v11371_v1, %s5056_s15 }
 0x914   :  { %3796 = vperm.xlu0 %4708, %v9193_v5  }
 0x917   :  { %3685 = vrot.lane.b32.xlu1 %v11365_v2, %s5057_s18 }
 0x918   :  { %3770 = vrot.lane.b32.xlu0 %v11366_v60, %s5059_s19 }
 0x919   :  { %4709 = vset.pattern.permute.xlu0 %v11372_v16 }
 0x91b   :  { %3687 = vrot.lane.b32.xlu1 %v11369_v58, %s5057_s18 }
 0x91c   :  { %3841 = vperm.xlu0 %4709, %v9193_v5  }
 0x91f   :  { %3691 = vrot.lane.b32.xlu1 %v11371_v1, %s5057_s18 }
 0x920   :  { %3811 = vrot.lane.b32.xlu0 %v11366_v60, %s5060_s20 }
 0x921   :  { %4710 = vset.pattern.permute.xlu0 %v11373_v25 }
 0x923   :  { %3726 = vrot.lane.b32.xlu1 %v11365_v2, %s5058_s14 }
 0x924   :  { %3882 = vperm.xlu0 %4710, %v9193_v5  }
 0x927   :  { %3728 = vrot.lane.b32.xlu1 %v11369_v58, %s5058_s14 }
 0x928   :  { %3856 = vrot.lane.b32.xlu0 %v11366_v60, %s5061_s2 }
 0x929   :  { %4713 = vset.pattern.permute.xlu0 %v11374_v4  ;;  %v9367_v4 = vrot.slane %v3660_v37, %v11357_v63 }
 0x92b   :  { %3732 = vrot.lane.b32.xlu1 %v11371_v1, %s5058_s14 }
 0x92c   :  { %3959 = vperm.xlu0 %4713, %v9193_v5  }
 0x92f   :  { %3766 = vrot.lane.b32.xlu1 %v11365_v2, %s5059_s19 }
 0x930   :  { %3933 = vrot.lane.b32.xlu0 %v11366_v60, %s5062_s21 }
 0x931   :  { %4714 = vset.pattern.permute.xlu0 %v11375_v33  ;;  %v9370_v33 = vrot.slane %v3660_v37, %v11358_v47 }
 0x933   :  { %3768 = vrot.lane.b32.xlu1 %v11369_v58, %s5059_s19 }
 0x934   :  { %3999 = vperm.xlu0 %4714, %v9193_v5  }
 0x937   :  { %3772 = vrot.lane.b32.xlu1 %v11371_v1, %s5059_s19 }
 0x938   :  { %3972 = vrot.lane.b32.xlu0 %v11369_v58, %s5063_s22 }
 0x939   :  { %4717 = vset.pattern.permute.xlu0 %v11376_v28 }
 0x93b   :  { %3807 = vrot.lane.b32.xlu1 %v11365_v2, %s5060_s20 }
 0x93c   :  { %3976 = vrot.lane.b32.xlu0 %v11371_v1, %s5063_s22 }
 0x93f   :  { %3809 = vrot.lane.b32.xlu1 %v11369_v58, %s5060_s20 }
 0x940   :  { %4046 = vperm.xlu0 %4717, %v9193_v5  }
 0x943   :  { %3813 = vrot.lane.b32.xlu1 %v11371_v1, %s5060_s20 }
 0x944   :  { %4059 = vrot.lane.b32.xlu0 %v11369_v58, %s5064_s7 }
 0x945   :  { %4720 = vset.pattern.permute.xlu0 %v11364_v53 }
 0x947   :  { %3852 = vrot.lane.b32.xlu1 %v11365_v2, %s5061_s2 }
 0x948   :  { %4063 = vrot.lane.b32.xlu0 %v11371_v1, %s5064_s7 }
 0x94b   :  { %3854 = vrot.lane.b32.xlu1 %v11369_v58, %s5061_s2 }
 0x94c   :  { %3367 = vperm.xlu0 %4720, %v9196_v50  }
 0x94f   :  { %3858 = vrot.lane.b32.xlu1 %v11371_v1, %s5061_s2 }
 0x950   :  { %4101 = vrot.lane.b32.xlu0 %v11366_v60, %s5065_s25 }
 0x951   :  { %4721 = vset.pattern.permute.xlu0 %v11377_v39 }
 0x953   :  { %3906 = vperm.xlu1 %4711, %v9193_v5  }
 0x954   :  { %4139 = vperm.xlu0 %4721, %v9193_v5  }
 0x957   :  { %4712 = vset.pattern.permute.xlu1 %v11378_v55 }
 0x958   :  { %4724 = vset.pattern.permute.xlu0 %v11379_v42  ;;  %3918 = vperm.xlu1 %4712, %v9193_v5  }
 0x959   :  { %4151 = vperm.xlu0 %4724, %v9193_v5  }
 0x95c   :  { %3929 = vrot.lane.b32.xlu1 %v11365_v2, %s5062_s21 }
 0x95d   :  { %4727 = vset.pattern.permute.xlu0 %v11380_v14  ;;  %4715 = vset.pattern.permute.xlu1 %v11381_v41 }
 0x95e   :  { %4204 = vperm.xlu0 %4727, %v9193_v5  }
 0x960   :  { %3931 = vrot.lane.b32.xlu1 %v11369_v58, %s5062_s21 }
 0x962   :  { %4728 = vset.pattern.permute.xlu0 %v11382_v36 }
 0x963   :  { %3894 = vperm.xlu0 %4728, %v9193_v5  }
 0x964   :  { %3935 = vrot.lane.b32.xlu1 %v11371_v1, %s5062_s21 }
 0x967   :  { %4176 = vrot.lane.b32.xlu0 %v11369_v58, %s5066_s26 }
 0x968   :  { %4023 = vperm.xlu1 %4715, %v9193_v5  }
 0x96b   :  { %4180 = vrot.lane.b32.xlu0 %v11371_v1, %s5066_s26 }
 0x96c   :  { %3970 = vrot.lane.b32.xlu1 %v11365_v2, %s5063_s22 }
 0x96d   :  { %4716 = vset.pattern.permute.xlu1 %v11383_v24 }
 0x96f   :  { %3438 = vperm.xlu0 %4728, %v9196_v50  }
 0x970   :  { %3974 = vrot.lane.b32.xlu1 %v11366_v60, %s5063_s22 }
 0x973   :  { %4733 = vset.pattern.permute.xlu0 %v11384_v7 }
 0x974   :  { %4291 = vperm.xlu0 %4733, %v9193_v5   ;;  %4011 = vperm.xlu1 %4716, %v9193_v5  }
 0x976   :  { %v9286_v29 = vpop.xlane.xlu1 %3331 }
 0x977   :  { %11385 = vst [vmem:[#allocation157_spill] sm:$0xff] %v9286_v29  ;;  %v9292_v6 = vpop.xlane.xlu0 %3326 }
 0x978   :  { %4736 = vset.pattern.permute.xlu0 %v11386_v31  ;;  %4718 = vset.pattern.permute.xlu1 %v11387_v62  ;;  %11388 = vst [vmem:[#allocation34_spill] sm:$0xff] %v9292_v6  ;;  %v3747_v31 = vrot.slane %v9334_v0, %v11358_v47 }
 0x979   :  { %4347 = vperm.xlu0 %4736, %v9193_v5   ;;  %4086 = vperm.xlu1 %4718, %v9193_v5  }
 0x97a   :  { %v9294_v19 = vpop.permute.xlu1 %3678 }
 0x97d   :  { %4739 = vset.pattern.permute.xlu0 %v11367_v21  ;;  %4057 = vrot.lane.b32.xlu1 %v11365_v2, %s5064_s7 }
 0x97e   :  { %3544 = vperm.xlu0 %4739, %v9296_v48   ;;  %v9302_v44 = vpop.permute.xlu1 %3715  ;;  %4719 = vset.pattern.permute.xlu1 %v11389_v51 }
 0x97f   :  { %v9304_v43 = vpop.permute.xlu0 %3359 }
 0x981   :  { %4061 = vrot.lane.b32.xlu1 %v11366_v60, %s5064_s7 }
 0x982   :  { %4742 = vset.pattern.permute.xlu0 %v11370_v35  ;;  %v3640_v8 = vpop.permute.xlu1 %3639 }
 0x983   :  { %v3690_v56 = vpop.permute.xlu0 %3689  ;;  %3572 = vperm.xlu0 %4742, %v9296_v48  }
 0x985   :  { %4127 = vperm.xlu1 %4719, %v9193_v5  }
 0x986   :  { %v9312_v15 = vpop.permute.xlu1 %3641 }
 0x987   :  { %v9314_v32 = vpop.permute.xlu0 %3755 }
 0x989   :  { %4097 = vrot.lane.b32.xlu1 %v11365_v2, %s5065_s25 }
 0x98a   :  { %v3644_v49 = vpop.permute.xlu1 %3643  ;;  %4722 = vset.pattern.permute.xlu1 %v11367_v21 }
 0x98b   :  { %v3731_v27 = vpop.permute.xlu0 %3730  ;;  %v9374_v28 = vsel %vm3647_vm9, %v3640_v8, %v3644_v49  ;;  %v9378_v39 = vsel %vm3647_vm9, %v3644_v49, %v3640_v8 }
 0x98c   :  { %11394 = vst [vmem:[#allocation109_spill] sm:$0xff] %v9378_v39  ;;  %v3672_v24 = vmul.f32 %v9367_v4, %v9378_v39  ;;  %v3673_v7 = vmul.f32 %v9370_v33, %v9374_v28 }
 0x98d   :  { %4099 = vrot.lane.b32.xlu1 %v11369_v58, %s5065_s25 }
 0x98e   :  { %v9329_v57 = vpop.permute.xlu1 %3645  ;;  %v3682_v37 = vmul.f32 %v9294_v19, %v3673_v7 }
 0x98f   :  { %v9331_v61 = vpop.permute.xlu0 %3796 }
 0x991   :  { %4103 = vrot.lane.b32.xlu1 %v11371_v1, %s5065_s25 }
 0x992   :  { %v3686_v30 = vpop.permute.xlu1 %3685 }
 0x993   :  { %v9343_v26 = vpop.permute.xlu0 %3770  ;;  %v9360_v13 = vsel %vm3693_vm6, %v3686_v30, %v3690_v56  ;;  %v9364_v1 = vsel %vm3693_vm6, %v3690_v56, %v3686_v30  ;;  %v3681_v30 = vmul.f32 %v9294_v19, %v3672_v24 }
 0x994   :  { %11392 = vst [vmem:[#allocation116_spill] sm:$0xff] %v9360_v13  ;;  %11393 = vst [vmem:[#allocation158_spill] sm:$0xff] %v9364_v1  ;;  %v3710_v42 = vmul.f32 %v9351_v23, %v9364_v1  ;;  %v3711_v14 = vmul.f32 %v9354_v22, %v9360_v13 }
 0x995   :  { %3379 = vperm.xlu1 %4722, %v9196_v50  }
 0x996   :  { %v3688_v46 = vpop.permute.xlu1 %3687  ;;  %v3718_v62 = vmul.f32 %v9302_v44, %v3710_v42  ;;  %v3719_v51 = vmul.f32 %v9302_v44, %v3711_v14 }
 0x997   :  { %v9356_v11 = vpop.permute.xlu0 %3841 }
 0x998   :  { %v3722_v20 = vadd.f32 %v3718_v62, %v3681_v30  ;;  %v3723_v3 = vadd.f32 %v3719_v51, %v3682_v37 }
 0x999   :  { %4723 = vset.pattern.permute.xlu1 %v11372_v16  ;;  %v3743_v16 = vrot.slane %v9334_v0, %v11357_v63 }
 0x99a   :  { %3403 = vperm.xlu1 %4723, %v9196_v50   ;;  %v3692_v41 = vpop.permute.xlu1 %3691 }
 0x99b   :  { %v9386_v36 = vpop.permute.xlu0 %3811  ;;  %v9443_v45 = vsel %vm3693_vm6, %v3688_v46, %v3692_v41 }
 0x99c   :  { %11401 = vst [vmem:[#allocation40_spill] sm:$0xff] %v9443_v45 }
 0x99e   :  { %4725 = vset.pattern.permute.xlu1 %v11370_v35  ;;  %v3727_v8 = vpop.permute.xlu1 %3726 }
 0x99f   :  { %v9400_v56 = vpop.permute.xlu0 %3882  ;;  %v9404_v49 = vsel %vm3734_vm13, %v3727_v8, %v3731_v27  ;;  %v9408_v54 = vsel %vm3734_vm13, %v3731_v27, %v3727_v8  ;;  %3391 = vperm.xlu1 %4725, %v9196_v50   ;;  %v11397_v27 = vmov 18   ;;  %v11398_v8 = vld [vmem:[#allocation33_spill] sm:$0xff] }
 0x9a0   :  { %11395 = vst [vmem:[#allocation118_spill] sm:$0xff] %v9404_v49  ;;  %11396 = vst [vmem:[#allocation107_spill] sm:$0xff] %v9408_v54  ;;  %v3750_v42 = vmul.f32 %v3743_v16, %v9408_v54  ;;  %v3751_v14 = vmul.f32 %v3747_v31, %v9404_v49  ;;  %v3779_v24 = vmul.f32 %v9334_v0, %v11398_v8  ;;  %v11430_v49 = vld [vmem:[#allocation110_spill] sm:$0xff] }
 0x9a2   :  { %v3758_v12 = vmul.f32 %v9314_v32, %v3750_v42  ;;  %v3759_v40 = vmul.f32 %v9314_v32, %v3751_v14  ;;  %v3729_v6 = vpop.permute.xlu1 %3728  ;;  %v9455_v14 = vsel %vm3822_vm12, 1.0, %v11390_v18 }
 0x9a3   :  { %v9417_v29 = vpop.permute.xlu0 %3856  ;;  %4726 = vset.pattern.permute.xlu1 %v11397_v27  ;;  %v9461_v27 = vsel %vm3647_vm9, %v9312_v15, %v9329_v57 }
 0x9a4   :  { %v3762_v9 = vadd.f32 %v3758_v12, %v3722_v20  ;;  %v3763_v7 = vadd.f32 %v3759_v40, %v3723_v3  ;;  %4163 = vperm.xlu1 %4726, %v9193_v5   ;;  %v3784_v40 = vrot.slane %v3779_v24, %v11357_v63  ;;  %v3788_v12 = vrot.slane %v3779_v24, %v11358_v47 }
 0x9a5   :  { %11403 = vst [vmem:[#allocation45_spill] sm:$0xff] %v9461_v27 }
 0x9a6   :  { %v3733_v62 = vpop.permute.xlu1 %3732 }
 0x9a7   :  { %v9425_v51 = vpop.permute.xlu0 %3959  ;;  %v9429_v30 = vsel %vm3734_vm13, %v3729_v6, %v3733_v62  ;;  %v9433_v37 = vsel %vm3734_vm13, %v3733_v62, %v3729_v6  ;;  %v9447_v6 = vsel %vm3693_vm6, %v3692_v41, %v3688_v46  ;;  %v9467_v46 = vsel %vm3647_vm9, %v9329_v57, %v9312_v15  ;;  %vm4217_vm6 = vmand %vm4215_vm0, %vm4216_vm8 }
 0x9a8   :  { %11399 = vst [vmem:[#allocation39_spill] sm:$0xff] %v9429_v30  ;;  %11400 = vst [vmem:[#allocation42_spill] sm:$0xff] %v9433_v37  ;;  %v3752_v3 = vmul.f32 %v3743_v16, %v9433_v37  ;;  %v3753_v20 = vmul.f32 %v3747_v31, %v9429_v30  ;;  %4729 = vset.pattern.permute.xlu1 %v11373_v25  ;;  %v3712_v24 = vmul.f32 %v9351_v23, %v9447_v6 }
 0x9a9   :  { %11402 = vst [vmem:[#allocation41_spill] sm:$0xff] %v9447_v6  ;;  %3426 = vperm.xlu1 %4729, %v9196_v50   ;;  %11404 = vst [vmem:[#allocation46_spill] sm:$0xff] %v9467_v46  ;;  %v3713_v62 = vmul.f32 %v9354_v22, %v9443_v45  ;;  %v3674_v57 = vmul.f32 %v9367_v4, %v9467_v46  ;;  %v11407_v22 = vmov 20   ;;  %v11431_v45 = vld [vmem:[#allocation124_spill] sm:$0xff]  ;;  %vm4182_vm9 = vcmp.lt.s32.totalorder %v5347_v38, 92 }
 0x9aa   :  { %v3760_v16 = vmul.f32 %v9314_v32, %v3752_v3  ;;  %v3761_v31 = vmul.f32 %v9314_v32, %v3753_v20  ;;  %v3767_v42 = vpop.permute.xlu1 %3766 }
 0x9ab   :  { %v9452_v25 = vpop.permute.xlu0 %3933  ;;  %v9472_v32 = vsel %vm3774_vm11, %v3767_v42, %v9343_v26  ;;  %v9477_v41 = vsel %vm3774_vm11, %v9343_v26, %v3767_v42  ;;  %v3675_v26 = vmul.f32 %v9370_v33, %v9461_v27  ;;  %v3721_v37 = vmul.f32 %v9302_v44, %v3713_v62 }
 0x9ac   :  { %11405 = vst [vmem:[#allocation36_spill] sm:$0xff] %v9472_v32  ;;  %11406 = vst [vmem:[#allocation68_spill] sm:$0xff] %v9477_v41  ;;  %v3791_v3 = vmul.f32 %v3784_v40, %v9477_v41  ;;  %v3792_v15 = vmul.f32 %v3788_v12, %v9472_v32  ;;  %v3824_v41 = vmul.f32 %v9455_v14, %v9334_v0 }
 0x9ad   :  { %4174 = vrot.lane.b32.xlu1 %v11365_v2, %s5066_s26  ;;  %v3720_v32 = vmul.f32 %v9302_v44, %v3712_v24  ;;  %v3683_v33 = vmul.f32 %v9294_v19, %v3674_v57 }
 0x9ae   :  { %v3799_v20 = vmul.f32 %v9331_v61, %v3791_v3  ;;  %v3800_v23 = vmul.f32 %v9331_v61, %v3792_v15  ;;  %v3769_v42 = vpop.permute.xlu1 %3768  ;;  %4730 = vset.pattern.permute.xlu1 %v11407_v22  ;;  %v3684_v3 = vmul.f32 %v9294_v19, %v3675_v26  ;;  %v3829_v44 = vrot.slane %v3824_v41, %v11357_v63 }
 0x9af   :  { %v9493_v17 = vpop.permute.xlu0 %3999 }
 0x9b0   :  { %v3803_v4 = vadd.f32 %v3799_v20, %v3762_v9  ;;  %v3804_v30 = vadd.f32 %v3800_v23, %v3763_v7  ;;  %v3724_v7 = vadd.f32 %v3720_v32, %v3683_v33  ;;  %v3725_v24 = vadd.f32 %v3721_v37, %v3684_v3 }
 0x9b1   :  { %4178 = vrot.lane.b32.xlu1 %v11366_v60, %s5066_s26  ;;  %v3833_v60 = vrot.slane %v3824_v41, %v11358_v47 }
 0x9b2   :  { %v3773_v15 = vpop.permute.xlu1 %3772  ;;  %v3764_v57 = vadd.f32 %v3760_v16, %v3724_v7  ;;  %v3765_v26 = vadd.f32 %v3761_v31, %v3725_v24  ;;  %v11413_v24 = vld [vmem:[#allocation148_spill] sm:$0xff] }
 0x9b3   :  { %v9504_v54 = vpop.permute.xlu0 %3972  ;;  %v9509_v0 = vsel %vm3774_vm11, %v3769_v42, %v3773_v15  ;;  %v9513_v9 = vsel %vm3774_vm11, %v3773_v15, %v3769_v42 }
 0x9b4   :  { %11408 = vst [vmem:[#allocation128_spill] sm:$0xff] %v9509_v0  ;;  %11409 = vst [vmem:[#allocation133_spill] sm:$0xff] %v9513_v9  ;;  %v3793_v19 = vmul.f32 %v3784_v40, %v9513_v9  ;;  %v3794_v62 = vmul.f32 %v3788_v12, %v9509_v0  ;;  %v11427_v9 = vld [vmem:[#allocation160_spill] sm:$0xff]  ;;  %v11428_v0 = vld [vmem:[#allocation161_spill] sm:$0xff] }
 0x9b5   :  { %4236 = vperm.xlu1 %4730, %v9193_v5  }
 0x9b6   :  { %v3801_v20 = vmul.f32 %v9331_v61, %v3793_v19  ;;  %v3802_v23 = vmul.f32 %v9331_v61, %v3794_v62  ;;  %v3808_v42 = vpop.permute.xlu1 %3807  ;;  %v11412_v61 = vmov 21   ;;  %v3865_v19 = vmul.f32 %v9337_v34, %v11413_v24 }
 0x9b7   :  { %v9522_v22 = vpop.permute.xlu0 %3976  ;;  %v9527_v32 = vsel %vm3815_vm14, %v3808_v42, %v9386_v36  ;;  %v9532_v37 = vsel %vm3815_vm14, %v9386_v36, %v3808_v42 }
 0x9b8   :  { %11410 = vst [vmem:[#allocation145_spill] sm:$0xff] %v9527_v32  ;;  %11411 = vst [vmem:[#allocation129_spill] sm:$0xff] %v9532_v37  ;;  %v3805_v40 = vadd.f32 %v3801_v20, %v3764_v57  ;;  %v3806_v12 = vadd.f32 %v3802_v23, %v3765_v26  ;;  %v3836_v16 = vmul.f32 %v3829_v44, %v9532_v37  ;;  %v11417_v37 = vmov 23  }
 0x9b9   :  { %v3837_v31 = vmul.f32 %v3833_v60, %v9527_v32  ;;  %4731 = vset.pattern.permute.xlu1 %v11412_v61  ;;  %v3874_v23 = vrot.slane %v3865_v19, %v11358_v47  ;;  %v11426_v32 = vld [vmem:[#allocation155_spill] sm:$0xff] }
 0x9ba   :  { %v3844_v41 = vmul.f32 %v9356_v11, %v3836_v16  ;;  %4264 = vperm.xlu1 %4731, %v9193_v5   ;;  %v3810_v3 = vpop.permute.xlu1 %3809 }
 0x9bb   :  { %v3845_v33 = vmul.f32 %v9356_v11, %v3837_v31  ;;  %v9540_v15 = vpop.permute.xlu0 %4046 }
 0x9bc   :  { %v3848_v7 = vadd.f32 %v3844_v41, %v3803_v4 }
 0x9bd   :  { %v3849_v36 = vadd.f32 %v3845_v33, %v3804_v30 }
 0x9be   :  { %4732 = vset.pattern.permute.xlu1 %v11368_v59  ;;  %v3814_v62 = vpop.permute.xlu1 %3813  ;;  %v3870_v59 = vrot.slane %v3865_v19, %v11357_v63 }
 0x9bf   :  { %v9545_v57 = vpop.permute.xlu0 %4059  ;;  %v9549_v26 = vsel %vm3815_vm14, %v3810_v3, %v3814_v62  ;;  %v9553_v20 = vsel %vm3815_vm14, %v3814_v62, %v3810_v3  ;;  %3450 = vperm.xlu1 %4732, %v9196_v50  }
 0x9c0   :  { %11414 = vst [vmem:[#allocation69_spill] sm:$0xff] %v9549_v26  ;;  %11415 = vst [vmem:[#allocation167_spill] sm:$0xff] %v9553_v20  ;;  %v3838_v30 = vmul.f32 %v3829_v44, %v9553_v20  ;;  %v3839_v4 = vmul.f32 %v3833_v60, %v9549_v26 }
 0x9c2   :  { %v3846_v42 = vmul.f32 %v9356_v11, %v3838_v30  ;;  %v3847_v16 = vmul.f32 %v9356_v11, %v3839_v4  ;;  %v3853_v31 = vpop.permute.xlu1 %3852 }
 0x9c3   :  { %v9563_v61 = vpop.permute.xlu0 %4063  ;;  %v3861_v41 = vsel %vm3860_vm1, %v3853_v31, %v9417_v29  ;;  %v3863_v44 = vsel %vm3860_vm1, %v9417_v29, %v3853_v31  ;;  %4734 = vset.pattern.permute.xlu1 %v11378_v55 }
 0x9c4   :  { %v3850_v60 = vadd.f32 %v3846_v42, %v3805_v40  ;;  %v3851_v33 = vadd.f32 %v3847_v16, %v3806_v12  ;;  %v3877_v3 = vmul.f32 %v3870_v59, %v3863_v44  ;;  %v3878_v19 = vmul.f32 %v3874_v23, %v3861_v41  ;;  %3462 = vperm.xlu1 %4734, %v9196_v50  }
 0x9c5   :  { %v11418_v16 = vmov 0  }
 0x9c6   :  { %v3885_v11 = vmul.f32 %v9400_v56, %v3877_v3  ;;  %v3886_v62 = vmul.f32 %v9400_v56, %v3878_v19  ;;  %v3855_v30 = vpop.permute.xlu1 %3854 }
 0x9c7   :  { %v9575_v4 = vpop.permute.xlu0 %3367 }
 0x9c8   :  { %11416 = vst [vmem:[#allocation75_spill] sm:$0xff] %v9575_v4  ;;  %v3889_v20 = vadd.f32 %v3885_v11, %v3848_v7  ;;  %v3890_v26 = vadd.f32 %v3886_v62, %v3849_v36  ;;  %4735 = vset.pattern.permute.xlu1 %v11417_v37 }
 0x9c9   :  { %4319 = vperm.xlu1 %4735, %v9193_v5  }
 0x9ca   :  { %v3859_v55 = vpop.permute.xlu1 %3858 }
 0x9cb   :  { %v9579_v29 = vpop.permute.xlu0 %4101  ;;  %v3862_v40 = vsel %vm3860_vm1, %v3855_v30, %v3859_v55  ;;  %v3864_v50 = vsel %vm3860_vm1, %v3859_v55, %v3855_v30 }
 0x9cc   :  { %v3879_v12 = vmul.f32 %v3870_v59, %v3864_v50  ;;  %v3880_v42 = vmul.f32 %v3874_v23, %v3862_v40  ;;  %v4358_v23 = vld [vmem:[#allocation18] sm:$0xf]  ;;  %v11424_v40 = vld [vmem:[#allocation111_spill] sm:$0xff] }
 0x9cd   :  { %4737 = vset.pattern.permute.xlu1 %v11418_v16 }
 0x9ce   :  { %v3887_v7 = vmul.f32 %v9400_v56, %v3879_v12  ;;  %v3888_v36 = vmul.f32 %v9400_v56, %v3880_v42  ;;  %3492 = vperm.xlu1 %4737, %v9296_v48   ;;  %v3907_v5 = vpop.permute.xlu1 %3906  ;;  %v3942_v56 = vmul.f32 %v9455_v14, %v11413_v24  ;;  %v11423_v24 = vld [vmem:[#allocation131_spill] sm:$0xff] }
 0x9cf   :  { %v9589_v37 = vpop.permute.xlu0 %4139  ;;  %v3910_v55 = vmul.f32 %v3907_v5, %v11423_v24  ;;  %v3911_v50 = vmul.f32 %v3907_v5, %v11424_v40  ;;  %v11432_v24 = vld [vmem:[#allocation121_spill] sm:$0xff] }
 0x9d0   :  { %11419 = vst [vmem:[#allocation74_spill] sm:$0xff] %v9589_v37  ;;  %v3891_v31 = vadd.f32 %v3887_v7, %v3850_v60  ;;  %v3892_v41 = vadd.f32 %v3888_v36, %v3851_v33  ;;  %v11422_v33 = vld [vmem:[#allocation119_spill] sm:$0xff]  ;;  %v3947_v62 = vrot.slane %v3942_v56, %v11357_v63  ;;  %v3951_v30 = vrot.slane %v3942_v56, %v11358_v47  ;;  %v11425_v7 = vld [vmem:[#allocation105_spill] sm:$0xff] }
 0x9d1   :  { %v3909_v11 = vmul.f32 %v3907_v5, %v11422_v33 }
 0x9d2   :  { %4738 = vset.pattern.permute.xlu1 %v11364_v53 }
 0x9d3   :  { %3516 = vperm.xlu1 %4738, %v9296_v48   ;;  %v3919_v44 = vpop.permute.xlu1 %3918  ;;  %v9604_v48 = vrot.slane %v9337_v34, %v11357_v63 }
 0x9d4   :  { %v9593_v59 = vpop.permute.xlu0 %4151  ;;  %v3921_v6 = vmul.f32 %v3919_v44, %v11430_v49  ;;  %v3923_v40 = vmul.f32 %v3919_v44, %v11431_v45  ;;  %v3924_v4 = vmul.f32 %v3919_v44, %v11432_v24 }
 0x9d5   :  { %11420 = vst [vmem:[#allocation127_spill] sm:$0xff] %v9593_v59  ;;  %v11429_v59 = vld [vmem:[#allocation122_spill] sm:$0xff] }
 0x9d6   :  { %v3912_v37 = vmul.f32 %v3907_v5, %v11429_v59 }
 0x9d7   :  { %4740 = vset.pattern.permute.xlu1 %v11418_v16  ;;  %v3930_v3 = vpop.permute.xlu1 %3929 }
 0x9d8   :  { %4377 = vperm.xlu1 %4740, %v4358_v23   ;;  %v3938_v12 = vsel %vm3937_vm10, %v3930_v3, %v9452_v25  ;;  %v3940_v42 = vsel %vm3937_vm10, %v9452_v25, %v3930_v3 }
 0x9d9   :  { %v9598_v19 = vpop.permute.xlu0 %4204  ;;  %v3954_v46 = vmul.f32 %v3947_v62, %v3940_v42  ;;  %v3955_v27 = vmul.f32 %v3951_v30, %v3938_v12  ;;  %v4074_v42 = vrot.slane %v9455_v14, %v11357_v63 }
 0x9da   :  { %11421 = vst [vmem:[#allocation112_spill] sm:$0xff] %v9598_v19 }
 0x9db   :  { %v3932_v60 = vpop.permute.xlu1 %3931 }
 0x9dc   :  { %4741 = vset.pattern.permute.xlu1 %v11364_v53 }
 0x9dd   :  { %4401 = vperm.xlu1 %4741, %v4358_v23  }
 0x9de   :  { %v3895_v16 = vpop.permute.xlu0 %3894 }
 0x9df   :  { %v3897_v36 = vmul.f32 %v3895_v16, %v11425_v7  ;;  %v3898_v56 = vmul.f32 %v3895_v16, %v11426_v32  ;;  %v3899_v53 = vmul.f32 %v3895_v16, %v11427_v9  ;;  %v3900_v19 = vmul.f32 %v3895_v16, %v11428_v0  ;;  %v3936_v33 = vpop.permute.xlu1 %3935 }
 0x9e0   :  { %v3939_v39 = vsel %vm3937_vm10, %v3932_v60, %v3936_v33  ;;  %v3941_v16 = vsel %vm3937_vm10, %v3936_v33, %v3932_v60  ;;  %v3980_v60 = vsel %vm3978_vm4, %v9504_v54, %v9522_v22 }
 0x9e1   :  { %v3901_v25 = vadd.f32 %v3897_v36, %v3889_v20  ;;  %v3902_v3 = vadd.f32 %v3898_v56, %v3890_v26  ;;  %v3903_v1 = vadd.f32 %v3899_v53, %v3891_v31  ;;  %v3904_v13 = vadd.f32 %v3900_v19, %v3892_v41  ;;  %4743 = vset.pattern.permute.xlu1 %v11367_v21  ;;  %v11433_v20 = vld [vmem:[#allocation117_spill] sm:$0xff] }
 0x9e2   :  { %4429 = vperm.xlu1 %4743, %v4358_v23   ;;  %v3991_v26 = vrot.slane %v9337_v34, %v11358_v47  ;;  %v3922_v31 = vmul.f32 %v3919_v44, %v11433_v20  ;;  %v3956_v41 = vmul.f32 %v3947_v62, %v3941_v16  ;;  %v3957_v19 = vmul.f32 %v3951_v30, %v3939_v39  ;;  %v4177_v10 = vpop.permute.xlu0 %4176 }
 0x9e3   :  { %v3913_v5 = vadd.f32 %v3909_v11, %v3901_v25  ;;  %v3914_v49 = vadd.f32 %v3910_v55, %v3902_v3  ;;  %v3915_v45 = vadd.f32 %v3911_v50, %v3903_v1  ;;  %v3916_v59 = vadd.f32 %v3912_v37, %v3904_v13  ;;  %v4024_v12 = vpop.permute.xlu1 %4023 }
 0x9e4   :  { %v3982_v13 = vsel %vm3978_vm4, %v9522_v22, %v9504_v54  ;;  %v3964_v1 = vmul.f32 %v9425_v51, %v3956_v41  ;;  %v3965_v37 = vmul.f32 %v9425_v51, %v3957_v19  ;;  %v3962_v39 = vmul.f32 %v9425_v51, %v3954_v46  ;;  %v11434_v22 = vld [vmem:[#allocation35_spill] sm:$0xff]  ;;  %v11435_v41 = vld [vmem:[#allocation70_spill] sm:$0xff] }
 0x9e5   :  { %v3927_v33 = vadd.f32 %v3923_v40, %v3915_v45  ;;  %v3928_v21 = vadd.f32 %v3924_v4, %v3916_v59  ;;  %v3925_v11 = vadd.f32 %v3921_v6, %v3913_v5  ;;  %v3926_v44 = vadd.f32 %v3922_v31, %v3914_v49 }
 0x9e6   :  { %v3963_v62 = vmul.f32 %v9425_v51, %v3955_v27  ;;  %4744 = vset.pattern.permute.xlu1 %v11370_v35  ;;  %v3996_v4 = vmul.f32 %v9604_v48, %v3982_v13  ;;  %v3997_v59 = vmul.f32 %v3991_v26, %v3980_v60  ;;  %v4031_v40 = vrot.slane %v4024_v12, %v11434_v22  ;;  %v11436_v12 = vld [vmem:[#allocation71_spill] sm:$0xff] }
 0x9e7   :  { %v3968_v30 = vadd.f32 %v3964_v1, %v3927_v33  ;;  %v3969_v45 = vadd.f32 %v3965_v37, %v3928_v21  ;;  %4457 = vperm.xlu1 %4744, %v4358_v23   ;;  %v3971_v6 = vpop.permute.xlu1 %3970  ;;  %v3966_v55 = vadd.f32 %v3962_v39, %v3925_v11  ;;  %v4078_v36 = vrot.slane %v9455_v14, %v11358_v47  ;;  %v11437_v11 = vld [vmem:[#allocation72_spill] sm:$0xff]  ;;  %v11438_v1 = vld [vmem:[#allocation97_spill] sm:$0xff] }
 0x9e8   :  { %v3967_v54 = vadd.f32 %v3963_v62, %v3926_v44  ;;  %v4004_v46 = vmul.f32 %v9493_v17, %v3996_v4  ;;  %v4005_v51 = vmul.f32 %v9493_v17, %v3997_v59  ;;  %v4033_v56 = vmul.f32 %v4031_v40, %v11365_v2  ;;  %v11440_v59 = vld [vmem:[#allocation135_spill] sm:$0xff] }
 0x9e9   :  { %v4034_v53 = vmul.f32 %v4031_v40, %v11369_v58  ;;  %v4067_v25 = vsel %vm4065_vm2, %v9545_v57, %v9563_v61  ;;  %v4052_v40 = vmul.f32 %v9540_v15, %v11440_v59  ;;  %v11472_v59 = vld [vmem:[#allocation113_spill] sm:$0xff] }
 0x9ea   :  { %v4009_v31 = vadd.f32 %v4005_v51, %v3969_v45  ;;  %v4083_v44 = vmul.f32 %v4074_v42, %v4067_v25 }
 0x9eb   :  { %v3975_v49 = vpop.permute.xlu1 %3974 }
 0x9ec   :  { %v3979_v35 = vsel %vm3978_vm4, %v3971_v6, %v3975_v49  ;;  %v3981_v27 = vsel %vm3978_vm4, %v3975_v49, %v3971_v6 }
 0x9ed   :  { %v3994_v23 = vmul.f32 %v9604_v48, %v3981_v27  ;;  %v3995_v50 = vmul.f32 %v3991_v26, %v3979_v35  ;;  %v4069_v48 = vsel %vm4065_vm2, %v9563_v61, %v9545_v57  ;;  %v4008_v26 = vadd.f32 %v4004_v46, %v3968_v30  ;;  %v11439_v30 = vld [vmem:[#allocation136_spill] sm:$0xff] }
 0x9ee   :  { %v4084_v39 = vmul.f32 %v4078_v36, %v4069_v48  ;;  %v4037_v57 = vcombine.high %v4033_v56, %v4033_v56  ;;  %v4038_v61 = vcombine.high %v4034_v53, %v4034_v53  ;;  %v4051_v45 = vmul.f32 %v9540_v15, %v11439_v30 }
 0x9ef   :  { %v4002_v3 = vmul.f32 %v9493_v17, %v3994_v23  ;;  %v4003_v16 = vmul.f32 %v9493_v17, %v3995_v50  ;;  %v4012_v5 = vpop.permute.xlu1 %4011 }
 0x9f0   :  { %v4014_v19 = vmul.f32 %v4012_v5, %v11435_v41  ;;  %v4015_v60 = vmul.f32 %v4012_v5, %v11436_v12  ;;  %v4016_v13 = vmul.f32 %v4012_v5, %v11437_v11  ;;  %v4017_v37 = vmul.f32 %v4012_v5, %v11438_v1 }
 0x9f1   :  { %v4006_v33 = vadd.f32 %v4002_v3, %v3966_v55  ;;  %v4007_v21 = vadd.f32 %v4003_v16, %v3967_v54 }
 0x9f2   :  { %v4020_v17 = vadd.f32 %v4016_v13, %v4008_v26  ;;  %v4021_v4 = vadd.f32 %v4017_v37, %v4009_v31  ;;  %v11441_v31 = vld [vmem:[#allocation183_spill] sm:$0xff] }
 0x9f3   :  { %v4018_v62 = vadd.f32 %v4014_v19, %v4006_v33  ;;  %v4019_v6 = vadd.f32 %v4015_v60, %v4007_v21  ;;  %v11442_v19 = vld [vmem:[#allocation184_spill] sm:$0xff] }
 0x9f4   :  { %v4087_v55 = vpop.permute.xlu1 %4086  ;;  %v4043_v46 = vadd.f32 %v4034_v53, %v4020_v17  ;;  %v4044_v51 = vadd.f32 %v4038_v61, %v4021_v4  ;;  %v4050_v53 = vmul.f32 %v9540_v15, %v11442_v19 }
 0x9f5   :  { %v4041_v54 = vadd.f32 %v4033_v56, %v4018_v62  ;;  %v4042_v49 = vadd.f32 %v4037_v57, %v4019_v6  ;;  %v4091_v35 = vmul.f32 %v4087_v55, %v4083_v44  ;;  %v4092_v27 = vmul.f32 %v4087_v55, %v4084_v39  ;;  %v11443_v6 = vld [vmem:[#allocation126_spill] sm:$0xff] }
 0x9f6   :  { %v4055_v23 = vadd.f32 %v4051_v45, %v4043_v46  ;;  %v4056_v50 = vadd.f32 %v4052_v40, %v4044_v51  ;;  %v4049_v56 = vmul.f32 %v9540_v15, %v11441_v31  ;;  %v4110_v17 = vmul.f32 %v9337_v34, %v11443_v6 }
 0x9f7   :  { %v4054_v13 = vadd.f32 %v4050_v53, %v4042_v49 }
 0x9f8   :  { %v4058_v25 = vpop.permute.xlu1 %4057  ;;  %v4095_v48 = vadd.f32 %v4091_v35, %v4055_v23  ;;  %v4096_v3 = vadd.f32 %v4092_v27, %v4056_v50  ;;  %v4053_v21 = vadd.f32 %v4049_v56, %v4041_v54  ;;  %v4115_v15 = vrot.slane %v4110_v17, %v11357_v63  ;;  %v4181_v56 = vpop.permute.xlu0 %4180 }
 0x9f9   :  { %v4218_v23 = vsel %vm4217_vm6, 1.0, %v11390_v18  ;;  %v4187_v18 = vmul.f32 %v9455_v14, %v11443_v6  ;;  %v3362_v6 = vmul.f32 %v9304_v43, %v11425_v7 }
 0x9fc   :  { %v4062_v16 = vpop.permute.xlu1 %4061 }
 0x9fd   :  { %v4066_v5 = vsel %vm4065_vm2, %v4058_v25, %v4062_v16  ;;  %v4068_v26 = vsel %vm4065_vm2, %v4062_v16, %v4058_v25  ;;  %v4219_v25 = vmul.f32 %v4218_v23, %v9337_v34  ;;  %v4247_v16 = vmul.f32 %v4218_v23, %v11391_v52 }
 0x9fe   :  { %v4081_v60 = vmul.f32 %v4074_v42, %v4066_v5  ;;  %v4082_v33 = vmul.f32 %v4078_v36, %v4068_v26  ;;  %v4119_v42 = vrot.slane %v4110_v17, %v11358_v47  ;;  %v4302_v26 = vmul.f32 %v4218_v23, %v11398_v8 }
 0x9ff   :  { %v4224_v34 = vrot.slane %v4219_v25, %v11357_v63  ;;  %v4228_v52 = vrot.slane %v4219_v25, %v11358_v47  ;;  %v4252_v53 = vrot.slane %v4247_v16, %v11357_v63  ;;  %v4256_v8 = vrot.slane %v4247_v16, %v11358_v47  ;;  %v11451_v25 = vld [vmem:[#allocation46_spill] sm:$0xff] }
 0xa00   :  { %v4089_v37 = vmul.f32 %v4087_v55, %v4081_v60  ;;  %v4090_v44 = vmul.f32 %v4087_v55, %v4082_v33  ;;  %v4128_v39 = vpop.permute.xlu1 %4127  ;;  %v9749_v17 = vrot.slane %v4187_v18, %v11357_v63 }
 0xa01   :  { %v9761_v7 = vmul.f32 %v4224_v34, %v9374_v28  ;;  %v9772_v16 = vmul.f32 %v4228_v52, %v11451_v25  ;;  %v11454_v28 = vld [vmem:[#allocation119_spill] sm:$0xff] }
 0xa02   :  { %v9689_v57 = vadd.f32 %v4089_v37, %v4053_v21  ;;  %v9691_v61 = vadd.f32 %v4090_v44, %v4054_v13  ;;  %v4279_v21 = vrot.slane %v4218_v23, %v11357_v63  ;;  %v4283_v13 = vrot.slane %v4218_v23, %v11358_v47 }
 0xa03   :  { %v9734_v37 = vrot.slane %v4302_v26, %v11357_v63 }
 0xa04   :  { %v4098_v62 = vpop.permute.xlu1 %4097 }
 0xa05   :  { %v4106_v5 = vsel %vm4105_vm15, %v4098_v62, %v9579_v29  ;;  %11444 = vst [vmem:[#allocation143_spill] sm:$0xff] %v9734_v37  ;;  %v11471_v37 = vld [vmem:[#allocation127_spill] sm:$0xff] }
 0xa06   :  { %v4122_v60 = vmul.f32 %v4115_v15, %v4106_v5 }
 0xa08   :  { %v4100_v4 = vpop.permute.xlu1 %4099 }
 0xa0c   :  { %v4104_v36 = vpop.permute.xlu1 %4103 }
 0xa0d   :  { %v4107_v45 = vsel %vm4105_vm15, %v4100_v4, %v4104_v36  ;;  %v4109_v40 = vsel %vm4105_vm15, %v4104_v36, %v4100_v4  ;;  %v9752_v4 = vrot.slane %v4187_v18, %v11358_v47  ;;  %v3365_v36 = vmul.f32 %v9304_v43, %v11428_v0 }
 0xa0e   :  { %v4124_v55 = vmul.f32 %v4115_v15, %v4107_v45  ;;  %v4125_v54 = vmul.f32 %v4119_v42, %v4109_v40  ;;  %v3363_v15 = vmul.f32 %v9304_v43, %v11426_v32  ;;  %v4130_v45 = vmul.f32 %v4128_v39, %v4122_v60  ;;  %v11448_v40 = vld [vmem:[#allocation109_spill] sm:$0xff] }
 0xa10   :  { %v4132_v49 = vmul.f32 %v4128_v39, %v4124_v55  ;;  %v4133_v46 = vmul.f32 %v4128_v39, %v4125_v54  ;;  %v9704_v51 = vpop.permute.xlu1 %3379  ;;  %v9764_v55 = vmul.f32 %v4228_v52, %v11448_v40  ;;  %v11449_v54 = vld [vmem:[#allocation45_spill] sm:$0xff]  ;;  %v4186_v52 = vsel %vm4182_vm9, %v4181_v56, %v4177_v10 }
 0xa12   :  { %v9706_v35 = vadd.f32 %v4132_v49, %v4095_v48  ;;  %v9708_v27 = vadd.f32 %v4133_v46, %v4096_v3  ;;  %v4330_v48 = vmul.f32 %v4218_v23, %v9455_v14  ;;  %v4108_v3 = vsel %vm4105_vm15, %v9579_v29, %v4098_v62  ;;  %v9769_v46 = vpop.permute.xlu0 %3438 }
 0xa13   :  { %v4123_v29 = vmul.f32 %v4119_v42, %v4108_v3  ;;  %v9737_v14 = vrot.slane %v4302_v26, %v11358_v47  ;;  %v3364_v42 = vmul.f32 %v9304_v43, %v11427_v9  ;;  %v9767_v49 = vmul.f32 %v4224_v34, %v11449_v54  ;;  %11450 = vst [vmem:[#allocation44_spill] sm:$0xff] %v9769_v46  ;;  %v11452_v9 = vld [vmem:[#allocation116_spill] sm:$0xff]  ;;  %v11453_v43 = vld [vmem:[#allocation158_spill] sm:$0xff]  ;;  %v11455_v26 = vld [vmem:[#allocation75_spill] sm:$0xff] }
 0xa14   :  { %v9740_v44 = vrot.slane %v4330_v48, %v11357_v63  ;;  %v9743_v62 = vrot.slane %v4330_v48, %v11358_v47  ;;  %v9775_v5 = vmul.f32 %v4252_v53, %v11452_v9  ;;  %v9778_v0 = vmul.f32 %v4256_v8, %v11453_v43  ;;  %v11456_v3 = vld [vmem:[#allocation131_spill] sm:$0xff]  ;;  %v11459_v54 = vld [vmem:[#allocation41_spill] sm:$0xff]  ;;  %v11460_v9 = vld [vmem:[#allocation122_spill] sm:$0xff] }
 0xa15   :  { %v9711_v50 = vpop.permute.xlu1 %3403  ;;  %11445 = vst [vmem:[#allocation78_spill] sm:$0xff] %v9737_v14  ;;  %v4131_v23 = vmul.f32 %v4128_v39, %v4123_v29  ;;  %v3370_v48 = vmul.f32 %v11455_v26, %v11454_v28  ;;  %v3371_v18 = vmul.f32 %v11455_v26, %v11456_v3  ;;  %v11457_v34 = vld [vmem:[#allocation111_spill] sm:$0xff]  ;;  %v4184_v39 = vsel %vm4182_vm9, %v4177_v10, %v4181_v56  ;;  %v11458_v29 = vld [vmem:[#allocation40_spill] sm:$0xff]  ;;  %v11461_v3 = vld [vmem:[#allocation118_spill] sm:$0xff] }
 0xa16   :  { %11446 = vst [vmem:[#allocation132_spill] sm:$0xff] %v9740_v44  ;;  %11447 = vst [vmem:[#allocation43_spill] sm:$0xff] %v9743_v62  ;;  %v3372_v60 = vmul.f32 %v11455_v26, %v11457_v34  ;;  %v9791_v40 = vmul.f32 %v4252_v53, %v11458_v29  ;;  %v9794_v25 = vmul.f32 %v4256_v8, %v11459_v54  ;;  %v11462_v34 = vld [vmem:[#allocation107_spill] sm:$0xff]  ;;  %v11464_v10 = vld [vmem:[#allocation42_spill] sm:$0xff] }
 0xa17   :  { %v3373_v43 = vmul.f32 %v11455_v26, %v11460_v9  ;;  %v4134_v28 = vadd.f32 %v4130_v45, %v9689_v57  ;;  %v4286_v47 = vmul.f32 %v4279_v21, %v11461_v3  ;;  %v4287_v63 = vmul.f32 %v4283_v13, %v11462_v34  ;;  %v11463_v46 = vld [vmem:[#allocation39_spill] sm:$0xff]  ;;  %v11465_v53 = vld [vmem:[#allocation162_spill] sm:$0xff] }
 0xa18   :  { %v4288_v62 = vmul.f32 %v4279_v21, %v11463_v46  ;;  %v4135_v44 = vadd.f32 %v4131_v23, %v9691_v61  ;;  %v4289_v56 = vmul.f32 %v4283_v13, %v11464_v10  ;;  %v11466_v29 = vld [vmem:[#allocation74_spill] sm:$0xff]  ;;  %v4201_v8 = vmul.f32 %v9749_v17, %v4184_v39  ;;  %v11467_v3 = vld [vmem:[#allocation163_spill] sm:$0xff]  ;;  %v4292_v21 = vpop.permute.xlu0 %4291  ;;  %v11468_v61 = vld [vmem:[#allocation108_spill] sm:$0xff] }
 0xa19   :  { %v4142_v14 = vmul.f32 %v11466_v29, %v11465_v53  ;;  %v4202_v54 = vmul.f32 %v9752_v4, %v4186_v52  ;;  %v3374_v57 = vadd.f32 %v3370_v48, %v3362_v6  ;;  %v3375_v45 = vadd.f32 %v3371_v18, %v3363_v15  ;;  %v11469_v23 = vld [vmem:[#allocation120_spill] sm:$0xff]  ;;  %v11470_v39 = vld [vmem:[#allocation123_spill] sm:$0xff]  ;;  %v11473_v15 = vld [vmem:[#allocation137_spill] sm:$0xff] }
 0xa1a   :  { %v9728_v33 = vpop.permute.xlu1 %3391  ;;  %v3376_v9 = vadd.f32 %v3372_v60, %v3364_v42  ;;  %v4143_v34 = vmul.f32 %v11466_v29, %v11467_v3  ;;  %v3377_v46 = vadd.f32 %v3373_v43, %v3365_v36  ;;  %v4144_v13 = vmul.f32 %v11466_v29, %v11468_v61  ;;  %v11474_v18 = vld [vmem:[#allocation92_spill] sm:$0xff] }
 0xa1b   :  { %v4145_v10 = vmul.f32 %v11466_v29, %v11469_v23  ;;  %v4146_v53 = vadd.f32 %v4142_v14, %v4134_v28  ;;  %v4154_v52 = vmul.f32 %v11471_v37, %v11470_v39  ;;  %v4155_v6 = vmul.f32 %v11471_v37, %v11472_v59  ;;  %v11475_v60 = vld [vmem:[#allocation112_spill] sm:$0xff] }
 0xa1c   :  { %v4156_v42 = vmul.f32 %v11471_v37, %v11473_v15  ;;  %v4147_v48 = vadd.f32 %v4143_v34, %v4135_v44  ;;  %v4157_v36 = vmul.f32 %v11471_v37, %v11474_v18  ;;  %v4209_v43 = vmul.f32 %v11475_v60, %v4201_v8  ;;  %v11476_v44 = vld [vmem:[#allocation110_spill] sm:$0xff]  ;;  %v11477_v34 = vld [vmem:[#allocation84_spill] sm:$0xff]  ;;  %v11478_v18 = vld [vmem:[#allocation85_spill] sm:$0xff] }
 0xa1d   :  { %v4210_v61 = vmul.f32 %v11475_v60, %v4202_v54  ;;  %v9826_v3 = vmul.f32 %v4292_v21, %v4286_v47  ;;  %v9828_v28 = vmul.f32 %v4292_v21, %v4287_v63  ;;  %v9830_v29 = vmul.f32 %v4292_v21, %v4288_v62 }
 0xa1e   :  { %v4148_v59 = vadd.f32 %v4144_v13, %v9706_v35  ;;  %v4149_v39 = vadd.f32 %v4145_v10, %v9708_v27  ;;  %v9834_v15 = vmul.f32 %v4292_v21, %v4289_v56  ;;  %v3382_v37 = vmul.f32 %v9704_v51, %v11476_v44  ;;  %v11479_v35 = vld [vmem:[#allocation124_spill] sm:$0xff]  ;;  %v11480_v21 = vld [vmem:[#allocation138_spill] sm:$0xff]  ;;  %v11481_v10 = vld [vmem:[#allocation93_spill] sm:$0xff] }
 0xa1f   :  { %v4164_v32 = vpop.permute.xlu1 %4163  ;;  %v3383_v8 = vmul.f32 %v9704_v51, %v11433_v20  ;;  %v4158_v54 = vadd.f32 %v4154_v52, %v4146_v53  ;;  %v3411_v47 = vrot.slane %v9711_v50, %v11434_v22  ;;  %v4159_v63 = vadd.f32 %v4155_v6, %v4147_v48 }
 0xa20   :  { %v4168_v62 = vmul.f32 %v4164_v32, %v11477_v34  ;;  %v4169_v23 = vmul.f32 %v4164_v32, %v11478_v18  ;;  %v3384_v27 = vmul.f32 %v9704_v51, %v11479_v35  ;;  %v3385_v56 = vmul.f32 %v9704_v51, %v11432_v24 }
 0xa21   :  { %v4166_v13 = vmul.f32 %v4164_v32, %v11480_v21  ;;  %v4167_v44 = vmul.f32 %v4164_v32, %v11481_v10  ;;  %v4160_v53 = vadd.f32 %v4156_v42, %v4148_v59  ;;  %v4161_v52 = vadd.f32 %v4157_v36, %v4149_v39 }
 0xa22   :  { %v3386_v6 = vadd.f32 %v3382_v37, %v3374_v57  ;;  %v3387_v48 = vadd.f32 %v3383_v8, %v3375_v45  ;;  %v3413_v24 = vmul.f32 %v3411_v47, %v11365_v2  ;;  %v3414_v51 = vmul.f32 %v3411_v47, %v11369_v58 }
 0xa23   :  { %v4172_v32 = vadd.f32 %v4168_v62, %v4160_v53  ;;  %v4173_v34 = vadd.f32 %v4169_v23, %v4161_v52  ;;  %v4170_v59 = vadd.f32 %v4166_v13, %v4158_v54  ;;  %v4171_v39 = vadd.f32 %v4167_v44, %v4159_v63 }
 0xa24   :  { %v9808_v26 = vpop.permute.xlu1 %3426  ;;  %v3394_v2 = vmul.f32 %v9728_v33, %v11435_v41  ;;  %v3395_v58 = vmul.f32 %v9728_v33, %v11436_v12  ;;  %v3388_v37 = vadd.f32 %v3384_v27, %v3376_v9  ;;  %v3417_v8 = vcombine.high %v3413_v24, %v3413_v24 }
 0xa28   :  { %v4175_v14 = vpop.permute.xlu1 %4174 }
 0xa2c   :  { %v4179_v20 = vpop.permute.xlu1 %4178 }
 0xa2d   :  { %v4183_v22 = vsel %vm4182_vm9, %v4175_v14, %v4179_v20  ;;  %v4185_v50 = vsel %vm4182_vm9, %v4179_v20, %v4175_v14 }
 0xa2e   :  { %v4199_v35 = vmul.f32 %v9749_v17, %v4183_v22  ;;  %v4200_v18 = vmul.f32 %v9752_v4, %v4185_v50 }
 0xa30   :  { %v4207_v42 = vmul.f32 %v11475_v60, %v4199_v35  ;;  %v4208_v36 = vmul.f32 %v11475_v60, %v4200_v18  ;;  %v4237_v38 = vpop.permute.xlu1 %4236  ;;  %v3396_v18 = vmul.f32 %v9728_v33, %v11437_v11  ;;  %v4213_v60 = vadd.f32 %v4209_v43, %v4172_v32  ;;  %v11484_v32 = vld [vmem:[#allocation143_spill] sm:$0xff] }
 0xa31   :  { %v4239_v57 = vmul.f32 %v4237_v38, %v9761_v7  ;;  %v4240_v45 = vmul.f32 %v4237_v38, %v9764_v55  ;;  %v4241_v17 = vmul.f32 %v4237_v38, %v9767_v49  ;;  %v4242_v4 = vmul.f32 %v4237_v38, %v9772_v16 }
 0xa32   :  { %v4211_v23 = vadd.f32 %v4207_v42, %v4170_v59  ;;  %v4212_v14 = vadd.f32 %v4208_v36, %v4171_v39  ;;  %v3397_v7 = vmul.f32 %v9728_v33, %v11438_v1  ;;  %v4214_v55 = vadd.f32 %v4210_v61, %v4173_v34  ;;  %v11486_v39 = vld [vmem:[#allocation78_spill] sm:$0xff] }
 0xa33   :  { %v3389_v49 = vadd.f32 %v3385_v56, %v3377_v46  ;;  %v3418_v16 = vcombine.high %v3414_v51, %v3414_v51  ;;  %v4245_v41 = vadd.f32 %v4241_v17, %v4213_v60  ;;  %v3398_v1 = vadd.f32 %v3394_v2, %v3386_v6  ;;  %v11491_v17 = vld [vmem:[#allocation129_spill] sm:$0xff]  ;;  %v11496_v60 = vld [vmem:[#allocation44_spill] sm:$0xff] }
 0xa34   :  { %v4243_v54 = vadd.f32 %v4239_v57, %v4211_v23  ;;  %v4244_v47 = vadd.f32 %v4240_v45, %v4212_v14  ;;  %v4246_v63 = vadd.f32 %v4242_v4, %v4214_v55  ;;  %v3399_v33 = vadd.f32 %v3395_v58, %v3387_v48  ;;  %v11490_v45 = vld [vmem:[#allocation132_spill] sm:$0xff]  ;;  %v11492_v4 = vld [vmem:[#allocation43_spill] sm:$0xff]  ;;  %v11493_v58 = vld [vmem:[#allocation69_spill] sm:$0xff] }
 0xa35   :  { %v4265_v62 = vpop.permute.xlu1 %4264  ;;  %v3400_v61 = vadd.f32 %v3396_v18, %v3388_v37  ;;  %v3401_v9 = vadd.f32 %v3397_v7, %v3389_v49  ;;  %v3429_v56 = vmul.f32 %v9808_v26, %v11441_v31  ;;  %v3421_v6 = vadd.f32 %v3413_v24, %v3398_v1  ;;  %v11489_v24 = vld [vmem:[#allocation145_spill] sm:$0xff]  ;;  %v11494_v14 = vld [vmem:[#allocation167_spill] sm:$0xff]  ;;  %v11495_v7 = vld [vmem:[#allocation162_spill] sm:$0xff] }
 0xa36   :  { %v4267_v12 = vmul.f32 %v4265_v62, %v9775_v5  ;;  %v4268_v13 = vmul.f32 %v4265_v62, %v9778_v0  ;;  %v4269_v11 = vmul.f32 %v4265_v62, %v9791_v40  ;;  %v4270_v44 = vmul.f32 %v4265_v62, %v9794_v25  ;;  %v11482_v40 = vld [vmem:[#allocation135_spill] sm:$0xff] }
 0xa37   :  { %v3430_v5 = vmul.f32 %v9808_v26, %v11442_v19  ;;  %v3431_v0 = vmul.f32 %v9808_v26, %v11439_v30  ;;  %v3432_v25 = vmul.f32 %v9808_v26, %v11482_v40  ;;  %v3422_v31 = vadd.f32 %v3417_v8, %v3399_v33  ;;  %v11483_v19 = vld [vmem:[#allocation36_spill] sm:$0xff]  ;;  %v11497_v37 = vld [vmem:[#allocation163_spill] sm:$0xff]  ;;  %v11505_v40 = vld [vmem:[#allocation85_spill] sm:$0xff] }
 0xa38   :  { %v4271_v46 = vadd.f32 %v4267_v12, %v4243_v54  ;;  %v4272_v43 = vadd.f32 %v4268_v13, %v4244_v47  ;;  %v4273_v34 = vadd.f32 %v4269_v11, %v4245_v41  ;;  %v4274_v27 = vadd.f32 %v4270_v44, %v4246_v63  ;;  %v11485_v30 = vld [vmem:[#allocation68_spill] sm:$0xff]  ;;  %v4348_v63 = vpop.permute.xlu0 %4347  ;;  %v11500_v62 = vld [vmem:[#allocation123_spill] sm:$0xff]  ;;  %v11501_v13 = vld [vmem:[#allocation113_spill] sm:$0xff] }
 0xa39   :  { %v3423_v48 = vadd.f32 %v3414_v51, %v3400_v61  ;;  %v3424_v35 = vadd.f32 %v3418_v16, %v3401_v9  ;;  %v4314_v59 = vmul.f32 %v11484_v32, %v11483_v19  ;;  %v4315_v42 = vmul.f32 %v11486_v39, %v11485_v30  ;;  %v11487_v26 = vld [vmem:[#allocation128_spill] sm:$0xff]  ;;  %v11502_v44 = vld [vmem:[#allocation137_spill] sm:$0xff] }
 0xa3a   :  { %v3451_v20 = vpop.permute.xlu1 %3450  ;;  %v4298_v53 = vadd.f32 %v9826_v3, %v4271_v46  ;;  %v4299_v52 = vadd.f32 %v9828_v28, %v4272_v43  ;;  %v4300_v22 = vadd.f32 %v9830_v29, %v4273_v34  ;;  %v4301_v50 = vadd.f32 %v9834_v15, %v4274_v27  ;;  %v11488_v3 = vld [vmem:[#allocation133_spill] sm:$0xff]  ;;  %v11498_v8 = vld [vmem:[#allocation108_spill] sm:$0xff] }
 0xa3b   :  { %v4316_v36 = vmul.f32 %v11484_v32, %v11487_v26  ;;  %v4317_v28 = vmul.f32 %v11486_v39, %v11488_v3  ;;  %v3433_v38 = vadd.f32 %v3429_v56, %v3421_v6  ;;  %v3434_v29 = vadd.f32 %v3430_v5, %v3422_v31  ;;  %v11499_v54 = vld [vmem:[#allocation120_spill] sm:$0xff] }
 0xa3c   :  { %v3435_v57 = vadd.f32 %v3431_v0, %v3423_v48  ;;  %v3436_v15 = vadd.f32 %v3432_v25, %v3424_v35  ;;  %v4342_v51 = vmul.f32 %v11490_v45, %v11489_v24  ;;  %v4343_v2 = vmul.f32 %v11492_v4, %v11491_v17  ;;  %v11503_v33 = vld [vmem:[#allocation92_spill] sm:$0xff] }
 0xa3d   :  { %v4344_v23 = vmul.f32 %v11490_v45, %v11493_v58  ;;  %v4345_v18 = vmul.f32 %v11492_v4, %v11494_v14  ;;  %v3441_v55 = vmul.f32 %v11496_v60, %v11495_v7  ;;  %v3442_v49 = vmul.f32 %v11496_v60, %v11497_v37  ;;  %v11504_v5 = vld [vmem:[#allocation84_spill] sm:$0xff]  ;;  %v3545_v4 = vpop.permute.xlu0 %3544 }
 0xa3e   :  { %v3443_v16 = vmul.f32 %v11496_v60, %v11498_v8  ;;  %v3444_v47 = vmul.f32 %v11496_v60, %v11499_v54  ;;  %v3453_v12 = vmul.f32 %v3451_v20, %v11500_v62  ;;  %v3454_v11 = vmul.f32 %v3451_v20, %v11501_v13  ;;  %v11509_v54 = vld [vmem:[#allocation38_spill] sm:$0xff] }
 0xa3f   :  { %v3463_v41 = vpop.permute.xlu1 %3462  ;;  %v3455_v1 = vmul.f32 %v3451_v20, %v11502_v44  ;;  %v3456_v61 = vmul.f32 %v3451_v20, %v11503_v33  ;;  %v3445_v9 = vadd.f32 %v3441_v55, %v3433_v38  ;;  %v3446_v46 = vadd.f32 %v3442_v49, %v3434_v29  ;;  %v11508_v55 = vld [vmem:[#allocation37_spill] sm:$0xff] }
 0xa40   :  { %v3447_v43 = vadd.f32 %v3443_v16, %v3435_v57  ;;  %v3448_v34 = vadd.f32 %v3444_v47, %v3436_v15  ;;  %v3465_v27 = vmul.f32 %v3463_v41, %v11480_v21  ;;  %v3466_v56 = vmul.f32 %v3463_v41, %v11481_v10 }
 0xa41   :  { %v3467_v0 = vmul.f32 %v3463_v41, %v11504_v5  ;;  %v3468_v25 = vmul.f32 %v3463_v41, %v11505_v40  ;;  %v4350_v6 = vmul.f32 %v4348_v63, %v4342_v51  ;;  %v4351_v31 = vmul.f32 %v4348_v63, %v4343_v2  ;;  %v3573_v33 = vpop.permute.xlu0 %3572 }
 0xa42   :  { %v4352_v48 = vmul.f32 %v4348_v63, %v4344_v23  ;;  %v4353_v35 = vmul.f32 %v4348_v63, %v4345_v18  ;;  %v3457_v19 = vadd.f32 %v3453_v12, %v3445_v9  ;;  %v3458_v32 = vadd.f32 %v3454_v11, %v3446_v46 }
 0xa43   :  { %v3459_v30 = vadd.f32 %v3455_v1, %v3447_v43  ;;  %v3460_v20 = vadd.f32 %v3456_v61, %v3448_v34 }
 0xa44   :  { %v4320_v39 = vpop.permute.xlu1 %4319  ;;  %v3469_v21 = vadd.f32 %v3465_v27, %v3457_v19  ;;  %v3470_v57 = vadd.f32 %v3466_v56, %v3458_v32 }
 0xa45   :  { %v4322_v26 = vmul.f32 %v4320_v39, %v4314_v59  ;;  %v4323_v3 = vmul.f32 %v4320_v39, %v4315_v42  ;;  %v4324_v38 = vmul.f32 %v4320_v39, %v4316_v36  ;;  %v4325_v29 = vmul.f32 %v4320_v39, %v4317_v28  ;;  %v11506_v42 = vld [vmem:[#allocation98_spill] sm:$0xff] }
 0xa46   :  { %v3471_v10 = vadd.f32 %v3467_v0, %v3459_v30  ;;  %v3472_v15 = vadd.f32 %v3468_v25, %v3460_v20  ;;  %v3530_v36 = vrot.slane %v3469_v21, %v11506_v42  ;;  %v3534_v28 = vrot.slane %v3470_v57, %v11506_v42 }
 0xa47   :  { %v4326_v24 = vadd.f32 %v4322_v26, %v4298_v53  ;;  %v4327_v45 = vadd.f32 %v4323_v3, %v4299_v52  ;;  %v4328_v17 = vadd.f32 %v4324_v38, %v4300_v22  ;;  %v4329_v51 = vadd.f32 %v4325_v29, %v4301_v50  ;;  %v11507_v52 = vld [vmem:[#allocation99_spill] sm:$0xff] }
 0xa48   :  { %v3538_v18 = vrot.slane %v3471_v10, %v11506_v42  ;;  %v3542_v53 = vrot.slane %v3472_v15, %v11506_v42  ;;  %v3558_v22 = vrot.slane %v3469_v21, %v11507_v52  ;;  %v3562_v50 = vrot.slane %v3470_v57, %v11507_v52 }
 0xa49   :  { %v9920_v2 = vadd.f32 %v4350_v6, %v4326_v24  ;;  %v9922_v58 = vadd.f32 %v4351_v31, %v4327_v45  ;;  %v9924_v23 = vadd.f32 %v4352_v48, %v4328_v17  ;;  %v9926_v14 = vadd.f32 %v4353_v35, %v4329_v51  ;;  %v3493_v59 = vpop.permute.xlu1 %3492 }
 0xa4a   :  { %v3566_v7 = vrot.slane %v3471_v10, %v11507_v52  ;;  %v3570_v60 = vrot.slane %v3472_v15, %v11507_v52  ;;  %v3477_v37 = vrot.slane %v3469_v21, %v11508_v55  ;;  %v3481_v49 = vrot.slane %v3470_v57, %v11508_v55 }
 0xa4b   :  { %v3485_v8 = vrot.slane %v3471_v10, %v11508_v55  ;;  %v3489_v16 = vrot.slane %v3472_v15, %v11508_v55  ;;  %v3502_v47 = vrot.slane %v3469_v21, %v11509_v54  ;;  %v3506_v41 = vrot.slane %v3470_v57, %v11509_v54 }
 0xa4c   :  { %v3510_v63 = vrot.slane %v3471_v10, %v11509_v54  ;;  %v3514_v62 = vrot.slane %v3472_v15, %v11509_v54  ;;  %v3495_v12 = vmul.f32 %v3493_v59, %v3477_v37  ;;  %v3496_v13 = vmul.f32 %v3493_v59, %v3481_v49 }
 0xa4d   :  { %v3497_v11 = vmul.f32 %v3493_v59, %v3485_v8  ;;  %v3498_v44 = vmul.f32 %v3493_v59, %v3489_v16  ;;  %v3547_v34 = vmul.f32 %v3545_v4, %v3530_v36  ;;  %v3548_v27 = vmul.f32 %v3545_v4, %v3534_v28 }
 0xa4e   :  { %v3517_v1 = vpop.permute.xlu1 %3516  ;;  %v3549_v56 = vmul.f32 %v3545_v4, %v3538_v18  ;;  %v3550_v5 = vmul.f32 %v3545_v4, %v3542_v53  ;;  %v3575_v31 = vmul.f32 %v3573_v33, %v3558_v22  ;;  %v3576_v48 = vmul.f32 %v3573_v33, %v3562_v50 }
 0xa4f   :  { %v3519_v61 = vmul.f32 %v3517_v1, %v3502_v47  ;;  %v3520_v9 = vmul.f32 %v3517_v1, %v3506_v41  ;;  %v3521_v46 = vmul.f32 %v3517_v1, %v3510_v63  ;;  %v3522_v43 = vmul.f32 %v3517_v1, %v3514_v62 }
 0xa50   :  { %v3577_v35 = vmul.f32 %v3573_v33, %v3566_v7  ;;  %v3578_v19 = vmul.f32 %v3573_v33, %v3570_v60  ;;  %v4362_v45 = vrot.slane %v9920_v2, %v11508_v55  ;;  %v4366_v59 = vrot.slane %v9922_v58, %v11508_v55 }
 0xa51   :  { %v3523_v0 = vadd.f32 %v3519_v61, %v3495_v12  ;;  %v3524_v40 = vadd.f32 %v3520_v9, %v3496_v13  ;;  %v3525_v25 = vadd.f32 %v3521_v46, %v3497_v11  ;;  %v3526_v6 = vadd.f32 %v3522_v43, %v3498_v44 }
 0xa52   :  { %v4370_v36 = vrot.slane %v9924_v23, %v11508_v55  ;;  %v4374_v28 = vrot.slane %v9926_v14, %v11508_v55  ;;  %v4387_v18 = vrot.slane %v9920_v2, %v11509_v54  ;;  %v4391_v53 = vrot.slane %v9922_v58, %v11509_v54 }
 0xa53   :  { %v4378_v32 = vpop.permute.xlu1 %4377  ;;  %v3553_v30 = vadd.f32 %v3549_v56, %v3525_v25  ;;  %v3554_v20 = vadd.f32 %v3550_v5, %v3526_v6  ;;  %v3551_v39 = vadd.f32 %v3547_v34, %v3523_v0  ;;  %v3552_v26 = vadd.f32 %v3548_v27, %v3524_v40 }
 0xa54   :  { %v4395_v22 = vrot.slane %v9924_v23, %v11509_v54  ;;  %v4399_v50 = vrot.slane %v9926_v14, %v11509_v54  ;;  %v4415_v7 = vrot.slane %v9920_v2, %v11506_v42  ;;  %v4419_v60 = vrot.slane %v9922_v58, %v11506_v42 }
 0xa55   :  { %v9944_v3 = vadd.f32 %v3577_v35, %v3553_v30  ;;  %v9946_v38 = vadd.f32 %v3578_v19, %v3554_v20  ;;  %v9948_v29 = vadd.f32 %v3575_v31, %v3551_v39  ;;  %v9950_v21 = vadd.f32 %v3576_v48, %v3552_v26 }
 0xa56   :  { %v4423_v55 = vrot.slane %v9924_v23, %v11506_v42  ;;  %v4427_v37 = vrot.slane %v9926_v14, %v11506_v42  ;;  %v4380_v41 = vmul.f32 %v4378_v32, %v4362_v45  ;;  %v4381_v54 = vmul.f32 %v4378_v32, %v4366_v59 }
 0xa57   :  { %v3588_v57 = vsel %vm651_vm5, %v9944_v3, 0.0  ;;  %v3589_v10 = vsel %vm651_vm5, %v9946_v38, 0.0  ;;  %v3583_v15 = vsel %vm651_vm5, %v9948_v29, 0.0  ;;  %v3584_v24 = vsel %vm651_vm5, %v9950_v21, 0.0 }
 0xa58   :  { %v4402_v17 = vpop.permute.xlu1 %4401  ;;  %v3590_v51 = vadd.f32 %v3589_v10, %v3588_v57  ;;  %v3585_v4 = vadd.f32 %v3584_v24, %v3583_v15  ;;  %v4382_v63 = vmul.f32 %v4378_v32, %v4370_v36  ;;  %v4383_v62 = vmul.f32 %v4378_v32, %v4374_v28 }
 0xa59   :  { %v4404_v49 = vmul.f32 %v4402_v17, %v4387_v18  ;;  %v4405_v8 = vmul.f32 %v4402_v17, %v4391_v53  ;;  %v4406_v16 = vmul.f32 %v4402_v17, %v4395_v22  ;;  %v4407_v47 = vmul.f32 %v4402_v17, %v4399_v50 }
 0xa5a   :  { %3591 = vadd.xlane.f32.xlu1 %v3590_v51  ;;  %3586 = vadd.xlane.f32.xlu0 %v3585_v4  ;;  %v4443_v42 = vrot.slane %v9920_v2, %v11507_v52  ;;  %v4447_v43 = vrot.slane %v9922_v58, %v11507_v52  ;;  %v4451_v34 = vrot.slane %v9924_v23, %v11507_v52 }
 0xa5b   :  { %v4408_v33 = vadd.f32 %v4404_v49, %v4380_v41  ;;  %v4409_v61 = vadd.f32 %v4405_v8, %v4381_v54  ;;  %v4410_v9 = vadd.f32 %v4406_v16, %v4382_v63  ;;  %v4411_v46 = vadd.f32 %v4407_v47, %v4383_v62 }
 0xa5c   :  { %v4455_v27 = vrot.slane %v9926_v14, %v11507_v52 }
 0xa5d   :  { %v4430_v12 = vpop.permute.xlu1 %4429 }
 0xa5e   :  { %v4432_v13 = vmul.f32 %v4430_v12, %v4415_v7  ;;  %v4433_v11 = vmul.f32 %v4430_v12, %v4419_v60  ;;  %v4434_v44 = vmul.f32 %v4430_v12, %v4423_v55  ;;  %v4435_v1 = vmul.f32 %v4430_v12, %v4427_v37 }
 0xa60   :  { %v4436_v56 = vadd.f32 %v4432_v13, %v4408_v33  ;;  %v4437_v5 = vadd.f32 %v4433_v11, %v4409_v61  ;;  %v4438_v0 = vadd.f32 %v4434_v44, %v4410_v9  ;;  %v4439_v40 = vadd.f32 %v4435_v1, %v4411_v46  ;;  %v11510_v46 = vld [vmem:[#allocation100_spill] sm:$0xff] }
 0xa62   :  { %v4458_v25 = vpop.permute.xlu1 %4457 }
 0xa63   :  { %v4460_v6 = vmul.f32 %v4458_v25, %v4443_v42  ;;  %v4461_v31 = vmul.f32 %v4458_v25, %v4447_v43  ;;  %v4462_v48 = vmul.f32 %v4458_v25, %v4451_v34  ;;  %v4463_v35 = vmul.f32 %v4458_v25, %v4455_v27  ;;  %v11511_v43 = vld [vmem:[#allocation54_spill] sm:$0xff]  ;;  %v11512_v27 = vld [vmem:[#allocation103_spill] sm:$0xff] }
 0xa64   :  { %v685_v42 = vsel %vm651_vm5, %v11510_v46, 0.0  ;;  %v684_v34 = vsel %vm651_vm5, %v11511_v43, 0.0 }
 0xa65   :  { %v4464_v19 = vadd.f32 %v4460_v6, %v4436_v56  ;;  %v4465_v2 = vadd.f32 %v4461_v31, %v4437_v5  ;;  %v4466_v32 = vadd.f32 %v4462_v48, %v4438_v0  ;;  %v4467_v30 = vadd.f32 %v4463_v35, %v4439_v40  ;;  %v11513_v0 = vld [vmem:[#allocation101_spill] sm:$0xff]  ;;  %v11514_v31 = vld [vmem:[#allocation144_spill] sm:$0xff] }
 0xa66   :  { %v740_v56 = vsel %vm651_vm5, %v11512_v27, 0.0  ;;  %v686_v5 = vadd.f32 %v685_v42, %v684_v34  ;;  %v739_v40 = vsel %vm651_vm5, %v11513_v0, 0.0  ;;  %v1546_v48 = vsel %vm651_vm5, %v11514_v31, 0.0  ;;  %v11521_v42 = vld [vmem:[#allocation55_spill] sm:$0xff]  ;;  %v11523_v0 = vld [vmem:[#allocation60_spill] sm:$0xff] }
 0xa67   :  { %v4468_v58 = vsel %vm651_vm5, %v4464_v19, 0.0  ;;  %v4469_v23 = vsel %vm651_vm5, %v4465_v2, 0.0  ;;  %v4473_v14 = vsel %vm651_vm5, %v4466_v32, 0.0  ;;  %v4474_v52 = vsel %vm651_vm5, %v4467_v30, 0.0 }
 0xa68   :  { %v4470_v20 = vadd.f32 %v4469_v23, %v4468_v58  ;;  %v4475_v39 = vadd.f32 %v4474_v52, %v4473_v14  ;;  %v741_v25 = vadd.f32 %v740_v56, %v739_v40  ;;  %v687_v6 = vmul.f32 0.001953125, %v686_v5  ;;  %v11517_v58 = vld [vmem:[#allocation34_spill] sm:$0xff]  ;;  %v11522_v56 = vld [vmem:[#allocation59_spill] sm:$0xff] }
 0xa69   :  { %v3333_v23 = vsel %vm651_vm5, %v11517_v58, 0.0  ;;  %v3339_v27 = vstv %s10064_s10 }
 0xa6a   :  { %4471 = vadd.xlane.f32.xlu0 %v4470_v20  ;;  %v742_v35 = vmul.f32 0.001953125, %v741_v25 }
 0xa6e   :  { %4476 = vadd.xlane.f32.xlu0 %v4475_v39  ;;  %v688_v39 = vadd.f32 1e-05, %v687_v6  ;;  %v4769_v6 = vld [vmem:[#allocation6] sm:$0xff] }
 0xa70   :  { %4753 = vrsqrt.f32 %v688_v39 }
 0xae3   :  { %v3592_v26 = vpop.xlane.xlu1 %3591  ;;  %v3587_v57 = vpop.xlane.xlu0 %3586 }
 0xae4   :  { %v3594_v10 = vsel %vm651_vm5, %v3592_v26, 0.0  ;;  %v3593_v15 = vsel %vm651_vm5, %v3587_v57, 0.0 }
 0xae5   :  { %v3595_v24 = vadd.f32 %v3594_v10, %v3593_v15  ;;  %v743_v15 = vadd.f32 1e-05, %v742_v35  ;;  %v11524_v35 = vld [vmem:[#allocation61_spill] sm:$0xff] }
 0xae7   :  { %v3596_v45 = vmul.f32 0.001953125, %v3595_v24  ;;  %4755 = vrsqrt.f32 %v743_v15 }
 0xae9   :  { %v9999_v17 = vsub.f32 %v9944_v3, %v3596_v45  ;;  %v10002_v51 = vsub.f32 %v9946_v38, %v3596_v45  ;;  %v10005_v4 = vsub.f32 %v9948_v29, %v3596_v45  ;;  %v10008_v59 = vsub.f32 %v9950_v21, %v3596_v45 }
 0xaeb   :  { %v3603_v36 = vmul.f32 %v9999_v17, %v9999_v17  ;;  %v3604_v28 = vmul.f32 %v10002_v51, %v10002_v51  ;;  %v3601_v18 = vmul.f32 %v10005_v4, %v10005_v4  ;;  %v3602_v3 = vmul.f32 %v10008_v59, %v10008_v59 }
 0xaed   :  { %v3610_v38 = vsel %vm651_vm5, %v3603_v36, 0.0  ;;  %v3611_v29 = vsel %vm651_vm5, %v3604_v28, 0.0  ;;  %v3605_v53 = vsel %vm651_vm5, %v3601_v18, 0.0  ;;  %v3606_v21 = vsel %vm651_vm5, %v3602_v3, 0.0 }
 0xaee   :  { %v3612_v22 = vadd.f32 %v3611_v29, %v3610_v38  ;;  %v3607_v50 = vadd.f32 %v3606_v21, %v3605_v53  ;;  %v4754_v29 = vpop.eup %4753  ;;  %v690_v53 = vstv %s4547_s27 }
 0xaf0   :  { %3613 = vadd.xlane.f32.xlu0 %v3612_v22  ;;  %3608 = vadd.xlane.f32.xlu1 %v3607_v50 }
 0xaf3   :  { %v4472_v7 = vpop.xlane.xlu0 %4471 }
 0xaf4   :  { %v4478_v55 = vsel %vm651_vm5, %v4472_v7, 0.0  ;;  %v4756_v50 = vpop.eup %4755  ;;  %v745_v7 = vstv %s4548_s28 }
 0xaf7   :  { %v4477_v60 = vpop.xlane.xlu0 %4476 }
 0xaf8   :  { %v4479_v37 = vsel %vm651_vm5, %v4477_v60, 0.0 }
 0xaf9   :  { %v4480_v49 = vadd.f32 %v4479_v37, %v4478_v55  ;;  %v691_v37 = vmul.f32 %v4754_v29, %v690_v53  ;;  %v11530_v29 = vld [vmem:[#allocation154_spill] sm:$0xff] }
 0xafb   :  { %v4481_v8 = vmul.f32 0.001953125, %v4480_v49  ;;  %v695_v43 = vmul.f32 %v691_v37, %v11521_v42 }
 0xafd   :  { %v10024_v16 = vsub.f32 %v4466_v32, %v4481_v8  ;;  %v10026_v47 = vsub.f32 %v4467_v30, %v4481_v8  ;;  %v10028_v41 = vsub.f32 %v4464_v19, %v4481_v8  ;;  %v10030_v54 = vsub.f32 %v4465_v2, %v4481_v8  ;;  %v11515_v19 = vld [vmem:[#allocation146_spill] sm:$0xff]  ;;  %v11516_v32 = vld [vmem:[#allocation157_spill] sm:$0xff] }
 0xafe   :  { %v1545_v2 = vsel %vm651_vm5, %v11515_v19, 0.0  ;;  %v3334_v30 = vsel %vm651_vm5, %v11516_v32, 0.0  ;;  %v746_v8 = vmul.f32 %v4756_v50, %v745_v7  ;;  %v11532_v50 = vld [vmem:[#allocation114_spill] sm:$0xff] }
 0xaff   :  { %v4488_v63 = vmul.f32 %v10024_v16, %v10024_v16  ;;  %v4489_v62 = vmul.f32 %v10026_v47, %v10026_v47  ;;  %v4486_v12 = vmul.f32 %v10028_v41, %v10028_v41  ;;  %v4487_v13 = vmul.f32 %v10030_v54, %v10030_v54 }
 0xb00   :  { %v1547_v52 = vadd.f32 %v1546_v48, %v1545_v2  ;;  %v3335_v26 = vadd.f32 %v3334_v30, %v3333_v23  ;;  %v747_v5 = vmul.f32 %v746_v8, %v11522_v56  ;;  %v748_v40 = vmul.f32 %v746_v8, %v11523_v0  ;;  %v11525_v2 = vld [vmem:[#allocation62_spill] sm:$0xff] }
 0xb01   :  { %v4495_v11 = vsel %vm651_vm5, %v4488_v63, 0.0  ;;  %v4496_v44 = vsel %vm651_vm5, %v4489_v62, 0.0  ;;  %v4490_v1 = vsel %vm651_vm5, %v4486_v12, 0.0  ;;  %v4491_v33 = vsel %vm651_vm5, %v4487_v13, 0.0 }
 0xb02   :  { %v4497_v61 = vadd.f32 %v4496_v44, %v4495_v11  ;;  %v4492_v9 = vadd.f32 %v4491_v33, %v4490_v1  ;;  %v1548_v24 = vmul.f32 0.001953125, %v1547_v52  ;;  %v3336_v36 = vmul.f32 0.001953125, %v3335_v26  ;;  %v11518_v11 = vld [vmem:[#allocation56_spill] sm:$0xff]  ;;  %v11519_v1 = vld [vmem:[#allocation29_spill] sm:$0xff]  ;;  %v11526_v26 = vld [vmem:[#allocation87_spill] sm:$0xff] }
 0xb03   :  { %v1551_v12 = vstv %s4549_s29  ;;  %v692_v44 = vmul.f32 %v691_v37, %v11518_v11  ;;  %v693_v33 = vmul.f32 %v691_v37, %v11519_v1  ;;  %v749_v19 = vmul.f32 %v746_v8, %v11524_v35 }
 0xb04   :  { %4498 = vadd.xlane.f32.xlu0 %v4497_v61  ;;  %4493 = vadd.xlane.f32.xlu1 %v4492_v9  ;;  %v1549_v28 = vadd.f32 1e-05, %v1548_v24  ;;  %v3337_v3 = vadd.f32 1e-05, %v3336_v36  ;;  %v647_v61 = vstv %s10062_s3  ;;  %v11520_v9 = vld [vmem:[#allocation65_spill] sm:$0xff]  ;;  %v750_v32 = vmul.f32 %v746_v8, %v11525_v2  ;;  %v11528_v24 = vld [vmem:[#allocation139_spill] sm:$0xff] }
 0xb05   :  { %v694_v46 = vmul.f32 %v691_v37, %v11520_v9  ;;  %v648_v31 = vmul.f32 %v4769_v6, %v647_v61  ;;  %v700_v48 = vcombine.low %v692_v44, %v693_v33  ;;  %v3621_v23 = vstv %s10068_s13  ;;  %v11529_v36 = vld [vmem:[#allocation142_spill] sm:$0xff] }
 0xb06   :  { %4757 = vrsqrt.f32 %v1549_v28  ;;  %v755_v39 = vcombine.low %v747_v5, %v748_v40 }
 0xb07   :  { %4759 = vrsqrt.f32 %v3337_v3  ;;  %v701_v52 = vcombine.low %v694_v46, %v695_v43  ;;  %v756_v3 = vcombine.low %v749_v19, %v750_v32 }
 0xb13   :  { %v4758_v62 = vpop.eup %4757 }
 0xb14   :  { %v4760_v34 = vpop.eup %4759  ;;  %v1552_v25 = vmul.f32 %v4758_v62, %v1551_v12 }
 0xb15   :  { %v3340_v58 = vmul.f32 %v4760_v34, %v3339_v27 }
 0xb16   :  { %v1556_v28 = vmul.f32 %v1552_v25, %v11529_v36 }
 0xb17   :  { %v3341_v53 = vmul.f32 %v3340_v58, %v11530_v29  ;;  %v3343_v7 = vmul.f32 %v3340_v58, %v11532_v50 }
 0xb79   :  { %v3609_v20 = vpop.xlane.xlu1 %3608  ;;  %v3614_v14 = vpop.xlane.xlu0 %3613 }
 0xb7a   :  { %v3615_v57 = vsel %vm651_vm5, %v3609_v20, 0.0  ;;  %v3616_v10 = vsel %vm651_vm5, %v3614_v14, 0.0  ;;  %v4770_v20 = vld [vmem:[#allocation6 + $0x8] sm:$0xff] }
 0xb7b   :  { %v3617_v45 = vadd.f32 %v3616_v10, %v3615_v57  ;;  %v649_v14 = vmul.f32 %v4770_v20, %v647_v61  ;;  %v1553_v57 = vmul.f32 %v1552_v25, %v11526_v26  ;;  %v11527_v10 = vld [vmem:[#allocation125_spill] sm:$0xff]  ;;  %v4506_v61 = vstv %s10081_s8 }
 0xb7c   :  { %v1554_v15 = vmul.f32 %v1552_v25, %v11527_v10 }
 0xb7d   :  { %v3618_v18 = vmul.f32 0.001953125, %v3617_v45  ;;  %v1555_v45 = vmul.f32 %v1552_v25, %v11528_v24  ;;  %v705_v37 = vadd.f32 %v701_v52, %v649_v14 }
 0xb7e   :  { %v1561_v8 = vcombine.low %v1553_v57, %v1554_v15 }
 0xb7f   :  { %v3619_v38 = vadd.f32 1e-05, %v3618_v18  ;;  %v704_v18 = vadd.f32 %v700_v48, %v648_v31  ;;  %v760_v44 = vadd.f32 %v756_v3, %v705_v37 }
 0xb81   :  { %4761 = vrsqrt.f32 %v3619_v38 }
 0xb8d   :  { %v4494_v21 = vpop.xlane.xlu1 %4493  ;;  %v4499_v22 = vpop.xlane.xlu0 %4498 }
 0xb8e   :  { %v4500_v60 = vsel %vm651_vm5, %v4494_v21, 0.0  ;;  %v4501_v55 = vsel %vm651_vm5, %v4499_v22, 0.0  ;;  %v4762_v30 = vpop.eup %4761  ;;  %v11531_v21 = vld [vmem:[#allocation156_spill] sm:$0xff] }
 0xb8f   :  { %v4502_v49 = vadd.f32 %v4501_v55, %v4500_v60  ;;  %v3622_v38 = vmul.f32 %v4762_v30, %v3621_v23  ;;  %v3342_v22 = vmul.f32 %v3340_v58, %v11531_v21  ;;  %v11533_v60 = vld [vmem:[#allocation153_spill] sm:$0xff] }
 0xb90   :  { %v3344_v55 = vmul.f32 %v3340_v58, %v11533_v60 }
 0xb91   :  { %v4503_v63 = vmul.f32 0.001953125, %v4502_v49  ;;  %v759_v49 = vadd.f32 %v755_v39, %v704_v18  ;;  %v3623_v62 = vmul.f32 %v3622_v38, %v10005_v4  ;;  %v3624_v12 = vmul.f32 %v3622_v38, %v10008_v59 }
 0xb92   :  { %v3626_v11 = vmul.f32 %v3622_v38, %v10002_v51  ;;  %v3349_v1 = vcombine.low %v3341_v53, %v3342_v22  ;;  %v3350_v33 = vcombine.low %v3343_v7, %v3344_v55 }
 0xb93   :  { %v4504_v13 = vadd.f32 1e-05, %v4503_v63  ;;  %v1562_v63 = vcombine.low %v1555_v45, %v1556_v28  ;;  %v1565_v46 = vadd.f32 %v1561_v8, %v759_v49  ;;  %v3631_v43 = vcombine.low %v3623_v62, %v3624_v12 }
 0xb95   :  { %4763 = vrsqrt.f32 %v4504_v13  ;;  %v3625_v13 = vmul.f32 %v3622_v38, %v9999_v17  ;;  %v1566_v42 = vadd.f32 %v1562_v63, %v760_v44  ;;  %v3353_v56 = vadd.f32 %v3349_v1, %v1565_v46 }
 0xb97   :  { %v3632_v34 = vcombine.low %v3625_v13, %v3626_v11  ;;  %v3354_v5 = vadd.f32 %v3350_v33, %v1566_v42  ;;  %v3635_v0 = vadd.f32 %v3631_v43, %v3353_v56 }
 0xb99   :  { %v3636_v40 = vadd.f32 %v3632_v34, %v3354_v5 }
 0xba2   :  { %v4764_v9 = vpop.eup %4763 }
 0xba3   :  { %v4507_v27 = vmul.f32 %v4764_v9, %v4506_v61 }
 0xba5   :  { %v4508_v4 = vmul.f32 %v4507_v27, %v10028_v41  ;;  %v4509_v59 = vmul.f32 %v4507_v27, %v10030_v54  ;;  %v4510_v17 = vmul.f32 %v4507_v27, %v10024_v16  ;;  %v4511_v51 = vmul.f32 %v4507_v27, %v10026_v47 }
 0xba7   :  { %v4516_v25 = vcombine.low %v4508_v4, %v4509_v59  ;;  %v4517_v6 = vcombine.low %v4510_v17, %v4511_v51 }
 0xba9   :  { %v4520_v31 = vadd.f32 %v4516_v25, %v3635_v0  ;;  %v4521_v48 = vadd.f32 %v4517_v6, %v3636_v40 }
 0xbab   :  { %4522 = vst [vmem:[#allocation19] sm:$0xff] %v4520_v31  ;;  %4523 = vst [vmem:[#allocation19 + $0x8] sm:$0xff] %v4521_v48 }
 0xbac   :  { %4970 = shalt.err (!%p4967_p7)
}
 0xbad   :  { %s11534_s4 = smov 128  }
 0xbae   :  { %4535 = dma.vmem_to_hbm [thread:$0]  %s4530_s6, 256, %s10122_s16, [#allocation4], %s11534_s4, %s11534_s4, %s5000_s0  }
 0xbaf   :  { %4991 = dma.done.wait [#allocation4], 256  }
 0xbb0   :  { %4992 = vsyncadd [#allocation4], 4294967040 }
 0xbb1   :  { %4539 = vsyncpa [#allocation3], 1 }
 0xbb2   :  { %4540 = vsyncpa [#allocation8], 1 }
 0xbb3   :  { %4541 = vsyncpa [#allocation11], 1 }
 0xbb4   :  { %4542 = vsyncpa [#allocation14], 1 }
 0xbb5   :  { %4543 = vsyncpa [#allocation17], 1 }
 0xbb6   :  { %4544 = vsyncpa [#allocation4], 1 }
 0xbb7   :  { %4545 = vsyncpa [#allocation5], 1 }

</bundles_post_ra>
